<compile_context>
chip_gen: v7x
topology: tpu7x:2x2x1
jax: 0.10.0
libtpu: 0.0.40
codegen_flags: <defaults>
</compile_context>

<pallas_src>
import functools
import math

import jax
import jax.numpy as jnp
from jax import lax
from jax.experimental import pallas as pl
from jax.experimental.pallas import tpu as pltpu


_LANE = 128
_MAX_RAND_BITS = 19            # rand_bits + idx_bits stays <= 30 (positive int32)
_HASH_MULT = 0x27D4EB2F        # odd => x -> x*const is a bijection mod 2^idx_bits


def _choose_ways(n):
    """Search arity: wide for latency-bound small inputs, narrow for large
    VALU-throughput-bound inputs (perf item 4)."""
    if n <= (1 << 16):
        return 16
    if n <= (1 << 20):
        return 8
    return 4


def _search_depth(span, ways):
    """Worst-case steps for the ways-ary search to shrink [0, span] to a point."""
    d = 0
    while span > 0:
        span //= ways
        d += 1
    return max(d, 1)


def _collapse_to_2d(x):
    """Collapse to (rows, cols) with cols a multiple of 128 built purely from
    trailing dims: a contiguous reshape, no pad / extra HBM round trip.
    Falls back to flatten+pad for awkward shapes (padded zeros are never
    counted nor kept, so correctness is unaffected)."""
    n = x.size
    suffix = 1
    for k in range(x.ndim - 1, -1, -1):
        suffix *= int(x.shape[k])
        if suffix % _LANE == 0:
            return x.reshape(n // suffix, suffix), 0
    tile = 8 * _LANE
    n_pad = ((n + tile - 1) // tile) * tile
    xf = jnp.pad(jnp.ravel(x), (0, n_pad - n))
    return xf.reshape(n_pad // _LANE, _LANE), n_pad - n


def _rand_max_sparse_kernel(x_ref, rand_ref, o_ref, *,
                            goal_nz, idx_bits, rand_bits, search_depth,
                            log2_ways):
    ways = 1 << log2_ways
    x = x_ref[...]
    rows, cols = x.shape
    nz = x != 0.0                                   # NaN counts as nonzero

    # Unique per-element priority: random bits in the high bits, a hashed
    # (odd-multiplier => bijective mod 2^idx_bits) flat index in the low bits.
    # Uniqueness gives the exact keep-count guarantee; hashing the index keeps
    # ties inside one random bucket from systematically favouring low indices.
    row = lax.broadcasted_iota(jnp.int32, (rows, cols), 0)
    col = lax.broadcasted_iota(jnp.int32, (rows, cols), 1)
    flat = row * cols + col
    hashed = (flat * jnp.int32(_HASH_MULT)) & jnp.int32((1 << idx_bits) - 1)
    pri = (rand_ref[...] << idx_bits) | hashed      # < 2**(rand_bits+idx_bits)

    hi0 = jnp.int32(1 << (rand_bits + idx_bits))
    # Fold the nonzero mask in once: zeros get an out-of-range sentinel, so
    # every search step is compare + reduce only and the final select needs no
    # separate nz / count_nz<=goal handling (perf item 3).
    masked_pri = jnp.where(nz, pri, hi0)

    goal = jnp.int32(goal_nz)

    # ways-ary search for the smallest thr with #{masked_pri < thr} >= goal.
    # The (ways-1) counts per step are independent full-slab reductions; the
    # serial part is one bucket-index popcount + two arithmetic updates.
    # TODO(synk): if the XLU becomes the binding slot on very large slabs,
    #             accumulate the compare masks row-chunk-wise on the VPU and
    #             do a single cross-lane reduce per threshold (perf item 6).
    def body(_, bounds):
        lo, hi = bounds
        span = hi - lo
        q = span >> log2_ways
        r = span & (ways - 1)
        # mids[k-1] == lo + (k*span)//ways, overflow-free decomposition.
        mids = [lo + k * q + ((k * r) >> log2_ways) for k in range(1, ways)]
        counts = [jnp.sum(masked_pri < m, dtype=jnp.int32) for m in mids]
        # Counts are monotone; the bucket index is how many are still < goal.
        b = (counts[0] < goal).astype(jnp.int32)
        for c in counts[1:]:
            b = b + (c < goal).astype(jnp.int32)
        bp = b + 1
        new_hi = lo + bp * q + ((bp * r) >> log2_ways)           # == hi when b==ways-1
        new_lo = lo + b * q + ((b * r) >> log2_ways) + (b > 0).astype(jnp.int32)
        new_lo = jnp.minimum(new_lo, new_hi)   # guards the converged / no-answer case
        return new_lo, new_hi

    thr, _ = lax.fori_loop(0, search_depth, body,
                           (jnp.int32(goal_nz), hi0), unroll=True)

    # Exactly goal_nz nonzeros satisfy masked_pri < thr when the input has more
    # than goal_nz nonzeros; otherwise thr == hi0 and every nonzero is kept
    # (zero-valued elements write 0 either way).
    o_ref[...] = jnp.where(masked_pri < thr, x, jnp.zeros_like(x))


def rand_max_sparse(x, key, out_percent_nonzero=0.05):
    """JAX wrapper reproducing RandMaxSparse.forward on a dense tensor."""
    orig_shape = x.shape
    n = x.size
    goal_nz = math.floor(out_percent_nonzero * n)

    x2d, pad = _collapse_to_2d(x)
    rows, cols = x2d.shape
    n_slab = rows * cols

    idx_bits = max(1, (n_slab - 1).bit_length())
    rand_bits = min(_MAX_RAND_BITS, 30 - idx_bits)
    if rand_bits < 4:
        # TODO(synk): >2^26 elements needs 64-bit / lexicographic priorities
        #             plus the tiled two-pass grid.
        raise NotImplementedError("input too large for 32-bit packed priorities")

    ways = _choose_ways(n_slab)
    log2_ways = ways.bit_length() - 1
    depth = _search_depth(1 << (rand_bits + idx_bits), ways)

    # Host-side counter PRNG for the high random bits (no sort / permutation;
    # one int32 slab).  pltpu.prng_* would avoid this DMA but has no CPU /
    # interpret lowering, so the portable form is used.
    rand2d = jax.random.randint(key, (rows, cols), 0, 1 << rand_bits,
                                dtype=jnp.int32)

    kernel = functools.partial(
        _rand_max_sparse_kernel,
        goal_nz=goal_nz, idx_bits=idx_bits, rand_bits=rand_bits,
        search_depth=depth, log2_ways=log2_ways)

    # Grid-less, whole-array invocation: no pipeline -> the x / rand / out
    # slabs are single-buffered in VMEM (perf item 1).  Raise the scoped-VMEM
    # cap only when the resident slabs actually need it.
    slab_bytes = n_slab * 4
    compiler_params = None
    if 4 * slab_bytes > (8 << 20):
        compiler_params = pltpu.CompilerParams(
            vmem_limit_bytes=min(max(6 * slab_bytes, 32 << 20), 56 << 20))

    out2d = pl.pallas_call(
        kernel,
        out_shape=jax.ShapeDtypeStruct((rows, cols), x.dtype),
        compiler_params=compiler_params,
    )(x2d, rand2d)

    if pad:
        return out2d.reshape(-1)[:n].reshape(orig_shape)
    return out2d.reshape(orig_shape)


if __name__ == "__main__":
    key = jax.random.PRNGKey(0)
    k_val, k_mask, k_sel = jax.random.split(key, 3)

    # Small NCHW conv-style activation tensor with some pre-existing zeros.
    x = jax.random.normal(k_val, (2, 4, 16, 16), dtype=jnp.float32)
    x = jnp.where(jax.random.uniform(k_mask, x.shape) < 0.3, 0.0, x)

    fn = jax.jit(functools.partial(rand_max_sparse, out_percent_nonzero=0.05))
    out = jax.block_until_ready(fn(x, k_sel))

    # Sanity: exactly min(goal_nz, count_nz) nonzeros survive, values unchanged.
    n = x.size
    goal_nz = math.floor(0.05 * n)
    count_nz_in = int(jnp.sum(x != 0))
    count_nz_out = int(jnp.sum(out != 0))
    assert count_nz_out == min(goal_nz, count_nz_in), (count_nz_out, goal_nz, count_nz_in)
    assert bool(jnp.all(jnp.where(out != 0, out == x, True)))

    print("KERNEL_OK")
</pallas_src>

<mosaic_0001>
module attributes {stable_mosaic.version = 11 : i64} {
  func.func @_rand_max_sparse_kernel(%arg0: memref<8x256xf32, #tpu.memory_space<vmem>>, %arg1: memref<8x256xi32, #tpu.memory_space<vmem>>, %arg2: memref<8x256xf32, #tpu.memory_space<vmem>>) attributes {dimension_semantics = [], scalar_prefetch = 0 : i64, scratch_operands = 0 : i64, tpu.core_type = #tpu.core_type<tc>} {
    %c0 = arith.constant 0 : index
    %c0_0 = arith.constant 0 : index
    %0 = vector.load %arg0[%c0, %c0_0] : memref<8x256xf32, #tpu.memory_space<vmem>>, vector<8x256xf32>
    %cst = arith.constant 0.000000e+00 : f32
    %1 = vector.broadcast %cst : f32 to vector<8x256xf32>
    %2 = arith.cmpf one, %0, %1 : vector<8x256xf32>
    %3 = tpu.iota {dimensions = array<i32: 0>} : vector<8x256xi32>
    %4 = tpu.iota {dimensions = array<i32: 1>} : vector<8x256xi32>
    %c256_i32 = arith.constant 256 : i32
    %5 = vector.broadcast %c256_i32 : i32 to vector<8x256xi32>
    %6 = arith.muli %3, %5 : vector<8x256xi32>
    %7 = arith.addi %6, %4 : vector<8x256xi32>
    %c668265263_i32 = arith.constant 668265263 : i32
    %8 = vector.broadcast %c668265263_i32 : i32 to vector<8x256xi32>
    %9 = arith.muli %7, %8 : vector<8x256xi32>
    %c2047_i32 = arith.constant 2047 : i32
    %10 = vector.broadcast %c2047_i32 : i32 to vector<8x256xi32>
    %11 = arith.andi %9, %10 : vector<8x256xi32>
    %c0_1 = arith.constant 0 : index
    %c0_2 = arith.constant 0 : index
    %12 = vector.load %arg1[%c0_1, %c0_2] : memref<8x256xi32, #tpu.memory_space<vmem>>, vector<8x256xi32>
    %c11_i32 = arith.constant 11 : i32
    %13 = vector.broadcast %c11_i32 : i32 to vector<8x256xi32>
    %14 = arith.shli %12, %13 : vector<8x256xi32>
    %15 = arith.ori %14, %11 : vector<8x256xi32>
    %c1073741824_i32 = arith.constant 1073741824 : i32
    %16 = vector.broadcast %c1073741824_i32 : i32 to vector<8x256xi32>
    %17 = arith.select %2, %15, %16 : vector<8x256xi1>, vector<8x256xi32>
    %c102_i32 = arith.constant 102 : i32
    %c102_i32_3 = arith.constant 102 : i32
    %c1073741824_i32_4 = arith.constant 1073741824 : i32
    %c0_i32 = arith.constant 0 : i32
    %18 = arith.subi %c1073741824_i32_4, %c102_i32_3 : i32
    %c4_i32 = arith.constant 4 : i32
    %19 = arith.shrsi %18, %c4_i32 : i32
    %c15_i32 = arith.constant 15 : i32
    %20 = arith.andi %18, %c15_i32 : i32
    %c1_i32 = arith.constant 1 : i32
    %21 = arith.muli %c1_i32, %19 : i32
    %22 = arith.addi %c102_i32_3, %21 : i32
    %c1_i32_5 = arith.constant 1 : i32
    %23 = arith.muli %c1_i32_5, %20 : i32
    %c4_i32_6 = arith.constant 4 : i32
    %24 = arith.shrsi %23, %c4_i32_6 : i32
    %25 = arith.addi %22, %24 : i32
    %c2_i32 = arith.constant 2 : i32
    %26 = arith.muli %c2_i32, %19 : i32
    %27 = arith.addi %c102_i32_3, %26 : i32
    %c2_i32_7 = arith.constant 2 : i32
    %28 = arith.muli %c2_i32_7, %20 : i32
    %c4_i32_8 = arith.constant 4 : i32
    %29 = arith.shrsi %28, %c4_i32_8 : i32
    %30 = arith.addi %27, %29 : i32
    %c3_i32 = arith.constant 3 : i32
    %31 = arith.muli %c3_i32, %19 : i32
    %32 = arith.addi %c102_i32_3, %31 : i32
    %c3_i32_9 = arith.constant 3 : i32
    %33 = arith.muli %c3_i32_9, %20 : i32
    %c4_i32_10 = arith.constant 4 : i32
    %34 = arith.shrsi %33, %c4_i32_10 : i32
    %35 = arith.addi %32, %34 : i32
    %c4_i32_11 = arith.constant 4 : i32
    %36 = arith.muli %c4_i32_11, %19 : i32
    %37 = arith.addi %c102_i32_3, %36 : i32
    %c4_i32_12 = arith.constant 4 : i32
    %38 = arith.muli %c4_i32_12, %20 : i32
    %c4_i32_13 = arith.constant 4 : i32
    %39 = arith.shrsi %38, %c4_i32_13 : i32
    %40 = arith.addi %37, %39 : i32
    %c5_i32 = arith.constant 5 : i32
    %41 = arith.muli %c5_i32, %19 : i32
    %42 = arith.addi %c102_i32_3, %41 : i32
    %c5_i32_14 = arith.constant 5 : i32
    %43 = arith.muli %c5_i32_14, %20 : i32
    %c4_i32_15 = arith.constant 4 : i32
    %44 = arith.shrsi %43, %c4_i32_15 : i32
    %45 = arith.addi %42, %44 : i32
    %c6_i32 = arith.constant 6 : i32
    %46 = arith.muli %c6_i32, %19 : i32
    %47 = arith.addi %c102_i32_3, %46 : i32
    %c6_i32_16 = arith.constant 6 : i32
    %48 = arith.muli %c6_i32_16, %20 : i32
    %c4_i32_17 = arith.constant 4 : i32
    %49 = arith.shrsi %48, %c4_i32_17 : i32
    %50 = arith.addi %47, %49 : i32
    %c7_i32 = arith.constant 7 : i32
    %51 = arith.muli %c7_i32, %19 : i32
    %52 = arith.addi %c102_i32_3, %51 : i32
    %c7_i32_18 = arith.constant 7 : i32
    %53 = arith.muli %c7_i32_18, %20 : i32
    %c4_i32_19 = arith.constant 4 : i32
    %54 = arith.shrsi %53, %c4_i32_19 : i32
    %55 = arith.addi %52, %54 : i32
    %c8_i32 = arith.constant 8 : i32
    %56 = arith.muli %c8_i32, %19 : i32
    %57 = arith.addi %c102_i32_3, %56 : i32
    %c8_i32_20 = arith.constant 8 : i32
    %58 = arith.muli %c8_i32_20, %20 : i32
    %c4_i32_21 = arith.constant 4 : i32
    %59 = arith.shrsi %58, %c4_i32_21 : i32
    %60 = arith.addi %57, %59 : i32
    %c9_i32 = arith.constant 9 : i32
    %61 = arith.muli %c9_i32, %19 : i32
    %62 = arith.addi %c102_i32_3, %61 : i32
    %c9_i32_22 = arith.constant 9 : i32
    %63 = arith.muli %c9_i32_22, %20 : i32
    %c4_i32_23 = arith.constant 4 : i32
    %64 = arith.shrsi %63, %c4_i32_23 : i32
    %65 = arith.addi %62, %64 : i32
    %c10_i32 = arith.constant 10 : i32
    %66 = arith.muli %c10_i32, %19 : i32
    %67 = arith.addi %c102_i32_3, %66 : i32
    %c10_i32_24 = arith.constant 10 : i32
    %68 = arith.muli %c10_i32_24, %20 : i32
    %c4_i32_25 = arith.constant 4 : i32
    %69 = arith.shrsi %68, %c4_i32_25 : i32
    %70 = arith.addi %67, %69 : i32
    %c11_i32_26 = arith.constant 11 : i32
    %71 = arith.muli %c11_i32_26, %19 : i32
    %72 = arith.addi %c102_i32_3, %71 : i32
    %c11_i32_27 = arith.constant 11 : i32
    %73 = arith.muli %c11_i32_27, %20 : i32
    %c4_i32_28 = arith.constant 4 : i32
    %74 = arith.shrsi %73, %c4_i32_28 : i32
    %75 = arith.addi %72, %74 : i32
    %c12_i32 = arith.constant 12 : i32
    %76 = arith.muli %c12_i32, %19 : i32
    %77 = arith.addi %c102_i32_3, %76 : i32
    %c12_i32_29 = arith.constant 12 : i32
    %78 = arith.muli %c12_i32_29, %20 : i32
    %c4_i32_30 = arith.constant 4 : i32
    %79 = arith.shrsi %78, %c4_i32_30 : i32
    %80 = arith.addi %77, %79 : i32
    %c13_i32 = arith.constant 13 : i32
    %81 = arith.muli %c13_i32, %19 : i32
    %82 = arith.addi %c102_i32_3, %81 : i32
    %c13_i32_31 = arith.constant 13 : i32
    %83 = arith.muli %c13_i32_31, %20 : i32
    %c4_i32_32 = arith.constant 4 : i32
    %84 = arith.shrsi %83, %c4_i32_32 : i32
    %85 = arith.addi %82, %84 : i32
    %c14_i32 = arith.constant 14 : i32
    %86 = arith.muli %c14_i32, %19 : i32
    %87 = arith.addi %c102_i32_3, %86 : i32
    %c14_i32_33 = arith.constant 14 : i32
    %88 = arith.muli %c14_i32_33, %20 : i32
    %c4_i32_34 = arith.constant 4 : i32
    %89 = arith.shrsi %88, %c4_i32_34 : i32
    %90 = arith.addi %87, %89 : i32
    %c15_i32_35 = arith.constant 15 : i32
    %91 = arith.muli %c15_i32_35, %19 : i32
    %92 = arith.addi %c102_i32_3, %91 : i32
    %c15_i32_36 = arith.constant 15 : i32
    %93 = arith.muli %c15_i32_36, %20 : i32
    %c4_i32_37 = arith.constant 4 : i32
    %94 = arith.shrsi %93, %c4_i32_37 : i32
    %95 = arith.addi %92, %94 : i32
    %96 = vector.broadcast %25 : i32 to vector<8x256xi32>
    %97 = arith.cmpi slt, %17, %96 : vector<8x256xi32>
    %98 = arith.extui %97 : vector<8x256xi1> to vector<8x256xi32>
    %99 = vector.shape_cast %98 : vector<8x256xi32> to vector<1x8x256xi32>
    %cst_38 = arith.constant dense<0> : vector<1xi32>
    %100 = vector.multi_reduction <add>, %99, %cst_38 [1, 2] : vector<1x8x256xi32> to vector<1xi32>
    %101 = vector.shape_cast %100 : vector<1xi32> to vector<1x1x1xi32>
    %102 = vector.extract %101[0, 0, 0] : i32 from vector<1x1x1xi32>
    %103 = vector.broadcast %30 : i32 to vector<8x256xi32>
    %104 = arith.cmpi slt, %17, %103 : vector<8x256xi32>
    %105 = arith.extui %104 : vector<8x256xi1> to vector<8x256xi32>
    %106 = vector.shape_cast %105 : vector<8x256xi32> to vector<1x8x256xi32>
    %cst_39 = arith.constant dense<0> : vector<1xi32>
    %107 = vector.multi_reduction <add>, %106, %cst_39 [1, 2] : vector<1x8x256xi32> to vector<1xi32>
    %108 = vector.shape_cast %107 : vector<1xi32> to vector<1x1x1xi32>
    %109 = vector.extract %108[0, 0, 0] : i32 from vector<1x1x1xi32>
    %110 = vector.broadcast %35 : i32 to vector<8x256xi32>
    %111 = arith.cmpi slt, %17, %110 : vector<8x256xi32>
    %112 = arith.extui %111 : vector<8x256xi1> to vector<8x256xi32>
    %113 = vector.shape_cast %112 : vector<8x256xi32> to vector<1x8x256xi32>
    %cst_40 = arith.constant dense<0> : vector<1xi32>
    %114 = vector.multi_reduction <add>, %113, %cst_40 [1, 2] : vector<1x8x256xi32> to vector<1xi32>
    %115 = vector.shape_cast %114 : vector<1xi32> to vector<1x1x1xi32>
    %116 = vector.extract %115[0, 0, 0] : i32 from vector<1x1x1xi32>
    %117 = vector.broadcast %40 : i32 to vector<8x256xi32>
    %118 = arith.cmpi slt, %17, %117 : vector<8x256xi32>
    %119 = arith.extui %118 : vector<8x256xi1> to vector<8x256xi32>
    %120 = vector.shape_cast %119 : vector<8x256xi32> to vector<1x8x256xi32>
    %cst_41 = arith.constant dense<0> : vector<1xi32>
    %121 = vector.multi_reduction <add>, %120, %cst_41 [1, 2] : vector<1x8x256xi32> to vector<1xi32>
    %122 = vector.shape_cast %121 : vector<1xi32> to vector<1x1x1xi32>
    %123 = vector.extract %122[0, 0, 0] : i32 from vector<1x1x1xi32>
    %124 = vector.broadcast %45 : i32 to vector<8x256xi32>
    %125 = arith.cmpi slt, %17, %124 : vector<8x256xi32>
    %126 = arith.extui %125 : vector<8x256xi1> to vector<8x256xi32>
    %127 = vector.shape_cast %126 : vector<8x256xi32> to vector<1x8x256xi32>
    %cst_42 = arith.constant dense<0> : vector<1xi32>
    %128 = vector.multi_reduction <add>, %127, %cst_42 [1, 2] : vector<1x8x256xi32> to vector<1xi32>
    %129 = vector.shape_cast %128 : vector<1xi32> to vector<1x1x1xi32>
    %130 = vector.extract %129[0, 0, 0] : i32 from vector<1x1x1xi32>
    %131 = vector.broadcast %50 : i32 to vector<8x256xi32>
    %132 = arith.cmpi slt, %17, %131 : vector<8x256xi32>
    %133 = arith.extui %132 : vector<8x256xi1> to vector<8x256xi32>
    %134 = vector.shape_cast %133 : vector<8x256xi32> to vector<1x8x256xi32>
    %cst_43 = arith.constant dense<0> : vector<1xi32>
    %135 = vector.multi_reduction <add>, %134, %cst_43 [1, 2] : vector<1x8x256xi32> to vector<1xi32>
    %136 = vector.shape_cast %135 : vector<1xi32> to vector<1x1x1xi32>
    %137 = vector.extract %136[0, 0, 0] : i32 from vector<1x1x1xi32>
    %138 = vector.broadcast %55 : i32 to vector<8x256xi32>
    %139 = arith.cmpi slt, %17, %138 : vector<8x256xi32>
    %140 = arith.extui %139 : vector<8x256xi1> to vector<8x256xi32>
    %141 = vector.shape_cast %140 : vector<8x256xi32> to vector<1x8x256xi32>
    %cst_44 = arith.constant dense<0> : vector<1xi32>
    %142 = vector.multi_reduction <add>, %141, %cst_44 [1, 2] : vector<1x8x256xi32> to vector<1xi32>
    %143 = vector.shape_cast %142 : vector<1xi32> to vector<1x1x1xi32>
    %144 = vector.extract %143[0, 0, 0] : i32 from vector<1x1x1xi32>
    %145 = vector.broadcast %60 : i32 to vector<8x256xi32>
    %146 = arith.cmpi slt, %17, %145 : vector<8x256xi32>
    %147 = arith.extui %146 : vector<8x256xi1> to vector<8x256xi32>
    %148 = vector.shape_cast %147 : vector<8x256xi32> to vector<1x8x256xi32>
    %cst_45 = arith.constant dense<0> : vector<1xi32>
    %149 = vector.multi_reduction <add>, %148, %cst_45 [1, 2] : vector<1x8x256xi32> to vector<1xi32>
    %150 = vector.shape_cast %149 : vector<1xi32> to vector<1x1x1xi32>
    %151 = vector.extract %150[0, 0, 0] : i32 from vector<1x1x1xi32>
    %152 = vector.broadcast %65 : i32 to vector<8x256xi32>
    %153 = arith.cmpi slt, %17, %152 : vector<8x256xi32>
    %154 = arith.extui %153 : vector<8x256xi1> to vector<8x256xi32>
    %155 = vector.shape_cast %154 : vector<8x256xi32> to vector<1x8x256xi32>
    %cst_46 = arith.constant dense<0> : vector<1xi32>
    %156 = vector.multi_reduction <add>, %155, %cst_46 [1, 2] : vector<1x8x256xi32> to vector<1xi32>
    %157 = vector.shape_cast %156 : vector<1xi32> to vector<1x1x1xi32>
    %158 = vector.extract %157[0, 0, 0] : i32 from vector<1x1x1xi32>
    %159 = vector.broadcast %70 : i32 to vector<8x256xi32>
    %160 = arith.cmpi slt, %17, %159 : vector<8x256xi32>
    %161 = arith.extui %160 : vector<8x256xi1> to vector<8x256xi32>
    %162 = vector.shape_cast %161 : vector<8x256xi32> to vector<1x8x256xi32>
    %cst_47 = arith.constant dense<0> : vector<1xi32>
    %163 = vector.multi_reduction <add>, %162, %cst_47 [1, 2] : vector<1x8x256xi32> to vector<1xi32>
    %164 = vector.shape_cast %163 : vector<1xi32> to vector<1x1x1xi32>
    %165 = vector.extract %164[0, 0, 0] : i32 from vector<1x1x1xi32>
    %166 = vector.broadcast %75 : i32 to vector<8x256xi32>
    %167 = arith.cmpi slt, %17, %166 : vector<8x256xi32>
    %168 = arith.extui %167 : vector<8x256xi1> to vector<8x256xi32>
    %169 = vector.shape_cast %168 : vector<8x256xi32> to vector<1x8x256xi32>
    %cst_48 = arith.constant dense<0> : vector<1xi32>
    %170 = vector.multi_reduction <add>, %169, %cst_48 [1, 2] : vector<1x8x256xi32> to vector<1xi32>
    %171 = vector.shape_cast %170 : vector<1xi32> to vector<1x1x1xi32>
    %172 = vector.extract %171[0, 0, 0] : i32 from vector<1x1x1xi32>
    %173 = vector.broadcast %80 : i32 to vector<8x256xi32>
    %174 = arith.cmpi slt, %17, %173 : vector<8x256xi32>
    %175 = arith.extui %174 : vector<8x256xi1> to vector<8x256xi32>
    %176 = vector.shape_cast %175 : vector<8x256xi32> to vector<1x8x256xi32>
    %cst_49 = arith.constant dense<0> : vector<1xi32>
    %177 = vector.multi_reduction <add>, %176, %cst_49 [1, 2] : vector<1x8x256xi32> to vector<1xi32>
    %178 = vector.shape_cast %177 : vector<1xi32> to vector<1x1x1xi32>
    %179 = vector.extract %178[0, 0, 0] : i32 from vector<1x1x1xi32>
    %180 = vector.broadcast %85 : i32 to vector<8x256xi32>
    %181 = arith.cmpi slt, %17, %180 : vector<8x256xi32>
    %182 = arith.extui %181 : vector<8x256xi1> to vector<8x256xi32>
    %183 = vector.shape_cast %182 : vector<8x256xi32> to vector<1x8x256xi32>
    %cst_50 = arith.constant dense<0> : vector<1xi32>
    %184 = vector.multi_reduction <add>, %183, %cst_50 [1, 2] : vector<1x8x256xi32> to vector<1xi32>
    %185 = vector.shape_cast %184 : vector<1xi32> to vector<1x1x1xi32>
    %186 = vector.extract %185[0, 0, 0] : i32 from vector<1x1x1xi32>
    %187 = vector.broadcast %90 : i32 to vector<8x256xi32>
    %188 = arith.cmpi slt, %17, %187 : vector<8x256xi32>
    %189 = arith.extui %188 : vector<8x256xi1> to vector<8x256xi32>
    %190 = vector.shape_cast %189 : vector<8x256xi32> to vector<1x8x256xi32>
    %cst_51 = arith.constant dense<0> : vector<1xi32>
    %191 = vector.multi_reduction <add>, %190, %cst_51 [1, 2] : vector<1x8x256xi32> to vector<1xi32>
    %192 = vector.shape_cast %191 : vector<1xi32> to vector<1x1x1xi32>
    %193 = vector.extract %192[0, 0, 0] : i32 from vector<1x1x1xi32>
    %194 = vector.broadcast %95 : i32 to vector<8x256xi32>
    %195 = arith.cmpi slt, %17, %194 : vector<8x256xi32>
    %196 = arith.extui %195 : vector<8x256xi1> to vector<8x256xi32>
    %197 = vector.shape_cast %196 : vector<8x256xi32> to vector<1x8x256xi32>
    %cst_52 = arith.constant dense<0> : vector<1xi32>
    %198 = vector.multi_reduction <add>, %197, %cst_52 [1, 2] : vector<1x8x256xi32> to vector<1xi32>
    %199 = vector.shape_cast %198 : vector<1xi32> to vector<1x1x1xi32>
    %200 = vector.extract %199[0, 0, 0] : i32 from vector<1x1x1xi32>
    %201 = arith.cmpi slt, %102, %c102_i32 : i32
    %202 = arith.extui %201 : i1 to i32
    %203 = arith.cmpi slt, %109, %c102_i32 : i32
    %204 = arith.extui %203 : i1 to i32
    %205 = arith.addi %202, %204 : i32
    %206 = arith.cmpi slt, %116, %c102_i32 : i32
    %207 = arith.extui %206 : i1 to i32
    %208 = arith.addi %205, %207 : i32
    %209 = arith.cmpi slt, %123, %c102_i32 : i32
    %210 = arith.extui %209 : i1 to i32
    %211 = arith.addi %208, %210 : i32
    %212 = arith.cmpi slt, %130, %c102_i32 : i32
    %213 = arith.extui %212 : i1 to i32
    %214 = arith.addi %211, %213 : i32
    %215 = arith.cmpi slt, %137, %c102_i32 : i32
    %216 = arith.extui %215 : i1 to i32
    %217 = arith.addi %214, %216 : i32
    %218 = arith.cmpi slt, %144, %c102_i32 : i32
    %219 = arith.extui %218 : i1 to i32
    %220 = arith.addi %217, %219 : i32
    %221 = arith.cmpi slt, %151, %c102_i32 : i32
    %222 = arith.extui %221 : i1 to i32
    %223 = arith.addi %220, %222 : i32
    %224 = arith.cmpi slt, %158, %c102_i32 : i32
    %225 = arith.extui %224 : i1 to i32
    %226 = arith.addi %223, %225 : i32
    %227 = arith.cmpi slt, %165, %c102_i32 : i32
    %228 = arith.extui %227 : i1 to i32
    %229 = arith.addi %226, %228 : i32
    %230 = arith.cmpi slt, %172, %c102_i32 : i32
    %231 = arith.extui %230 : i1 to i32
    %232 = arith.addi %229, %231 : i32
    %233 = arith.cmpi slt, %179, %c102_i32 : i32
    %234 = arith.extui %233 : i1 to i32
    %235 = arith.addi %232, %234 : i32
    %236 = arith.cmpi slt, %186, %c102_i32 : i32
    %237 = arith.extui %236 : i1 to i32
    %238 = arith.addi %235, %237 : i32
    %239 = arith.cmpi slt, %193, %c102_i32 : i32
    %240 = arith.extui %239 : i1 to i32
    %241 = arith.addi %238, %240 : i32
    %242 = arith.cmpi slt, %200, %c102_i32 : i32
    %243 = arith.extui %242 : i1 to i32
    %244 = arith.addi %241, %243 : i32
    %c1_i32_53 = arith.constant 1 : i32
    %245 = arith.addi %244, %c1_i32_53 : i32
    %246 = arith.muli %245, %19 : i32
    %247 = arith.addi %c102_i32_3, %246 : i32
    %248 = arith.muli %245, %20 : i32
    %c4_i32_54 = arith.constant 4 : i32
    %249 = arith.shrsi %248, %c4_i32_54 : i32
    %250 = arith.addi %247, %249 : i32
    %251 = arith.muli %244, %19 : i32
    %252 = arith.addi %c102_i32_3, %251 : i32
    %253 = arith.muli %244, %20 : i32
    %c4_i32_55 = arith.constant 4 : i32
    %254 = arith.shrsi %253, %c4_i32_55 : i32
    %255 = arith.addi %252, %254 : i32
    %c0_i32_56 = arith.constant 0 : i32
    %256 = arith.cmpi sgt, %244, %c0_i32_56 : i32
    %257 = arith.extui %256 : i1 to i32
    %258 = arith.addi %255, %257 : i32
    %259 = arith.minsi %258, %250 : i32
    %c1_i32_57 = arith.constant 1 : i32
    %260 = arith.subi %250, %259 : i32
    %c4_i32_58 = arith.constant 4 : i32
    %261 = arith.shrsi %260, %c4_i32_58 : i32
    %c15_i32_59 = arith.constant 15 : i32
    %262 = arith.andi %260, %c15_i32_59 : i32
    %c1_i32_60 = arith.constant 1 : i32
    %263 = arith.muli %c1_i32_60, %261 : i32
    %264 = arith.addi %259, %263 : i32
    %c1_i32_61 = arith.constant 1 : i32
    %265 = arith.muli %c1_i32_61, %262 : i32
    %c4_i32_62 = arith.constant 4 : i32
    %266 = arith.shrsi %265, %c4_i32_62 : i32
    %267 = arith.addi %264, %266 : i32
    %c2_i32_63 = arith.constant 2 : i32
    %268 = arith.muli %c2_i32_63, %261 : i32
    %269 = arith.addi %259, %268 : i32
    %c2_i32_64 = arith.constant 2 : i32
    %270 = arith.muli %c2_i32_64, %262 : i32
    %c4_i32_65 = arith.constant 4 : i32
    %271 = arith.shrsi %270, %c4_i32_65 : i32
    %272 = arith.addi %269, %271 : i32
    %c3_i32_66 = arith.constant 3 : i32
    %273 = arith.muli %c3_i32_66, %261 : i32
    %274 = arith.addi %259, %273 : i32
    %c3_i32_67 = arith.constant 3 : i32
    %275 = arith.muli %c3_i32_67, %262 : i32
    %c4_i32_68 = arith.constant 4 : i32
    %276 = arith.shrsi %275, %c4_i32_68 : i32
    %277 = arith.addi %274, %276 : i32
    %c4_i32_69 = arith.constant 4 : i32
    %278 = arith.muli %c4_i32_69, %261 : i32
    %279 = arith.addi %259, %278 : i32
    %c4_i32_70 = arith.constant 4 : i32
    %280 = arith.muli %c4_i32_70, %262 : i32
    %c4_i32_71 = arith.constant 4 : i32
    %281 = arith.shrsi %280, %c4_i32_71 : i32
    %282 = arith.addi %279, %281 : i32
    %c5_i32_72 = arith.constant 5 : i32
    %283 = arith.muli %c5_i32_72, %261 : i32
    %284 = arith.addi %259, %283 : i32
    %c5_i32_73 = arith.constant 5 : i32
    %285 = arith.muli %c5_i32_73, %262 : i32
    %c4_i32_74 = arith.constant 4 : i32
    %286 = arith.shrsi %285, %c4_i32_74 : i32
    %287 = arith.addi %284, %286 : i32
    %c6_i32_75 = arith.constant 6 : i32
    %288 = arith.muli %c6_i32_75, %261 : i32
    %289 = arith.addi %259, %288 : i32
    %c6_i32_76 = arith.constant 6 : i32
    %290 = arith.muli %c6_i32_76, %262 : i32
    %c4_i32_77 = arith.constant 4 : i32
    %291 = arith.shrsi %290, %c4_i32_77 : i32
    %292 = arith.addi %289, %291 : i32
    %c7_i32_78 = arith.constant 7 : i32
    %293 = arith.muli %c7_i32_78, %261 : i32
    %294 = arith.addi %259, %293 : i32
    %c7_i32_79 = arith.constant 7 : i32
    %295 = arith.muli %c7_i32_79, %262 : i32
    %c4_i32_80 = arith.constant 4 : i32
    %296 = arith.shrsi %295, %c4_i32_80 : i32
    %297 = arith.addi %294, %296 : i32
    %c8_i32_81 = arith.constant 8 : i32
    %298 = arith.muli %c8_i32_81, %261 : i32
    %299 = arith.addi %259, %298 : i32
    %c8_i32_82 = arith.constant 8 : i32
    %300 = arith.muli %c8_i32_82, %262 : i32
    %c4_i32_83 = arith.constant 4 : i32
    %301 = arith.shrsi %300, %c4_i32_83 : i32
    %302 = arith.addi %299, %301 : i32
    %c9_i32_84 = arith.constant 9 : i32
    %303 = arith.muli %c9_i32_84, %261 : i32
    %304 = arith.addi %259, %303 : i32
    %c9_i32_85 = arith.constant 9 : i32
    %305 = arith.muli %c9_i32_85, %262 : i32
    %c4_i32_86 = arith.constant 4 : i32
    %306 = arith.shrsi %305, %c4_i32_86 : i32
    %307 = arith.addi %304, %306 : i32
    %c10_i32_87 = arith.constant 10 : i32
    %308 = arith.muli %c10_i32_87, %261 : i32
    %309 = arith.addi %259, %308 : i32
    %c10_i32_88 = arith.constant 10 : i32
    %310 = arith.muli %c10_i32_88, %262 : i32
    %c4_i32_89 = arith.constant 4 : i32
    %311 = arith.shrsi %310, %c4_i32_89 : i32
    %312 = arith.addi %309, %311 : i32
    %c11_i32_90 = arith.constant 11 : i32
    %313 = arith.muli %c11_i32_90, %261 : i32
    %314 = arith.addi %259, %313 : i32
    %c11_i32_91 = arith.constant 11 : i32
    %315 = arith.muli %c11_i32_91, %262 : i32
    %c4_i32_92 = arith.constant 4 : i32
    %316 = arith.shrsi %315, %c4_i32_92 : i32
    %317 = arith.addi %314, %316 : i32
    %c12_i32_93 = arith.constant 12 : i32
    %318 = arith.muli %c12_i32_93, %261 : i32
    %319 = arith.addi %259, %318 : i32
    %c12_i32_94 = arith.constant 12 : i32
    %320 = arith.muli %c12_i32_94, %262 : i32
    %c4_i32_95 = arith.constant 4 : i32
    %321 = arith.shrsi %320, %c4_i32_95 : i32
    %322 = arith.addi %319, %321 : i32
    %c13_i32_96 = arith.constant 13 : i32
    %323 = arith.muli %c13_i32_96, %261 : i32
    %324 = arith.addi %259, %323 : i32
    %c13_i32_97 = arith.constant 13 : i32
    %325 = arith.muli %c13_i32_97, %262 : i32
    %c4_i32_98 = arith.constant 4 : i32
    %326 = arith.shrsi %325, %c4_i32_98 : i32
    %327 = arith.addi %324, %326 : i32
    %c14_i32_99 = arith.constant 14 : i32
    %328 = arith.muli %c14_i32_99, %261 : i32
    %329 = arith.addi %259, %328 : i32
    %c14_i32_100 = arith.constant 14 : i32
    %330 = arith.muli %c14_i32_100, %262 : i32
    %c4_i32_101 = arith.constant 4 : i32
    %331 = arith.shrsi %330, %c4_i32_101 : i32
    %332 = arith.addi %329, %331 : i32
    %c15_i32_102 = arith.constant 15 : i32
    %333 = arith.muli %c15_i32_102, %261 : i32
    %334 = arith.addi %259, %333 : i32
    %c15_i32_103 = arith.constant 15 : i32
    %335 = arith.muli %c15_i32_103, %262 : i32
    %c4_i32_104 = arith.constant 4 : i32
    %336 = arith.shrsi %335, %c4_i32_104 : i32
    %337 = arith.addi %334, %336 : i32
    %338 = vector.broadcast %267 : i32 to vector<8x256xi32>
    %339 = arith.cmpi slt, %17, %338 : vector<8x256xi32>
    %340 = arith.extui %339 : vector<8x256xi1> to vector<8x256xi32>
    %341 = vector.shape_cast %340 : vector<8x256xi32> to vector<1x8x256xi32>
    %cst_105 = arith.constant dense<0> : vector<1xi32>
    %342 = vector.multi_reduction <add>, %341, %cst_105 [1, 2] : vector<1x8x256xi32> to vector<1xi32>
    %343 = vector.shape_cast %342 : vector<1xi32> to vector<1x1x1xi32>
    %344 = vector.extract %343[0, 0, 0] : i32 from vector<1x1x1xi32>
    %345 = vector.broadcast %272 : i32 to vector<8x256xi32>
    %346 = arith.cmpi slt, %17, %345 : vector<8x256xi32>
    %347 = arith.extui %346 : vector<8x256xi1> to vector<8x256xi32>
    %348 = vector.shape_cast %347 : vector<8x256xi32> to vector<1x8x256xi32>
    %cst_106 = arith.constant dense<0> : vector<1xi32>
    %349 = vector.multi_reduction <add>, %348, %cst_106 [1, 2] : vector<1x8x256xi32> to vector<1xi32>
    %350 = vector.shape_cast %349 : vector<1xi32> to vector<1x1x1xi32>
    %351 = vector.extract %350[0, 0, 0] : i32 from vector<1x1x1xi32>
    %352 = vector.broadcast %277 : i32 to vector<8x256xi32>
    %353 = arith.cmpi slt, %17, %352 : vector<8x256xi32>
    %354 = arith.extui %353 : vector<8x256xi1> to vector<8x256xi32>
    %355 = vector.shape_cast %354 : vector<8x256xi32> to vector<1x8x256xi32>
    %cst_107 = arith.constant dense<0> : vector<1xi32>
    %356 = vector.multi_reduction <add>, %355, %cst_107 [1, 2] : vector<1x8x256xi32> to vector<1xi32>
    %357 = vector.shape_cast %356 : vector<1xi32> to vector<1x1x1xi32>
    %358 = vector.extract %357[0, 0, 0] : i32 from vector<1x1x1xi32>
    %359 = vector.broadcast %282 : i32 to vector<8x256xi32>
    %360 = arith.cmpi slt, %17, %359 : vector<8x256xi32>
    %361 = arith.extui %360 : vector<8x256xi1> to vector<8x256xi32>
    %362 = vector.shape_cast %361 : vector<8x256xi32> to vector<1x8x256xi32>
    %cst_108 = arith.constant dense<0> : vector<1xi32>
    %363 = vector.multi_reduction <add>, %362, %cst_108 [1, 2] : vector<1x8x256xi32> to vector<1xi32>
    %364 = vector.shape_cast %363 : vector<1xi32> to vector<1x1x1xi32>
    %365 = vector.extract %364[0, 0, 0] : i32 from vector<1x1x1xi32>
    %366 = vector.broadcast %287 : i32 to vector<8x256xi32>
    %367 = arith.cmpi slt, %17, %366 : vector<8x256xi32>
    %368 = arith.extui %367 : vector<8x256xi1> to vector<8x256xi32>
    %369 = vector.shape_cast %368 : vector<8x256xi32> to vector<1x8x256xi32>
    %cst_109 = arith.constant dense<0> : vector<1xi32>
    %370 = vector.multi_reduction <add>, %369, %cst_109 [1, 2] : vector<1x8x256xi32> to vector<1xi32>
    %371 = vector.shape_cast %370 : vector<1xi32> to vector<1x1x1xi32>
    %372 = vector.extract %371[0, 0, 0] : i32 from vector<1x1x1xi32>
    %373 = vector.broadcast %292 : i32 to vector<8x256xi32>
    %374 = arith.cmpi slt, %17, %373 : vector<8x256xi32>
    %375 = arith.extui %374 : vector<8x256xi1> to vector<8x256xi32>
    %376 = vector.shape_cast %375 : vector<8x256xi32> to vector<1x8x256xi32>
    %cst_110 = arith.constant dense<0> : vector<1xi32>
    %377 = vector.multi_reduction <add>, %376, %cst_110 [1, 2] : vector<1x8x256xi32> to vector<1xi32>
    %378 = vector.shape_cast %377 : vector<1xi32> to vector<1x1x1xi32>
    %379 = vector.extract %378[0, 0, 0] : i32 from vector<1x1x1xi32>
    %380 = vector.broadcast %297 : i32 to vector<8x256xi32>
    %381 = arith.cmpi slt, %17, %380 : vector<8x256xi32>
    %382 = arith.extui %381 : vector<8x256xi1> to vector<8x256xi32>
    %383 = vector.shape_cast %382 : vector<8x256xi32> to vector<1x8x256xi32>
    %cst_111 = arith.constant dense<0> : vector<1xi32>
    %384 = vector.multi_reduction <add>, %383, %cst_111 [1, 2] : vector<1x8x256xi32> to vector<1xi32>
    %385 = vector.shape_cast %384 : vector<1xi32> to vector<1x1x1xi32>
    %386 = vector.extract %385[0, 0, 0] : i32 from vector<1x1x1xi32>
    %387 = vector.broadcast %302 : i32 to vector<8x256xi32>
    %388 = arith.cmpi slt, %17, %387 : vector<8x256xi32>
    %389 = arith.extui %388 : vector<8x256xi1> to vector<8x256xi32>
    %390 = vector.shape_cast %389 : vector<8x256xi32> to vector<1x8x256xi32>
    %cst_112 = arith.constant dense<0> : vector<1xi32>
    %391 = vector.multi_reduction <add>, %390, %cst_112 [1, 2] : vector<1x8x256xi32> to vector<1xi32>
    %392 = vector.shape_cast %391 : vector<1xi32> to vector<1x1x1xi32>
    %393 = vector.extract %392[0, 0, 0] : i32 from vector<1x1x1xi32>
    %394 = vector.broadcast %307 : i32 to vector<8x256xi32>
    %395 = arith.cmpi slt, %17, %394 : vector<8x256xi32>
    %396 = arith.extui %395 : vector<8x256xi1> to vector<8x256xi32>
    %397 = vector.shape_cast %396 : vector<8x256xi32> to vector<1x8x256xi32>
    %cst_113 = arith.constant dense<0> : vector<1xi32>
    %398 = vector.multi_reduction <add>, %397, %cst_113 [1, 2] : vector<1x8x256xi32> to vector<1xi32>
    %399 = vector.shape_cast %398 : vector<1xi32> to vector<1x1x1xi32>
    %400 = vector.extract %399[0, 0, 0] : i32 from vector<1x1x1xi32>
    %401 = vector.broadcast %312 : i32 to vector<8x256xi32>
    %402 = arith.cmpi slt, %17, %401 : vector<8x256xi32>
    %403 = arith.extui %402 : vector<8x256xi1> to vector<8x256xi32>
    %404 = vector.shape_cast %403 : vector<8x256xi32> to vector<1x8x256xi32>
    %cst_114 = arith.constant dense<0> : vector<1xi32>
    %405 = vector.multi_reduction <add>, %404, %cst_114 [1, 2] : vector<1x8x256xi32> to vector<1xi32>
    %406 = vector.shape_cast %405 : vector<1xi32> to vector<1x1x1xi32>
    %407 = vector.extract %406[0, 0, 0] : i32 from vector<1x1x1xi32>
    %408 = vector.broadcast %317 : i32 to vector<8x256xi32>
    %409 = arith.cmpi slt, %17, %408 : vector<8x256xi32>
    %410 = arith.extui %409 : vector<8x256xi1> to vector<8x256xi32>
    %411 = vector.shape_cast %410 : vector<8x256xi32> to vector<1x8x256xi32>
    %cst_115 = arith.constant dense<0> : vector<1xi32>
    %412 = vector.multi_reduction <add>, %411, %cst_115 [1, 2] : vector<1x8x256xi32> to vector<1xi32>
    %413 = vector.shape_cast %412 : vector<1xi32> to vector<1x1x1xi32>
    %414 = vector.extract %413[0, 0, 0] : i32 from vector<1x1x1xi32>
    %415 = vector.broadcast %322 : i32 to vector<8x256xi32>
    %416 = arith.cmpi slt, %17, %415 : vector<8x256xi32>
    %417 = arith.extui %416 : vector<8x256xi1> to vector<8x256xi32>
    %418 = vector.shape_cast %417 : vector<8x256xi32> to vector<1x8x256xi32>
    %cst_116 = arith.constant dense<0> : vector<1xi32>
    %419 = vector.multi_reduction <add>, %418, %cst_116 [1, 2] : vector<1x8x256xi32> to vector<1xi32>
    %420 = vector.shape_cast %419 : vector<1xi32> to vector<1x1x1xi32>
    %421 = vector.extract %420[0, 0, 0] : i32 from vector<1x1x1xi32>
    %422 = vector.broadcast %327 : i32 to vector<8x256xi32>
    %423 = arith.cmpi slt, %17, %422 : vector<8x256xi32>
    %424 = arith.extui %423 : vector<8x256xi1> to vector<8x256xi32>
    %425 = vector.shape_cast %424 : vector<8x256xi32> to vector<1x8x256xi32>
    %cst_117 = arith.constant dense<0> : vector<1xi32>
    %426 = vector.multi_reduction <add>, %425, %cst_117 [1, 2] : vector<1x8x256xi32> to vector<1xi32>
    %427 = vector.shape_cast %426 : vector<1xi32> to vector<1x1x1xi32>
    %428 = vector.extract %427[0, 0, 0] : i32 from vector<1x1x1xi32>
    %429 = vector.broadcast %332 : i32 to vector<8x256xi32>
    %430 = arith.cmpi slt, %17, %429 : vector<8x256xi32>
    %431 = arith.extui %430 : vector<8x256xi1> to vector<8x256xi32>
    %432 = vector.shape_cast %431 : vector<8x256xi32> to vector<1x8x256xi32>
    %cst_118 = arith.constant dense<0> : vector<1xi32>
    %433 = vector.multi_reduction <add>, %432, %cst_118 [1, 2] : vector<1x8x256xi32> to vector<1xi32>
    %434 = vector.shape_cast %433 : vector<1xi32> to vector<1x1x1xi32>
    %435 = vector.extract %434[0, 0, 0] : i32 from vector<1x1x1xi32>
    %436 = vector.broadcast %337 : i32 to vector<8x256xi32>
    %437 = arith.cmpi slt, %17, %436 : vector<8x256xi32>
    %438 = arith.extui %437 : vector<8x256xi1> to vector<8x256xi32>
    %439 = vector.shape_cast %438 : vector<8x256xi32> to vector<1x8x256xi32>
    %cst_119 = arith.constant dense<0> : vector<1xi32>
    %440 = vector.multi_reduction <add>, %439, %cst_119 [1, 2] : vector<1x8x256xi32> to vector<1xi32>
    %441 = vector.shape_cast %440 : vector<1xi32> to vector<1x1x1xi32>
    %442 = vector.extract %441[0, 0, 0] : i32 from vector<1x1x1xi32>
    %443 = arith.cmpi slt, %344, %c102_i32 : i32
    %444 = arith.extui %443 : i1 to i32
    %445 = arith.cmpi slt, %351, %c102_i32 : i32
    %446 = arith.extui %445 : i1 to i32
    %447 = arith.addi %444, %446 : i32
    %448 = arith.cmpi slt, %358, %c102_i32 : i32
    %449 = arith.extui %448 : i1 to i32
    %450 = arith.addi %447, %449 : i32
    %451 = arith.cmpi slt, %365, %c102_i32 : i32
    %452 = arith.extui %451 : i1 to i32
    %453 = arith.addi %450, %452 : i32
    %454 = arith.cmpi slt, %372, %c102_i32 : i32
    %455 = arith.extui %454 : i1 to i32
    %456 = arith.addi %453, %455 : i32
    %457 = arith.cmpi slt, %379, %c102_i32 : i32
    %458 = arith.extui %457 : i1 to i32
    %459 = arith.addi %456, %458 : i32
    %460 = arith.cmpi slt, %386, %c102_i32 : i32
    %461 = arith.extui %460 : i1 to i32
    %462 = arith.addi %459, %461 : i32
    %463 = arith.cmpi slt, %393, %c102_i32 : i32
    %464 = arith.extui %463 : i1 to i32
    %465 = arith.addi %462, %464 : i32
    %466 = arith.cmpi slt, %400, %c102_i32 : i32
    %467 = arith.extui %466 : i1 to i32
    %468 = arith.addi %465, %467 : i32
    %469 = arith.cmpi slt, %407, %c102_i32 : i32
    %470 = arith.extui %469 : i1 to i32
    %471 = arith.addi %468, %470 : i32
    %472 = arith.cmpi slt, %414, %c102_i32 : i32
    %473 = arith.extui %472 : i1 to i32
    %474 = arith.addi %471, %473 : i32
    %475 = arith.cmpi slt, %421, %c102_i32 : i32
    %476 = arith.extui %475 : i1 to i32
    %477 = arith.addi %474, %476 : i32
    %478 = arith.cmpi slt, %428, %c102_i32 : i32
    %479 = arith.extui %478 : i1 to i32
    %480 = arith.addi %477, %479 : i32
    %481 = arith.cmpi slt, %435, %c102_i32 : i32
    %482 = arith.extui %481 : i1 to i32
    %483 = arith.addi %480, %482 : i32
    %484 = arith.cmpi slt, %442, %c102_i32 : i32
    %485 = arith.extui %484 : i1 to i32
    %486 = arith.addi %483, %485 : i32
    %c1_i32_120 = arith.constant 1 : i32
    %487 = arith.addi %486, %c1_i32_120 : i32
    %488 = arith.muli %487, %261 : i32
    %489 = arith.addi %259, %488 : i32
    %490 = arith.muli %487, %262 : i32
    %c4_i32_121 = arith.constant 4 : i32
    %491 = arith.shrsi %490, %c4_i32_121 : i32
    %492 = arith.addi %489, %491 : i32
    %493 = arith.muli %486, %261 : i32
    %494 = arith.addi %259, %493 : i32
    %495 = arith.muli %486, %262 : i32
    %c4_i32_122 = arith.constant 4 : i32
    %496 = arith.shrsi %495, %c4_i32_122 : i32
    %497 = arith.addi %494, %496 : i32
    %c0_i32_123 = arith.constant 0 : i32
    %498 = arith.cmpi sgt, %486, %c0_i32_123 : i32
    %499 = arith.extui %498 : i1 to i32
    %500 = arith.addi %497, %499 : i32
    %501 = arith.minsi %500, %492 : i32
    %c2_i32_124 = arith.constant 2 : i32
    %502 = arith.subi %492, %501 : i32
    %c4_i32_125 = arith.constant 4 : i32
    %503 = arith.shrsi %502, %c4_i32_125 : i32
    %c15_i32_126 = arith.constant 15 : i32
    %504 = arith.andi %502, %c15_i32_126 : i32
    %c1_i32_127 = arith.constant 1 : i32
    %505 = arith.muli %c1_i32_127, %503 : i32
    %506 = arith.addi %501, %505 : i32
    %c1_i32_128 = arith.constant 1 : i32
    %507 = arith.muli %c1_i32_128, %504 : i32
    %c4_i32_129 = arith.constant 4 : i32
    %508 = arith.shrsi %507, %c4_i32_129 : i32
    %509 = arith.addi %506, %508 : i32
    %c2_i32_130 = arith.constant 2 : i32
    %510 = arith.muli %c2_i32_130, %503 : i32
    %511 = arith.addi %501, %510 : i32
    %c2_i32_131 = arith.constant 2 : i32
    %512 = arith.muli %c2_i32_131, %504 : i32
    %c4_i32_132 = arith.constant 4 : i32
    %513 = arith.shrsi %512, %c4_i32_132 : i32
    %514 = arith.addi %511, %513 : i32
    %c3_i32_133 = arith.constant 3 : i32
    %515 = arith.muli %c3_i32_133, %503 : i32
    %516 = arith.addi %501, %515 : i32
    %c3_i32_134 = arith.constant 3 : i32
    %517 = arith.muli %c3_i32_134, %504 : i32
    %c4_i32_135 = arith.constant 4 : i32
    %518 = arith.shrsi %517, %c4_i32_135 : i32
    %519 = arith.addi %516, %518 : i32
    %c4_i32_136 = arith.constant 4 : i32
    %520 = arith.muli %c4_i32_136, %503 : i32
    %521 = arith.addi %501, %520 : i32
    %c4_i32_137 = arith.constant 4 : i32
    %522 = arith.muli %c4_i32_137, %504 : i32
    %c4_i32_138 = arith.constant 4 : i32
    %523 = arith.shrsi %522, %c4_i32_138 : i32
    %524 = arith.addi %521, %523 : i32
    %c5_i32_139 = arith.constant 5 : i32
    %525 = arith.muli %c5_i32_139, %503 : i32
    %526 = arith.addi %501, %525 : i32
    %c5_i32_140 = arith.constant 5 : i32
    %527 = arith.muli %c5_i32_140, %504 : i32
    %c4_i32_141 = arith.constant 4 : i32
    %528 = arith.shrsi %527, %c4_i32_141 : i32
    %529 = arith.addi %526, %528 : i32
    %c6_i32_142 = arith.constant 6 : i32
    %530 = arith.muli %c6_i32_142, %503 : i32
    %531 = arith.addi %501, %530 : i32
    %c6_i32_143 = arith.constant 6 : i32
    %532 = arith.muli %c6_i32_143, %504 : i32
    %c4_i32_144 = arith.constant 4 : i32
    %533 = arith.shrsi %532, %c4_i32_144 : i32
    %534 = arith.addi %531, %533 : i32
    %c7_i32_145 = arith.constant 7 : i32
    %535 = arith.muli %c7_i32_145, %503 : i32
    %536 = arith.addi %501, %535 : i32
    %c7_i32_146 = arith.constant 7 : i32
    %537 = arith.muli %c7_i32_146, %504 : i32
    %c4_i32_147 = arith.constant 4 : i32
    %538 = arith.shrsi %537, %c4_i32_147 : i32
    %539 = arith.addi %536, %538 : i32
    %c8_i32_148 = arith.constant 8 : i32
    %540 = arith.muli %c8_i32_148, %503 : i32
    %541 = arith.addi %501, %540 : i32
    %c8_i32_149 = arith.constant 8 : i32
    %542 = arith.muli %c8_i32_149, %504 : i32
    %c4_i32_150 = arith.constant 4 : i32
    %543 = arith.shrsi %542, %c4_i32_150 : i32
    %544 = arith.addi %541, %543 : i32
    %c9_i32_151 = arith.constant 9 : i32
    %545 = arith.muli %c9_i32_151, %503 : i32
    %546 = arith.addi %501, %545 : i32
    %c9_i32_152 = arith.constant 9 : i32
    %547 = arith.muli %c9_i32_152, %504 : i32
    %c4_i32_153 = arith.constant 4 : i32
    %548 = arith.shrsi %547, %c4_i32_153 : i32
    %549 = arith.addi %546, %548 : i32
    %c10_i32_154 = arith.constant 10 : i32
    %550 = arith.muli %c10_i32_154, %503 : i32
    %551 = arith.addi %501, %550 : i32
    %c10_i32_155 = arith.constant 10 : i32
    %552 = arith.muli %c10_i32_155, %504 : i32
    %c4_i32_156 = arith.constant 4 : i32
    %553 = arith.shrsi %552, %c4_i32_156 : i32
    %554 = arith.addi %551, %553 : i32
    %c11_i32_157 = arith.constant 11 : i32
    %555 = arith.muli %c11_i32_157, %503 : i32
    %556 = arith.addi %501, %555 : i32
    %c11_i32_158 = arith.constant 11 : i32
    %557 = arith.muli %c11_i32_158, %504 : i32
    %c4_i32_159 = arith.constant 4 : i32
    %558 = arith.shrsi %557, %c4_i32_159 : i32
    %559 = arith.addi %556, %558 : i32
    %c12_i32_160 = arith.constant 12 : i32
    %560 = arith.muli %c12_i32_160, %503 : i32
    %561 = arith.addi %501, %560 : i32
    %c12_i32_161 = arith.constant 12 : i32
    %562 = arith.muli %c12_i32_161, %504 : i32
    %c4_i32_162 = arith.constant 4 : i32
    %563 = arith.shrsi %562, %c4_i32_162 : i32
    %564 = arith.addi %561, %563 : i32
    %c13_i32_163 = arith.constant 13 : i32
    %565 = arith.muli %c13_i32_163, %503 : i32
    %566 = arith.addi %501, %565 : i32
    %c13_i32_164 = arith.constant 13 : i32
    %567 = arith.muli %c13_i32_164, %504 : i32
    %c4_i32_165 = arith.constant 4 : i32
    %568 = arith.shrsi %567, %c4_i32_165 : i32
    %569 = arith.addi %566, %568 : i32
    %c14_i32_166 = arith.constant 14 : i32
    %570 = arith.muli %c14_i32_166, %503 : i32
    %571 = arith.addi %501, %570 : i32
    %c14_i32_167 = arith.constant 14 : i32
    %572 = arith.muli %c14_i32_167, %504 : i32
    %c4_i32_168 = arith.constant 4 : i32
    %573 = arith.shrsi %572, %c4_i32_168 : i32
    %574 = arith.addi %571, %573 : i32
    %c15_i32_169 = arith.constant 15 : i32
    %575 = arith.muli %c15_i32_169, %503 : i32
    %576 = arith.addi %501, %575 : i32
    %c15_i32_170 = arith.constant 15 : i32
    %577 = arith.muli %c15_i32_170, %504 : i32
    %c4_i32_171 = arith.constant 4 : i32
    %578 = arith.shrsi %577, %c4_i32_171 : i32
    %579 = arith.addi %576, %578 : i32
    %580 = vector.broadcast %509 : i32 to vector<8x256xi32>
    %581 = arith.cmpi slt, %17, %580 : vector<8x256xi32>
    %582 = arith.extui %581 : vector<8x256xi1> to vector<8x256xi32>
    %583 = vector.shape_cast %582 : vector<8x256xi32> to vector<1x8x256xi32>
    %cst_172 = arith.constant dense<0> : vector<1xi32>
    %584 = vector.multi_reduction <add>, %583, %cst_172 [1, 2] : vector<1x8x256xi32> to vector<1xi32>
    %585 = vector.shape_cast %584 : vector<1xi32> to vector<1x1x1xi32>
    %586 = vector.extract %585[0, 0, 0] : i32 from vector<1x1x1xi32>
    %587 = vector.broadcast %514 : i32 to vector<8x256xi32>
    %588 = arith.cmpi slt, %17, %587 : vector<8x256xi32>
    %589 = arith.extui %588 : vector<8x256xi1> to vector<8x256xi32>
    %590 = vector.shape_cast %589 : vector<8x256xi32> to vector<1x8x256xi32>
    %cst_173 = arith.constant dense<0> : vector<1xi32>
    %591 = vector.multi_reduction <add>, %590, %cst_173 [1, 2] : vector<1x8x256xi32> to vector<1xi32>
    %592 = vector.shape_cast %591 : vector<1xi32> to vector<1x1x1xi32>
    %593 = vector.extract %592[0, 0, 0] : i32 from vector<1x1x1xi32>
    %594 = vector.broadcast %519 : i32 to vector<8x256xi32>
    %595 = arith.cmpi slt, %17, %594 : vector<8x256xi32>
    %596 = arith.extui %595 : vector<8x256xi1> to vector<8x256xi32>
    %597 = vector.shape_cast %596 : vector<8x256xi32> to vector<1x8x256xi32>
    %cst_174 = arith.constant dense<0> : vector<1xi32>
    %598 = vector.multi_reduction <add>, %597, %cst_174 [1, 2] : vector<1x8x256xi32> to vector<1xi32>
    %599 = vector.shape_cast %598 : vector<1xi32> to vector<1x1x1xi32>
    %600 = vector.extract %599[0, 0, 0] : i32 from vector<1x1x1xi32>
    %601 = vector.broadcast %524 : i32 to vector<8x256xi32>
    %602 = arith.cmpi slt, %17, %601 : vector<8x256xi32>
    %603 = arith.extui %602 : vector<8x256xi1> to vector<8x256xi32>
    %604 = vector.shape_cast %603 : vector<8x256xi32> to vector<1x8x256xi32>
    %cst_175 = arith.constant dense<0> : vector<1xi32>
    %605 = vector.multi_reduction <add>, %604, %cst_175 [1, 2] : vector<1x8x256xi32> to vector<1xi32>
    %606 = vector.shape_cast %605 : vector<1xi32> to vector<1x1x1xi32>
    %607 = vector.extract %606[0, 0, 0] : i32 from vector<1x1x1xi32>
    %608 = vector.broadcast %529 : i32 to vector<8x256xi32>
    %609 = arith.cmpi slt, %17, %608 : vector<8x256xi32>
    %610 = arith.extui %609 : vector<8x256xi1> to vector<8x256xi32>
    %611 = vector.shape_cast %610 : vector<8x256xi32> to vector<1x8x256xi32>
    %cst_176 = arith.constant dense<0> : vector<1xi32>
    %612 = vector.multi_reduction <add>, %611, %cst_176 [1, 2] : vector<1x8x256xi32> to vector<1xi32>
    %613 = vector.shape_cast %612 : vector<1xi32> to vector<1x1x1xi32>
    %614 = vector.extract %613[0, 0, 0] : i32 from vector<1x1x1xi32>
    %615 = vector.broadcast %534 : i32 to vector<8x256xi32>
    %616 = arith.cmpi slt, %17, %615 : vector<8x256xi32>
    %617 = arith.extui %616 : vector<8x256xi1> to vector<8x256xi32>
    %618 = vector.shape_cast %617 : vector<8x256xi32> to vector<1x8x256xi32>
    %cst_177 = arith.constant dense<0> : vector<1xi32>
    %619 = vector.multi_reduction <add>, %618, %cst_177 [1, 2] : vector<1x8x256xi32> to vector<1xi32>
    %620 = vector.shape_cast %619 : vector<1xi32> to vector<1x1x1xi32>
    %621 = vector.extract %620[0, 0, 0] : i32 from vector<1x1x1xi32>
    %622 = vector.broadcast %539 : i32 to vector<8x256xi32>
    %623 = arith.cmpi slt, %17, %622 : vector<8x256xi32>
    %624 = arith.extui %623 : vector<8x256xi1> to vector<8x256xi32>
    %625 = vector.shape_cast %624 : vector<8x256xi32> to vector<1x8x256xi32>
    %cst_178 = arith.constant dense<0> : vector<1xi32>
    %626 = vector.multi_reduction <add>, %625, %cst_178 [1, 2] : vector<1x8x256xi32> to vector<1xi32>
    %627 = vector.shape_cast %626 : vector<1xi32> to vector<1x1x1xi32>
    %628 = vector.extract %627[0, 0, 0] : i32 from vector<1x1x1xi32>
    %629 = vector.broadcast %544 : i32 to vector<8x256xi32>
    %630 = arith.cmpi slt, %17, %629 : vector<8x256xi32>
    %631 = arith.extui %630 : vector<8x256xi1> to vector<8x256xi32>
    %632 = vector.shape_cast %631 : vector<8x256xi32> to vector<1x8x256xi32>
    %cst_179 = arith.constant dense<0> : vector<1xi32>
    %633 = vector.multi_reduction <add>, %632, %cst_179 [1, 2] : vector<1x8x256xi32> to vector<1xi32>
    %634 = vector.shape_cast %633 : vector<1xi32> to vector<1x1x1xi32>
    %635 = vector.extract %634[0, 0, 0] : i32 from vector<1x1x1xi32>
    %636 = vector.broadcast %549 : i32 to vector<8x256xi32>
    %637 = arith.cmpi slt, %17, %636 : vector<8x256xi32>
    %638 = arith.extui %637 : vector<8x256xi1> to vector<8x256xi32>
    %639 = vector.shape_cast %638 : vector<8x256xi32> to vector<1x8x256xi32>
    %cst_180 = arith.constant dense<0> : vector<1xi32>
    %640 = vector.multi_reduction <add>, %639, %cst_180 [1, 2] : vector<1x8x256xi32> to vector<1xi32>
    %641 = vector.shape_cast %640 : vector<1xi32> to vector<1x1x1xi32>
    %642 = vector.extract %641[0, 0, 0] : i32 from vector<1x1x1xi32>
    %643 = vector.broadcast %554 : i32 to vector<8x256xi32>
    %644 = arith.cmpi slt, %17, %643 : vector<8x256xi32>
    %645 = arith.extui %644 : vector<8x256xi1> to vector<8x256xi32>
    %646 = vector.shape_cast %645 : vector<8x256xi32> to vector<1x8x256xi32>
    %cst_181 = arith.constant dense<0> : vector<1xi32>
    %647 = vector.multi_reduction <add>, %646, %cst_181 [1, 2] : vector<1x8x256xi32> to vector<1xi32>
    %648 = vector.shape_cast %647 : vector<1xi32> to vector<1x1x1xi32>
    %649 = vector.extract %648[0, 0, 0] : i32 from vector<1x1x1xi32>
    %650 = vector.broadcast %559 : i32 to vector<8x256xi32>
    %651 = arith.cmpi slt, %17, %650 : vector<8x256xi32>
    %652 = arith.extui %651 : vector<8x256xi1> to vector<8x256xi32>
    %653 = vector.shape_cast %652 : vector<8x256xi32> to vector<1x8x256xi32>
    %cst_182 = arith.constant dense<0> : vector<1xi32>
    %654 = vector.multi_reduction <add>, %653, %cst_182 [1, 2] : vector<1x8x256xi32> to vector<1xi32>
    %655 = vector.shape_cast %654 : vector<1xi32> to vector<1x1x1xi32>
    %656 = vector.extract %655[0, 0, 0] : i32 from vector<1x1x1xi32>
    %657 = vector.broadcast %564 : i32 to vector<8x256xi32>
    %658 = arith.cmpi slt, %17, %657 : vector<8x256xi32>
    %659 = arith.extui %658 : vector<8x256xi1> to vector<8x256xi32>
    %660 = vector.shape_cast %659 : vector<8x256xi32> to vector<1x8x256xi32>
    %cst_183 = arith.constant dense<0> : vector<1xi32>
    %661 = vector.multi_reduction <add>, %660, %cst_183 [1, 2] : vector<1x8x256xi32> to vector<1xi32>
    %662 = vector.shape_cast %661 : vector<1xi32> to vector<1x1x1xi32>
    %663 = vector.extract %662[0, 0, 0] : i32 from vector<1x1x1xi32>
    %664 = vector.broadcast %569 : i32 to vector<8x256xi32>
    %665 = arith.cmpi slt, %17, %664 : vector<8x256xi32>
    %666 = arith.extui %665 : vector<8x256xi1> to vector<8x256xi32>
    %667 = vector.shape_cast %666 : vector<8x256xi32> to vector<1x8x256xi32>
    %cst_184 = arith.constant dense<0> : vector<1xi32>
    %668 = vector.multi_reduction <add>, %667, %cst_184 [1, 2] : vector<1x8x256xi32> to vector<1xi32>
    %669 = vector.shape_cast %668 : vector<1xi32> to vector<1x1x1xi32>
    %670 = vector.extract %669[0, 0, 0] : i32 from vector<1x1x1xi32>
    %671 = vector.broadcast %574 : i32 to vector<8x256xi32>
    %672 = arith.cmpi slt, %17, %671 : vector<8x256xi32>
    %673 = arith.extui %672 : vector<8x256xi1> to vector<8x256xi32>
    %674 = vector.shape_cast %673 : vector<8x256xi32> to vector<1x8x256xi32>
    %cst_185 = arith.constant dense<0> : vector<1xi32>
    %675 = vector.multi_reduction <add>, %674, %cst_185 [1, 2] : vector<1x8x256xi32> to vector<1xi32>
    %676 = vector.shape_cast %675 : vector<1xi32> to vector<1x1x1xi32>
    %677 = vector.extract %676[0, 0, 0] : i32 from vector<1x1x1xi32>
    %678 = vector.broadcast %579 : i32 to vector<8x256xi32>
    %679 = arith.cmpi slt, %17, %678 : vector<8x256xi32>
    %680 = arith.extui %679 : vector<8x256xi1> to vector<8x256xi32>
    %681 = vector.shape_cast %680 : vector<8x256xi32> to vector<1x8x256xi32>
    %cst_186 = arith.constant dense<0> : vector<1xi32>
    %682 = vector.multi_reduction <add>, %681, %cst_186 [1, 2] : vector<1x8x256xi32> to vector<1xi32>
    %683 = vector.shape_cast %682 : vector<1xi32> to vector<1x1x1xi32>
    %684 = vector.extract %683[0, 0, 0] : i32 from vector<1x1x1xi32>
    %685 = arith.cmpi slt, %586, %c102_i32 : i32
    %686 = arith.extui %685 : i1 to i32
    %687 = arith.cmpi slt, %593, %c102_i32 : i32
    %688 = arith.extui %687 : i1 to i32
    %689 = arith.addi %686, %688 : i32
    %690 = arith.cmpi slt, %600, %c102_i32 : i32
    %691 = arith.extui %690 : i1 to i32
    %692 = arith.addi %689, %691 : i32
    %693 = arith.cmpi slt, %607, %c102_i32 : i32
    %694 = arith.extui %693 : i1 to i32
    %695 = arith.addi %692, %694 : i32
    %696 = arith.cmpi slt, %614, %c102_i32 : i32
    %697 = arith.extui %696 : i1 to i32
    %698 = arith.addi %695, %697 : i32
    %699 = arith.cmpi slt, %621, %c102_i32 : i32
    %700 = arith.extui %699 : i1 to i32
    %701 = arith.addi %698, %700 : i32
    %702 = arith.cmpi slt, %628, %c102_i32 : i32
    %703 = arith.extui %702 : i1 to i32
    %704 = arith.addi %701, %703 : i32
    %705 = arith.cmpi slt, %635, %c102_i32 : i32
    %706 = arith.extui %705 : i1 to i32
    %707 = arith.addi %704, %706 : i32
    %708 = arith.cmpi slt, %642, %c102_i32 : i32
    %709 = arith.extui %708 : i1 to i32
    %710 = arith.addi %707, %709 : i32
    %711 = arith.cmpi slt, %649, %c102_i32 : i32
    %712 = arith.extui %711 : i1 to i32
    %713 = arith.addi %710, %712 : i32
    %714 = arith.cmpi slt, %656, %c102_i32 : i32
    %715 = arith.extui %714 : i1 to i32
    %716 = arith.addi %713, %715 : i32
    %717 = arith.cmpi slt, %663, %c102_i32 : i32
    %718 = arith.extui %717 : i1 to i32
    %719 = arith.addi %716, %718 : i32
    %720 = arith.cmpi slt, %670, %c102_i32 : i32
    %721 = arith.extui %720 : i1 to i32
    %722 = arith.addi %719, %721 : i32
    %723 = arith.cmpi slt, %677, %c102_i32 : i32
    %724 = arith.extui %723 : i1 to i32
    %725 = arith.addi %722, %724 : i32
    %726 = arith.cmpi slt, %684, %c102_i32 : i32
    %727 = arith.extui %726 : i1 to i32
    %728 = arith.addi %725, %727 : i32
    %c1_i32_187 = arith.constant 1 : i32
    %729 = arith.addi %728, %c1_i32_187 : i32
    %730 = arith.muli %729, %503 : i32
    %731 = arith.addi %501, %730 : i32
    %732 = arith.muli %729, %504 : i32
    %c4_i32_188 = arith.constant 4 : i32
    %733 = arith.shrsi %732, %c4_i32_188 : i32
    %734 = arith.addi %731, %733 : i32
    %735 = arith.muli %728, %503 : i32
    %736 = arith.addi %501, %735 : i32
    %737 = arith.muli %728, %504 : i32
    %c4_i32_189 = arith.constant 4 : i32
    %738 = arith.shrsi %737, %c4_i32_189 : i32
    %739 = arith.addi %736, %738 : i32
    %c0_i32_190 = arith.constant 0 : i32
    %740 = arith.cmpi sgt, %728, %c0_i32_190 : i32
    %741 = arith.extui %740 : i1 to i32
    %742 = arith.addi %739, %741 : i32
    %743 = arith.minsi %742, %734 : i32
    %c3_i32_191 = arith.constant 3 : i32
    %744 = arith.subi %734, %743 : i32
    %c4_i32_192 = arith.constant 4 : i32
    %745 = arith.shrsi %744, %c4_i32_192 : i32
    %c15_i32_193 = arith.constant 15 : i32
    %746 = arith.andi %744, %c15_i32_193 : i32
    %c1_i32_194 = arith.constant 1 : i32
    %747 = arith.muli %c1_i32_194, %745 : i32
    %748 = arith.addi %743, %747 : i32
    %c1_i32_195 = arith.constant 1 : i32
    %749 = arith.muli %c1_i32_195, %746 : i32
    %c4_i32_196 = arith.constant 4 : i32
    %750 = arith.shrsi %749, %c4_i32_196 : i32
    %751 = arith.addi %748, %750 : i32
    %c2_i32_197 = arith.constant 2 : i32
    %752 = arith.muli %c2_i32_197, %745 : i32
    %753 = arith.addi %743, %752 : i32
    %c2_i32_198 = arith.constant 2 : i32
    %754 = arith.muli %c2_i32_198, %746 : i32
    %c4_i32_199 = arith.constant 4 : i32
    %755 = arith.shrsi %754, %c4_i32_199 : i32
    %756 = arith.addi %753, %755 : i32
    %c3_i32_200 = arith.constant 3 : i32
    %757 = arith.muli %c3_i32_200, %745 : i32
    %758 = arith.addi %743, %757 : i32
    %c3_i32_201 = arith.constant 3 : i32
    %759 = arith.muli %c3_i32_201, %746 : i32
    %c4_i32_202 = arith.constant 4 : i32
    %760 = arith.shrsi %759, %c4_i32_202 : i32
    %761 = arith.addi %758, %760 : i32
    %c4_i32_203 = arith.constant 4 : i32
    %762 = arith.muli %c4_i32_203, %745 : i32
    %763 = arith.addi %743, %762 : i32
    %c4_i32_204 = arith.constant 4 : i32
    %764 = arith.muli %c4_i32_204, %746 : i32
    %c4_i32_205 = arith.constant 4 : i32
    %765 = arith.shrsi %764, %c4_i32_205 : i32
    %766 = arith.addi %763, %765 : i32
    %c5_i32_206 = arith.constant 5 : i32
    %767 = arith.muli %c5_i32_206, %745 : i32
    %768 = arith.addi %743, %767 : i32
    %c5_i32_207 = arith.constant 5 : i32
    %769 = arith.muli %c5_i32_207, %746 : i32
    %c4_i32_208 = arith.constant 4 : i32
    %770 = arith.shrsi %769, %c4_i32_208 : i32
    %771 = arith.addi %768, %770 : i32
    %c6_i32_209 = arith.constant 6 : i32
    %772 = arith.muli %c6_i32_209, %745 : i32
    %773 = arith.addi %743, %772 : i32
    %c6_i32_210 = arith.constant 6 : i32
    %774 = arith.muli %c6_i32_210, %746 : i32
    %c4_i32_211 = arith.constant 4 : i32
    %775 = arith.shrsi %774, %c4_i32_211 : i32
    %776 = arith.addi %773, %775 : i32
    %c7_i32_212 = arith.constant 7 : i32
    %777 = arith.muli %c7_i32_212, %745 : i32
    %778 = arith.addi %743, %777 : i32
    %c7_i32_213 = arith.constant 7 : i32
    %779 = arith.muli %c7_i32_213, %746 : i32
    %c4_i32_214 = arith.constant 4 : i32
    %780 = arith.shrsi %779, %c4_i32_214 : i32
    %781 = arith.addi %778, %780 : i32
    %c8_i32_215 = arith.constant 8 : i32
    %782 = arith.muli %c8_i32_215, %745 : i32
    %783 = arith.addi %743, %782 : i32
    %c8_i32_216 = arith.constant 8 : i32
    %784 = arith.muli %c8_i32_216, %746 : i32
    %c4_i32_217 = arith.constant 4 : i32
    %785 = arith.shrsi %784, %c4_i32_217 : i32
    %786 = arith.addi %783, %785 : i32
    %c9_i32_218 = arith.constant 9 : i32
    %787 = arith.muli %c9_i32_218, %745 : i32
    %788 = arith.addi %743, %787 : i32
    %c9_i32_219 = arith.constant 9 : i32
    %789 = arith.muli %c9_i32_219, %746 : i32
    %c4_i32_220 = arith.constant 4 : i32
    %790 = arith.shrsi %789, %c4_i32_220 : i32
    %791 = arith.addi %788, %790 : i32
    %c10_i32_221 = arith.constant 10 : i32
    %792 = arith.muli %c10_i32_221, %745 : i32
    %793 = arith.addi %743, %792 : i32
    %c10_i32_222 = arith.constant 10 : i32
    %794 = arith.muli %c10_i32_222, %746 : i32
    %c4_i32_223 = arith.constant 4 : i32
    %795 = arith.shrsi %794, %c4_i32_223 : i32
    %796 = arith.addi %793, %795 : i32
    %c11_i32_224 = arith.constant 11 : i32
    %797 = arith.muli %c11_i32_224, %745 : i32
    %798 = arith.addi %743, %797 : i32
    %c11_i32_225 = arith.constant 11 : i32
    %799 = arith.muli %c11_i32_225, %746 : i32
    %c4_i32_226 = arith.constant 4 : i32
    %800 = arith.shrsi %799, %c4_i32_226 : i32
    %801 = arith.addi %798, %800 : i32
    %c12_i32_227 = arith.constant 12 : i32
    %802 = arith.muli %c12_i32_227, %745 : i32
    %803 = arith.addi %743, %802 : i32
    %c12_i32_228 = arith.constant 12 : i32
    %804 = arith.muli %c12_i32_228, %746 : i32
    %c4_i32_229 = arith.constant 4 : i32
    %805 = arith.shrsi %804, %c4_i32_229 : i32
    %806 = arith.addi %803, %805 : i32
    %c13_i32_230 = arith.constant 13 : i32
    %807 = arith.muli %c13_i32_230, %745 : i32
    %808 = arith.addi %743, %807 : i32
    %c13_i32_231 = arith.constant 13 : i32
    %809 = arith.muli %c13_i32_231, %746 : i32
    %c4_i32_232 = arith.constant 4 : i32
    %810 = arith.shrsi %809, %c4_i32_232 : i32
    %811 = arith.addi %808, %810 : i32
    %c14_i32_233 = arith.constant 14 : i32
    %812 = arith.muli %c14_i32_233, %745 : i32
    %813 = arith.addi %743, %812 : i32
    %c14_i32_234 = arith.constant 14 : i32
    %814 = arith.muli %c14_i32_234, %746 : i32
    %c4_i32_235 = arith.constant 4 : i32
    %815 = arith.shrsi %814, %c4_i32_235 : i32
    %816 = arith.addi %813, %815 : i32
    %c15_i32_236 = arith.constant 15 : i32
    %817 = arith.muli %c15_i32_236, %745 : i32
    %818 = arith.addi %743, %817 : i32
    %c15_i32_237 = arith.constant 15 : i32
    %819 = arith.muli %c15_i32_237, %746 : i32
    %c4_i32_238 = arith.constant 4 : i32
    %820 = arith.shrsi %819, %c4_i32_238 : i32
    %821 = arith.addi %818, %820 : i32
    %822 = vector.broadcast %751 : i32 to vector<8x256xi32>
    %823 = arith.cmpi slt, %17, %822 : vector<8x256xi32>
    %824 = arith.extui %823 : vector<8x256xi1> to vector<8x256xi32>
    %825 = vector.shape_cast %824 : vector<8x256xi32> to vector<1x8x256xi32>
    %cst_239 = arith.constant dense<0> : vector<1xi32>
    %826 = vector.multi_reduction <add>, %825, %cst_239 [1, 2] : vector<1x8x256xi32> to vector<1xi32>
    %827 = vector.shape_cast %826 : vector<1xi32> to vector<1x1x1xi32>
    %828 = vector.extract %827[0, 0, 0] : i32 from vector<1x1x1xi32>
    %829 = vector.broadcast %756 : i32 to vector<8x256xi32>
    %830 = arith.cmpi slt, %17, %829 : vector<8x256xi32>
    %831 = arith.extui %830 : vector<8x256xi1> to vector<8x256xi32>
    %832 = vector.shape_cast %831 : vector<8x256xi32> to vector<1x8x256xi32>
    %cst_240 = arith.constant dense<0> : vector<1xi32>
    %833 = vector.multi_reduction <add>, %832, %cst_240 [1, 2] : vector<1x8x256xi32> to vector<1xi32>
    %834 = vector.shape_cast %833 : vector<1xi32> to vector<1x1x1xi32>
    %835 = vector.extract %834[0, 0, 0] : i32 from vector<1x1x1xi32>
    %836 = vector.broadcast %761 : i32 to vector<8x256xi32>
    %837 = arith.cmpi slt, %17, %836 : vector<8x256xi32>
    %838 = arith.extui %837 : vector<8x256xi1> to vector<8x256xi32>
    %839 = vector.shape_cast %838 : vector<8x256xi32> to vector<1x8x256xi32>
    %cst_241 = arith.constant dense<0> : vector<1xi32>
    %840 = vector.multi_reduction <add>, %839, %cst_241 [1, 2] : vector<1x8x256xi32> to vector<1xi32>
    %841 = vector.shape_cast %840 : vector<1xi32> to vector<1x1x1xi32>
    %842 = vector.extract %841[0, 0, 0] : i32 from vector<1x1x1xi32>
    %843 = vector.broadcast %766 : i32 to vector<8x256xi32>
    %844 = arith.cmpi slt, %17, %843 : vector<8x256xi32>
    %845 = arith.extui %844 : vector<8x256xi1> to vector<8x256xi32>
    %846 = vector.shape_cast %845 : vector<8x256xi32> to vector<1x8x256xi32>
    %cst_242 = arith.constant dense<0> : vector<1xi32>
    %847 = vector.multi_reduction <add>, %846, %cst_242 [1, 2] : vector<1x8x256xi32> to vector<1xi32>
    %848 = vector.shape_cast %847 : vector<1xi32> to vector<1x1x1xi32>
    %849 = vector.extract %848[0, 0, 0] : i32 from vector<1x1x1xi32>
    %850 = vector.broadcast %771 : i32 to vector<8x256xi32>
    %851 = arith.cmpi slt, %17, %850 : vector<8x256xi32>
    %852 = arith.extui %851 : vector<8x256xi1> to vector<8x256xi32>
    %853 = vector.shape_cast %852 : vector<8x256xi32> to vector<1x8x256xi32>
    %cst_243 = arith.constant dense<0> : vector<1xi32>
    %854 = vector.multi_reduction <add>, %853, %cst_243 [1, 2] : vector<1x8x256xi32> to vector<1xi32>
    %855 = vector.shape_cast %854 : vector<1xi32> to vector<1x1x1xi32>
    %856 = vector.extract %855[0, 0, 0] : i32 from vector<1x1x1xi32>
    %857 = vector.broadcast %776 : i32 to vector<8x256xi32>
    %858 = arith.cmpi slt, %17, %857 : vector<8x256xi32>
    %859 = arith.extui %858 : vector<8x256xi1> to vector<8x256xi32>
    %860 = vector.shape_cast %859 : vector<8x256xi32> to vector<1x8x256xi32>
    %cst_244 = arith.constant dense<0> : vector<1xi32>
    %861 = vector.multi_reduction <add>, %860, %cst_244 [1, 2] : vector<1x8x256xi32> to vector<1xi32>
    %862 = vector.shape_cast %861 : vector<1xi32> to vector<1x1x1xi32>
    %863 = vector.extract %862[0, 0, 0] : i32 from vector<1x1x1xi32>
    %864 = vector.broadcast %781 : i32 to vector<8x256xi32>
    %865 = arith.cmpi slt, %17, %864 : vector<8x256xi32>
    %866 = arith.extui %865 : vector<8x256xi1> to vector<8x256xi32>
    %867 = vector.shape_cast %866 : vector<8x256xi32> to vector<1x8x256xi32>
    %cst_245 = arith.constant dense<0> : vector<1xi32>
    %868 = vector.multi_reduction <add>, %867, %cst_245 [1, 2] : vector<1x8x256xi32> to vector<1xi32>
    %869 = vector.shape_cast %868 : vector<1xi32> to vector<1x1x1xi32>
    %870 = vector.extract %869[0, 0, 0] : i32 from vector<1x1x1xi32>
    %871 = vector.broadcast %786 : i32 to vector<8x256xi32>
    %872 = arith.cmpi slt, %17, %871 : vector<8x256xi32>
    %873 = arith.extui %872 : vector<8x256xi1> to vector<8x256xi32>
    %874 = vector.shape_cast %873 : vector<8x256xi32> to vector<1x8x256xi32>
    %cst_246 = arith.constant dense<0> : vector<1xi32>
    %875 = vector.multi_reduction <add>, %874, %cst_246 [1, 2] : vector<1x8x256xi32> to vector<1xi32>
    %876 = vector.shape_cast %875 : vector<1xi32> to vector<1x1x1xi32>
    %877 = vector.extract %876[0, 0, 0] : i32 from vector<1x1x1xi32>
    %878 = vector.broadcast %791 : i32 to vector<8x256xi32>
    %879 = arith.cmpi slt, %17, %878 : vector<8x256xi32>
    %880 = arith.extui %879 : vector<8x256xi1> to vector<8x256xi32>
    %881 = vector.shape_cast %880 : vector<8x256xi32> to vector<1x8x256xi32>
    %cst_247 = arith.constant dense<0> : vector<1xi32>
    %882 = vector.multi_reduction <add>, %881, %cst_247 [1, 2] : vector<1x8x256xi32> to vector<1xi32>
    %883 = vector.shape_cast %882 : vector<1xi32> to vector<1x1x1xi32>
    %884 = vector.extract %883[0, 0, 0] : i32 from vector<1x1x1xi32>
    %885 = vector.broadcast %796 : i32 to vector<8x256xi32>
    %886 = arith.cmpi slt, %17, %885 : vector<8x256xi32>
    %887 = arith.extui %886 : vector<8x256xi1> to vector<8x256xi32>
    %888 = vector.shape_cast %887 : vector<8x256xi32> to vector<1x8x256xi32>
    %cst_248 = arith.constant dense<0> : vector<1xi32>
    %889 = vector.multi_reduction <add>, %888, %cst_248 [1, 2] : vector<1x8x256xi32> to vector<1xi32>
    %890 = vector.shape_cast %889 : vector<1xi32> to vector<1x1x1xi32>
    %891 = vector.extract %890[0, 0, 0] : i32 from vector<1x1x1xi32>
    %892 = vector.broadcast %801 : i32 to vector<8x256xi32>
    %893 = arith.cmpi slt, %17, %892 : vector<8x256xi32>
    %894 = arith.extui %893 : vector<8x256xi1> to vector<8x256xi32>
    %895 = vector.shape_cast %894 : vector<8x256xi32> to vector<1x8x256xi32>
    %cst_249 = arith.constant dense<0> : vector<1xi32>
    %896 = vector.multi_reduction <add>, %895, %cst_249 [1, 2] : vector<1x8x256xi32> to vector<1xi32>
    %897 = vector.shape_cast %896 : vector<1xi32> to vector<1x1x1xi32>
    %898 = vector.extract %897[0, 0, 0] : i32 from vector<1x1x1xi32>
    %899 = vector.broadcast %806 : i32 to vector<8x256xi32>
    %900 = arith.cmpi slt, %17, %899 : vector<8x256xi32>
    %901 = arith.extui %900 : vector<8x256xi1> to vector<8x256xi32>
    %902 = vector.shape_cast %901 : vector<8x256xi32> to vector<1x8x256xi32>
    %cst_250 = arith.constant dense<0> : vector<1xi32>
    %903 = vector.multi_reduction <add>, %902, %cst_250 [1, 2] : vector<1x8x256xi32> to vector<1xi32>
    %904 = vector.shape_cast %903 : vector<1xi32> to vector<1x1x1xi32>
    %905 = vector.extract %904[0, 0, 0] : i32 from vector<1x1x1xi32>
    %906 = vector.broadcast %811 : i32 to vector<8x256xi32>
    %907 = arith.cmpi slt, %17, %906 : vector<8x256xi32>
    %908 = arith.extui %907 : vector<8x256xi1> to vector<8x256xi32>
    %909 = vector.shape_cast %908 : vector<8x256xi32> to vector<1x8x256xi32>
    %cst_251 = arith.constant dense<0> : vector<1xi32>
    %910 = vector.multi_reduction <add>, %909, %cst_251 [1, 2] : vector<1x8x256xi32> to vector<1xi32>
    %911 = vector.shape_cast %910 : vector<1xi32> to vector<1x1x1xi32>
    %912 = vector.extract %911[0, 0, 0] : i32 from vector<1x1x1xi32>
    %913 = vector.broadcast %816 : i32 to vector<8x256xi32>
    %914 = arith.cmpi slt, %17, %913 : vector<8x256xi32>
    %915 = arith.extui %914 : vector<8x256xi1> to vector<8x256xi32>
    %916 = vector.shape_cast %915 : vector<8x256xi32> to vector<1x8x256xi32>
    %cst_252 = arith.constant dense<0> : vector<1xi32>
    %917 = vector.multi_reduction <add>, %916, %cst_252 [1, 2] : vector<1x8x256xi32> to vector<1xi32>
    %918 = vector.shape_cast %917 : vector<1xi32> to vector<1x1x1xi32>
    %919 = vector.extract %918[0, 0, 0] : i32 from vector<1x1x1xi32>
    %920 = vector.broadcast %821 : i32 to vector<8x256xi32>
    %921 = arith.cmpi slt, %17, %920 : vector<8x256xi32>
    %922 = arith.extui %921 : vector<8x256xi1> to vector<8x256xi32>
    %923 = vector.shape_cast %922 : vector<8x256xi32> to vector<1x8x256xi32>
    %cst_253 = arith.constant dense<0> : vector<1xi32>
    %924 = vector.multi_reduction <add>, %923, %cst_253 [1, 2] : vector<1x8x256xi32> to vector<1xi32>
    %925 = vector.shape_cast %924 : vector<1xi32> to vector<1x1x1xi32>
    %926 = vector.extract %925[0, 0, 0] : i32 from vector<1x1x1xi32>
    %927 = arith.cmpi slt, %828, %c102_i32 : i32
    %928 = arith.extui %927 : i1 to i32
    %929 = arith.cmpi slt, %835, %c102_i32 : i32
    %930 = arith.extui %929 : i1 to i32
    %931 = arith.addi %928, %930 : i32
    %932 = arith.cmpi slt, %842, %c102_i32 : i32
    %933 = arith.extui %932 : i1 to i32
    %934 = arith.addi %931, %933 : i32
    %935 = arith.cmpi slt, %849, %c102_i32 : i32
    %936 = arith.extui %935 : i1 to i32
    %937 = arith.addi %934, %936 : i32
    %938 = arith.cmpi slt, %856, %c102_i32 : i32
    %939 = arith.extui %938 : i1 to i32
    %940 = arith.addi %937, %939 : i32
    %941 = arith.cmpi slt, %863, %c102_i32 : i32
    %942 = arith.extui %941 : i1 to i32
    %943 = arith.addi %940, %942 : i32
    %944 = arith.cmpi slt, %870, %c102_i32 : i32
    %945 = arith.extui %944 : i1 to i32
    %946 = arith.addi %943, %945 : i32
    %947 = arith.cmpi slt, %877, %c102_i32 : i32
    %948 = arith.extui %947 : i1 to i32
    %949 = arith.addi %946, %948 : i32
    %950 = arith.cmpi slt, %884, %c102_i32 : i32
    %951 = arith.extui %950 : i1 to i32
    %952 = arith.addi %949, %951 : i32
    %953 = arith.cmpi slt, %891, %c102_i32 : i32
    %954 = arith.extui %953 : i1 to i32
    %955 = arith.addi %952, %954 : i32
    %956 = arith.cmpi slt, %898, %c102_i32 : i32
    %957 = arith.extui %956 : i1 to i32
    %958 = arith.addi %955, %957 : i32
    %959 = arith.cmpi slt, %905, %c102_i32 : i32
    %960 = arith.extui %959 : i1 to i32
    %961 = arith.addi %958, %960 : i32
    %962 = arith.cmpi slt, %912, %c102_i32 : i32
    %963 = arith.extui %962 : i1 to i32
    %964 = arith.addi %961, %963 : i32
    %965 = arith.cmpi slt, %919, %c102_i32 : i32
    %966 = arith.extui %965 : i1 to i32
    %967 = arith.addi %964, %966 : i32
    %968 = arith.cmpi slt, %926, %c102_i32 : i32
    %969 = arith.extui %968 : i1 to i32
    %970 = arith.addi %967, %969 : i32
    %c1_i32_254 = arith.constant 1 : i32
    %971 = arith.addi %970, %c1_i32_254 : i32
    %972 = arith.muli %971, %745 : i32
    %973 = arith.addi %743, %972 : i32
    %974 = arith.muli %971, %746 : i32
    %c4_i32_255 = arith.constant 4 : i32
    %975 = arith.shrsi %974, %c4_i32_255 : i32
    %976 = arith.addi %973, %975 : i32
    %977 = arith.muli %970, %745 : i32
    %978 = arith.addi %743, %977 : i32
    %979 = arith.muli %970, %746 : i32
    %c4_i32_256 = arith.constant 4 : i32
    %980 = arith.shrsi %979, %c4_i32_256 : i32
    %981 = arith.addi %978, %980 : i32
    %c0_i32_257 = arith.constant 0 : i32
    %982 = arith.cmpi sgt, %970, %c0_i32_257 : i32
    %983 = arith.extui %982 : i1 to i32
    %984 = arith.addi %981, %983 : i32
    %985 = arith.minsi %984, %976 : i32
    %c4_i32_258 = arith.constant 4 : i32
    %986 = arith.subi %976, %985 : i32
    %c4_i32_259 = arith.constant 4 : i32
    %987 = arith.shrsi %986, %c4_i32_259 : i32
    %c15_i32_260 = arith.constant 15 : i32
    %988 = arith.andi %986, %c15_i32_260 : i32
    %c1_i32_261 = arith.constant 1 : i32
    %989 = arith.muli %c1_i32_261, %987 : i32
    %990 = arith.addi %985, %989 : i32
    %c1_i32_262 = arith.constant 1 : i32
    %991 = arith.muli %c1_i32_262, %988 : i32
    %c4_i32_263 = arith.constant 4 : i32
    %992 = arith.shrsi %991, %c4_i32_263 : i32
    %993 = arith.addi %990, %992 : i32
    %c2_i32_264 = arith.constant 2 : i32
    %994 = arith.muli %c2_i32_264, %987 : i32
    %995 = arith.addi %985, %994 : i32
    %c2_i32_265 = arith.constant 2 : i32
    %996 = arith.muli %c2_i32_265, %988 : i32
    %c4_i32_266 = arith.constant 4 : i32
    %997 = arith.shrsi %996, %c4_i32_266 : i32
    %998 = arith.addi %995, %997 : i32
    %c3_i32_267 = arith.constant 3 : i32
    %999 = arith.muli %c3_i32_267, %987 : i32
    %1000 = arith.addi %985, %999 : i32
    %c3_i32_268 = arith.constant 3 : i32
    %1001 = arith.muli %c3_i32_268, %988 : i32
    %c4_i32_269 = arith.constant 4 : i32
    %1002 = arith.shrsi %1001, %c4_i32_269 : i32
    %1003 = arith.addi %1000, %1002 : i32
    %c4_i32_270 = arith.constant 4 : i32
    %1004 = arith.muli %c4_i32_270, %987 : i32
    %1005 = arith.addi %985, %1004 : i32
    %c4_i32_271 = arith.constant 4 : i32
    %1006 = arith.muli %c4_i32_271, %988 : i32
    %c4_i32_272 = arith.constant 4 : i32
    %1007 = arith.shrsi %1006, %c4_i32_272 : i32
    %1008 = arith.addi %1005, %1007 : i32
    %c5_i32_273 = arith.constant 5 : i32
    %1009 = arith.muli %c5_i32_273, %987 : i32
    %1010 = arith.addi %985, %1009 : i32
    %c5_i32_274 = arith.constant 5 : i32
    %1011 = arith.muli %c5_i32_274, %988 : i32
    %c4_i32_275 = arith.constant 4 : i32
    %1012 = arith.shrsi %1011, %c4_i32_275 : i32
    %1013 = arith.addi %1010, %1012 : i32
    %c6_i32_276 = arith.constant 6 : i32
    %1014 = arith.muli %c6_i32_276, %987 : i32
    %1015 = arith.addi %985, %1014 : i32
    %c6_i32_277 = arith.constant 6 : i32
    %1016 = arith.muli %c6_i32_277, %988 : i32
    %c4_i32_278 = arith.constant 4 : i32
    %1017 = arith.shrsi %1016, %c4_i32_278 : i32
    %1018 = arith.addi %1015, %1017 : i32
    %c7_i32_279 = arith.constant 7 : i32
    %1019 = arith.muli %c7_i32_279, %987 : i32
    %1020 = arith.addi %985, %1019 : i32
    %c7_i32_280 = arith.constant 7 : i32
    %1021 = arith.muli %c7_i32_280, %988 : i32
    %c4_i32_281 = arith.constant 4 : i32
    %1022 = arith.shrsi %1021, %c4_i32_281 : i32
    %1023 = arith.addi %1020, %1022 : i32
    %c8_i32_282 = arith.constant 8 : i32
    %1024 = arith.muli %c8_i32_282, %987 : i32
    %1025 = arith.addi %985, %1024 : i32
    %c8_i32_283 = arith.constant 8 : i32
    %1026 = arith.muli %c8_i32_283, %988 : i32
    %c4_i32_284 = arith.constant 4 : i32
    %1027 = arith.shrsi %1026, %c4_i32_284 : i32
    %1028 = arith.addi %1025, %1027 : i32
    %c9_i32_285 = arith.constant 9 : i32
    %1029 = arith.muli %c9_i32_285, %987 : i32
    %1030 = arith.addi %985, %1029 : i32
    %c9_i32_286 = arith.constant 9 : i32
    %1031 = arith.muli %c9_i32_286, %988 : i32
    %c4_i32_287 = arith.constant 4 : i32
    %1032 = arith.shrsi %1031, %c4_i32_287 : i32
    %1033 = arith.addi %1030, %1032 : i32
    %c10_i32_288 = arith.constant 10 : i32
    %1034 = arith.muli %c10_i32_288, %987 : i32
    %1035 = arith.addi %985, %1034 : i32
    %c10_i32_289 = arith.constant 10 : i32
    %1036 = arith.muli %c10_i32_289, %988 : i32
    %c4_i32_290 = arith.constant 4 : i32
    %1037 = arith.shrsi %1036, %c4_i32_290 : i32
    %1038 = arith.addi %1035, %1037 : i32
    %c11_i32_291 = arith.constant 11 : i32
    %1039 = arith.muli %c11_i32_291, %987 : i32
    %1040 = arith.addi %985, %1039 : i32
    %c11_i32_292 = arith.constant 11 : i32
    %1041 = arith.muli %c11_i32_292, %988 : i32
    %c4_i32_293 = arith.constant 4 : i32
    %1042 = arith.shrsi %1041, %c4_i32_293 : i32
    %1043 = arith.addi %1040, %1042 : i32
    %c12_i32_294 = arith.constant 12 : i32
    %1044 = arith.muli %c12_i32_294, %987 : i32
    %1045 = arith.addi %985, %1044 : i32
    %c12_i32_295 = arith.constant 12 : i32
    %1046 = arith.muli %c12_i32_295, %988 : i32
    %c4_i32_296 = arith.constant 4 : i32
    %1047 = arith.shrsi %1046, %c4_i32_296 : i32
    %1048 = arith.addi %1045, %1047 : i32
    %c13_i32_297 = arith.constant 13 : i32
    %1049 = arith.muli %c13_i32_297, %987 : i32
    %1050 = arith.addi %985, %1049 : i32
    %c13_i32_298 = arith.constant 13 : i32
    %1051 = arith.muli %c13_i32_298, %988 : i32
    %c4_i32_299 = arith.constant 4 : i32
    %1052 = arith.shrsi %1051, %c4_i32_299 : i32
    %1053 = arith.addi %1050, %1052 : i32
    %c14_i32_300 = arith.constant 14 : i32
    %1054 = arith.muli %c14_i32_300, %987 : i32
    %1055 = arith.addi %985, %1054 : i32
    %c14_i32_301 = arith.constant 14 : i32
    %1056 = arith.muli %c14_i32_301, %988 : i32
    %c4_i32_302 = arith.constant 4 : i32
    %1057 = arith.shrsi %1056, %c4_i32_302 : i32
    %1058 = arith.addi %1055, %1057 : i32
    %c15_i32_303 = arith.constant 15 : i32
    %1059 = arith.muli %c15_i32_303, %987 : i32
    %1060 = arith.addi %985, %1059 : i32
    %c15_i32_304 = arith.constant 15 : i32
    %1061 = arith.muli %c15_i32_304, %988 : i32
    %c4_i32_305 = arith.constant 4 : i32
    %1062 = arith.shrsi %1061, %c4_i32_305 : i32
    %1063 = arith.addi %1060, %1062 : i32
    %1064 = vector.broadcast %993 : i32 to vector<8x256xi32>
    %1065 = arith.cmpi slt, %17, %1064 : vector<8x256xi32>
    %1066 = arith.extui %1065 : vector<8x256xi1> to vector<8x256xi32>
    %1067 = vector.shape_cast %1066 : vector<8x256xi32> to vector<1x8x256xi32>
    %cst_306 = arith.constant dense<0> : vector<1xi32>
    %1068 = vector.multi_reduction <add>, %1067, %cst_306 [1, 2] : vector<1x8x256xi32> to vector<1xi32>
    %1069 = vector.shape_cast %1068 : vector<1xi32> to vector<1x1x1xi32>
    %1070 = vector.extract %1069[0, 0, 0] : i32 from vector<1x1x1xi32>
    %1071 = vector.broadcast %998 : i32 to vector<8x256xi32>
    %1072 = arith.cmpi slt, %17, %1071 : vector<8x256xi32>
    %1073 = arith.extui %1072 : vector<8x256xi1> to vector<8x256xi32>
    %1074 = vector.shape_cast %1073 : vector<8x256xi32> to vector<1x8x256xi32>
    %cst_307 = arith.constant dense<0> : vector<1xi32>
    %1075 = vector.multi_reduction <add>, %1074, %cst_307 [1, 2] : vector<1x8x256xi32> to vector<1xi32>
    %1076 = vector.shape_cast %1075 : vector<1xi32> to vector<1x1x1xi32>
    %1077 = vector.extract %1076[0, 0, 0] : i32 from vector<1x1x1xi32>
    %1078 = vector.broadcast %1003 : i32 to vector<8x256xi32>
    %1079 = arith.cmpi slt, %17, %1078 : vector<8x256xi32>
    %1080 = arith.extui %1079 : vector<8x256xi1> to vector<8x256xi32>
    %1081 = vector.shape_cast %1080 : vector<8x256xi32> to vector<1x8x256xi32>
    %cst_308 = arith.constant dense<0> : vector<1xi32>
    %1082 = vector.multi_reduction <add>, %1081, %cst_308 [1, 2] : vector<1x8x256xi32> to vector<1xi32>
    %1083 = vector.shape_cast %1082 : vector<1xi32> to vector<1x1x1xi32>
    %1084 = vector.extract %1083[0, 0, 0] : i32 from vector<1x1x1xi32>
    %1085 = vector.broadcast %1008 : i32 to vector<8x256xi32>
    %1086 = arith.cmpi slt, %17, %1085 : vector<8x256xi32>
    %1087 = arith.extui %1086 : vector<8x256xi1> to vector<8x256xi32>
    %1088 = vector.shape_cast %1087 : vector<8x256xi32> to vector<1x8x256xi32>
    %cst_309 = arith.constant dense<0> : vector<1xi32>
    %1089 = vector.multi_reduction <add>, %1088, %cst_309 [1, 2] : vector<1x8x256xi32> to vector<1xi32>
    %1090 = vector.shape_cast %1089 : vector<1xi32> to vector<1x1x1xi32>
    %1091 = vector.extract %1090[0, 0, 0] : i32 from vector<1x1x1xi32>
    %1092 = vector.broadcast %1013 : i32 to vector<8x256xi32>
    %1093 = arith.cmpi slt, %17, %1092 : vector<8x256xi32>
    %1094 = arith.extui %1093 : vector<8x256xi1> to vector<8x256xi32>
    %1095 = vector.shape_cast %1094 : vector<8x256xi32> to vector<1x8x256xi32>
    %cst_310 = arith.constant dense<0> : vector<1xi32>
    %1096 = vector.multi_reduction <add>, %1095, %cst_310 [1, 2] : vector<1x8x256xi32> to vector<1xi32>
    %1097 = vector.shape_cast %1096 : vector<1xi32> to vector<1x1x1xi32>
    %1098 = vector.extract %1097[0, 0, 0] : i32 from vector<1x1x1xi32>
    %1099 = vector.broadcast %1018 : i32 to vector<8x256xi32>
    %1100 = arith.cmpi slt, %17, %1099 : vector<8x256xi32>
    %1101 = arith.extui %1100 : vector<8x256xi1> to vector<8x256xi32>
    %1102 = vector.shape_cast %1101 : vector<8x256xi32> to vector<1x8x256xi32>
    %cst_311 = arith.constant dense<0> : vector<1xi32>
    %1103 = vector.multi_reduction <add>, %1102, %cst_311 [1, 2] : vector<1x8x256xi32> to vector<1xi32>
    %1104 = vector.shape_cast %1103 : vector<1xi32> to vector<1x1x1xi32>
    %1105 = vector.extract %1104[0, 0, 0] : i32 from vector<1x1x1xi32>
    %1106 = vector.broadcast %1023 : i32 to vector<8x256xi32>
    %1107 = arith.cmpi slt, %17, %1106 : vector<8x256xi32>
    %1108 = arith.extui %1107 : vector<8x256xi1> to vector<8x256xi32>
    %1109 = vector.shape_cast %1108 : vector<8x256xi32> to vector<1x8x256xi32>
    %cst_312 = arith.constant dense<0> : vector<1xi32>
    %1110 = vector.multi_reduction <add>, %1109, %cst_312 [1, 2] : vector<1x8x256xi32> to vector<1xi32>
    %1111 = vector.shape_cast %1110 : vector<1xi32> to vector<1x1x1xi32>
    %1112 = vector.extract %1111[0, 0, 0] : i32 from vector<1x1x1xi32>
    %1113 = vector.broadcast %1028 : i32 to vector<8x256xi32>
    %1114 = arith.cmpi slt, %17, %1113 : vector<8x256xi32>
    %1115 = arith.extui %1114 : vector<8x256xi1> to vector<8x256xi32>
    %1116 = vector.shape_cast %1115 : vector<8x256xi32> to vector<1x8x256xi32>
    %cst_313 = arith.constant dense<0> : vector<1xi32>
    %1117 = vector.multi_reduction <add>, %1116, %cst_313 [1, 2] : vector<1x8x256xi32> to vector<1xi32>
    %1118 = vector.shape_cast %1117 : vector<1xi32> to vector<1x1x1xi32>
    %1119 = vector.extract %1118[0, 0, 0] : i32 from vector<1x1x1xi32>
    %1120 = vector.broadcast %1033 : i32 to vector<8x256xi32>
    %1121 = arith.cmpi slt, %17, %1120 : vector<8x256xi32>
    %1122 = arith.extui %1121 : vector<8x256xi1> to vector<8x256xi32>
    %1123 = vector.shape_cast %1122 : vector<8x256xi32> to vector<1x8x256xi32>
    %cst_314 = arith.constant dense<0> : vector<1xi32>
    %1124 = vector.multi_reduction <add>, %1123, %cst_314 [1, 2] : vector<1x8x256xi32> to vector<1xi32>
    %1125 = vector.shape_cast %1124 : vector<1xi32> to vector<1x1x1xi32>
    %1126 = vector.extract %1125[0, 0, 0] : i32 from vector<1x1x1xi32>
    %1127 = vector.broadcast %1038 : i32 to vector<8x256xi32>
    %1128 = arith.cmpi slt, %17, %1127 : vector<8x256xi32>
    %1129 = arith.extui %1128 : vector<8x256xi1> to vector<8x256xi32>
    %1130 = vector.shape_cast %1129 : vector<8x256xi32> to vector<1x8x256xi32>
    %cst_315 = arith.constant dense<0> : vector<1xi32>
    %1131 = vector.multi_reduction <add>, %1130, %cst_315 [1, 2] : vector<1x8x256xi32> to vector<1xi32>
    %1132 = vector.shape_cast %1131 : vector<1xi32> to vector<1x1x1xi32>
    %1133 = vector.extract %1132[0, 0, 0] : i32 from vector<1x1x1xi32>
    %1134 = vector.broadcast %1043 : i32 to vector<8x256xi32>
    %1135 = arith.cmpi slt, %17, %1134 : vector<8x256xi32>
    %1136 = arith.extui %1135 : vector<8x256xi1> to vector<8x256xi32>
    %1137 = vector.shape_cast %1136 : vector<8x256xi32> to vector<1x8x256xi32>
    %cst_316 = arith.constant dense<0> : vector<1xi32>
    %1138 = vector.multi_reduction <add>, %1137, %cst_316 [1, 2] : vector<1x8x256xi32> to vector<1xi32>
    %1139 = vector.shape_cast %1138 : vector<1xi32> to vector<1x1x1xi32>
    %1140 = vector.extract %1139[0, 0, 0] : i32 from vector<1x1x1xi32>
    %1141 = vector.broadcast %1048 : i32 to vector<8x256xi32>
    %1142 = arith.cmpi slt, %17, %1141 : vector<8x256xi32>
    %1143 = arith.extui %1142 : vector<8x256xi1> to vector<8x256xi32>
    %1144 = vector.shape_cast %1143 : vector<8x256xi32> to vector<1x8x256xi32>
    %cst_317 = arith.constant dense<0> : vector<1xi32>
    %1145 = vector.multi_reduction <add>, %1144, %cst_317 [1, 2] : vector<1x8x256xi32> to vector<1xi32>
    %1146 = vector.shape_cast %1145 : vector<1xi32> to vector<1x1x1xi32>
    %1147 = vector.extract %1146[0, 0, 0] : i32 from vector<1x1x1xi32>
    %1148 = vector.broadcast %1053 : i32 to vector<8x256xi32>
    %1149 = arith.cmpi slt, %17, %1148 : vector<8x256xi32>
    %1150 = arith.extui %1149 : vector<8x256xi1> to vector<8x256xi32>
    %1151 = vector.shape_cast %1150 : vector<8x256xi32> to vector<1x8x256xi32>
    %cst_318 = arith.constant dense<0> : vector<1xi32>
    %1152 = vector.multi_reduction <add>, %1151, %cst_318 [1, 2] : vector<1x8x256xi32> to vector<1xi32>
    %1153 = vector.shape_cast %1152 : vector<1xi32> to vector<1x1x1xi32>
    %1154 = vector.extract %1153[0, 0, 0] : i32 from vector<1x1x1xi32>
    %1155 = vector.broadcast %1058 : i32 to vector<8x256xi32>
    %1156 = arith.cmpi slt, %17, %1155 : vector<8x256xi32>
    %1157 = arith.extui %1156 : vector<8x256xi1> to vector<8x256xi32>
    %1158 = vector.shape_cast %1157 : vector<8x256xi32> to vector<1x8x256xi32>
    %cst_319 = arith.constant dense<0> : vector<1xi32>
    %1159 = vector.multi_reduction <add>, %1158, %cst_319 [1, 2] : vector<1x8x256xi32> to vector<1xi32>
    %1160 = vector.shape_cast %1159 : vector<1xi32> to vector<1x1x1xi32>
    %1161 = vector.extract %1160[0, 0, 0] : i32 from vector<1x1x1xi32>
    %1162 = vector.broadcast %1063 : i32 to vector<8x256xi32>
    %1163 = arith.cmpi slt, %17, %1162 : vector<8x256xi32>
    %1164 = arith.extui %1163 : vector<8x256xi1> to vector<8x256xi32>
    %1165 = vector.shape_cast %1164 : vector<8x256xi32> to vector<1x8x256xi32>
    %cst_320 = arith.constant dense<0> : vector<1xi32>
    %1166 = vector.multi_reduction <add>, %1165, %cst_320 [1, 2] : vector<1x8x256xi32> to vector<1xi32>
    %1167 = vector.shape_cast %1166 : vector<1xi32> to vector<1x1x1xi32>
    %1168 = vector.extract %1167[0, 0, 0] : i32 from vector<1x1x1xi32>
    %1169 = arith.cmpi slt, %1070, %c102_i32 : i32
    %1170 = arith.extui %1169 : i1 to i32
    %1171 = arith.cmpi slt, %1077, %c102_i32 : i32
    %1172 = arith.extui %1171 : i1 to i32
    %1173 = arith.addi %1170, %1172 : i32
    %1174 = arith.cmpi slt, %1084, %c102_i32 : i32
    %1175 = arith.extui %1174 : i1 to i32
    %1176 = arith.addi %1173, %1175 : i32
    %1177 = arith.cmpi slt, %1091, %c102_i32 : i32
    %1178 = arith.extui %1177 : i1 to i32
    %1179 = arith.addi %1176, %1178 : i32
    %1180 = arith.cmpi slt, %1098, %c102_i32 : i32
    %1181 = arith.extui %1180 : i1 to i32
    %1182 = arith.addi %1179, %1181 : i32
    %1183 = arith.cmpi slt, %1105, %c102_i32 : i32
    %1184 = arith.extui %1183 : i1 to i32
    %1185 = arith.addi %1182, %1184 : i32
    %1186 = arith.cmpi slt, %1112, %c102_i32 : i32
    %1187 = arith.extui %1186 : i1 to i32
    %1188 = arith.addi %1185, %1187 : i32
    %1189 = arith.cmpi slt, %1119, %c102_i32 : i32
    %1190 = arith.extui %1189 : i1 to i32
    %1191 = arith.addi %1188, %1190 : i32
    %1192 = arith.cmpi slt, %1126, %c102_i32 : i32
    %1193 = arith.extui %1192 : i1 to i32
    %1194 = arith.addi %1191, %1193 : i32
    %1195 = arith.cmpi slt, %1133, %c102_i32 : i32
    %1196 = arith.extui %1195 : i1 to i32
    %1197 = arith.addi %1194, %1196 : i32
    %1198 = arith.cmpi slt, %1140, %c102_i32 : i32
    %1199 = arith.extui %1198 : i1 to i32
    %1200 = arith.addi %1197, %1199 : i32
    %1201 = arith.cmpi slt, %1147, %c102_i32 : i32
    %1202 = arith.extui %1201 : i1 to i32
    %1203 = arith.addi %1200, %1202 : i32
    %1204 = arith.cmpi slt, %1154, %c102_i32 : i32
    %1205 = arith.extui %1204 : i1 to i32
    %1206 = arith.addi %1203, %1205 : i32
    %1207 = arith.cmpi slt, %1161, %c102_i32 : i32
    %1208 = arith.extui %1207 : i1 to i32
    %1209 = arith.addi %1206, %1208 : i32
    %1210 = arith.cmpi slt, %1168, %c102_i32 : i32
    %1211 = arith.extui %1210 : i1 to i32
    %1212 = arith.addi %1209, %1211 : i32
    %c1_i32_321 = arith.constant 1 : i32
    %1213 = arith.addi %1212, %c1_i32_321 : i32
    %1214 = arith.muli %1213, %987 : i32
    %1215 = arith.addi %985, %1214 : i32
    %1216 = arith.muli %1213, %988 : i32
    %c4_i32_322 = arith.constant 4 : i32
    %1217 = arith.shrsi %1216, %c4_i32_322 : i32
    %1218 = arith.addi %1215, %1217 : i32
    %1219 = arith.muli %1212, %987 : i32
    %1220 = arith.addi %985, %1219 : i32
    %1221 = arith.muli %1212, %988 : i32
    %c4_i32_323 = arith.constant 4 : i32
    %1222 = arith.shrsi %1221, %c4_i32_323 : i32
    %1223 = arith.addi %1220, %1222 : i32
    %c0_i32_324 = arith.constant 0 : i32
    %1224 = arith.cmpi sgt, %1212, %c0_i32_324 : i32
    %1225 = arith.extui %1224 : i1 to i32
    %1226 = arith.addi %1223, %1225 : i32
    %1227 = arith.minsi %1226, %1218 : i32
    %c5_i32_325 = arith.constant 5 : i32
    %1228 = arith.subi %1218, %1227 : i32
    %c4_i32_326 = arith.constant 4 : i32
    %1229 = arith.shrsi %1228, %c4_i32_326 : i32
    %c15_i32_327 = arith.constant 15 : i32
    %1230 = arith.andi %1228, %c15_i32_327 : i32
    %c1_i32_328 = arith.constant 1 : i32
    %1231 = arith.muli %c1_i32_328, %1229 : i32
    %1232 = arith.addi %1227, %1231 : i32
    %c1_i32_329 = arith.constant 1 : i32
    %1233 = arith.muli %c1_i32_329, %1230 : i32
    %c4_i32_330 = arith.constant 4 : i32
    %1234 = arith.shrsi %1233, %c4_i32_330 : i32
    %1235 = arith.addi %1232, %1234 : i32
    %c2_i32_331 = arith.constant 2 : i32
    %1236 = arith.muli %c2_i32_331, %1229 : i32
    %1237 = arith.addi %1227, %1236 : i32
    %c2_i32_332 = arith.constant 2 : i32
    %1238 = arith.muli %c2_i32_332, %1230 : i32
    %c4_i32_333 = arith.constant 4 : i32
    %1239 = arith.shrsi %1238, %c4_i32_333 : i32
    %1240 = arith.addi %1237, %1239 : i32
    %c3_i32_334 = arith.constant 3 : i32
    %1241 = arith.muli %c3_i32_334, %1229 : i32
    %1242 = arith.addi %1227, %1241 : i32
    %c3_i32_335 = arith.constant 3 : i32
    %1243 = arith.muli %c3_i32_335, %1230 : i32
    %c4_i32_336 = arith.constant 4 : i32
    %1244 = arith.shrsi %1243, %c4_i32_336 : i32
    %1245 = arith.addi %1242, %1244 : i32
    %c4_i32_337 = arith.constant 4 : i32
    %1246 = arith.muli %c4_i32_337, %1229 : i32
    %1247 = arith.addi %1227, %1246 : i32
    %c4_i32_338 = arith.constant 4 : i32
    %1248 = arith.muli %c4_i32_338, %1230 : i32
    %c4_i32_339 = arith.constant 4 : i32
    %1249 = arith.shrsi %1248, %c4_i32_339 : i32
    %1250 = arith.addi %1247, %1249 : i32
    %c5_i32_340 = arith.constant 5 : i32
    %1251 = arith.muli %c5_i32_340, %1229 : i32
    %1252 = arith.addi %1227, %1251 : i32
    %c5_i32_341 = arith.constant 5 : i32
    %1253 = arith.muli %c5_i32_341, %1230 : i32
    %c4_i32_342 = arith.constant 4 : i32
    %1254 = arith.shrsi %1253, %c4_i32_342 : i32
    %1255 = arith.addi %1252, %1254 : i32
    %c6_i32_343 = arith.constant 6 : i32
    %1256 = arith.muli %c6_i32_343, %1229 : i32
    %1257 = arith.addi %1227, %1256 : i32
    %c6_i32_344 = arith.constant 6 : i32
    %1258 = arith.muli %c6_i32_344, %1230 : i32
    %c4_i32_345 = arith.constant 4 : i32
    %1259 = arith.shrsi %1258, %c4_i32_345 : i32
    %1260 = arith.addi %1257, %1259 : i32
    %c7_i32_346 = arith.constant 7 : i32
    %1261 = arith.muli %c7_i32_346, %1229 : i32
    %1262 = arith.addi %1227, %1261 : i32
    %c7_i32_347 = arith.constant 7 : i32
    %1263 = arith.muli %c7_i32_347, %1230 : i32
    %c4_i32_348 = arith.constant 4 : i32
    %1264 = arith.shrsi %1263, %c4_i32_348 : i32
    %1265 = arith.addi %1262, %1264 : i32
    %c8_i32_349 = arith.constant 8 : i32
    %1266 = arith.muli %c8_i32_349, %1229 : i32
    %1267 = arith.addi %1227, %1266 : i32
    %c8_i32_350 = arith.constant 8 : i32
    %1268 = arith.muli %c8_i32_350, %1230 : i32
    %c4_i32_351 = arith.constant 4 : i32
    %1269 = arith.shrsi %1268, %c4_i32_351 : i32
    %1270 = arith.addi %1267, %1269 : i32
    %c9_i32_352 = arith.constant 9 : i32
    %1271 = arith.muli %c9_i32_352, %1229 : i32
    %1272 = arith.addi %1227, %1271 : i32
    %c9_i32_353 = arith.constant 9 : i32
    %1273 = arith.muli %c9_i32_353, %1230 : i32
    %c4_i32_354 = arith.constant 4 : i32
    %1274 = arith.shrsi %1273, %c4_i32_354 : i32
    %1275 = arith.addi %1272, %1274 : i32
    %c10_i32_355 = arith.constant 10 : i32
    %1276 = arith.muli %c10_i32_355, %1229 : i32
    %1277 = arith.addi %1227, %1276 : i32
    %c10_i32_356 = arith.constant 10 : i32
    %1278 = arith.muli %c10_i32_356, %1230 : i32
    %c4_i32_357 = arith.constant 4 : i32
    %1279 = arith.shrsi %1278, %c4_i32_357 : i32
    %1280 = arith.addi %1277, %1279 : i32
    %c11_i32_358 = arith.constant 11 : i32
    %1281 = arith.muli %c11_i32_358, %1229 : i32
    %1282 = arith.addi %1227, %1281 : i32
    %c11_i32_359 = arith.constant 11 : i32
    %1283 = arith.muli %c11_i32_359, %1230 : i32
    %c4_i32_360 = arith.constant 4 : i32
    %1284 = arith.shrsi %1283, %c4_i32_360 : i32
    %1285 = arith.addi %1282, %1284 : i32
    %c12_i32_361 = arith.constant 12 : i32
    %1286 = arith.muli %c12_i32_361, %1229 : i32
    %1287 = arith.addi %1227, %1286 : i32
    %c12_i32_362 = arith.constant 12 : i32
    %1288 = arith.muli %c12_i32_362, %1230 : i32
    %c4_i32_363 = arith.constant 4 : i32
    %1289 = arith.shrsi %1288, %c4_i32_363 : i32
    %1290 = arith.addi %1287, %1289 : i32
    %c13_i32_364 = arith.constant 13 : i32
    %1291 = arith.muli %c13_i32_364, %1229 : i32
    %1292 = arith.addi %1227, %1291 : i32
    %c13_i32_365 = arith.constant 13 : i32
    %1293 = arith.muli %c13_i32_365, %1230 : i32
    %c4_i32_366 = arith.constant 4 : i32
    %1294 = arith.shrsi %1293, %c4_i32_366 : i32
    %1295 = arith.addi %1292, %1294 : i32
    %c14_i32_367 = arith.constant 14 : i32
    %1296 = arith.muli %c14_i32_367, %1229 : i32
    %1297 = arith.addi %1227, %1296 : i32
    %c14_i32_368 = arith.constant 14 : i32
    %1298 = arith.muli %c14_i32_368, %1230 : i32
    %c4_i32_369 = arith.constant 4 : i32
    %1299 = arith.shrsi %1298, %c4_i32_369 : i32
    %1300 = arith.addi %1297, %1299 : i32
    %c15_i32_370 = arith.constant 15 : i32
    %1301 = arith.muli %c15_i32_370, %1229 : i32
    %1302 = arith.addi %1227, %1301 : i32
    %c15_i32_371 = arith.constant 15 : i32
    %1303 = arith.muli %c15_i32_371, %1230 : i32
    %c4_i32_372 = arith.constant 4 : i32
    %1304 = arith.shrsi %1303, %c4_i32_372 : i32
    %1305 = arith.addi %1302, %1304 : i32
    %1306 = vector.broadcast %1235 : i32 to vector<8x256xi32>
    %1307 = arith.cmpi slt, %17, %1306 : vector<8x256xi32>
    %1308 = arith.extui %1307 : vector<8x256xi1> to vector<8x256xi32>
    %1309 = vector.shape_cast %1308 : vector<8x256xi32> to vector<1x8x256xi32>
    %cst_373 = arith.constant dense<0> : vector<1xi32>
    %1310 = vector.multi_reduction <add>, %1309, %cst_373 [1, 2] : vector<1x8x256xi32> to vector<1xi32>
    %1311 = vector.shape_cast %1310 : vector<1xi32> to vector<1x1x1xi32>
    %1312 = vector.extract %1311[0, 0, 0] : i32 from vector<1x1x1xi32>
    %1313 = vector.broadcast %1240 : i32 to vector<8x256xi32>
    %1314 = arith.cmpi slt, %17, %1313 : vector<8x256xi32>
    %1315 = arith.extui %1314 : vector<8x256xi1> to vector<8x256xi32>
    %1316 = vector.shape_cast %1315 : vector<8x256xi32> to vector<1x8x256xi32>
    %cst_374 = arith.constant dense<0> : vector<1xi32>
    %1317 = vector.multi_reduction <add>, %1316, %cst_374 [1, 2] : vector<1x8x256xi32> to vector<1xi32>
    %1318 = vector.shape_cast %1317 : vector<1xi32> to vector<1x1x1xi32>
    %1319 = vector.extract %1318[0, 0, 0] : i32 from vector<1x1x1xi32>
    %1320 = vector.broadcast %1245 : i32 to vector<8x256xi32>
    %1321 = arith.cmpi slt, %17, %1320 : vector<8x256xi32>
    %1322 = arith.extui %1321 : vector<8x256xi1> to vector<8x256xi32>
    %1323 = vector.shape_cast %1322 : vector<8x256xi32> to vector<1x8x256xi32>
    %cst_375 = arith.constant dense<0> : vector<1xi32>
    %1324 = vector.multi_reduction <add>, %1323, %cst_375 [1, 2] : vector<1x8x256xi32> to vector<1xi32>
    %1325 = vector.shape_cast %1324 : vector<1xi32> to vector<1x1x1xi32>
    %1326 = vector.extract %1325[0, 0, 0] : i32 from vector<1x1x1xi32>
    %1327 = vector.broadcast %1250 : i32 to vector<8x256xi32>
    %1328 = arith.cmpi slt, %17, %1327 : vector<8x256xi32>
    %1329 = arith.extui %1328 : vector<8x256xi1> to vector<8x256xi32>
    %1330 = vector.shape_cast %1329 : vector<8x256xi32> to vector<1x8x256xi32>
    %cst_376 = arith.constant dense<0> : vector<1xi32>
    %1331 = vector.multi_reduction <add>, %1330, %cst_376 [1, 2] : vector<1x8x256xi32> to vector<1xi32>
    %1332 = vector.shape_cast %1331 : vector<1xi32> to vector<1x1x1xi32>
    %1333 = vector.extract %1332[0, 0, 0] : i32 from vector<1x1x1xi32>
    %1334 = vector.broadcast %1255 : i32 to vector<8x256xi32>
    %1335 = arith.cmpi slt, %17, %1334 : vector<8x256xi32>
    %1336 = arith.extui %1335 : vector<8x256xi1> to vector<8x256xi32>
    %1337 = vector.shape_cast %1336 : vector<8x256xi32> to vector<1x8x256xi32>
    %cst_377 = arith.constant dense<0> : vector<1xi32>
    %1338 = vector.multi_reduction <add>, %1337, %cst_377 [1, 2] : vector<1x8x256xi32> to vector<1xi32>
    %1339 = vector.shape_cast %1338 : vector<1xi32> to vector<1x1x1xi32>
    %1340 = vector.extract %1339[0, 0, 0] : i32 from vector<1x1x1xi32>
    %1341 = vector.broadcast %1260 : i32 to vector<8x256xi32>
    %1342 = arith.cmpi slt, %17, %1341 : vector<8x256xi32>
    %1343 = arith.extui %1342 : vector<8x256xi1> to vector<8x256xi32>
    %1344 = vector.shape_cast %1343 : vector<8x256xi32> to vector<1x8x256xi32>
    %cst_378 = arith.constant dense<0> : vector<1xi32>
    %1345 = vector.multi_reduction <add>, %1344, %cst_378 [1, 2] : vector<1x8x256xi32> to vector<1xi32>
    %1346 = vector.shape_cast %1345 : vector<1xi32> to vector<1x1x1xi32>
    %1347 = vector.extract %1346[0, 0, 0] : i32 from vector<1x1x1xi32>
    %1348 = vector.broadcast %1265 : i32 to vector<8x256xi32>
    %1349 = arith.cmpi slt, %17, %1348 : vector<8x256xi32>
    %1350 = arith.extui %1349 : vector<8x256xi1> to vector<8x256xi32>
    %1351 = vector.shape_cast %1350 : vector<8x256xi32> to vector<1x8x256xi32>
    %cst_379 = arith.constant dense<0> : vector<1xi32>
    %1352 = vector.multi_reduction <add>, %1351, %cst_379 [1, 2] : vector<1x8x256xi32> to vector<1xi32>
    %1353 = vector.shape_cast %1352 : vector<1xi32> to vector<1x1x1xi32>
    %1354 = vector.extract %1353[0, 0, 0] : i32 from vector<1x1x1xi32>
    %1355 = vector.broadcast %1270 : i32 to vector<8x256xi32>
    %1356 = arith.cmpi slt, %17, %1355 : vector<8x256xi32>
    %1357 = arith.extui %1356 : vector<8x256xi1> to vector<8x256xi32>
    %1358 = vector.shape_cast %1357 : vector<8x256xi32> to vector<1x8x256xi32>
    %cst_380 = arith.constant dense<0> : vector<1xi32>
    %1359 = vector.multi_reduction <add>, %1358, %cst_380 [1, 2] : vector<1x8x256xi32> to vector<1xi32>
    %1360 = vector.shape_cast %1359 : vector<1xi32> to vector<1x1x1xi32>
    %1361 = vector.extract %1360[0, 0, 0] : i32 from vector<1x1x1xi32>
    %1362 = vector.broadcast %1275 : i32 to vector<8x256xi32>
    %1363 = arith.cmpi slt, %17, %1362 : vector<8x256xi32>
    %1364 = arith.extui %1363 : vector<8x256xi1> to vector<8x256xi32>
    %1365 = vector.shape_cast %1364 : vector<8x256xi32> to vector<1x8x256xi32>
    %cst_381 = arith.constant dense<0> : vector<1xi32>
    %1366 = vector.multi_reduction <add>, %1365, %cst_381 [1, 2] : vector<1x8x256xi32> to vector<1xi32>
    %1367 = vector.shape_cast %1366 : vector<1xi32> to vector<1x1x1xi32>
    %1368 = vector.extract %1367[0, 0, 0] : i32 from vector<1x1x1xi32>
    %1369 = vector.broadcast %1280 : i32 to vector<8x256xi32>
    %1370 = arith.cmpi slt, %17, %1369 : vector<8x256xi32>
    %1371 = arith.extui %1370 : vector<8x256xi1> to vector<8x256xi32>
    %1372 = vector.shape_cast %1371 : vector<8x256xi32> to vector<1x8x256xi32>
    %cst_382 = arith.constant dense<0> : vector<1xi32>
    %1373 = vector.multi_reduction <add>, %1372, %cst_382 [1, 2] : vector<1x8x256xi32> to vector<1xi32>
    %1374 = vector.shape_cast %1373 : vector<1xi32> to vector<1x1x1xi32>
    %1375 = vector.extract %1374[0, 0, 0] : i32 from vector<1x1x1xi32>
    %1376 = vector.broadcast %1285 : i32 to vector<8x256xi32>
    %1377 = arith.cmpi slt, %17, %1376 : vector<8x256xi32>
    %1378 = arith.extui %1377 : vector<8x256xi1> to vector<8x256xi32>
    %1379 = vector.shape_cast %1378 : vector<8x256xi32> to vector<1x8x256xi32>
    %cst_383 = arith.constant dense<0> : vector<1xi32>
    %1380 = vector.multi_reduction <add>, %1379, %cst_383 [1, 2] : vector<1x8x256xi32> to vector<1xi32>
    %1381 = vector.shape_cast %1380 : vector<1xi32> to vector<1x1x1xi32>
    %1382 = vector.extract %1381[0, 0, 0] : i32 from vector<1x1x1xi32>
    %1383 = vector.broadcast %1290 : i32 to vector<8x256xi32>
    %1384 = arith.cmpi slt, %17, %1383 : vector<8x256xi32>
    %1385 = arith.extui %1384 : vector<8x256xi1> to vector<8x256xi32>
    %1386 = vector.shape_cast %1385 : vector<8x256xi32> to vector<1x8x256xi32>
    %cst_384 = arith.constant dense<0> : vector<1xi32>
    %1387 = vector.multi_reduction <add>, %1386, %cst_384 [1, 2] : vector<1x8x256xi32> to vector<1xi32>
    %1388 = vector.shape_cast %1387 : vector<1xi32> to vector<1x1x1xi32>
    %1389 = vector.extract %1388[0, 0, 0] : i32 from vector<1x1x1xi32>
    %1390 = vector.broadcast %1295 : i32 to vector<8x256xi32>
    %1391 = arith.cmpi slt, %17, %1390 : vector<8x256xi32>
    %1392 = arith.extui %1391 : vector<8x256xi1> to vector<8x256xi32>
    %1393 = vector.shape_cast %1392 : vector<8x256xi32> to vector<1x8x256xi32>
    %cst_385 = arith.constant dense<0> : vector<1xi32>
    %1394 = vector.multi_reduction <add>, %1393, %cst_385 [1, 2] : vector<1x8x256xi32> to vector<1xi32>
    %1395 = vector.shape_cast %1394 : vector<1xi32> to vector<1x1x1xi32>
    %1396 = vector.extract %1395[0, 0, 0] : i32 from vector<1x1x1xi32>
    %1397 = vector.broadcast %1300 : i32 to vector<8x256xi32>
    %1398 = arith.cmpi slt, %17, %1397 : vector<8x256xi32>
    %1399 = arith.extui %1398 : vector<8x256xi1> to vector<8x256xi32>
    %1400 = vector.shape_cast %1399 : vector<8x256xi32> to vector<1x8x256xi32>
    %cst_386 = arith.constant dense<0> : vector<1xi32>
    %1401 = vector.multi_reduction <add>, %1400, %cst_386 [1, 2] : vector<1x8x256xi32> to vector<1xi32>
    %1402 = vector.shape_cast %1401 : vector<1xi32> to vector<1x1x1xi32>
    %1403 = vector.extract %1402[0, 0, 0] : i32 from vector<1x1x1xi32>
    %1404 = vector.broadcast %1305 : i32 to vector<8x256xi32>
    %1405 = arith.cmpi slt, %17, %1404 : vector<8x256xi32>
    %1406 = arith.extui %1405 : vector<8x256xi1> to vector<8x256xi32>
    %1407 = vector.shape_cast %1406 : vector<8x256xi32> to vector<1x8x256xi32>
    %cst_387 = arith.constant dense<0> : vector<1xi32>
    %1408 = vector.multi_reduction <add>, %1407, %cst_387 [1, 2] : vector<1x8x256xi32> to vector<1xi32>
    %1409 = vector.shape_cast %1408 : vector<1xi32> to vector<1x1x1xi32>
    %1410 = vector.extract %1409[0, 0, 0] : i32 from vector<1x1x1xi32>
    %1411 = arith.cmpi slt, %1312, %c102_i32 : i32
    %1412 = arith.extui %1411 : i1 to i32
    %1413 = arith.cmpi slt, %1319, %c102_i32 : i32
    %1414 = arith.extui %1413 : i1 to i32
    %1415 = arith.addi %1412, %1414 : i32
    %1416 = arith.cmpi slt, %1326, %c102_i32 : i32
    %1417 = arith.extui %1416 : i1 to i32
    %1418 = arith.addi %1415, %1417 : i32
    %1419 = arith.cmpi slt, %1333, %c102_i32 : i32
    %1420 = arith.extui %1419 : i1 to i32
    %1421 = arith.addi %1418, %1420 : i32
    %1422 = arith.cmpi slt, %1340, %c102_i32 : i32
    %1423 = arith.extui %1422 : i1 to i32
    %1424 = arith.addi %1421, %1423 : i32
    %1425 = arith.cmpi slt, %1347, %c102_i32 : i32
    %1426 = arith.extui %1425 : i1 to i32
    %1427 = arith.addi %1424, %1426 : i32
    %1428 = arith.cmpi slt, %1354, %c102_i32 : i32
    %1429 = arith.extui %1428 : i1 to i32
    %1430 = arith.addi %1427, %1429 : i32
    %1431 = arith.cmpi slt, %1361, %c102_i32 : i32
    %1432 = arith.extui %1431 : i1 to i32
    %1433 = arith.addi %1430, %1432 : i32
    %1434 = arith.cmpi slt, %1368, %c102_i32 : i32
    %1435 = arith.extui %1434 : i1 to i32
    %1436 = arith.addi %1433, %1435 : i32
    %1437 = arith.cmpi slt, %1375, %c102_i32 : i32
    %1438 = arith.extui %1437 : i1 to i32
    %1439 = arith.addi %1436, %1438 : i32
    %1440 = arith.cmpi slt, %1382, %c102_i32 : i32
    %1441 = arith.extui %1440 : i1 to i32
    %1442 = arith.addi %1439, %1441 : i32
    %1443 = arith.cmpi slt, %1389, %c102_i32 : i32
    %1444 = arith.extui %1443 : i1 to i32
    %1445 = arith.addi %1442, %1444 : i32
    %1446 = arith.cmpi slt, %1396, %c102_i32 : i32
    %1447 = arith.extui %1446 : i1 to i32
    %1448 = arith.addi %1445, %1447 : i32
    %1449 = arith.cmpi slt, %1403, %c102_i32 : i32
    %1450 = arith.extui %1449 : i1 to i32
    %1451 = arith.addi %1448, %1450 : i32
    %1452 = arith.cmpi slt, %1410, %c102_i32 : i32
    %1453 = arith.extui %1452 : i1 to i32
    %1454 = arith.addi %1451, %1453 : i32
    %c1_i32_388 = arith.constant 1 : i32
    %1455 = arith.addi %1454, %c1_i32_388 : i32
    %1456 = arith.muli %1455, %1229 : i32
    %1457 = arith.addi %1227, %1456 : i32
    %1458 = arith.muli %1455, %1230 : i32
    %c4_i32_389 = arith.constant 4 : i32
    %1459 = arith.shrsi %1458, %c4_i32_389 : i32
    %1460 = arith.addi %1457, %1459 : i32
    %1461 = arith.muli %1454, %1229 : i32
    %1462 = arith.addi %1227, %1461 : i32
    %1463 = arith.muli %1454, %1230 : i32
    %c4_i32_390 = arith.constant 4 : i32
    %1464 = arith.shrsi %1463, %c4_i32_390 : i32
    %1465 = arith.addi %1462, %1464 : i32
    %c0_i32_391 = arith.constant 0 : i32
    %1466 = arith.cmpi sgt, %1454, %c0_i32_391 : i32
    %1467 = arith.extui %1466 : i1 to i32
    %1468 = arith.addi %1465, %1467 : i32
    %1469 = arith.minsi %1468, %1460 : i32
    %c6_i32_392 = arith.constant 6 : i32
    %1470 = arith.subi %1460, %1469 : i32
    %c4_i32_393 = arith.constant 4 : i32
    %1471 = arith.shrsi %1470, %c4_i32_393 : i32
    %c15_i32_394 = arith.constant 15 : i32
    %1472 = arith.andi %1470, %c15_i32_394 : i32
    %c1_i32_395 = arith.constant 1 : i32
    %1473 = arith.muli %c1_i32_395, %1471 : i32
    %1474 = arith.addi %1469, %1473 : i32
    %c1_i32_396 = arith.constant 1 : i32
    %1475 = arith.muli %c1_i32_396, %1472 : i32
    %c4_i32_397 = arith.constant 4 : i32
    %1476 = arith.shrsi %1475, %c4_i32_397 : i32
    %1477 = arith.addi %1474, %1476 : i32
    %c2_i32_398 = arith.constant 2 : i32
    %1478 = arith.muli %c2_i32_398, %1471 : i32
    %1479 = arith.addi %1469, %1478 : i32
    %c2_i32_399 = arith.constant 2 : i32
    %1480 = arith.muli %c2_i32_399, %1472 : i32
    %c4_i32_400 = arith.constant 4 : i32
    %1481 = arith.shrsi %1480, %c4_i32_400 : i32
    %1482 = arith.addi %1479, %1481 : i32
    %c3_i32_401 = arith.constant 3 : i32
    %1483 = arith.muli %c3_i32_401, %1471 : i32
    %1484 = arith.addi %1469, %1483 : i32
    %c3_i32_402 = arith.constant 3 : i32
    %1485 = arith.muli %c3_i32_402, %1472 : i32
    %c4_i32_403 = arith.constant 4 : i32
    %1486 = arith.shrsi %1485, %c4_i32_403 : i32
    %1487 = arith.addi %1484, %1486 : i32
    %c4_i32_404 = arith.constant 4 : i32
    %1488 = arith.muli %c4_i32_404, %1471 : i32
    %1489 = arith.addi %1469, %1488 : i32
    %c4_i32_405 = arith.constant 4 : i32
    %1490 = arith.muli %c4_i32_405, %1472 : i32
    %c4_i32_406 = arith.constant 4 : i32
    %1491 = arith.shrsi %1490, %c4_i32_406 : i32
    %1492 = arith.addi %1489, %1491 : i32
    %c5_i32_407 = arith.constant 5 : i32
    %1493 = arith.muli %c5_i32_407, %1471 : i32
    %1494 = arith.addi %1469, %1493 : i32
    %c5_i32_408 = arith.constant 5 : i32
    %1495 = arith.muli %c5_i32_408, %1472 : i32
    %c4_i32_409 = arith.constant 4 : i32
    %1496 = arith.shrsi %1495, %c4_i32_409 : i32
    %1497 = arith.addi %1494, %1496 : i32
    %c6_i32_410 = arith.constant 6 : i32
    %1498 = arith.muli %c6_i32_410, %1471 : i32
    %1499 = arith.addi %1469, %1498 : i32
    %c6_i32_411 = arith.constant 6 : i32
    %1500 = arith.muli %c6_i32_411, %1472 : i32
    %c4_i32_412 = arith.constant 4 : i32
    %1501 = arith.shrsi %1500, %c4_i32_412 : i32
    %1502 = arith.addi %1499, %1501 : i32
    %c7_i32_413 = arith.constant 7 : i32
    %1503 = arith.muli %c7_i32_413, %1471 : i32
    %1504 = arith.addi %1469, %1503 : i32
    %c7_i32_414 = arith.constant 7 : i32
    %1505 = arith.muli %c7_i32_414, %1472 : i32
    %c4_i32_415 = arith.constant 4 : i32
    %1506 = arith.shrsi %1505, %c4_i32_415 : i32
    %1507 = arith.addi %1504, %1506 : i32
    %c8_i32_416 = arith.constant 8 : i32
    %1508 = arith.muli %c8_i32_416, %1471 : i32
    %1509 = arith.addi %1469, %1508 : i32
    %c8_i32_417 = arith.constant 8 : i32
    %1510 = arith.muli %c8_i32_417, %1472 : i32
    %c4_i32_418 = arith.constant 4 : i32
    %1511 = arith.shrsi %1510, %c4_i32_418 : i32
    %1512 = arith.addi %1509, %1511 : i32
    %c9_i32_419 = arith.constant 9 : i32
    %1513 = arith.muli %c9_i32_419, %1471 : i32
    %1514 = arith.addi %1469, %1513 : i32
    %c9_i32_420 = arith.constant 9 : i32
    %1515 = arith.muli %c9_i32_420, %1472 : i32
    %c4_i32_421 = arith.constant 4 : i32
    %1516 = arith.shrsi %1515, %c4_i32_421 : i32
    %1517 = arith.addi %1514, %1516 : i32
    %c10_i32_422 = arith.constant 10 : i32
    %1518 = arith.muli %c10_i32_422, %1471 : i32
    %1519 = arith.addi %1469, %1518 : i32
    %c10_i32_423 = arith.constant 10 : i32
    %1520 = arith.muli %c10_i32_423, %1472 : i32
    %c4_i32_424 = arith.constant 4 : i32
    %1521 = arith.shrsi %1520, %c4_i32_424 : i32
    %1522 = arith.addi %1519, %1521 : i32
    %c11_i32_425 = arith.constant 11 : i32
    %1523 = arith.muli %c11_i32_425, %1471 : i32
    %1524 = arith.addi %1469, %1523 : i32
    %c11_i32_426 = arith.constant 11 : i32
    %1525 = arith.muli %c11_i32_426, %1472 : i32
    %c4_i32_427 = arith.constant 4 : i32
    %1526 = arith.shrsi %1525, %c4_i32_427 : i32
    %1527 = arith.addi %1524, %1526 : i32
    %c12_i32_428 = arith.constant 12 : i32
    %1528 = arith.muli %c12_i32_428, %1471 : i32
    %1529 = arith.addi %1469, %1528 : i32
    %c12_i32_429 = arith.constant 12 : i32
    %1530 = arith.muli %c12_i32_429, %1472 : i32
    %c4_i32_430 = arith.constant 4 : i32
    %1531 = arith.shrsi %1530, %c4_i32_430 : i32
    %1532 = arith.addi %1529, %1531 : i32
    %c13_i32_431 = arith.constant 13 : i32
    %1533 = arith.muli %c13_i32_431, %1471 : i32
    %1534 = arith.addi %1469, %1533 : i32
    %c13_i32_432 = arith.constant 13 : i32
    %1535 = arith.muli %c13_i32_432, %1472 : i32
    %c4_i32_433 = arith.constant 4 : i32
    %1536 = arith.shrsi %1535, %c4_i32_433 : i32
    %1537 = arith.addi %1534, %1536 : i32
    %c14_i32_434 = arith.constant 14 : i32
    %1538 = arith.muli %c14_i32_434, %1471 : i32
    %1539 = arith.addi %1469, %1538 : i32
    %c14_i32_435 = arith.constant 14 : i32
    %1540 = arith.muli %c14_i32_435, %1472 : i32
    %c4_i32_436 = arith.constant 4 : i32
    %1541 = arith.shrsi %1540, %c4_i32_436 : i32
    %1542 = arith.addi %1539, %1541 : i32
    %c15_i32_437 = arith.constant 15 : i32
    %1543 = arith.muli %c15_i32_437, %1471 : i32
    %1544 = arith.addi %1469, %1543 : i32
    %c15_i32_438 = arith.constant 15 : i32
    %1545 = arith.muli %c15_i32_438, %1472 : i32
    %c4_i32_439 = arith.constant 4 : i32
    %1546 = arith.shrsi %1545, %c4_i32_439 : i32
    %1547 = arith.addi %1544, %1546 : i32
    %1548 = vector.broadcast %1477 : i32 to vector<8x256xi32>
    %1549 = arith.cmpi slt, %17, %1548 : vector<8x256xi32>
    %1550 = arith.extui %1549 : vector<8x256xi1> to vector<8x256xi32>
    %1551 = vector.shape_cast %1550 : vector<8x256xi32> to vector<1x8x256xi32>
    %cst_440 = arith.constant dense<0> : vector<1xi32>
    %1552 = vector.multi_reduction <add>, %1551, %cst_440 [1, 2] : vector<1x8x256xi32> to vector<1xi32>
    %1553 = vector.shape_cast %1552 : vector<1xi32> to vector<1x1x1xi32>
    %1554 = vector.extract %1553[0, 0, 0] : i32 from vector<1x1x1xi32>
    %1555 = vector.broadcast %1482 : i32 to vector<8x256xi32>
    %1556 = arith.cmpi slt, %17, %1555 : vector<8x256xi32>
    %1557 = arith.extui %1556 : vector<8x256xi1> to vector<8x256xi32>
    %1558 = vector.shape_cast %1557 : vector<8x256xi32> to vector<1x8x256xi32>
    %cst_441 = arith.constant dense<0> : vector<1xi32>
    %1559 = vector.multi_reduction <add>, %1558, %cst_441 [1, 2] : vector<1x8x256xi32> to vector<1xi32>
    %1560 = vector.shape_cast %1559 : vector<1xi32> to vector<1x1x1xi32>
    %1561 = vector.extract %1560[0, 0, 0] : i32 from vector<1x1x1xi32>
    %1562 = vector.broadcast %1487 : i32 to vector<8x256xi32>
    %1563 = arith.cmpi slt, %17, %1562 : vector<8x256xi32>
    %1564 = arith.extui %1563 : vector<8x256xi1> to vector<8x256xi32>
    %1565 = vector.shape_cast %1564 : vector<8x256xi32> to vector<1x8x256xi32>
    %cst_442 = arith.constant dense<0> : vector<1xi32>
    %1566 = vector.multi_reduction <add>, %1565, %cst_442 [1, 2] : vector<1x8x256xi32> to vector<1xi32>
    %1567 = vector.shape_cast %1566 : vector<1xi32> to vector<1x1x1xi32>
    %1568 = vector.extract %1567[0, 0, 0] : i32 from vector<1x1x1xi32>
    %1569 = vector.broadcast %1492 : i32 to vector<8x256xi32>
    %1570 = arith.cmpi slt, %17, %1569 : vector<8x256xi32>
    %1571 = arith.extui %1570 : vector<8x256xi1> to vector<8x256xi32>
    %1572 = vector.shape_cast %1571 : vector<8x256xi32> to vector<1x8x256xi32>
    %cst_443 = arith.constant dense<0> : vector<1xi32>
    %1573 = vector.multi_reduction <add>, %1572, %cst_443 [1, 2] : vector<1x8x256xi32> to vector<1xi32>
    %1574 = vector.shape_cast %1573 : vector<1xi32> to vector<1x1x1xi32>
    %1575 = vector.extract %1574[0, 0, 0] : i32 from vector<1x1x1xi32>
    %1576 = vector.broadcast %1497 : i32 to vector<8x256xi32>
    %1577 = arith.cmpi slt, %17, %1576 : vector<8x256xi32>
    %1578 = arith.extui %1577 : vector<8x256xi1> to vector<8x256xi32>
    %1579 = vector.shape_cast %1578 : vector<8x256xi32> to vector<1x8x256xi32>
    %cst_444 = arith.constant dense<0> : vector<1xi32>
    %1580 = vector.multi_reduction <add>, %1579, %cst_444 [1, 2] : vector<1x8x256xi32> to vector<1xi32>
    %1581 = vector.shape_cast %1580 : vector<1xi32> to vector<1x1x1xi32>
    %1582 = vector.extract %1581[0, 0, 0] : i32 from vector<1x1x1xi32>
    %1583 = vector.broadcast %1502 : i32 to vector<8x256xi32>
    %1584 = arith.cmpi slt, %17, %1583 : vector<8x256xi32>
    %1585 = arith.extui %1584 : vector<8x256xi1> to vector<8x256xi32>
    %1586 = vector.shape_cast %1585 : vector<8x256xi32> to vector<1x8x256xi32>
    %cst_445 = arith.constant dense<0> : vector<1xi32>
    %1587 = vector.multi_reduction <add>, %1586, %cst_445 [1, 2] : vector<1x8x256xi32> to vector<1xi32>
    %1588 = vector.shape_cast %1587 : vector<1xi32> to vector<1x1x1xi32>
    %1589 = vector.extract %1588[0, 0, 0] : i32 from vector<1x1x1xi32>
    %1590 = vector.broadcast %1507 : i32 to vector<8x256xi32>
    %1591 = arith.cmpi slt, %17, %1590 : vector<8x256xi32>
    %1592 = arith.extui %1591 : vector<8x256xi1> to vector<8x256xi32>
    %1593 = vector.shape_cast %1592 : vector<8x256xi32> to vector<1x8x256xi32>
    %cst_446 = arith.constant dense<0> : vector<1xi32>
    %1594 = vector.multi_reduction <add>, %1593, %cst_446 [1, 2] : vector<1x8x256xi32> to vector<1xi32>
    %1595 = vector.shape_cast %1594 : vector<1xi32> to vector<1x1x1xi32>
    %1596 = vector.extract %1595[0, 0, 0] : i32 from vector<1x1x1xi32>
    %1597 = vector.broadcast %1512 : i32 to vector<8x256xi32>
    %1598 = arith.cmpi slt, %17, %1597 : vector<8x256xi32>
    %1599 = arith.extui %1598 : vector<8x256xi1> to vector<8x256xi32>
    %1600 = vector.shape_cast %1599 : vector<8x256xi32> to vector<1x8x256xi32>
    %cst_447 = arith.constant dense<0> : vector<1xi32>
    %1601 = vector.multi_reduction <add>, %1600, %cst_447 [1, 2] : vector<1x8x256xi32> to vector<1xi32>
    %1602 = vector.shape_cast %1601 : vector<1xi32> to vector<1x1x1xi32>
    %1603 = vector.extract %1602[0, 0, 0] : i32 from vector<1x1x1xi32>
    %1604 = vector.broadcast %1517 : i32 to vector<8x256xi32>
    %1605 = arith.cmpi slt, %17, %1604 : vector<8x256xi32>
    %1606 = arith.extui %1605 : vector<8x256xi1> to vector<8x256xi32>
    %1607 = vector.shape_cast %1606 : vector<8x256xi32> to vector<1x8x256xi32>
    %cst_448 = arith.constant dense<0> : vector<1xi32>
    %1608 = vector.multi_reduction <add>, %1607, %cst_448 [1, 2] : vector<1x8x256xi32> to vector<1xi32>
    %1609 = vector.shape_cast %1608 : vector<1xi32> to vector<1x1x1xi32>
    %1610 = vector.extract %1609[0, 0, 0] : i32 from vector<1x1x1xi32>
    %1611 = vector.broadcast %1522 : i32 to vector<8x256xi32>
    %1612 = arith.cmpi slt, %17, %1611 : vector<8x256xi32>
    %1613 = arith.extui %1612 : vector<8x256xi1> to vector<8x256xi32>
    %1614 = vector.shape_cast %1613 : vector<8x256xi32> to vector<1x8x256xi32>
    %cst_449 = arith.constant dense<0> : vector<1xi32>
    %1615 = vector.multi_reduction <add>, %1614, %cst_449 [1, 2] : vector<1x8x256xi32> to vector<1xi32>
    %1616 = vector.shape_cast %1615 : vector<1xi32> to vector<1x1x1xi32>
    %1617 = vector.extract %1616[0, 0, 0] : i32 from vector<1x1x1xi32>
    %1618 = vector.broadcast %1527 : i32 to vector<8x256xi32>
    %1619 = arith.cmpi slt, %17, %1618 : vector<8x256xi32>
    %1620 = arith.extui %1619 : vector<8x256xi1> to vector<8x256xi32>
    %1621 = vector.shape_cast %1620 : vector<8x256xi32> to vector<1x8x256xi32>
    %cst_450 = arith.constant dense<0> : vector<1xi32>
    %1622 = vector.multi_reduction <add>, %1621, %cst_450 [1, 2] : vector<1x8x256xi32> to vector<1xi32>
    %1623 = vector.shape_cast %1622 : vector<1xi32> to vector<1x1x1xi32>
    %1624 = vector.extract %1623[0, 0, 0] : i32 from vector<1x1x1xi32>
    %1625 = vector.broadcast %1532 : i32 to vector<8x256xi32>
    %1626 = arith.cmpi slt, %17, %1625 : vector<8x256xi32>
    %1627 = arith.extui %1626 : vector<8x256xi1> to vector<8x256xi32>
    %1628 = vector.shape_cast %1627 : vector<8x256xi32> to vector<1x8x256xi32>
    %cst_451 = arith.constant dense<0> : vector<1xi32>
    %1629 = vector.multi_reduction <add>, %1628, %cst_451 [1, 2] : vector<1x8x256xi32> to vector<1xi32>
    %1630 = vector.shape_cast %1629 : vector<1xi32> to vector<1x1x1xi32>
    %1631 = vector.extract %1630[0, 0, 0] : i32 from vector<1x1x1xi32>
    %1632 = vector.broadcast %1537 : i32 to vector<8x256xi32>
    %1633 = arith.cmpi slt, %17, %1632 : vector<8x256xi32>
    %1634 = arith.extui %1633 : vector<8x256xi1> to vector<8x256xi32>
    %1635 = vector.shape_cast %1634 : vector<8x256xi32> to vector<1x8x256xi32>
    %cst_452 = arith.constant dense<0> : vector<1xi32>
    %1636 = vector.multi_reduction <add>, %1635, %cst_452 [1, 2] : vector<1x8x256xi32> to vector<1xi32>
    %1637 = vector.shape_cast %1636 : vector<1xi32> to vector<1x1x1xi32>
    %1638 = vector.extract %1637[0, 0, 0] : i32 from vector<1x1x1xi32>
    %1639 = vector.broadcast %1542 : i32 to vector<8x256xi32>
    %1640 = arith.cmpi slt, %17, %1639 : vector<8x256xi32>
    %1641 = arith.extui %1640 : vector<8x256xi1> to vector<8x256xi32>
    %1642 = vector.shape_cast %1641 : vector<8x256xi32> to vector<1x8x256xi32>
    %cst_453 = arith.constant dense<0> : vector<1xi32>
    %1643 = vector.multi_reduction <add>, %1642, %cst_453 [1, 2] : vector<1x8x256xi32> to vector<1xi32>
    %1644 = vector.shape_cast %1643 : vector<1xi32> to vector<1x1x1xi32>
    %1645 = vector.extract %1644[0, 0, 0] : i32 from vector<1x1x1xi32>
    %1646 = vector.broadcast %1547 : i32 to vector<8x256xi32>
    %1647 = arith.cmpi slt, %17, %1646 : vector<8x256xi32>
    %1648 = arith.extui %1647 : vector<8x256xi1> to vector<8x256xi32>
    %1649 = vector.shape_cast %1648 : vector<8x256xi32> to vector<1x8x256xi32>
    %cst_454 = arith.constant dense<0> : vector<1xi32>
    %1650 = vector.multi_reduction <add>, %1649, %cst_454 [1, 2] : vector<1x8x256xi32> to vector<1xi32>
    %1651 = vector.shape_cast %1650 : vector<1xi32> to vector<1x1x1xi32>
    %1652 = vector.extract %1651[0, 0, 0] : i32 from vector<1x1x1xi32>
    %1653 = arith.cmpi slt, %1554, %c102_i32 : i32
    %1654 = arith.extui %1653 : i1 to i32
    %1655 = arith.cmpi slt, %1561, %c102_i32 : i32
    %1656 = arith.extui %1655 : i1 to i32
    %1657 = arith.addi %1654, %1656 : i32
    %1658 = arith.cmpi slt, %1568, %c102_i32 : i32
    %1659 = arith.extui %1658 : i1 to i32
    %1660 = arith.addi %1657, %1659 : i32
    %1661 = arith.cmpi slt, %1575, %c102_i32 : i32
    %1662 = arith.extui %1661 : i1 to i32
    %1663 = arith.addi %1660, %1662 : i32
    %1664 = arith.cmpi slt, %1582, %c102_i32 : i32
    %1665 = arith.extui %1664 : i1 to i32
    %1666 = arith.addi %1663, %1665 : i32
    %1667 = arith.cmpi slt, %1589, %c102_i32 : i32
    %1668 = arith.extui %1667 : i1 to i32
    %1669 = arith.addi %1666, %1668 : i32
    %1670 = arith.cmpi slt, %1596, %c102_i32 : i32
    %1671 = arith.extui %1670 : i1 to i32
    %1672 = arith.addi %1669, %1671 : i32
    %1673 = arith.cmpi slt, %1603, %c102_i32 : i32
    %1674 = arith.extui %1673 : i1 to i32
    %1675 = arith.addi %1672, %1674 : i32
    %1676 = arith.cmpi slt, %1610, %c102_i32 : i32
    %1677 = arith.extui %1676 : i1 to i32
    %1678 = arith.addi %1675, %1677 : i32
    %1679 = arith.cmpi slt, %1617, %c102_i32 : i32
    %1680 = arith.extui %1679 : i1 to i32
    %1681 = arith.addi %1678, %1680 : i32
    %1682 = arith.cmpi slt, %1624, %c102_i32 : i32
    %1683 = arith.extui %1682 : i1 to i32
    %1684 = arith.addi %1681, %1683 : i32
    %1685 = arith.cmpi slt, %1631, %c102_i32 : i32
    %1686 = arith.extui %1685 : i1 to i32
    %1687 = arith.addi %1684, %1686 : i32
    %1688 = arith.cmpi slt, %1638, %c102_i32 : i32
    %1689 = arith.extui %1688 : i1 to i32
    %1690 = arith.addi %1687, %1689 : i32
    %1691 = arith.cmpi slt, %1645, %c102_i32 : i32
    %1692 = arith.extui %1691 : i1 to i32
    %1693 = arith.addi %1690, %1692 : i32
    %1694 = arith.cmpi slt, %1652, %c102_i32 : i32
    %1695 = arith.extui %1694 : i1 to i32
    %1696 = arith.addi %1693, %1695 : i32
    %c1_i32_455 = arith.constant 1 : i32
    %1697 = arith.addi %1696, %c1_i32_455 : i32
    %1698 = arith.muli %1697, %1471 : i32
    %1699 = arith.addi %1469, %1698 : i32
    %1700 = arith.muli %1697, %1472 : i32
    %c4_i32_456 = arith.constant 4 : i32
    %1701 = arith.shrsi %1700, %c4_i32_456 : i32
    %1702 = arith.addi %1699, %1701 : i32
    %1703 = arith.muli %1696, %1471 : i32
    %1704 = arith.addi %1469, %1703 : i32
    %1705 = arith.muli %1696, %1472 : i32
    %c4_i32_457 = arith.constant 4 : i32
    %1706 = arith.shrsi %1705, %c4_i32_457 : i32
    %1707 = arith.addi %1704, %1706 : i32
    %c0_i32_458 = arith.constant 0 : i32
    %1708 = arith.cmpi sgt, %1696, %c0_i32_458 : i32
    %1709 = arith.extui %1708 : i1 to i32
    %1710 = arith.addi %1707, %1709 : i32
    %1711 = arith.minsi %1710, %1702 : i32
    %c7_i32_459 = arith.constant 7 : i32
    %1712 = arith.subi %1702, %1711 : i32
    %c4_i32_460 = arith.constant 4 : i32
    %1713 = arith.shrsi %1712, %c4_i32_460 : i32
    %c15_i32_461 = arith.constant 15 : i32
    %1714 = arith.andi %1712, %c15_i32_461 : i32
    %c1_i32_462 = arith.constant 1 : i32
    %1715 = arith.muli %c1_i32_462, %1713 : i32
    %1716 = arith.addi %1711, %1715 : i32
    %c1_i32_463 = arith.constant 1 : i32
    %1717 = arith.muli %c1_i32_463, %1714 : i32
    %c4_i32_464 = arith.constant 4 : i32
    %1718 = arith.shrsi %1717, %c4_i32_464 : i32
    %1719 = arith.addi %1716, %1718 : i32
    %c2_i32_465 = arith.constant 2 : i32
    %1720 = arith.muli %c2_i32_465, %1713 : i32
    %1721 = arith.addi %1711, %1720 : i32
    %c2_i32_466 = arith.constant 2 : i32
    %1722 = arith.muli %c2_i32_466, %1714 : i32
    %c4_i32_467 = arith.constant 4 : i32
    %1723 = arith.shrsi %1722, %c4_i32_467 : i32
    %1724 = arith.addi %1721, %1723 : i32
    %c3_i32_468 = arith.constant 3 : i32
    %1725 = arith.muli %c3_i32_468, %1713 : i32
    %1726 = arith.addi %1711, %1725 : i32
    %c3_i32_469 = arith.constant 3 : i32
    %1727 = arith.muli %c3_i32_469, %1714 : i32
    %c4_i32_470 = arith.constant 4 : i32
    %1728 = arith.shrsi %1727, %c4_i32_470 : i32
    %1729 = arith.addi %1726, %1728 : i32
    %c4_i32_471 = arith.constant 4 : i32
    %1730 = arith.muli %c4_i32_471, %1713 : i32
    %1731 = arith.addi %1711, %1730 : i32
    %c4_i32_472 = arith.constant 4 : i32
    %1732 = arith.muli %c4_i32_472, %1714 : i32
    %c4_i32_473 = arith.constant 4 : i32
    %1733 = arith.shrsi %1732, %c4_i32_473 : i32
    %1734 = arith.addi %1731, %1733 : i32
    %c5_i32_474 = arith.constant 5 : i32
    %1735 = arith.muli %c5_i32_474, %1713 : i32
    %1736 = arith.addi %1711, %1735 : i32
    %c5_i32_475 = arith.constant 5 : i32
    %1737 = arith.muli %c5_i32_475, %1714 : i32
    %c4_i32_476 = arith.constant 4 : i32
    %1738 = arith.shrsi %1737, %c4_i32_476 : i32
    %1739 = arith.addi %1736, %1738 : i32
    %c6_i32_477 = arith.constant 6 : i32
    %1740 = arith.muli %c6_i32_477, %1713 : i32
    %1741 = arith.addi %1711, %1740 : i32
    %c6_i32_478 = arith.constant 6 : i32
    %1742 = arith.muli %c6_i32_478, %1714 : i32
    %c4_i32_479 = arith.constant 4 : i32
    %1743 = arith.shrsi %1742, %c4_i32_479 : i32
    %1744 = arith.addi %1741, %1743 : i32
    %c7_i32_480 = arith.constant 7 : i32
    %1745 = arith.muli %c7_i32_480, %1713 : i32
    %1746 = arith.addi %1711, %1745 : i32
    %c7_i32_481 = arith.constant 7 : i32
    %1747 = arith.muli %c7_i32_481, %1714 : i32
    %c4_i32_482 = arith.constant 4 : i32
    %1748 = arith.shrsi %1747, %c4_i32_482 : i32
    %1749 = arith.addi %1746, %1748 : i32
    %c8_i32_483 = arith.constant 8 : i32
    %1750 = arith.muli %c8_i32_483, %1713 : i32
    %1751 = arith.addi %1711, %1750 : i32
    %c8_i32_484 = arith.constant 8 : i32
    %1752 = arith.muli %c8_i32_484, %1714 : i32
    %c4_i32_485 = arith.constant 4 : i32
    %1753 = arith.shrsi %1752, %c4_i32_485 : i32
    %1754 = arith.addi %1751, %1753 : i32
    %c9_i32_486 = arith.constant 9 : i32
    %1755 = arith.muli %c9_i32_486, %1713 : i32
    %1756 = arith.addi %1711, %1755 : i32
    %c9_i32_487 = arith.constant 9 : i32
    %1757 = arith.muli %c9_i32_487, %1714 : i32
    %c4_i32_488 = arith.constant 4 : i32
    %1758 = arith.shrsi %1757, %c4_i32_488 : i32
    %1759 = arith.addi %1756, %1758 : i32
    %c10_i32_489 = arith.constant 10 : i32
    %1760 = arith.muli %c10_i32_489, %1713 : i32
    %1761 = arith.addi %1711, %1760 : i32
    %c10_i32_490 = arith.constant 10 : i32
    %1762 = arith.muli %c10_i32_490, %1714 : i32
    %c4_i32_491 = arith.constant 4 : i32
    %1763 = arith.shrsi %1762, %c4_i32_491 : i32
    %1764 = arith.addi %1761, %1763 : i32
    %c11_i32_492 = arith.constant 11 : i32
    %1765 = arith.muli %c11_i32_492, %1713 : i32
    %1766 = arith.addi %1711, %1765 : i32
    %c11_i32_493 = arith.constant 11 : i32
    %1767 = arith.muli %c11_i32_493, %1714 : i32
    %c4_i32_494 = arith.constant 4 : i32
    %1768 = arith.shrsi %1767, %c4_i32_494 : i32
    %1769 = arith.addi %1766, %1768 : i32
    %c12_i32_495 = arith.constant 12 : i32
    %1770 = arith.muli %c12_i32_495, %1713 : i32
    %1771 = arith.addi %1711, %1770 : i32
    %c12_i32_496 = arith.constant 12 : i32
    %1772 = arith.muli %c12_i32_496, %1714 : i32
    %c4_i32_497 = arith.constant 4 : i32
    %1773 = arith.shrsi %1772, %c4_i32_497 : i32
    %1774 = arith.addi %1771, %1773 : i32
    %c13_i32_498 = arith.constant 13 : i32
    %1775 = arith.muli %c13_i32_498, %1713 : i32
    %1776 = arith.addi %1711, %1775 : i32
    %c13_i32_499 = arith.constant 13 : i32
    %1777 = arith.muli %c13_i32_499, %1714 : i32
    %c4_i32_500 = arith.constant 4 : i32
    %1778 = arith.shrsi %1777, %c4_i32_500 : i32
    %1779 = arith.addi %1776, %1778 : i32
    %c14_i32_501 = arith.constant 14 : i32
    %1780 = arith.muli %c14_i32_501, %1713 : i32
    %1781 = arith.addi %1711, %1780 : i32
    %c14_i32_502 = arith.constant 14 : i32
    %1782 = arith.muli %c14_i32_502, %1714 : i32
    %c4_i32_503 = arith.constant 4 : i32
    %1783 = arith.shrsi %1782, %c4_i32_503 : i32
    %1784 = arith.addi %1781, %1783 : i32
    %c15_i32_504 = arith.constant 15 : i32
    %1785 = arith.muli %c15_i32_504, %1713 : i32
    %1786 = arith.addi %1711, %1785 : i32
    %c15_i32_505 = arith.constant 15 : i32
    %1787 = arith.muli %c15_i32_505, %1714 : i32
    %c4_i32_506 = arith.constant 4 : i32
    %1788 = arith.shrsi %1787, %c4_i32_506 : i32
    %1789 = arith.addi %1786, %1788 : i32
    %1790 = vector.broadcast %1719 : i32 to vector<8x256xi32>
    %1791 = arith.cmpi slt, %17, %1790 : vector<8x256xi32>
    %1792 = arith.extui %1791 : vector<8x256xi1> to vector<8x256xi32>
    %1793 = vector.shape_cast %1792 : vector<8x256xi32> to vector<1x8x256xi32>
    %cst_507 = arith.constant dense<0> : vector<1xi32>
    %1794 = vector.multi_reduction <add>, %1793, %cst_507 [1, 2] : vector<1x8x256xi32> to vector<1xi32>
    %1795 = vector.shape_cast %1794 : vector<1xi32> to vector<1x1x1xi32>
    %1796 = vector.extract %1795[0, 0, 0] : i32 from vector<1x1x1xi32>
    %1797 = vector.broadcast %1724 : i32 to vector<8x256xi32>
    %1798 = arith.cmpi slt, %17, %1797 : vector<8x256xi32>
    %1799 = arith.extui %1798 : vector<8x256xi1> to vector<8x256xi32>
    %1800 = vector.shape_cast %1799 : vector<8x256xi32> to vector<1x8x256xi32>
    %cst_508 = arith.constant dense<0> : vector<1xi32>
    %1801 = vector.multi_reduction <add>, %1800, %cst_508 [1, 2] : vector<1x8x256xi32> to vector<1xi32>
    %1802 = vector.shape_cast %1801 : vector<1xi32> to vector<1x1x1xi32>
    %1803 = vector.extract %1802[0, 0, 0] : i32 from vector<1x1x1xi32>
    %1804 = vector.broadcast %1729 : i32 to vector<8x256xi32>
    %1805 = arith.cmpi slt, %17, %1804 : vector<8x256xi32>
    %1806 = arith.extui %1805 : vector<8x256xi1> to vector<8x256xi32>
    %1807 = vector.shape_cast %1806 : vector<8x256xi32> to vector<1x8x256xi32>
    %cst_509 = arith.constant dense<0> : vector<1xi32>
    %1808 = vector.multi_reduction <add>, %1807, %cst_509 [1, 2] : vector<1x8x256xi32> to vector<1xi32>
    %1809 = vector.shape_cast %1808 : vector<1xi32> to vector<1x1x1xi32>
    %1810 = vector.extract %1809[0, 0, 0] : i32 from vector<1x1x1xi32>
    %1811 = vector.broadcast %1734 : i32 to vector<8x256xi32>
    %1812 = arith.cmpi slt, %17, %1811 : vector<8x256xi32>
    %1813 = arith.extui %1812 : vector<8x256xi1> to vector<8x256xi32>
    %1814 = vector.shape_cast %1813 : vector<8x256xi32> to vector<1x8x256xi32>
    %cst_510 = arith.constant dense<0> : vector<1xi32>
    %1815 = vector.multi_reduction <add>, %1814, %cst_510 [1, 2] : vector<1x8x256xi32> to vector<1xi32>
    %1816 = vector.shape_cast %1815 : vector<1xi32> to vector<1x1x1xi32>
    %1817 = vector.extract %1816[0, 0, 0] : i32 from vector<1x1x1xi32>
    %1818 = vector.broadcast %1739 : i32 to vector<8x256xi32>
    %1819 = arith.cmpi slt, %17, %1818 : vector<8x256xi32>
    %1820 = arith.extui %1819 : vector<8x256xi1> to vector<8x256xi32>
    %1821 = vector.shape_cast %1820 : vector<8x256xi32> to vector<1x8x256xi32>
    %cst_511 = arith.constant dense<0> : vector<1xi32>
    %1822 = vector.multi_reduction <add>, %1821, %cst_511 [1, 2] : vector<1x8x256xi32> to vector<1xi32>
    %1823 = vector.shape_cast %1822 : vector<1xi32> to vector<1x1x1xi32>
    %1824 = vector.extract %1823[0, 0, 0] : i32 from vector<1x1x1xi32>
    %1825 = vector.broadcast %1744 : i32 to vector<8x256xi32>
    %1826 = arith.cmpi slt, %17, %1825 : vector<8x256xi32>
    %1827 = arith.extui %1826 : vector<8x256xi1> to vector<8x256xi32>
    %1828 = vector.shape_cast %1827 : vector<8x256xi32> to vector<1x8x256xi32>
    %cst_512 = arith.constant dense<0> : vector<1xi32>
    %1829 = vector.multi_reduction <add>, %1828, %cst_512 [1, 2] : vector<1x8x256xi32> to vector<1xi32>
    %1830 = vector.shape_cast %1829 : vector<1xi32> to vector<1x1x1xi32>
    %1831 = vector.extract %1830[0, 0, 0] : i32 from vector<1x1x1xi32>
    %1832 = vector.broadcast %1749 : i32 to vector<8x256xi32>
    %1833 = arith.cmpi slt, %17, %1832 : vector<8x256xi32>
    %1834 = arith.extui %1833 : vector<8x256xi1> to vector<8x256xi32>
    %1835 = vector.shape_cast %1834 : vector<8x256xi32> to vector<1x8x256xi32>
    %cst_513 = arith.constant dense<0> : vector<1xi32>
    %1836 = vector.multi_reduction <add>, %1835, %cst_513 [1, 2] : vector<1x8x256xi32> to vector<1xi32>
    %1837 = vector.shape_cast %1836 : vector<1xi32> to vector<1x1x1xi32>
    %1838 = vector.extract %1837[0, 0, 0] : i32 from vector<1x1x1xi32>
    %1839 = vector.broadcast %1754 : i32 to vector<8x256xi32>
    %1840 = arith.cmpi slt, %17, %1839 : vector<8x256xi32>
    %1841 = arith.extui %1840 : vector<8x256xi1> to vector<8x256xi32>
    %1842 = vector.shape_cast %1841 : vector<8x256xi32> to vector<1x8x256xi32>
    %cst_514 = arith.constant dense<0> : vector<1xi32>
    %1843 = vector.multi_reduction <add>, %1842, %cst_514 [1, 2] : vector<1x8x256xi32> to vector<1xi32>
    %1844 = vector.shape_cast %1843 : vector<1xi32> to vector<1x1x1xi32>
    %1845 = vector.extract %1844[0, 0, 0] : i32 from vector<1x1x1xi32>
    %1846 = vector.broadcast %1759 : i32 to vector<8x256xi32>
    %1847 = arith.cmpi slt, %17, %1846 : vector<8x256xi32>
    %1848 = arith.extui %1847 : vector<8x256xi1> to vector<8x256xi32>
    %1849 = vector.shape_cast %1848 : vector<8x256xi32> to vector<1x8x256xi32>
    %cst_515 = arith.constant dense<0> : vector<1xi32>
    %1850 = vector.multi_reduction <add>, %1849, %cst_515 [1, 2] : vector<1x8x256xi32> to vector<1xi32>
    %1851 = vector.shape_cast %1850 : vector<1xi32> to vector<1x1x1xi32>
    %1852 = vector.extract %1851[0, 0, 0] : i32 from vector<1x1x1xi32>
    %1853 = vector.broadcast %1764 : i32 to vector<8x256xi32>
    %1854 = arith.cmpi slt, %17, %1853 : vector<8x256xi32>
    %1855 = arith.extui %1854 : vector<8x256xi1> to vector<8x256xi32>
    %1856 = vector.shape_cast %1855 : vector<8x256xi32> to vector<1x8x256xi32>
    %cst_516 = arith.constant dense<0> : vector<1xi32>
    %1857 = vector.multi_reduction <add>, %1856, %cst_516 [1, 2] : vector<1x8x256xi32> to vector<1xi32>
    %1858 = vector.shape_cast %1857 : vector<1xi32> to vector<1x1x1xi32>
    %1859 = vector.extract %1858[0, 0, 0] : i32 from vector<1x1x1xi32>
    %1860 = vector.broadcast %1769 : i32 to vector<8x256xi32>
    %1861 = arith.cmpi slt, %17, %1860 : vector<8x256xi32>
    %1862 = arith.extui %1861 : vector<8x256xi1> to vector<8x256xi32>
    %1863 = vector.shape_cast %1862 : vector<8x256xi32> to vector<1x8x256xi32>
    %cst_517 = arith.constant dense<0> : vector<1xi32>
    %1864 = vector.multi_reduction <add>, %1863, %cst_517 [1, 2] : vector<1x8x256xi32> to vector<1xi32>
    %1865 = vector.shape_cast %1864 : vector<1xi32> to vector<1x1x1xi32>
    %1866 = vector.extract %1865[0, 0, 0] : i32 from vector<1x1x1xi32>
    %1867 = vector.broadcast %1774 : i32 to vector<8x256xi32>
    %1868 = arith.cmpi slt, %17, %1867 : vector<8x256xi32>
    %1869 = arith.extui %1868 : vector<8x256xi1> to vector<8x256xi32>
    %1870 = vector.shape_cast %1869 : vector<8x256xi32> to vector<1x8x256xi32>
    %cst_518 = arith.constant dense<0> : vector<1xi32>
    %1871 = vector.multi_reduction <add>, %1870, %cst_518 [1, 2] : vector<1x8x256xi32> to vector<1xi32>
    %1872 = vector.shape_cast %1871 : vector<1xi32> to vector<1x1x1xi32>
    %1873 = vector.extract %1872[0, 0, 0] : i32 from vector<1x1x1xi32>
    %1874 = vector.broadcast %1779 : i32 to vector<8x256xi32>
    %1875 = arith.cmpi slt, %17, %1874 : vector<8x256xi32>
    %1876 = arith.extui %1875 : vector<8x256xi1> to vector<8x256xi32>
    %1877 = vector.shape_cast %1876 : vector<8x256xi32> to vector<1x8x256xi32>
    %cst_519 = arith.constant dense<0> : vector<1xi32>
    %1878 = vector.multi_reduction <add>, %1877, %cst_519 [1, 2] : vector<1x8x256xi32> to vector<1xi32>
    %1879 = vector.shape_cast %1878 : vector<1xi32> to vector<1x1x1xi32>
    %1880 = vector.extract %1879[0, 0, 0] : i32 from vector<1x1x1xi32>
    %1881 = vector.broadcast %1784 : i32 to vector<8x256xi32>
    %1882 = arith.cmpi slt, %17, %1881 : vector<8x256xi32>
    %1883 = arith.extui %1882 : vector<8x256xi1> to vector<8x256xi32>
    %1884 = vector.shape_cast %1883 : vector<8x256xi32> to vector<1x8x256xi32>
    %cst_520 = arith.constant dense<0> : vector<1xi32>
    %1885 = vector.multi_reduction <add>, %1884, %cst_520 [1, 2] : vector<1x8x256xi32> to vector<1xi32>
    %1886 = vector.shape_cast %1885 : vector<1xi32> to vector<1x1x1xi32>
    %1887 = vector.extract %1886[0, 0, 0] : i32 from vector<1x1x1xi32>
    %1888 = vector.broadcast %1789 : i32 to vector<8x256xi32>
    %1889 = arith.cmpi slt, %17, %1888 : vector<8x256xi32>
    %1890 = arith.extui %1889 : vector<8x256xi1> to vector<8x256xi32>
    %1891 = vector.shape_cast %1890 : vector<8x256xi32> to vector<1x8x256xi32>
    %cst_521 = arith.constant dense<0> : vector<1xi32>
    %1892 = vector.multi_reduction <add>, %1891, %cst_521 [1, 2] : vector<1x8x256xi32> to vector<1xi32>
    %1893 = vector.shape_cast %1892 : vector<1xi32> to vector<1x1x1xi32>
    %1894 = vector.extract %1893[0, 0, 0] : i32 from vector<1x1x1xi32>
    %1895 = arith.cmpi slt, %1796, %c102_i32 : i32
    %1896 = arith.extui %1895 : i1 to i32
    %1897 = arith.cmpi slt, %1803, %c102_i32 : i32
    %1898 = arith.extui %1897 : i1 to i32
    %1899 = arith.addi %1896, %1898 : i32
    %1900 = arith.cmpi slt, %1810, %c102_i32 : i32
    %1901 = arith.extui %1900 : i1 to i32
    %1902 = arith.addi %1899, %1901 : i32
    %1903 = arith.cmpi slt, %1817, %c102_i32 : i32
    %1904 = arith.extui %1903 : i1 to i32
    %1905 = arith.addi %1902, %1904 : i32
    %1906 = arith.cmpi slt, %1824, %c102_i32 : i32
    %1907 = arith.extui %1906 : i1 to i32
    %1908 = arith.addi %1905, %1907 : i32
    %1909 = arith.cmpi slt, %1831, %c102_i32 : i32
    %1910 = arith.extui %1909 : i1 to i32
    %1911 = arith.addi %1908, %1910 : i32
    %1912 = arith.cmpi slt, %1838, %c102_i32 : i32
    %1913 = arith.extui %1912 : i1 to i32
    %1914 = arith.addi %1911, %1913 : i32
    %1915 = arith.cmpi slt, %1845, %c102_i32 : i32
    %1916 = arith.extui %1915 : i1 to i32
    %1917 = arith.addi %1914, %1916 : i32
    %1918 = arith.cmpi slt, %1852, %c102_i32 : i32
    %1919 = arith.extui %1918 : i1 to i32
    %1920 = arith.addi %1917, %1919 : i32
    %1921 = arith.cmpi slt, %1859, %c102_i32 : i32
    %1922 = arith.extui %1921 : i1 to i32
    %1923 = arith.addi %1920, %1922 : i32
    %1924 = arith.cmpi slt, %1866, %c102_i32 : i32
    %1925 = arith.extui %1924 : i1 to i32
    %1926 = arith.addi %1923, %1925 : i32
    %1927 = arith.cmpi slt, %1873, %c102_i32 : i32
    %1928 = arith.extui %1927 : i1 to i32
    %1929 = arith.addi %1926, %1928 : i32
    %1930 = arith.cmpi slt, %1880, %c102_i32 : i32
    %1931 = arith.extui %1930 : i1 to i32
    %1932 = arith.addi %1929, %1931 : i32
    %1933 = arith.cmpi slt, %1887, %c102_i32 : i32
    %1934 = arith.extui %1933 : i1 to i32
    %1935 = arith.addi %1932, %1934 : i32
    %1936 = arith.cmpi slt, %1894, %c102_i32 : i32
    %1937 = arith.extui %1936 : i1 to i32
    %1938 = arith.addi %1935, %1937 : i32
    %c1_i32_522 = arith.constant 1 : i32
    %1939 = arith.addi %1938, %c1_i32_522 : i32
    %1940 = arith.muli %1939, %1713 : i32
    %1941 = arith.addi %1711, %1940 : i32
    %1942 = arith.muli %1939, %1714 : i32
    %c4_i32_523 = arith.constant 4 : i32
    %1943 = arith.shrsi %1942, %c4_i32_523 : i32
    %1944 = arith.addi %1941, %1943 : i32
    %1945 = arith.muli %1938, %1713 : i32
    %1946 = arith.addi %1711, %1945 : i32
    %1947 = arith.muli %1938, %1714 : i32
    %c4_i32_524 = arith.constant 4 : i32
    %1948 = arith.shrsi %1947, %c4_i32_524 : i32
    %1949 = arith.addi %1946, %1948 : i32
    %c0_i32_525 = arith.constant 0 : i32
    %1950 = arith.cmpi sgt, %1938, %c0_i32_525 : i32
    %1951 = arith.extui %1950 : i1 to i32
    %1952 = arith.addi %1949, %1951 : i32
    %1953 = arith.minsi %1952, %1944 : i32
    %1954 = vector.broadcast %1953 : i32 to vector<8x256xi32>
    %1955 = arith.cmpi slt, %17, %1954 : vector<8x256xi32>
    %cst_526 = arith.constant 0.000000e+00 : f32
    %1956 = vector.broadcast %cst_526 : f32 to vector<8x256xf32>
    %1957 = arith.select %1955, %0, %1956 : vector<8x256xi1>, vector<8x256xf32>
    %c0_527 = arith.constant 0 : index
    %c0_528 = arith.constant 0 : index
    %1958 = vector.load %arg2[%c0_527, %c0_528] : memref<8x256xf32, #tpu.memory_space<vmem>>, vector<8x256xf32>
    tpu.vector_store %arg2[%c0_527, %c0_528], %1957 {strides = array<i32>} : memref<8x256xf32, #tpu.memory_space<vmem>>, vector<8x256xf32>,
    return
  }
}

</mosaic_0001>

<bundles_post_ra>
// kernel: rand_max_sparse.1
= control target key start
LH: loop header
LB: loop body
LE: loop exit
PB: predicated region body
PF: predicated region fallthrough
CT: control target
= control target key end

     0   :  { %v15_v0 = vlaneseq  ;;  %v4328_v21 = vmov 0   ;;  %s5344_s1 = inlined_call_operand.vmem [shape: s32[8,256], index: 1, kind: input, shape index: {}]   ;;  %s5345_s0 = inlined_call_operand.vmem [shape: f32[8,256], index: 0, kind: input, shape index: {}]   ;;  %s5346_s2 = inlined_call_operand.vmem [shape: f32[8,256], index: 2, kind: output, shape index: {}]  }
   0x1   :  { %v27_v5 = vld [vmem:[%s5344_s1] sm:$0xff]  ;;  %v28_v6 = vld [vmem:[%s5344_s1 + $0x8] sm:$0xff] }
   0x2   :  { %v16_v1 = vshrl.u32 %v15_v0, 7  ;;  %v18_v2 = vand.u32 127, %v15_v0  ;;  %v11_v9 = vld [vmem:[%s5345_s0] sm:$0xff]  ;;  %v12_v10 = vld [vmem:[%s5345_s0 + $0x8] sm:$0xff]  ;;  %v29_v13 = vshll.u32 %v27_v5, 11  ;;  %v30_v14 = vshll.u32 %v28_v6, 11 }
   0x3   :  { %vm13_vm0 = vcmp.ne.f32.partialorder %v11_v9, 0.0  ;;  %vm14_vm1 = vcmp.ne.f32.partialorder %v12_v10, 0.0 }
   0x4   :  { %v19_v3 = vadd.s32 128, %v18_v2  ;;  %v20_v4 = vmul.u32 256, %v16_v1 }
   0x6   :  { %v21_v7 = vadd.s32 %v20_v4, %v18_v2  ;;  %v22_v8 = vadd.s32 %v20_v4, %v19_v3 }
   0x8   :  { %v23_v11 = vmul.u32 668265263, %v21_v7  ;;  %v24_v12 = vmul.u32 668265263, %v22_v8 }
   0xa   :  { %v25_v15 = vand.u32 2047, %v23_v11  ;;  %v26_v16 = vand.u32 2047, %v24_v12 }
   0xc   :  { %v31_v17 = vor.u32 %v29_v13, %v25_v15  ;;  %v32_v18 = vor.u32 %v30_v14, %v26_v16 }
   0xe   :  { %v4356_v19 = vsel %vm13_vm0, %v31_v17, 1073741824  ;;  %v4358_v20 = vsel %vm14_vm1, %v32_v18, 1073741824 }
   0xf   :  { %vm83_vm2 = vcmp.lt.s32.totalorder %v4356_v19, 201326674  ;;  %vm84_vm3 = vcmp.lt.s32.totalorder %v4358_v20, 201326674  ;;  %vm35_vm4 = vcmp.lt.s32.totalorder %v4356_v19, 67108959 }
  0x10   :  { %v85_v22 = vsel %vm83_vm2, 1, %v4328_v21  ;;  %v86_v23 = vsel %vm84_vm3, 1, %v4328_v21  ;;  %vm36_vm5 = vcmp.lt.s32.totalorder %v4358_v20, 67108959  ;;  %v37_v24 = vsel %vm35_vm4, 1, %v4328_v21 }
  0x11   :  { %v87_v25 = vadd.s32 %v86_v23, %v85_v22  ;;  %v38_v26 = vsel %vm36_vm5, 1, %v4328_v21  ;;  %vm59_vm6 = vcmp.lt.s32.totalorder %v4356_v19, 134217817  ;;  %vm60_vm7 = vcmp.lt.s32.totalorder %v4358_v20, 134217817 }
  0x12   :  { %v39_v27 = vadd.s32 %v38_v26, %v37_v24  ;;  %v61_v28 = vsel %vm59_vm6, 1, %v4328_v21  ;;  %v62_v29 = vsel %vm60_vm7, 1, %v4328_v21  ;;  %vm107_vm8 = vcmp.lt.s32.totalorder %v4356_v19, 268435532 }
  0x13   :  { %v89_v30 = vshrl.u32 %v87_v25, 16  ;;  %v63_v31 = vadd.s32 %v62_v29, %v61_v28  ;;  %vm108_vm9 = vcmp.lt.s32.totalorder %v4358_v20, 268435532  ;;  %v109_v32 = vsel %vm107_vm8, 1, %v4328_v21 }
  0x14   :  { %v41_v33 = vshrl.u32 %v39_v27, 16  ;;  %v40_v34 = vand.u32 65535, %v39_v27  ;;  %v110_v35 = vsel %vm108_vm9, 1, %v4328_v21  ;;  %vm131_vm10 = vcmp.lt.s32.totalorder %v4356_v19, 335544390 }
  0x15   :  { %v91_v36 = vcvt.s32.f32 %v89_v30  ;;  %v65_v37 = vshrl.u32 %v63_v31, 16  ;;  %v111_v38 = vadd.s32 %v110_v35, %v109_v32  ;;  %v64_v41 = vand.u32 65535, %v63_v31 }
  0x16   :  { %v43_v39 = vcvt.s32.f32 %v41_v33  ;;  %v42_v40 = vcvt.s32.f32 %v40_v34  ;;  %vm132_vm11 = vcmp.lt.s32.totalorder %v4358_v20, 335544390  ;;  %v133_v44 = vsel %vm131_vm10, 1, %v4328_v21 }
  0x17   :  { %94 = vadd.xlane.f32.xlu1 %v91_v36  ;;  %v113_v42 = vshrl.u32 %v111_v38, 16  ;;  %v67_v43 = vcvt.s32.f32 %v65_v37  ;;  %v134_v45 = vsel %vm132_vm11, 1, %v4328_v21  ;;  %vm155_vm12 = vcmp.lt.s32.totalorder %v4356_v19, 402653247 }
  0x18   :  { %46 = vadd.xlane.f32.xlu0 %v43_v39  ;;  %v135_v46 = vadd.s32 %v134_v45, %v133_v44  ;;  %vm156_vm13 = vcmp.lt.s32.totalorder %v4358_v20, 402653247  ;;  %v157_v47 = vsel %vm155_vm12, 1, %v4328_v21  ;;  %vm179_vm14 = vcmp.lt.s32.totalorder %v4356_v19, 469762105 }
  0x19   :  { %v158_v48 = vsel %vm156_vm13, 1, %v4328_v21  ;;  %vm180_vm15 = vcmp.lt.s32.totalorder %v4358_v20, 469762105  ;;  %v115_v49 = vcvt.s32.f32 %v113_v42  ;;  %v66_v52 = vcvt.s32.f32 %v64_v41 }
  0x1a   :  { %v137_v50 = vshrl.u32 %v135_v46, 16  ;;  %v159_v51 = vadd.s32 %v158_v48, %v157_v47  ;;  %v88_v53 = vand.u32 65535, %v87_v25  ;;  %v181_v54 = vsel %vm179_vm14, 1, %v4328_v21 }
  0x1b   :  { %44 = vadd.xlane.f32.xlu1 %v42_v40  ;;  %v182_v55 = vsel %vm180_vm15, 1, %v4328_v21  ;;  %vm203_vm0 = vcmp.lt.s32.totalorder %v4356_v19, 536870963  ;;  %vm204_vm1 = vcmp.lt.s32.totalorder %v4358_v20, 536870963  ;;  %v112_v60 = vand.u32 65535, %v111_v38 }
  0x1c   :  { %70 = vadd.xlane.f32.xlu0 %v67_v43  ;;  %v139_v56 = vcvt.s32.f32 %v137_v50  ;;  %v161_v57 = vshrl.u32 %v159_v51, 16  ;;  %v183_v58 = vadd.s32 %v182_v55, %v181_v54  ;;  %v90_v59 = vcvt.s32.f32 %v88_v53 }
  0x1d   :  { %v205_v61 = vsel %vm203_vm0, 1, %v4328_v21  ;;  %v206_v62 = vsel %vm204_vm1, 1, %v4328_v21  ;;  %vm227_vm2 = vcmp.lt.s32.totalorder %v4356_v19, 603979820  ;;  %vm228_vm3 = vcmp.lt.s32.totalorder %v4358_v20, 603979820 }
  0x1e   :  { %v163_v63 = vcvt.s32.f32 %v161_v57  ;;  %v185_v0 = vshrl.u32 %v183_v58, 16  ;;  %v207_v1 = vadd.s32 %v206_v62, %v205_v61  ;;  %v114_v2 = vcvt.s32.f32 %v112_v60 }
  0x1f   :  { %118 = vadd.xlane.f32.xlu1 %v115_v49  ;;  %v136_v3 = vand.u32 65535, %v135_v46  ;;  %v229_v4 = vsel %vm227_vm2, 1, %v4328_v21  ;;  %v230_v5 = vsel %vm228_vm3, 1, %v4328_v21  ;;  %vm251_vm4 = vcmp.lt.s32.totalorder %v4356_v19, 671088678 }
  0x20   :  { %68 = vadd.xlane.f32.xlu0 %v66_v52  ;;  %vm252_vm5 = vcmp.lt.s32.totalorder %v4358_v20, 671088678  ;;  %v187_v6 = vcvt.s32.f32 %v185_v0  ;;  %v209_v7 = vshrl.u32 %v207_v1, 16  ;;  %v231_v8 = vadd.s32 %v230_v5, %v229_v4 }
  0x21   :  { %v138_v9 = vcvt.s32.f32 %v136_v3  ;;  %v160_v10 = vand.u32 65535, %v159_v51  ;;  %v253_v11 = vsel %vm251_vm4, 1, %v4328_v21  ;;  %v254_v12 = vsel %vm252_vm5, 1, %v4328_v21 }
  0x22   :  { %vm275_vm6 = vcmp.lt.s32.totalorder %v4356_v19, 738197535  ;;  %vm276_vm7 = vcmp.lt.s32.totalorder %v4358_v20, 738197535  ;;  %v211_v13 = vcvt.s32.f32 %v209_v7  ;;  %v233_v14 = vshrl.u32 %v231_v8, 16 }
  0x23   :  { %142 = vadd.xlane.f32.xlu1 %v139_v56  ;;  %v255_v15 = vadd.s32 %v254_v12, %v253_v11  ;;  %v162_v16 = vcvt.s32.f32 %v160_v10  ;;  %v184_v17 = vand.u32 65535, %v183_v58  ;;  %v277_v18 = vsel %vm275_vm6, 1, %v4328_v21 }
  0x24   :  { %92 = vadd.xlane.f32.xlu0 %v90_v59  ;;  %v278_v22 = vsel %vm276_vm7, 1, %v4328_v21  ;;  %vm299_vm8 = vcmp.lt.s32.totalorder %v4356_v19, 805306393  ;;  %vm300_vm9 = vcmp.lt.s32.totalorder %v4358_v20, 805306393  ;;  %v235_v23 = vcvt.s32.f32 %v233_v14 }
  0x25   :  { %v257_v24 = vshrl.u32 %v255_v15, 16  ;;  %v279_v25 = vadd.s32 %v278_v22, %v277_v18  ;;  %v186_v26 = vcvt.s32.f32 %v184_v17  ;;  %v208_v27 = vand.u32 65535, %v207_v1 }
  0x26   :  { %v301_v28 = vsel %vm299_vm8, 1, %v4328_v21  ;;  %v302_v29 = vsel %vm300_vm9, 1, %v4328_v21  ;;  %vm323_vm10 = vcmp.lt.s32.totalorder %v4356_v19, 872415251  ;;  %vm324_vm11 = vcmp.lt.s32.totalorder %v4358_v20, 872415251 }
  0x27   :  { %166 = vadd.xlane.f32.xlu1 %v163_v63  ;;  %v259_v30 = vcvt.s32.f32 %v257_v24  ;;  %v281_v31 = vshrl.u32 %v279_v25, 16  ;;  %v303_v32 = vadd.s32 %v302_v29, %v301_v28  ;;  %v210_v33 = vcvt.s32.f32 %v208_v27 }
  0x28   :  { %116 = vadd.xlane.f32.xlu0 %v114_v2  ;;  %v232_v34 = vand.u32 65535, %v231_v8  ;;  %v325_v35 = vsel %vm323_vm10, 1, %v4328_v21  ;;  %v326_v36 = vsel %vm324_vm11, 1, %v4328_v21  ;;  %vm347_vm12 = vcmp.lt.s32.totalorder %v4356_v19, 939524108 }
  0x29   :  { %vm348_vm13 = vcmp.lt.s32.totalorder %v4358_v20, 939524108  ;;  %v283_v37 = vcvt.s32.f32 %v281_v31  ;;  %v305_v38 = vshrl.u32 %v303_v32, 16  ;;  %v327_v39 = vadd.s32 %v326_v36, %v325_v35 }
  0x2a   :  { %v234_v40 = vcvt.s32.f32 %v232_v34  ;;  %v256_v41 = vand.u32 65535, %v255_v15  ;;  %v349_v42 = vsel %vm347_vm12, 1, %v4328_v21  ;;  %v350_v43 = vsel %vm348_vm13, 1, %v4328_v21 }
  0x2b   :  { %190 = vadd.xlane.f32.xlu1 %v187_v6  ;;  %vm371_vm14 = vcmp.lt.s32.totalorder %v4356_v19, 1006632966  ;;  %vm372_vm15 = vcmp.lt.s32.totalorder %v4358_v20, 1006632966  ;;  %v307_v44 = vcvt.s32.f32 %v305_v38  ;;  %v329_v45 = vshrl.u32 %v327_v39, 16 }
  0x2c   :  { %140 = vadd.xlane.f32.xlu0 %v138_v9  ;;  %v351_v46 = vadd.s32 %v350_v43, %v349_v42  ;;  %v258_v47 = vcvt.s32.f32 %v256_v41  ;;  %v280_v48 = vand.u32 65535, %v279_v25  ;;  %v373_v49 = vsel %vm371_vm14, 1, %v4328_v21 }
  0x2d   :  { %v374_v50 = vsel %vm372_vm15, 1, %v4328_v21  ;;  %v331_v51 = vcvt.s32.f32 %v329_v45  ;;  %v304_v55 = vand.u32 65535, %v303_v32  ;;  %v328_v59 = vand.u32 65535, %v327_v39 }
  0x2e   :  { %v353_v52 = vshrl.u32 %v351_v46, 16  ;;  %v375_v53 = vadd.s32 %v374_v50, %v373_v49  ;;  %v282_v54 = vcvt.s32.f32 %v280_v48  ;;  %v352_v63 = vand.u32 65535, %v351_v46 }
  0x2f   :  { %214 = vadd.xlane.f32.xlu1 %v211_v13  ;;  %v306_v58 = vcvt.s32.f32 %v304_v55  ;;  %v330_v62 = vcvt.s32.f32 %v328_v59 }
  0x30   :  { %164 = vadd.xlane.f32.xlu0 %v162_v16  ;;  %v355_v56 = vcvt.s32.f32 %v353_v52  ;;  %v377_v57 = vshrl.u32 %v375_v53, 16  ;;  %v376_v61 = vand.u32 65535, %v375_v53  ;;  %v354_v1 = vcvt.s32.f32 %v352_v63 }
  0x32   :  { %v379_v60 = vcvt.s32.f32 %v377_v57  ;;  %v378_v0 = vcvt.s32.f32 %v376_v61 }
  0x33   :  { %238 = vadd.xlane.f32.xlu1 %v235_v23 }
  0x34   :  { %188 = vadd.xlane.f32.xlu0 %v186_v26 }
  0x37   :  { %262 = vadd.xlane.f32.xlu1 %v259_v30 }
  0x38   :  { %212 = vadd.xlane.f32.xlu0 %v210_v33 }
  0x3b   :  { %286 = vadd.xlane.f32.xlu1 %v283_v37 }
  0x3c   :  { %236 = vadd.xlane.f32.xlu0 %v234_v40 }
  0x3f   :  { %310 = vadd.xlane.f32.xlu1 %v307_v44 }
  0x40   :  { %260 = vadd.xlane.f32.xlu0 %v258_v47 }
  0x43   :  { %334 = vadd.xlane.f32.xlu1 %v331_v51 }
  0x44   :  { %284 = vadd.xlane.f32.xlu0 %v282_v54 }
  0x47   :  { %358 = vadd.xlane.f32.xlu1 %v355_v56 }
  0x48   :  { %308 = vadd.xlane.f32.xlu0 %v306_v58 }
  0x4b   :  { %382 = vadd.xlane.f32.xlu1 %v379_v60 }
  0x4c   :  { %332 = vadd.xlane.f32.xlu0 %v330_v62 }
  0x4f   :  { %380 = vadd.xlane.f32.xlu1 %v378_v0 }
  0x50   :  { %356 = vadd.xlane.f32.xlu0 %v354_v1 }
  0xa4   :  { %v95_v2 = vpop.xlane.xlu1 %94 }
  0xa5   :  { %v47_v3 = vpop.xlane.xlu0 %46  ;;  %v97_v14 = vcvt.f32.s32 %v95_v2 }
  0xa6   :  { %v49_v4 = vcvt.f32.s32 %v47_v3 }
  0xa7   :  { %v98_v25 = vshll.u32 %v97_v14, 16 }
  0xa8   :  { %v45_v5 = vpop.xlane.xlu1 %44  ;;  %v50_v6 = vshll.u32 %v49_v4, 16 }
  0xa9   :  { %v71_v7 = vpop.xlane.xlu0 %70  ;;  %v48_v8 = vcvt.f32.s32 %v45_v5 }
  0xaa   :  { %v73_v9 = vcvt.f32.s32 %v71_v7 }
  0xab   :  { %v51_v10 = vadd.s32 %v50_v6, %v48_v8 }
  0xac   :  { %v119_v11 = vpop.xlane.xlu1 %118  ;;  %v74_v15 = vshll.u32 %v73_v9, 16 }
  0xad   :  { %v52_v12 = vrot.slane %v51_v10, 4  ;;  %v69_v13 = vpop.xlane.xlu0 %68  ;;  %v121_v27 = vcvt.f32.s32 %v119_v11 }
  0xae   :  { %v72_v16 = vcvt.f32.s32 %v69_v13 }
  0xaf   :  { %v53_v17 = vadd.s32 %v52_v12, %v51_v10  ;;  %v122_v36 = vshll.u32 %v121_v27, 16 }
  0xb0   :  { %v75_v18 = vadd.s32 %v74_v15, %v72_v16  ;;  %v143_v22 = vpop.xlane.xlu1 %142 }
  0xb1   :  { %v93_v23 = vpop.xlane.xlu0 %92  ;;  %v54_v24 = vrot.slane %v53_v17, 2  ;;  %v145_v33 = vcvt.f32.s32 %v143_v22 }
  0xb2   :  { %v76_v26 = vrot.slane %v75_v18, 4  ;;  %v96_v28 = vcvt.f32.s32 %v93_v23 }
  0xb3   :  { %v55_v29 = vadd.s32 %v54_v24, %v53_v17  ;;  %v146_v45 = vshll.u32 %v145_v33, 16 }
  0xb4   :  { %v99_v30 = vadd.s32 %v98_v25, %v96_v28  ;;  %v167_v31 = vpop.xlane.xlu1 %166  ;;  %v77_v32 = vadd.s32 %v76_v26, %v75_v18 }
  0xb5   :  { %v117_v34 = vpop.xlane.xlu0 %116  ;;  %v56_v35 = vrot.slane %v55_v29, 1  ;;  %v169_v46 = vcvt.f32.s32 %v167_v31 }
  0xb6   :  { %v100_v37 = vrot.slane %v99_v30, 4  ;;  %v120_v38 = vcvt.f32.s32 %v117_v34  ;;  %v78_v39 = vrot.slane %v77_v32, 2 }
  0xb7   :  { %v57_v40 = vadd.s32 %v56_v35, %v55_v29  ;;  %v170_v57 = vshll.u32 %v169_v46, 16 }
  0xb8   :  { %v123_v41 = vadd.s32 %v122_v36, %v120_v38  ;;  %v191_v42 = vpop.xlane.xlu1 %190  ;;  %v79_v43 = vadd.s32 %v78_v39, %v77_v32  ;;  %v101_v44 = vadd.s32 %v100_v37, %v99_v30 }
  0xb9   :  { %v141_v47 = vpop.xlane.xlu0 %140  ;;  %4085 = vpush %v57_v40  ;;  %v193_v58 = vcvt.f32.s32 %v191_v42 }
  0xba   :  { %v124_v48 = vrot.slane %v123_v41, 4  ;;  %v144_v49 = vcvt.f32.s32 %v141_v47  ;;  %v80_v50 = vrot.slane %v79_v43, 1  ;;  %v102_v51 = vrot.slane %v101_v44, 2 }
  0xbb   :  { %v194_v5 = vshll.u32 %v193_v58, 16 }
  0xbc   :  { %v147_v52 = vadd.s32 %v146_v45, %v144_v49  ;;  %v215_v53 = vpop.xlane.xlu1 %214  ;;  %v81_v54 = vadd.s32 %v80_v50, %v79_v43  ;;  %v103_v55 = vadd.s32 %v102_v51, %v101_v44  ;;  %v125_v56 = vadd.s32 %v124_v48, %v123_v41 }
  0xbd   :  { %v165_v59 = vpop.xlane.xlu0 %164  ;;  %v217_v6 = vcvt.f32.s32 %v215_v53 }
  0xbe   :  { %v148_v60 = vrot.slane %v147_v52, 4  ;;  %v168_v61 = vcvt.f32.s32 %v165_v59  ;;  %4087 = vpush %v81_v54  ;;  %v104_v62 = vrot.slane %v103_v55, 1  ;;  %v126_v63 = vrot.slane %v125_v56, 2 }
  0xbf   :  { %v218_v17 = vshll.u32 %v217_v6, 16 }
  0xc0   :  { %v171_v0 = vadd.s32 %v170_v57, %v168_v61  ;;  %v239_v1 = vpop.xlane.xlu1 %238  ;;  %v105_v2 = vadd.s32 %v104_v62, %v103_v55  ;;  %v127_v3 = vadd.s32 %v126_v63, %v125_v56  ;;  %v149_v4 = vadd.s32 %v148_v60, %v147_v52 }
  0xc1   :  { %v189_v7 = vpop.xlane.xlu0 %188  ;;  %v241_v18 = vcvt.f32.s32 %v239_v1 }
  0xc2   :  { %v172_v8 = vrot.slane %v171_v0, 4  ;;  %v192_v9 = vcvt.f32.s32 %v189_v7  ;;  %4089 = vpush %v105_v2  ;;  %v128_v10 = vrot.slane %v127_v3, 1  ;;  %v150_v11 = vrot.slane %v149_v4, 2 }
  0xc3   :  { %v242_v32 = vshll.u32 %v241_v18, 16 }
  0xc4   :  { %v195_v12 = vadd.s32 %v194_v5, %v192_v9  ;;  %v263_v13 = vpop.xlane.xlu1 %262  ;;  %v129_v14 = vadd.s32 %v128_v10, %v127_v3  ;;  %v151_v15 = vadd.s32 %v150_v11, %v149_v4  ;;  %v173_v16 = vadd.s32 %v172_v8, %v171_v0 }
  0xc5   :  { %v213_v22 = vpop.xlane.xlu0 %212  ;;  %v265_v33 = vcvt.f32.s32 %v263_v13 }
  0xc6   :  { %v196_v23 = vrot.slane %v195_v12, 4  ;;  %v216_v24 = vcvt.f32.s32 %v213_v22  ;;  %4091 = vpush %v129_v14  ;;  %v152_v25 = vrot.slane %v151_v15, 1  ;;  %v174_v26 = vrot.slane %v173_v16, 2 }
  0xc7   :  { %v266_v44 = vshll.u32 %v265_v33, 16 }
  0xc8   :  { %v219_v27 = vadd.s32 %v218_v17, %v216_v24  ;;  %v287_v28 = vpop.xlane.xlu1 %286  ;;  %v153_v29 = vadd.s32 %v152_v25, %v151_v15  ;;  %v175_v30 = vadd.s32 %v174_v26, %v173_v16  ;;  %v197_v31 = vadd.s32 %v196_v23, %v195_v12 }
  0xc9   :  { %v237_v34 = vpop.xlane.xlu0 %236  ;;  %v289_v45 = vcvt.f32.s32 %v287_v28 }
  0xca   :  { %v220_v35 = vrot.slane %v219_v27, 4  ;;  %v240_v36 = vcvt.f32.s32 %v237_v34  ;;  %4093 = vpush %v153_v29  ;;  %v176_v37 = vrot.slane %v175_v30, 1  ;;  %v198_v38 = vrot.slane %v197_v31, 2 }
  0xcb   :  { %v290_v56 = vshll.u32 %v289_v45, 16 }
  0xcc   :  { %v243_v39 = vadd.s32 %v242_v32, %v240_v36  ;;  %v311_v40 = vpop.xlane.xlu1 %310  ;;  %v177_v41 = vadd.s32 %v176_v37, %v175_v30  ;;  %v199_v42 = vadd.s32 %v198_v38, %v197_v31  ;;  %v221_v43 = vadd.s32 %v220_v35, %v219_v27 }
  0xcd   :  { %v261_v46 = vpop.xlane.xlu0 %260  ;;  %v313_v57 = vcvt.f32.s32 %v311_v40 }
  0xce   :  { %v244_v47 = vrot.slane %v243_v39, 4  ;;  %v264_v48 = vcvt.f32.s32 %v261_v46  ;;  %4095 = vpush %v177_v41  ;;  %v200_v49 = vrot.slane %v199_v42, 1  ;;  %v222_v50 = vrot.slane %v221_v43, 2 }
  0xcf   :  { %v314_v4 = vshll.u32 %v313_v57, 16 }
  0xd0   :  { %v267_v51 = vadd.s32 %v266_v44, %v264_v48  ;;  %v335_v52 = vpop.xlane.xlu1 %334  ;;  %v201_v53 = vadd.s32 %v200_v49, %v199_v42  ;;  %v223_v54 = vadd.s32 %v222_v50, %v221_v43  ;;  %v245_v55 = vadd.s32 %v244_v47, %v243_v39 }
  0xd1   :  { %v285_v58 = vpop.xlane.xlu0 %284  ;;  %v337_v5 = vcvt.f32.s32 %v335_v52 }
  0xd2   :  { %v268_v59 = vrot.slane %v267_v51, 4  ;;  %v288_v60 = vcvt.f32.s32 %v285_v58  ;;  %4097 = vpush %v201_v53  ;;  %v224_v61 = vrot.slane %v223_v54, 1  ;;  %v246_v62 = vrot.slane %v245_v55, 2 }
  0xd3   :  { %v338_v16 = vshll.u32 %v337_v5, 16 }
  0xd4   :  { %v291_v63 = vadd.s32 %v290_v56, %v288_v60  ;;  %v359_v0 = vpop.xlane.xlu1 %358  ;;  %v225_v1 = vadd.s32 %v224_v61, %v223_v54  ;;  %v247_v2 = vadd.s32 %v246_v62, %v245_v55  ;;  %v269_v3 = vadd.s32 %v268_v59, %v267_v51 }
  0xd5   :  { %v309_v6 = vpop.xlane.xlu0 %308  ;;  %v361_v17 = vcvt.f32.s32 %v359_v0 }
  0xd6   :  { %v292_v7 = vrot.slane %v291_v63, 4  ;;  %v312_v8 = vcvt.f32.s32 %v309_v6  ;;  %4099 = vpush %v225_v1  ;;  %v248_v9 = vrot.slane %v247_v2, 1  ;;  %v270_v10 = vrot.slane %v269_v3, 2 }
  0xd7   :  { %v362_v33 = vshll.u32 %v361_v17, 16 }
  0xd8   :  { %v315_v11 = vadd.s32 %v314_v4, %v312_v8  ;;  %v383_v12 = vpop.xlane.xlu1 %382  ;;  %v249_v13 = vadd.s32 %v248_v9, %v247_v2  ;;  %v271_v14 = vadd.s32 %v270_v10, %v269_v3  ;;  %v293_v15 = vadd.s32 %v292_v7, %v291_v63 }
  0xd9   :  { %v333_v18 = vpop.xlane.xlu0 %332  ;;  %v385_v22 = vcvt.f32.s32 %v383_v12 }
  0xda   :  { %v316_v23 = vrot.slane %v315_v11, 4  ;;  %v336_v24 = vcvt.f32.s32 %v333_v18  ;;  %4101 = vpush %v249_v13  ;;  %v272_v25 = vrot.slane %v271_v14, 1  ;;  %v294_v26 = vrot.slane %v293_v15, 2 }
  0xdb   :  { %v386_v27 = vshll.u32 %v385_v22, 16 }
  0xdc   :  { %v339_v28 = vadd.s32 %v338_v16, %v336_v24  ;;  %v381_v29 = vpop.xlane.xlu1 %380  ;;  %v273_v30 = vadd.s32 %v272_v25, %v271_v14  ;;  %v295_v31 = vadd.s32 %v294_v26, %v293_v15  ;;  %v317_v32 = vadd.s32 %v316_v23, %v315_v11 }
  0xdd   :  { %v357_v34 = vpop.xlane.xlu0 %356  ;;  %v384_v35 = vcvt.f32.s32 %v381_v29 }
  0xde   :  { %v340_v36 = vrot.slane %v339_v28, 4  ;;  %v360_v37 = vcvt.f32.s32 %v357_v34  ;;  %4103 = vpush %v273_v30  ;;  %v296_v38 = vrot.slane %v295_v31, 1  ;;  %v318_v39 = vrot.slane %v317_v32, 2 }
  0xdf   :  { %v387_v40 = vadd.s32 %v386_v27, %v384_v35 }
  0xe0   :  { %v363_v41 = vadd.s32 %v362_v33, %v360_v37  ;;  %v297_v42 = vadd.s32 %v296_v38, %v295_v31  ;;  %v319_v43 = vadd.s32 %v318_v39, %v317_v32  ;;  %v341_v44 = vadd.s32 %v340_v36, %v339_v28 }
  0xe1   :  { %v388_v45 = vrot.slane %v387_v40, 4 }
  0xe2   :  { %v364_v46 = vrot.slane %v363_v41, 4  ;;  %4105 = vpush %v297_v42  ;;  %v320_v47 = vrot.slane %v319_v43, 1  ;;  %v342_v48 = vrot.slane %v341_v44, 2 }
  0xe3   :  { %v389_v49 = vadd.s32 %v388_v45, %v387_v40 }
  0xe4   :  { %v321_v50 = vadd.s32 %v320_v47, %v319_v43  ;;  %v343_v51 = vadd.s32 %v342_v48, %v341_v44  ;;  %v365_v52 = vadd.s32 %v364_v46, %v363_v41 }
  0xe5   :  { %v390_v53 = vrot.slane %v389_v49, 2 }
  0xe6   :  { %4107 = vpush %v321_v50  ;;  %v344_v54 = vrot.slane %v343_v51, 1  ;;  %v366_v55 = vrot.slane %v365_v52, 2 }
  0xe7   :  { %v391_v56 = vadd.s32 %v390_v53, %v389_v49 }
  0xe8   :  { %v345_v57 = vadd.s32 %v344_v54, %v343_v51  ;;  %v367_v58 = vadd.s32 %v366_v55, %v365_v52 }
  0xe9   :  { %v392_v59 = vrot.slane %v391_v56, 1 }
  0xea   :  { %4109 = vpush %v345_v57  ;;  %v368_v60 = vrot.slane %v367_v58, 1  ;;  %s4086_s1 = spop %4085 }
  0xeb   :  { %v393_v61 = vadd.s32 %v392_v59, %v391_v56  ;;  %p395_p0 = scmp.lt.s32.totalorder %s4086_s1, 102 }
  0xec   :  { %v369_v62 = vadd.s32 %v368_v60, %v367_v58 }
  0xed   :  { %s396_s20 = scalar_select %p395_p0, 1, 0 }
  0xee   :  { %4111 = vpush %v369_v62 }
  0xef   :  { %4113 = vpush %v393_v61  ;;  %s4088_s17 = spop %4087 }
  0xf0   :  { %p397_p1 = scmp.lt.s32.totalorder %s4088_s17, 102 }
  0xf2   :  { %s398_s21 = scalar_select %p397_p1, 1, 0 }
  0xf3   :  { %s4090_s18 = spop %4089 }
  0xf4   :  { %p400_p2 = scmp.lt.s32.totalorder %s4090_s18, 102  ;;  %s399_s28 = sadd.s32 %s398_s21, %s396_s20 }
  0xf6   :  { %s401_s23 = scalar_select %p400_p2, 1, 0 }
  0xf7   :  { %s4092_s19 = spop %4091 }
  0xf8   :  { %p403_p3 = scmp.lt.s32.totalorder %s4092_s19, 102  ;;  %s402_s7 = sadd.s32 %s401_s23, %s399_s28 }
  0xfa   :  { %s404_s26 = scalar_select %p403_p3, 1, 0 }
  0xfb   :  { %s4094_s22 = spop %4093 }
  0xfc   :  { %p406_p4 = scmp.lt.s32.totalorder %s4094_s22, 102  ;;  %s405_s9 = sadd.s32 %s404_s26, %s402_s7 }
  0xfe   :  { %s407_s29 = scalar_select %p406_p4, 1, 0 }
  0xff   :  { %s4096_s24 = spop %4095 }
 0x100   :  { %p409_p5 = scmp.lt.s32.totalorder %s4096_s24, 102  ;;  %s408_s11 = sadd.s32 %s407_s29, %s405_s9 }
 0x102   :  { %s410_s3 = scalar_select %p409_p5, 1, 0 }
 0x103   :  { %s4098_s25 = spop %4097 }
 0x104   :  { %p412_p6 = scmp.lt.s32.totalorder %s4098_s25, 102  ;;  %s411_s12 = sadd.s32 %s410_s3, %s408_s11 }
 0x106   :  { %s413_s4 = scalar_select %p412_p6, 1, 0 }
 0x107   :  { %s4100_s27 = spop %4099 }
 0x108   :  { %p415_p7 = scmp.lt.s32.totalorder %s4100_s27, 102  ;;  %s414_s15 = sadd.s32 %s413_s4, %s411_s12 }
 0x10a   :  { %s416_s6 = scalar_select %p415_p7, 1, 0 }
 0x10b   :  { %s4102_s30 = spop %4101 }
 0x10c   :  { %p418_p8 = scmp.lt.s32.totalorder %s4102_s30, 102  ;;  %s417_s1 = sadd.s32 %s416_s6, %s414_s15 }
 0x10e   :  { %s419_s10 = scalar_select %p418_p8, 1, 0 }
 0x10f   :  { %s4104_s5 = spop %4103 }
 0x110   :  { %p421_p9 = scmp.lt.s32.totalorder %s4104_s5, 102  ;;  %s420_s18 = sadd.s32 %s419_s10, %s417_s1 }
 0x112   :  { %s422_s14 = scalar_select %p421_p9, 1, 0 }
 0x113   :  { %s4106_s8 = spop %4105 }
 0x114   :  { %p424_p10 = scmp.lt.s32.totalorder %s4106_s8, 102  ;;  %s423_s21 = sadd.s32 %s422_s14, %s420_s18 }
 0x116   :  { %s425_s16 = scalar_select %p424_p10, 1, 0 }
 0x117   :  { %s4108_s13 = spop %4107 }
 0x118   :  { %p427_p11 = scmp.lt.s32.totalorder %s4108_s13, 102  ;;  %s426_s23 = sadd.s32 %s425_s16, %s423_s21 }
 0x11a   :  { %s428_s19 = scalar_select %p427_p11, 1, 0 }
 0x11b   :  { %s4110_s17 = spop %4109 }
 0x11c   :  { %p430_p12 = scmp.lt.s32.totalorder %s4110_s17, 102  ;;  %s429_s24 = sadd.s32 %s428_s19, %s426_s23 }
 0x11e   :  { %s431_s20 = scalar_select %p430_p12, 1, 0 }
 0x11f   :  { %s4112_s22 = spop %4111 }
 0x120   :  { %p433_p13 = scmp.lt.s32.totalorder %s4112_s22, 102  ;;  %s4114_s25 = spop %4113 }
 0x121   :  { %s432_s27 = sadd.s32 %s431_s20, %s429_s24  ;;  %p436_p0 = scmp.lt.s32.totalorder %s4114_s25, 102 }
 0x122   :  { %s434_s26 = scalar_select %p433_p13, 1, 0 }
 0x123   :  { %s437_s29 = scalar_select %p436_p0, 1, 0 }
 0x124   :  { %s435_s28 = sadd.s32 %s434_s26, %s432_s27 }
 0x125   :  { %s438_s30 = sadd.s32 %s437_s29, %s435_s28 }
 0x126   :  { %s439_s3 = sadd.s32 1, %s438_s30  ;;  %s445_s4 = smul.u32 67108857, %s438_s30 }
 0x127   :  { %s440_s5 = smul.u32 67108857, %s439_s3  ;;  %p450_p1 = scmp.gt.s32.totalorder %s438_s30, 0 }
 0x128   :  { %s442_s6 = smul.u32 10, %s439_s3  ;;  %s446_s7 = sadd.s32 102, %s445_s4 }
 0x129   :  { %s441_s8 = sadd.s32 102, %s440_s5  ;;  %s447_s9 = smul.u32 10, %s438_s30 }
 0x12a   :  { %s443_s10 = sshra.s32 %s442_s6, 4 }
 0x12b   :  { %s448_s11 = sshra.s32 %s447_s9, 4  ;;  %s444_s12 = sadd.s32 %s443_s10, %s441_s8 }
 0x12c   :  { %s449_s13 = sadd.s32 %s448_s11, %s446_s7 }
 0x12d   :  { %s451_s14 = scalar_select %p450_p1, 1, 0 }
 0x12f   :  { %s452_s15 = sadd.s32 %s451_s14, %s449_s13 }
 0x130   :  { %p453_p2 = scmp.lt.s32.totalorder %s452_s15, %s444_s12 }
 0x132   :  { %s5348_s15 = smov (!%p453_p2, %s452_s15), %s444_s12 }
 0x133   :  { %s455_s16 = ssub.s32 %s444_s12, %s5348_s15 }
 0x134   :  { %s4423_s1 = sshra.s32 %s455_s16, 4  ;;  %s4425_s17 = sand.u32 15, %s455_s16 }
 0x135   :  { %s458_s18 = sadd.s32 %s4423_s1, %s5348_s15  ;;  %s459_s19 = sshra.s32 %s4425_s17, 4 }
 0x136   :  { %s460_s20 = sadd.s32 %s459_s19, %s458_s18  ;;  %s4043_s21 = sshll.u32 %s4423_s1, 1 }
 0x137   :  { %v531_v63 = vstv %s460_s20  ;;  %s462_s22 = sadd.s32 %s4043_s21, %s5348_s15  ;;  %s4044_s23 = sshll.u32 %s4425_s17, 1 }
 0x138   :  { %vm532_vm0 = vcmp.lt.s32.totalorder %v4356_v19, %v531_v63  ;;  %vm533_vm1 = vcmp.lt.s32.totalorder %v4358_v20, %v531_v63  ;;  %s464_s24 = sshra.s32 %s4044_s23, 4  ;;  %s4045_s25 = sshll.u32 %s4423_s1, 2 }
 0x139   :  { %v534_v0 = vsel %vm532_vm0, 1, %v4328_v21  ;;  %v535_v1 = vsel %vm533_vm1, 1, %v4328_v21  ;;  %s465_s26 = sadd.s32 %s464_s24, %s462_s22  ;;  %s472_s27 = sadd.s32 %s4045_s25, %s5348_s15 }
 0x13a   :  { %v536_v2 = vadd.s32 %v535_v1, %v534_v0  ;;  %v556_v3 = vstv %s465_s26  ;;  %s4046_s28 = sshll.u32 %s4425_s17, 2  ;;  %s4047_s29 = sshll.u32 %s4423_s1, 3 }
 0x13b   :  { %vm557_vm2 = vcmp.lt.s32.totalorder %v4356_v19, %v556_v3  ;;  %vm558_vm3 = vcmp.lt.s32.totalorder %v4358_v20, %v556_v3  ;;  %s474_s30 = sshra.s32 %s4046_s28, 4  ;;  %s492_s3 = sadd.s32 %s4047_s29, %s5348_s15 }
 0x13c   :  { %v538_v4 = vshrl.u32 %v536_v2, 16  ;;  %v537_v5 = vand.u32 65535, %v536_v2  ;;  %v559_v6 = vsel %vm557_vm2, 1, %v4328_v21  ;;  %v560_v7 = vsel %vm558_vm3, 1, %v4328_v21  ;;  %s475_s4 = sadd.s32 %s474_s30, %s472_s27  ;;  %s4048_s5 = sshll.u32 %s4425_s17, 3 }
 0x13d   :  { %v561_v8 = vadd.s32 %v560_v7, %v559_v6  ;;  %v606_v9 = vstv %s475_s4  ;;  %s494_s6 = sshra.s32 %s4048_s5, 4  ;;  %s466_s7 = smul.u32 3, %s4423_s1 }
 0x13e   :  { %v540_v10 = vcvt.s32.f32 %v538_v4  ;;  %v539_v11 = vcvt.s32.f32 %v537_v5  ;;  %vm607_vm4 = vcmp.lt.s32.totalorder %v4356_v19, %v606_v9  ;;  %vm608_vm5 = vcmp.lt.s32.totalorder %v4358_v20, %v606_v9  ;;  %s495_s8 = sadd.s32 %s494_s6, %s492_s3  ;;  %s468_s9 = smul.u32 3, %s4425_s17 }
 0x13f   :  { %v562_v12 = vand.u32 65535, %v561_v8  ;;  %v563_v13 = vshrl.u32 %v561_v8, 16  ;;  %v609_v14 = vsel %vm607_vm4, 1, %v4328_v21  ;;  %v610_v15 = vsel %vm608_vm5, 1, %v4328_v21  ;;  %s467_s10 = sadd.s32 %s466_s7, %s5348_s15  ;;  %s476_s11 = smul.u32 5, %s4423_s1 }
 0x140   :  { %543 = vadd.xlane.f32.xlu0 %v540_v10  ;;  %541 = vadd.xlane.f32.xlu1 %v539_v11  ;;  %v611_v16 = vadd.s32 %v610_v15, %v609_v14  ;;  %v706_v17 = vstv %s495_s8  ;;  %s469_s12 = sshra.s32 %s468_s9, 4  ;;  %s478_s13 = smul.u32 5, %s4425_s17 }
 0x141   :  { %v564_v18 = vcvt.s32.f32 %v562_v12  ;;  %v565_v22 = vcvt.s32.f32 %v563_v13  ;;  %vm707_vm6 = vcmp.lt.s32.totalorder %v4356_v19, %v706_v17  ;;  %vm708_vm7 = vcmp.lt.s32.totalorder %v4358_v20, %v706_v17  ;;  %s470_s14 = sadd.s32 %s469_s12, %s467_s10  ;;  %s477_s16 = sadd.s32 %s476_s11, %s5348_s15 }
 0x142   :  { %v612_v23 = vand.u32 65535, %v611_v16  ;;  %v613_v24 = vshrl.u32 %v611_v16, 16  ;;  %v709_v25 = vsel %vm707_vm6, 1, %v4328_v21  ;;  %v710_v26 = vsel %vm708_vm7, 1, %v4328_v21  ;;  %s479_s18 = sshra.s32 %s478_s13, 4  ;;  %s481_s19 = smul.u32 6, %s4423_s1 }
 0x143   :  { %v711_v27 = vadd.s32 %v710_v26, %v709_v25  ;;  %v581_v28 = vstv %s470_s14  ;;  %s480_s20 = sadd.s32 %s479_s18, %s477_s16  ;;  %s483_s21 = smul.u32 6, %s4425_s17 }
 0x144   :  { %566 = vadd.xlane.f32.xlu0 %v564_v18  ;;  %568 = vadd.xlane.f32.xlu1 %v565_v22  ;;  %vm582_vm8 = vcmp.lt.s32.totalorder %v4356_v19, %v581_v28  ;;  %vm583_vm9 = vcmp.lt.s32.totalorder %v4358_v20, %v581_v28  ;;  %s482_s22 = sadd.s32 %s481_s19, %s5348_s15  ;;  %s486_s23 = smul.u32 7, %s4423_s1  ;;  %v614_v29 = vcvt.s32.f32 %v612_v23  ;;  %v615_v30 = vcvt.s32.f32 %v613_v24 }
 0x145   :  { %v584_v31 = vsel %vm582_vm8, 1, %v4328_v21  ;;  %v585_v32 = vsel %vm583_vm9, 1, %v4328_v21  ;;  %s484_s24 = sshra.s32 %s483_s21, 4  ;;  %s488_s25 = smul.u32 7, %s4425_s17  ;;  %v712_v33 = vand.u32 65535, %v711_v27  ;;  %v713_v34 = vshrl.u32 %v711_v27, 16 }
 0x146   :  { %v586_v35 = vadd.s32 %v585_v32, %v584_v31  ;;  %v631_v36 = vstv %s480_s20  ;;  %s485_s26 = sadd.s32 %s484_s24, %s482_s22  ;;  %s487_s27 = sadd.s32 %s486_s23, %s5348_s15 }
 0x147   :  { %vm632_vm10 = vcmp.lt.s32.totalorder %v4356_v19, %v631_v36  ;;  %vm633_vm11 = vcmp.lt.s32.totalorder %v4358_v20, %v631_v36  ;;  %s489_s28 = sshra.s32 %s488_s25, 4  ;;  %s496_s29 = smul.u32 9, %s4423_s1  ;;  %v656_v41 = vstv %s485_s26  ;;  %v714_v43 = vcvt.s32.f32 %v712_v33 }
 0x148   :  { %616 = vadd.xlane.f32.xlu0 %v614_v29  ;;  %618 = vadd.xlane.f32.xlu1 %v615_v30  ;;  %v634_v37 = vsel %vm632_vm10, 1, %v4328_v21  ;;  %v635_v38 = vsel %vm633_vm11, 1, %v4328_v21  ;;  %s490_s30 = sadd.s32 %s489_s28, %s487_s27  ;;  %s498_s3 = smul.u32 9, %s4425_s17  ;;  %v588_v39 = vshrl.u32 %v586_v35, 16  ;;  %v715_v44 = vcvt.s32.f32 %v713_v34 }
 0x149   :  { %v4477_v40 = vadd.s32 %v635_v38, %v634_v37  ;;  %v681_v42 = vstv %s490_s30  ;;  %s497_s4 = sadd.s32 %s496_s29, %s5348_s15  ;;  %s501_s5 = smul.u32 10, %s4423_s1  ;;  %vm657_vm12 = vcmp.lt.s32.totalorder %v4356_v19, %v656_v41  ;;  %vm658_vm13 = vcmp.lt.s32.totalorder %v4358_v20, %v656_v41 }
 0x14a   :  { %s499_s6 = sshra.s32 %s498_s3, 4  ;;  %s503_s7 = smul.u32 10, %s4425_s17  ;;  %v659_v46 = vsel %vm657_vm12, 1, %v4328_v21  ;;  %v660_v47 = vsel %vm658_vm13, 1, %v4328_v21  ;;  %vm682_vm14 = vcmp.lt.s32.totalorder %v4356_v19, %v681_v42  ;;  %vm683_vm15 = vcmp.lt.s32.totalorder %v4358_v20, %v681_v42 }
 0x14b   :  { %v638_v45 = vshrl.u32 %v4477_v40, 16  ;;  %s500_s8 = sadd.s32 %s499_s6, %s497_s4  ;;  %s502_s9 = sadd.s32 %s501_s5, %s5348_s15  ;;  %v4488_v48 = vadd.s32 %v660_v47, %v659_v46  ;;  %v590_v50 = vcvt.s32.f32 %v588_v39  ;;  %v587_v51 = vand.u32 65535, %v586_v35 }
 0x14c   :  { %716 = vadd.xlane.f32.xlu0 %v714_v43  ;;  %718 = vadd.xlane.f32.xlu1 %v715_v44  ;;  %v731_v49 = vstv %s500_s8  ;;  %s504_s10 = sshra.s32 %s503_s7, 4  ;;  %s506_s11 = smul.u32 11, %s4423_s1  ;;  %v684_v52 = vsel %vm682_vm14, 1, %v4328_v21  ;;  %v685_v53 = vsel %vm683_vm15, 1, %v4328_v21  ;;  %v637_v61 = vand.u32 65535, %v4477_v40 }
 0x14d   :  { %s505_s12 = sadd.s32 %s504_s10, %s502_s9  ;;  %s508_s13 = smul.u32 11, %s4425_s17  ;;  %v640_v54 = vcvt.s32.f32 %v638_v45  ;;  %v663_v55 = vshrl.u32 %v4488_v48, 16  ;;  %v4497_v56 = vadd.s32 %v685_v53, %v684_v52  ;;  %vm732_vm0 = vcmp.lt.s32.totalorder %v4356_v19, %v731_v49 }
 0x14e   :  { %s507_s14 = sadd.s32 %s506_s11, %s5348_s15  ;;  %s511_s16 = smul.u32 12, %s4423_s1  ;;  %vm733_vm1 = vcmp.lt.s32.totalorder %v4358_v20, %v731_v49  ;;  %v734_v57 = vsel %vm732_vm0, 1, %v4328_v21  ;;  %v756_v58 = vstv %s505_s12  ;;  %v589_v60 = vcvt.s32.f32 %v587_v51 }
 0x14f   :  { %s509_s18 = sshra.s32 %s508_s13, 4  ;;  %s513_s19 = smul.u32 12, %s4425_s17  ;;  %v735_v59 = vsel %vm733_vm1, 1, %v4328_v21  ;;  %vm757_vm2 = vcmp.lt.s32.totalorder %v4356_v19, %v756_v58  ;;  %vm758_vm3 = vcmp.lt.s32.totalorder %v4358_v20, %v756_v58  ;;  %v665_v62 = vcvt.s32.f32 %v663_v55 }
 0x150   :  { %593 = vadd.xlane.f32.xlu0 %v590_v50  ;;  %643 = vadd.xlane.f32.xlu1 %v640_v54  ;;  %s510_s20 = sadd.s32 %s509_s18, %s507_s14  ;;  %s512_s21 = sadd.s32 %s511_s16, %s5348_s15  ;;  %v688_v63 = vshrl.u32 %v4497_v56, 16  ;;  %v736_v0 = vadd.s32 %v735_v59, %v734_v57  ;;  %v759_v2 = vsel %vm757_vm2, 1, %v4328_v21  ;;  %v760_v3 = vsel %vm758_vm3, 1, %v4328_v21 }
 0x151   :  { %s514_s22 = sshra.s32 %s513_s19, 4  ;;  %s516_s23 = smul.u32 13, %s4423_s1  ;;  %v781_v1 = vstv %s510_s20  ;;  %v639_v4 = vcvt.s32.f32 %v637_v61  ;;  %v662_v7 = vand.u32 65535, %v4488_v48  ;;  %v761_v9 = vadd.s32 %v760_v3, %v759_v2 }
 0x152   :  { %s515_s24 = sadd.s32 %s514_s22, %s512_s21  ;;  %s518_s25 = smul.u32 13, %s4425_s17  ;;  %vm782_vm4 = vcmp.lt.s32.totalorder %v4356_v19, %v781_v1  ;;  %vm783_vm5 = vcmp.lt.s32.totalorder %v4358_v20, %v781_v1  ;;  %v690_v6 = vcvt.s32.f32 %v688_v63  ;;  %v738_v8 = vshrl.u32 %v736_v0, 16 }
 0x153   :  { %s517_s26 = sadd.s32 %s516_s23, %s5348_s15  ;;  %s521_s27 = smul.u32 14, %s4423_s1  ;;  %v806_v5 = vstv %s515_s24  ;;  %v784_v10 = vsel %vm782_vm4, 1, %v4328_v21  ;;  %v785_v11 = vsel %vm783_vm5, 1, %v4328_v21  ;;  %v687_v12 = vand.u32 65535, %v4497_v56 }
 0x154   :  { %591 = vadd.xlane.f32.xlu0 %v589_v60  ;;  %668 = vadd.xlane.f32.xlu1 %v665_v62  ;;  %s519_s28 = sshra.s32 %s518_s25, 4  ;;  %s523_s29 = smul.u32 14, %s4425_s17  ;;  %vm807_vm6 = vcmp.lt.s32.totalorder %v4356_v19, %v806_v5  ;;  %vm808_vm7 = vcmp.lt.s32.totalorder %v4358_v20, %v806_v5  ;;  %v664_v14 = vcvt.s32.f32 %v662_v7  ;;  %v740_v15 = vcvt.s32.f32 %v738_v8 }
 0x155   :  { %s520_s30 = sadd.s32 %s519_s28, %s517_s26  ;;  %s522_s3 = sadd.s32 %s521_s27, %s5348_s15  ;;  %v763_v16 = vshrl.u32 %v761_v9, 16  ;;  %v786_v17 = vadd.s32 %v785_v11, %v784_v10  ;;  %v809_v18 = vsel %vm807_vm6, 1, %v4328_v21  ;;  %v810_v22 = vsel %vm808_vm7, 1, %v4328_v21 }
 0x156   :  { %s526_s4 = smul.u32 15, %s4423_s1  ;;  %s524_s5 = sshra.s32 %s523_s29, 4  ;;  %v831_v13 = vstv %s520_s30  ;;  %v689_v23 = vcvt.s32.f32 %v687_v12  ;;  %v737_v26 = vand.u32 65535, %v736_v0  ;;  %v811_v28 = vadd.s32 %v810_v22, %v809_v18 }
 0x157   :  { %s528_s6 = smul.u32 15, %s4425_s17  ;;  %s525_s7 = sadd.s32 %s524_s5, %s522_s3  ;;  %vm832_vm8 = vcmp.lt.s32.totalorder %v4356_v19, %v831_v13  ;;  %vm833_vm9 = vcmp.lt.s32.totalorder %v4358_v20, %v831_v13  ;;  %v765_v25 = vcvt.s32.f32 %v763_v16  ;;  %v788_v27 = vshrl.u32 %v786_v17, 16 }
 0x158   :  { %641 = vadd.xlane.f32.xlu0 %v639_v4  ;;  %693 = vadd.xlane.f32.xlu1 %v690_v6  ;;  %s527_s8 = sadd.s32 %s526_s4, %s5348_s15  ;;  %v856_v24 = vstv %s525_s7  ;;  %v834_v29 = vsel %vm832_vm8, 1, %v4328_v21  ;;  %v835_v30 = vsel %vm833_vm9, 1, %v4328_v21  ;;  %v762_v31 = vand.u32 65535, %v761_v9 }
 0x159   :  { %s529_s9 = sshra.s32 %s528_s6, 4  ;;  %vm857_vm10 = vcmp.lt.s32.totalorder %v4356_v19, %v856_v24  ;;  %vm858_vm11 = vcmp.lt.s32.totalorder %v4358_v20, %v856_v24  ;;  %v739_v33 = vcvt.s32.f32 %v737_v26  ;;  %v790_v34 = vcvt.s32.f32 %v788_v27 }
 0x15a   :  { %s530_s10 = sadd.s32 %s529_s9, %s527_s8  ;;  %v813_v35 = vshrl.u32 %v811_v28, 16  ;;  %v836_v36 = vadd.s32 %v835_v30, %v834_v29  ;;  %v859_v37 = vsel %vm857_vm10, 1, %v4328_v21  ;;  %v860_v38 = vsel %vm858_vm11, 1, %v4328_v21 }
 0x15b   :  { %v881_v32 = vstv %s530_s10  ;;  %v764_v39 = vcvt.s32.f32 %v762_v31  ;;  %v787_v41 = vand.u32 65535, %v786_v17  ;;  %v861_v43 = vadd.s32 %v860_v38, %v859_v37 }
 0x15c   :  { %666 = vadd.xlane.f32.xlu0 %v664_v14  ;;  %743 = vadd.xlane.f32.xlu1 %v740_v15  ;;  %vm882_vm12 = vcmp.lt.s32.totalorder %v4356_v19, %v881_v32  ;;  %vm883_vm13 = vcmp.lt.s32.totalorder %v4358_v20, %v881_v32  ;;  %v815_v40 = vcvt.s32.f32 %v813_v35  ;;  %v838_v42 = vshrl.u32 %v836_v36, 16 }
 0x15d   :  { %v884_v44 = vsel %vm882_vm12, 1, %v4328_v21  ;;  %v885_v45 = vsel %vm883_vm13, 1, %v4328_v21  ;;  %v812_v46 = vand.u32 65535, %v811_v28  ;;  %v789_v47 = vcvt.s32.f32 %v787_v41 }
 0x15e   :  { %v840_v48 = vcvt.s32.f32 %v838_v42  ;;  %v863_v49 = vshrl.u32 %v861_v43, 16  ;;  %v886_v50 = vadd.s32 %v885_v45, %v884_v44  ;;  %v837_v53 = vand.u32 65535, %v836_v36 }
 0x15f   :  { %v814_v51 = vcvt.s32.f32 %v812_v46  ;;  %v862_v57 = vand.u32 65535, %v861_v43 }
 0x160   :  { %691 = vadd.xlane.f32.xlu0 %v689_v23  ;;  %768 = vadd.xlane.f32.xlu1 %v765_v25  ;;  %v865_v52 = vcvt.s32.f32 %v863_v49  ;;  %v888_v54 = vshrl.u32 %v886_v50, 16  ;;  %v839_v55 = vcvt.s32.f32 %v837_v53  ;;  %v887_v58 = vand.u32 65535, %v886_v50 }
 0x161   :  { %v864_v59 = vcvt.s32.f32 %v862_v57 }
 0x162   :  { %v890_v56 = vcvt.s32.f32 %v888_v54  ;;  %v889_v60 = vcvt.s32.f32 %v887_v58 }
 0x164   :  { %741 = vadd.xlane.f32.xlu0 %v739_v33  ;;  %793 = vadd.xlane.f32.xlu1 %v790_v34 }
 0x168   :  { %766 = vadd.xlane.f32.xlu0 %v764_v39  ;;  %818 = vadd.xlane.f32.xlu1 %v815_v40 }
 0x16c   :  { %791 = vadd.xlane.f32.xlu0 %v789_v47  ;;  %843 = vadd.xlane.f32.xlu1 %v840_v48 }
 0x170   :  { %816 = vadd.xlane.f32.xlu0 %v814_v51  ;;  %868 = vadd.xlane.f32.xlu1 %v865_v52 }
 0x174   :  { %841 = vadd.xlane.f32.xlu0 %v839_v55  ;;  %893 = vadd.xlane.f32.xlu1 %v890_v56 }
 0x178   :  { %866 = vadd.xlane.f32.xlu0 %v864_v59  ;;  %891 = vadd.xlane.f32.xlu1 %v889_v60 }
 0x1cd   :  { %v544_v61 = vpop.xlane.xlu0 %543  ;;  %v542_v62 = vpop.xlane.xlu1 %541 }
 0x1ce   :  { %v546_v63 = vcvt.f32.s32 %v544_v61  ;;  %v545_v1 = vcvt.f32.s32 %v542_v62 }
 0x1d0   :  { %v547_v0 = vshll.u32 %v546_v63, 16 }
 0x1d1   :  { %v567_v2 = vpop.xlane.xlu0 %566  ;;  %v569_v3 = vpop.xlane.xlu1 %568 }
 0x1d2   :  { %v548_v4 = vadd.s32 %v547_v0, %v545_v1  ;;  %v571_v5 = vcvt.f32.s32 %v569_v3  ;;  %v570_v7 = vcvt.f32.s32 %v567_v2 }
 0x1d4   :  { %v549_v6 = vrot.slane %v548_v4, 4  ;;  %v572_v8 = vshll.u32 %v571_v5, 16 }
 0x1d5   :  { %v617_v9 = vpop.xlane.xlu0 %616  ;;  %v619_v10 = vpop.xlane.xlu1 %618 }
 0x1d6   :  { %v573_v11 = vadd.s32 %v572_v8, %v570_v7  ;;  %v621_v12 = vcvt.f32.s32 %v619_v10  ;;  %v550_v13 = vadd.s32 %v549_v6, %v548_v4  ;;  %v620_v15 = vcvt.f32.s32 %v617_v9 }
 0x1d8   :  { %v574_v14 = vrot.slane %v573_v11, 4  ;;  %v622_v16 = vshll.u32 %v621_v12, 16  ;;  %v551_v17 = vrot.slane %v550_v13, 2 }
 0x1d9   :  { %v717_v18 = vpop.xlane.xlu0 %716  ;;  %v719_v22 = vpop.xlane.xlu1 %718 }
 0x1da   :  { %v623_v23 = vadd.s32 %v622_v16, %v620_v15  ;;  %v552_v24 = vadd.s32 %v551_v17, %v550_v13  ;;  %v575_v25 = vadd.s32 %v574_v14, %v573_v11  ;;  %v721_v28 = vcvt.f32.s32 %v719_v22 }
 0x1db   :  { %v720_v43 = vcvt.f32.s32 %v717_v18 }
 0x1dc   :  { %v553_v26 = vrot.slane %v552_v24, 1  ;;  %v624_v27 = vrot.slane %v623_v23, 4  ;;  %v576_v31 = vrot.slane %v575_v25, 2  ;;  %v722_v35 = vshll.u32 %v721_v28, 16 }
 0x1dd   :  { %v594_v29 = vpop.xlane.xlu0 %593  ;;  %v644_v30 = vpop.xlane.xlu1 %643 }
 0x1de   :  { %v596_v32 = vcvt.f32.s32 %v594_v29  ;;  %v554_v33 = vadd.s32 %v553_v26, %v552_v24  ;;  %v577_v34 = vadd.s32 %v576_v31, %v575_v25  ;;  %v625_v39 = vadd.s32 %v624_v27, %v623_v23 }
 0x1df   :  { %v646_v41 = vcvt.f32.s32 %v644_v30  ;;  %v723_v46 = vadd.s32 %v722_v35, %v720_v43 }
 0x1e0   :  { %4115 = vpush %v554_v33  ;;  %v578_v38 = vrot.slane %v577_v34, 1  ;;  %v597_v40 = vshll.u32 %v596_v32, 16  ;;  %v626_v50 = vrot.slane %v625_v39, 2 }
 0x1e1   :  { %v592_v36 = vpop.xlane.xlu0 %591  ;;  %v669_v37 = vpop.xlane.xlu1 %668  ;;  %v647_v51 = vshll.u32 %v646_v41, 16  ;;  %v724_v56 = vrot.slane %v723_v46, 4 }
 0x1e2   :  { %v595_v42 = vcvt.f32.s32 %v592_v36  ;;  %v579_v44 = vadd.s32 %v578_v38, %v577_v34  ;;  %v671_v47 = vcvt.f32.s32 %v669_v37  ;;  %v627_v60 = vadd.s32 %v626_v50, %v625_v39 }
 0x1e3   :  { %v725_v8 = vadd.s32 %v724_v56, %v723_v46 }
 0x1e4   :  { %v598_v45 = vadd.s32 %v597_v40, %v595_v42  ;;  %4117 = vpush %v579_v44  ;;  %v672_v57 = vshll.u32 %v671_v47, 16  ;;  %v628_v7 = vrot.slane %v627_v60, 1 }
 0x1e5   :  { %v642_v48 = vpop.xlane.xlu0 %641  ;;  %v694_v49 = vpop.xlane.xlu1 %693  ;;  %v726_v25 = vrot.slane %v725_v8, 2 }
 0x1e6   :  { %v599_v52 = vrot.slane %v598_v45, 4  ;;  %v645_v53 = vcvt.f32.s32 %v642_v48  ;;  %v696_v62 = vcvt.f32.s32 %v694_v49  ;;  %v629_v23 = vadd.s32 %v628_v7, %v627_v60 }
 0x1e7   :  { %v727_v38 = vadd.s32 %v726_v25, %v725_v8 }
 0x1e8   :  { %v648_v54 = vadd.s32 %v647_v51, %v645_v53  ;;  %v600_v55 = vadd.s32 %v599_v52, %v598_v45  ;;  %v697_v9 = vshll.u32 %v696_v62, 16 }
 0x1e9   :  { %v667_v58 = vpop.xlane.xlu0 %666  ;;  %v744_v59 = vpop.xlane.xlu1 %743  ;;  %v728_v51 = vrot.slane %v727_v38, 1 }
 0x1ea   :  { %v649_v61 = vrot.slane %v648_v54, 4  ;;  %v670_v63 = vcvt.f32.s32 %v667_v58  ;;  %v601_v0 = vrot.slane %v600_v55, 2  ;;  %v746_v4 = vcvt.f32.s32 %v744_v59 }
 0x1ec   :  { %v673_v1 = vadd.s32 %v672_v57, %v670_v63  ;;  %v602_v2 = vadd.s32 %v601_v0, %v600_v55  ;;  %v650_v3 = vadd.s32 %v649_v61, %v648_v54  ;;  %v747_v17 = vshll.u32 %v746_v4, 16 }
 0x1ed   :  { %v692_v5 = vpop.xlane.xlu0 %691  ;;  %v769_v6 = vpop.xlane.xlu1 %768  ;;  %v729_v0 = vadd.s32 %v728_v51, %v727_v38 }
 0x1ee   :  { %v674_v10 = vrot.slane %v673_v1, 4  ;;  %v695_v11 = vcvt.f32.s32 %v692_v5  ;;  %v603_v12 = vrot.slane %v602_v2, 1  ;;  %v651_v13 = vrot.slane %v650_v3, 2 }
 0x1ef   :  { %v771_v27 = vcvt.f32.s32 %v769_v6 }
 0x1f0   :  { %v698_v14 = vadd.s32 %v697_v9, %v695_v11  ;;  %v604_v15 = vadd.s32 %v603_v12, %v602_v2  ;;  %v675_v16 = vadd.s32 %v674_v10, %v673_v1  ;;  %v652_v24 = vadd.s32 %v651_v13, %v650_v3 }
 0x1f1   :  { %v742_v18 = vpop.xlane.xlu0 %741  ;;  %v794_v22 = vpop.xlane.xlu1 %793  ;;  %v772_v39 = vshll.u32 %v771_v27, 16 }
 0x1f2   :  { %v699_v26 = vrot.slane %v698_v14, 4  ;;  %v745_v28 = vcvt.f32.s32 %v742_v18  ;;  %4119 = vpush %v604_v15  ;;  %v676_v29 = vrot.slane %v675_v16, 2  ;;  %v653_v30 = vrot.slane %v652_v24, 1 }
 0x1f3   :  { %4121 = vpush %v629_v23  ;;  %v796_v34 = vcvt.f32.s32 %v794_v22 }
 0x1f4   :  { %v748_v31 = vadd.s32 %v747_v17, %v745_v28  ;;  %v677_v32 = vadd.s32 %v676_v29, %v675_v16  ;;  %v700_v33 = vadd.s32 %v699_v26, %v698_v14  ;;  %v654_v37 = vadd.s32 %v653_v30, %v652_v24 }
 0x1f5   :  { %v767_v35 = vpop.xlane.xlu0 %766  ;;  %v819_v36 = vpop.xlane.xlu1 %818  ;;  %v797_v47 = vshll.u32 %v796_v34, 16 }
 0x1f6   :  { %v749_v40 = vrot.slane %v748_v31, 4  ;;  %v770_v41 = vcvt.f32.s32 %v767_v35  ;;  %v678_v42 = vrot.slane %v677_v32, 1  ;;  %4123 = vpush %v654_v37  ;;  %v701_v43 = vrot.slane %v700_v33, 2 }
 0x1f7   :  { %v821_v53 = vcvt.f32.s32 %v819_v36 }
 0x1f8   :  { %v773_v44 = vadd.s32 %v772_v39, %v770_v41  ;;  %v679_v45 = vadd.s32 %v678_v42, %v677_v32  ;;  %v750_v46 = vadd.s32 %v749_v40, %v748_v31  ;;  %v702_v50 = vadd.s32 %v701_v43, %v700_v33 }
 0x1f9   :  { %v792_v48 = vpop.xlane.xlu0 %791  ;;  %v844_v49 = vpop.xlane.xlu1 %843  ;;  %v822_v1 = vshll.u32 %v821_v53, 16 }
 0x1fa   :  { %v774_v52 = vrot.slane %v773_v44, 4  ;;  %v795_v54 = vcvt.f32.s32 %v792_v48  ;;  %4125 = vpush %v679_v45  ;;  %v751_v55 = vrot.slane %v750_v46, 2  ;;  %v703_v56 = vrot.slane %v702_v50, 1 }
 0x1fb   :  { %v846_v60 = vcvt.f32.s32 %v844_v49 }
 0x1fc   :  { %v798_v57 = vadd.s32 %v797_v47, %v795_v54  ;;  %v752_v58 = vadd.s32 %v751_v55, %v750_v46  ;;  %v775_v59 = vadd.s32 %v774_v52, %v773_v44  ;;  %v704_v63 = vadd.s32 %v703_v56, %v702_v50 }
 0x1fd   :  { %v817_v61 = vpop.xlane.xlu0 %816  ;;  %v869_v62 = vpop.xlane.xlu1 %868  ;;  %v847_v9 = vshll.u32 %v846_v60, 16 }
 0x1fe   :  { %v799_v2 = vrot.slane %v798_v57, 4  ;;  %v820_v3 = vcvt.f32.s32 %v817_v61  ;;  %v753_v4 = vrot.slane %v752_v58, 1  ;;  %4127 = vpush %v704_v63  ;;  %v776_v5 = vrot.slane %v775_v59, 2 }
 0x1ff   :  { %4129 = vpush %v729_v0  ;;  %v871_v10 = vcvt.f32.s32 %v869_v62 }
 0x200   :  { %v823_v6 = vadd.s32 %v822_v1, %v820_v3  ;;  %v754_v7 = vadd.s32 %v753_v4, %v752_v58  ;;  %v800_v8 = vadd.s32 %v799_v2, %v798_v57  ;;  %v777_v13 = vadd.s32 %v776_v5, %v775_v59 }
 0x201   :  { %v842_v11 = vpop.xlane.xlu0 %841  ;;  %v894_v12 = vpop.xlane.xlu1 %893  ;;  %v872_v25 = vshll.u32 %v871_v10, 16 }
 0x202   :  { %v824_v14 = vrot.slane %v823_v6, 4  ;;  %v845_v15 = vcvt.f32.s32 %v842_v11  ;;  %v896_v16 = vcvt.f32.s32 %v894_v12  ;;  %4131 = vpush %v754_v7  ;;  %v801_v17 = vrot.slane %v800_v8, 2 }
 0x203   :  { %v778_v18 = vrot.slane %v777_v13, 1 }
 0x204   :  { %v848_v22 = vadd.s32 %v847_v9, %v845_v15  ;;  %v802_v23 = vadd.s32 %v801_v17, %v800_v8  ;;  %v825_v24 = vadd.s32 %v824_v14, %v823_v6  ;;  %v897_v26 = vshll.u32 %v896_v16, 16 }
 0x205   :  { %v867_v27 = vpop.xlane.xlu0 %866  ;;  %v892_v28 = vpop.xlane.xlu1 %891  ;;  %v779_v29 = vadd.s32 %v778_v18, %v777_v13 }
 0x206   :  { %v849_v30 = vrot.slane %v848_v22, 4  ;;  %v870_v31 = vcvt.f32.s32 %v867_v27  ;;  %v895_v32 = vcvt.f32.s32 %v892_v28  ;;  %v803_v33 = vrot.slane %v802_v23, 1 }
 0x207   :  { %4133 = vpush %v779_v29  ;;  %v826_v34 = vrot.slane %v825_v24, 2 }
 0x208   :  { %v873_v35 = vadd.s32 %v872_v25, %v870_v31  ;;  %v898_v36 = vadd.s32 %v897_v26, %v895_v32  ;;  %v804_v37 = vadd.s32 %v803_v33, %v802_v23  ;;  %v850_v38 = vadd.s32 %v849_v30, %v848_v22 }
 0x209   :  { %v827_v39 = vadd.s32 %v826_v34, %v825_v24 }
 0x20a   :  { %v874_v40 = vrot.slane %v873_v35, 4  ;;  %v899_v41 = vrot.slane %v898_v36, 4  ;;  %4135 = vpush %v804_v37  ;;  %v851_v42 = vrot.slane %v850_v38, 2 }
 0x20b   :  { %v828_v43 = vrot.slane %v827_v39, 1 }
 0x20c   :  { %v852_v44 = vadd.s32 %v851_v42, %v850_v38  ;;  %v875_v45 = vadd.s32 %v874_v40, %v873_v35  ;;  %v900_v46 = vadd.s32 %v899_v41, %v898_v36 }
 0x20d   :  { %v829_v47 = vadd.s32 %v828_v43, %v827_v39 }
 0x20e   :  { %v853_v48 = vrot.slane %v852_v44, 1  ;;  %v876_v49 = vrot.slane %v875_v45, 2  ;;  %v901_v50 = vrot.slane %v900_v46, 2 }
 0x20f   :  { %4137 = vpush %v829_v47 }
 0x210   :  { %v854_v51 = vadd.s32 %v853_v48, %v852_v44  ;;  %v877_v52 = vadd.s32 %v876_v49, %v875_v45  ;;  %v902_v53 = vadd.s32 %v901_v50, %v900_v46 }
 0x211   :  { %s4116_s11 = spop %4115 }
 0x212   :  { %4139 = vpush %v854_v51  ;;  %v878_v54 = vrot.slane %v877_v52, 1  ;;  %v903_v55 = vrot.slane %v902_v53, 1  ;;  %p906_p4 = scmp.lt.s32.totalorder %s4116_s11, 102 }
 0x214   :  { %v879_v56 = vadd.s32 %v878_v54, %v877_v52  ;;  %v904_v57 = vadd.s32 %v903_v55, %v902_v53  ;;  %s907_s18 = scalar_select %p906_p4, 1, 0 }
 0x215   :  { %s4118_s12 = spop %4117 }
 0x216   :  { %4141 = vpush %v879_v56  ;;  %p908_p3 = scmp.lt.s32.totalorder %s4118_s12, 102 }
 0x217   :  { %4143 = vpush %v904_v57 }
 0x218   :  { %s909_s16 = scalar_select %p908_p3, 1, 0 }
 0x21a   :  { %s910_s21 = sadd.s32 %s909_s16, %s907_s18 }
 0x223   :  { %s4120_s13 = spop %4119 }
 0x224   :  { %p911_p5 = scmp.lt.s32.totalorder %s4120_s13, 102  ;;  %s4122_s14 = spop %4121 }
 0x225   :  { %p914_p6 = scmp.lt.s32.totalorder %s4122_s14, 102 }
 0x226   :  { %s912_s20 = scalar_select %p911_p5, 1, 0 }
 0x227   :  { %s4124_s19 = spop %4123 }
 0x228   :  { %p917_p7 = scmp.lt.s32.totalorder %s4124_s19, 102  ;;  %s913_s26 = sadd.s32 %s912_s20, %s910_s21 }
 0x229   :  { %s915_s24 = scalar_select %p914_p6, 1, 0 }
 0x22a   :  { %s918_s27 = scalar_select %p917_p7, 1, 0 }
 0x22b   :  { %s4126_s22 = spop %4125  ;;  %s916_s5 = sadd.s32 %s915_s24, %s913_s26 }
 0x22c   :  { %p920_p8 = scmp.lt.s32.totalorder %s4126_s22, 102  ;;  %s919_s7 = sadd.s32 %s918_s27, %s916_s5 }
 0x22e   :  { %s921_s29 = scalar_select %p920_p8, 1, 0 }
 0x22f   :  { %s4128_s23 = spop %4127 }
 0x230   :  { %s4130_s25 = spop %4129  ;;  %p923_p9 = scmp.lt.s32.totalorder %s4128_s23, 102 }
 0x231   :  { %p926_p10 = scmp.lt.s32.totalorder %s4130_s25, 102  ;;  %s922_s9 = sadd.s32 %s921_s29, %s919_s7 }
 0x232   :  { %s924_s30 = scalar_select %p923_p9, 1, 0 }
 0x233   :  { %s4132_s28 = spop %4131 }
 0x234   :  { %p929_p11 = scmp.lt.s32.totalorder %s4132_s28, 102  ;;  %s925_s10 = sadd.s32 %s924_s30, %s922_s9 }
 0x235   :  { %s927_s4 = scalar_select %p926_p10, 1, 0 }
 0x236   :  { %s930_s8 = scalar_select %p929_p11, 1, 0 }
 0x237   :  { %s928_s14 = sadd.s32 %s927_s4, %s925_s10 }
 0x238   :  { %s4134_s3 = spop %4133  ;;  %s931_s18 = sadd.s32 %s930_s8, %s928_s14 }
 0x239   :  { %p932_p12 = scmp.lt.s32.totalorder %s4134_s3, 102 }
 0x23b   :  { %s4136_s6 = spop %4135 }
 0x23c   :  { %p935_p13 = scmp.lt.s32.totalorder %s4136_s6, 102 }
 0x23d   :  { %s933_s12 = scalar_select %p932_p12, 1, 0 }
 0x23e   :  { %s936_s13 = scalar_select %p935_p13, 1, 0 }
 0x23f   :  { %s934_s21 = sadd.s32 %s933_s12, %s931_s18 }
 0x240   :  { %s4138_s11 = spop %4137  ;;  %s937_s23 = sadd.s32 %s936_s13, %s934_s21 }
 0x241   :  { %p938_p0 = scmp.lt.s32.totalorder %s4138_s11, 102 }
 0x243   :  { %s4140_s16 = spop %4139 }
 0x244   :  { %p941_p1 = scmp.lt.s32.totalorder %s4140_s16, 102 }
 0x245   :  { %s939_s19 = scalar_select %p938_p0, 1, 0 }
 0x246   :  { %s942_s20 = scalar_select %p941_p1, 1, 0 }
 0x247   :  { %s4142_s22 = spop %4141  ;;  %s940_s24 = sadd.s32 %s939_s19, %s937_s23 }
 0x248   :  { %p944_p2 = scmp.lt.s32.totalorder %s4142_s22, 102  ;;  %s4144_s25 = spop %4143 }
 0x249   :  { %s943_s27 = sadd.s32 %s942_s20, %s940_s24  ;;  %p947_p3 = scmp.lt.s32.totalorder %s4144_s25, 102 }
 0x24a   :  { %s945_s26 = scalar_select %p944_p2, 1, 0 }
 0x24b   :  { %s948_s29 = scalar_select %p947_p3, 1, 0 }
 0x24c   :  { %s946_s28 = sadd.s32 %s945_s26, %s943_s27 }
 0x24d   :  { %s949_s30 = sadd.s32 %s948_s29, %s946_s28 }
 0x24e   :  { %s950_s3 = sadd.s32 1, %s949_s30  ;;  %s956_s4 = smul.u32 %s949_s30, %s4423_s1 }
 0x24f   :  { %s951_s5 = smul.u32 %s950_s3, %s4423_s1  ;;  %p961_p4 = scmp.gt.s32.totalorder %s949_s30, 0 }
 0x250   :  { %s953_s6 = smul.u32 %s950_s3, %s4425_s17  ;;  %s957_s7 = sadd.s32 %s956_s4, %s5348_s15 }
 0x251   :  { %s952_s8 = sadd.s32 %s951_s5, %s5348_s15  ;;  %s958_s9 = smul.u32 %s949_s30, %s4425_s17 }
 0x252   :  { %s954_s10 = sshra.s32 %s953_s6, 4 }
 0x253   :  { %s959_s11 = sshra.s32 %s958_s9, 4  ;;  %s955_s12 = sadd.s32 %s954_s10, %s952_s8 }
 0x254   :  { %s960_s13 = sadd.s32 %s959_s11, %s957_s7 }
 0x255   :  { %s962_s14 = scalar_select %p961_p4, 1, 0 }
 0x257   :  { %s963_s16 = sadd.s32 %s962_s14, %s960_s13 }
 0x258   :  { %p964_p5 = scmp.lt.s32.totalorder %s963_s16, %s955_s12 }
 0x25a   :  { %s5350_s16 = smov (!%p964_p5, %s963_s16), %s955_s12 }
 0x25b   :  { %s966_s18 = ssub.s32 %s955_s12, %s5350_s16 }
 0x25c   :  { %s4553_s19 = sshra.s32 %s966_s18, 4  ;;  %s4555_s15 = sand.u32 15, %s966_s18 }
 0x25d   :  { %s969_s1 = sadd.s32 %s4553_s19, %s5350_s16  ;;  %s970_s17 = sshra.s32 %s4555_s15, 4 }
 0x25e   :  { %s971_s20 = sadd.s32 %s970_s17, %s969_s1  ;;  %s4049_s21 = sshll.u32 %s4553_s19, 1 }
 0x25f   :  { %v1042_v58 = vstv %s971_s20  ;;  %s973_s22 = sadd.s32 %s4049_s21, %s5350_s16  ;;  %s4050_s23 = sshll.u32 %s4555_s15, 1 }
 0x260   :  { %vm1043_vm14 = vcmp.lt.s32.totalorder %v4356_v19, %v1042_v58  ;;  %vm1044_vm15 = vcmp.lt.s32.totalorder %v4358_v20, %v1042_v58  ;;  %s975_s24 = sshra.s32 %s4050_s23, 4  ;;  %s4051_s25 = sshll.u32 %s4553_s19, 2 }
 0x261   :  { %v1045_v59 = vsel %vm1043_vm14, 1, %v4328_v21  ;;  %v1046_v60 = vsel %vm1044_vm15, 1, %v4328_v21  ;;  %s976_s26 = sadd.s32 %s975_s24, %s973_s22  ;;  %s983_s27 = sadd.s32 %s4051_s25, %s5350_s16 }
 0x262   :  { %v1047_v61 = vadd.s32 %v1046_v60, %v1045_v59  ;;  %v1067_v62 = vstv %s976_s26  ;;  %s4052_s28 = sshll.u32 %s4555_s15, 2  ;;  %s4053_s29 = sshll.u32 %s4553_s19, 3 }
 0x263   :  { %vm1068_vm0 = vcmp.lt.s32.totalorder %v4356_v19, %v1067_v62  ;;  %vm1069_vm1 = vcmp.lt.s32.totalorder %v4358_v20, %v1067_v62  ;;  %s985_s30 = sshra.s32 %s4052_s28, 4  ;;  %s1003_s3 = sadd.s32 %s4053_s29, %s5350_s16 }
 0x264   :  { %v1049_v63 = vshrl.u32 %v1047_v61, 16  ;;  %v1048_v0 = vand.u32 65535, %v1047_v61  ;;  %v1070_v1 = vsel %vm1068_vm0, 1, %v4328_v21  ;;  %v1071_v2 = vsel %vm1069_vm1, 1, %v4328_v21  ;;  %s986_s4 = sadd.s32 %s985_s30, %s983_s27  ;;  %s4054_s5 = sshll.u32 %s4555_s15, 3 }
 0x265   :  { %v1072_v3 = vadd.s32 %v1071_v2, %v1070_v1  ;;  %v1117_v4 = vstv %s986_s4  ;;  %s1005_s6 = sshra.s32 %s4054_s5, 4  ;;  %s977_s7 = smul.u32 3, %s4553_s19 }
 0x266   :  { %v1051_v5 = vcvt.s32.f32 %v1049_v63  ;;  %v1050_v6 = vcvt.s32.f32 %v1048_v0  ;;  %vm1118_vm2 = vcmp.lt.s32.totalorder %v4356_v19, %v1117_v4  ;;  %vm1119_vm3 = vcmp.lt.s32.totalorder %v4358_v20, %v1117_v4  ;;  %s1006_s8 = sadd.s32 %s1005_s6, %s1003_s3  ;;  %s979_s9 = smul.u32 3, %s4555_s15 }
 0x267   :  { %v1073_v7 = vand.u32 65535, %v1072_v3  ;;  %v1074_v8 = vshrl.u32 %v1072_v3, 16  ;;  %v1120_v9 = vsel %vm1118_vm2, 1, %v4328_v21  ;;  %v1121_v10 = vsel %vm1119_vm3, 1, %v4328_v21  ;;  %s978_s10 = sadd.s32 %s977_s7, %s5350_s16  ;;  %s987_s11 = smul.u32 5, %s4553_s19 }
 0x268   :  { %1054 = vadd.xlane.f32.xlu0 %v1051_v5  ;;  %1052 = vadd.xlane.f32.xlu1 %v1050_v6  ;;  %v1122_v11 = vadd.s32 %v1121_v10, %v1120_v9  ;;  %v1217_v12 = vstv %s1006_s8  ;;  %s980_s12 = sshra.s32 %s979_s9, 4  ;;  %s989_s13 = smul.u32 5, %s4555_s15 }
 0x269   :  { %v1075_v13 = vcvt.s32.f32 %v1073_v7  ;;  %v1076_v14 = vcvt.s32.f32 %v1074_v8  ;;  %vm1218_vm4 = vcmp.lt.s32.totalorder %v4356_v19, %v1217_v12  ;;  %vm1219_vm5 = vcmp.lt.s32.totalorder %v4358_v20, %v1217_v12  ;;  %s981_s14 = sadd.s32 %s980_s12, %s978_s10  ;;  %s988_s18 = sadd.s32 %s987_s11, %s5350_s16 }
 0x26a   :  { %v1123_v15 = vand.u32 65535, %v1122_v11  ;;  %v1124_v16 = vshrl.u32 %v1122_v11, 16  ;;  %v1220_v17 = vsel %vm1218_vm4, 1, %v4328_v21  ;;  %v1221_v18 = vsel %vm1219_vm5, 1, %v4328_v21  ;;  %s990_s1 = sshra.s32 %s989_s13, 4  ;;  %s992_s17 = smul.u32 6, %s4553_s19 }
 0x26b   :  { %v1222_v22 = vadd.s32 %v1221_v18, %v1220_v17  ;;  %v1092_v23 = vstv %s981_s14  ;;  %s991_s20 = sadd.s32 %s990_s1, %s988_s18  ;;  %s994_s21 = smul.u32 6, %s4555_s15 }
 0x26c   :  { %1077 = vadd.xlane.f32.xlu0 %v1075_v13  ;;  %1079 = vadd.xlane.f32.xlu1 %v1076_v14  ;;  %vm1093_vm6 = vcmp.lt.s32.totalorder %v4356_v19, %v1092_v23  ;;  %vm1094_vm7 = vcmp.lt.s32.totalorder %v4358_v20, %v1092_v23  ;;  %s993_s22 = sadd.s32 %s992_s17, %s5350_s16  ;;  %s997_s23 = smul.u32 7, %s4553_s19  ;;  %v1125_v24 = vcvt.s32.f32 %v1123_v15  ;;  %v1126_v25 = vcvt.s32.f32 %v1124_v16 }
 0x26d   :  { %v1095_v26 = vsel %vm1093_vm6, 1, %v4328_v21  ;;  %v1096_v27 = vsel %vm1094_vm7, 1, %v4328_v21  ;;  %s995_s24 = sshra.s32 %s994_s21, 4  ;;  %s999_s25 = smul.u32 7, %s4555_s15  ;;  %v1223_v28 = vand.u32 65535, %v1222_v22  ;;  %v1224_v29 = vshrl.u32 %v1222_v22, 16 }
 0x26e   :  { %v1097_v30 = vadd.s32 %v1096_v27, %v1095_v26  ;;  %v1142_v31 = vstv %s991_s20  ;;  %s996_s26 = sadd.s32 %s995_s24, %s993_s22  ;;  %s998_s27 = sadd.s32 %s997_s23, %s5350_s16 }
 0x26f   :  { %vm1143_vm8 = vcmp.lt.s32.totalorder %v4356_v19, %v1142_v31  ;;  %vm1144_vm9 = vcmp.lt.s32.totalorder %v4358_v20, %v1142_v31  ;;  %s1000_s28 = sshra.s32 %s999_s25, 4  ;;  %s1007_s29 = smul.u32 9, %s4553_s19  ;;  %v1167_v36 = vstv %s996_s26  ;;  %v1225_v38 = vcvt.s32.f32 %v1223_v28 }
 0x270   :  { %1127 = vadd.xlane.f32.xlu0 %v1125_v24  ;;  %1129 = vadd.xlane.f32.xlu1 %v1126_v25  ;;  %v1145_v32 = vsel %vm1143_vm8, 1, %v4328_v21  ;;  %v1146_v33 = vsel %vm1144_vm9, 1, %v4328_v21  ;;  %s1001_s30 = sadd.s32 %s1000_s28, %s998_s27  ;;  %s1009_s3 = smul.u32 9, %s4555_s15  ;;  %v1099_v34 = vshrl.u32 %v1097_v30, 16  ;;  %v1226_v39 = vcvt.s32.f32 %v1224_v29 }
 0x271   :  { %v4607_v35 = vadd.s32 %v1146_v33, %v1145_v32  ;;  %v1192_v37 = vstv %s1001_s30  ;;  %s1008_s4 = sadd.s32 %s1007_s29, %s5350_s16  ;;  %s1012_s5 = smul.u32 10, %s4553_s19  ;;  %vm1168_vm10 = vcmp.lt.s32.totalorder %v4356_v19, %v1167_v36  ;;  %vm1169_vm11 = vcmp.lt.s32.totalorder %v4358_v20, %v1167_v36 }
 0x272   :  { %s1010_s6 = sshra.s32 %s1009_s3, 4  ;;  %s1014_s7 = smul.u32 10, %s4555_s15  ;;  %v1170_v41 = vsel %vm1168_vm10, 1, %v4328_v21  ;;  %v1171_v42 = vsel %vm1169_vm11, 1, %v4328_v21  ;;  %vm1193_vm12 = vcmp.lt.s32.totalorder %v4356_v19, %v1192_v37  ;;  %vm1194_vm13 = vcmp.lt.s32.totalorder %v4358_v20, %v1192_v37 }
 0x273   :  { %v1149_v40 = vshrl.u32 %v4607_v35, 16  ;;  %s1011_s8 = sadd.s32 %s1010_s6, %s1008_s4  ;;  %s1013_s9 = sadd.s32 %s1012_s5, %s5350_s16  ;;  %v4618_v43 = vadd.s32 %v1171_v42, %v1170_v41  ;;  %v1101_v45 = vcvt.s32.f32 %v1099_v34  ;;  %v1098_v46 = vand.u32 65535, %v1097_v30 }
 0x274   :  { %1227 = vadd.xlane.f32.xlu0 %v1225_v38  ;;  %1229 = vadd.xlane.f32.xlu1 %v1226_v39  ;;  %v1242_v44 = vstv %s1011_s8  ;;  %s1015_s10 = sshra.s32 %s1014_s7, 4  ;;  %s1017_s11 = smul.u32 11, %s4553_s19  ;;  %v1195_v47 = vsel %vm1193_vm12, 1, %v4328_v21  ;;  %v1196_v48 = vsel %vm1194_vm13, 1, %v4328_v21  ;;  %v1148_v56 = vand.u32 65535, %v4607_v35 }
 0x275   :  { %s1016_s12 = sadd.s32 %s1015_s10, %s1013_s9  ;;  %s1019_s13 = smul.u32 11, %s4555_s15  ;;  %v1151_v49 = vcvt.s32.f32 %v1149_v40  ;;  %v1174_v50 = vshrl.u32 %v4618_v43, 16  ;;  %v4627_v51 = vadd.s32 %v1196_v48, %v1195_v47  ;;  %vm1243_vm14 = vcmp.lt.s32.totalorder %v4356_v19, %v1242_v44 }
 0x276   :  { %s1018_s14 = sadd.s32 %s1017_s11, %s5350_s16  ;;  %s1022_s18 = smul.u32 12, %s4553_s19  ;;  %vm1244_vm15 = vcmp.lt.s32.totalorder %v4358_v20, %v1242_v44  ;;  %v1245_v52 = vsel %vm1243_vm14, 1, %v4328_v21  ;;  %v1267_v53 = vstv %s1016_s12  ;;  %v1100_v55 = vcvt.s32.f32 %v1098_v46 }
 0x277   :  { %s1020_s1 = sshra.s32 %s1019_s13, 4  ;;  %s1024_s17 = smul.u32 12, %s4555_s15  ;;  %v1246_v54 = vsel %vm1244_vm15, 1, %v4328_v21  ;;  %vm1268_vm0 = vcmp.lt.s32.totalorder %v4356_v19, %v1267_v53  ;;  %vm1269_vm1 = vcmp.lt.s32.totalorder %v4358_v20, %v1267_v53  ;;  %v1176_v57 = vcvt.s32.f32 %v1174_v50 }
 0x278   :  { %1104 = vadd.xlane.f32.xlu0 %v1101_v45  ;;  %1154 = vadd.xlane.f32.xlu1 %v1151_v49  ;;  %s1021_s20 = sadd.s32 %s1020_s1, %s1018_s14  ;;  %s1023_s21 = sadd.s32 %s1022_s18, %s5350_s16  ;;  %v1199_v58 = vshrl.u32 %v4627_v51, 16  ;;  %v1247_v59 = vadd.s32 %v1246_v54, %v1245_v52  ;;  %v1270_v61 = vsel %vm1268_vm0, 1, %v4328_v21  ;;  %v1271_v62 = vsel %vm1269_vm1, 1, %v4328_v21 }
 0x279   :  { %s1025_s22 = sshra.s32 %s1024_s17, 4  ;;  %s1027_s23 = smul.u32 13, %s4553_s19  ;;  %v1292_v60 = vstv %s1021_s20  ;;  %v1150_v63 = vcvt.s32.f32 %v1148_v56  ;;  %v1173_v2 = vand.u32 65535, %v4618_v43  ;;  %v1272_v4 = vadd.s32 %v1271_v62, %v1270_v61 }
 0x27a   :  { %s1026_s24 = sadd.s32 %s1025_s22, %s1023_s21  ;;  %s1029_s25 = smul.u32 13, %s4555_s15  ;;  %vm1293_vm2 = vcmp.lt.s32.totalorder %v4356_v19, %v1292_v60  ;;  %vm1294_vm3 = vcmp.lt.s32.totalorder %v4358_v20, %v1292_v60  ;;  %v1201_v1 = vcvt.s32.f32 %v1199_v58  ;;  %v1249_v3 = vshrl.u32 %v1247_v59, 16 }
 0x27b   :  { %s1028_s26 = sadd.s32 %s1027_s23, %s5350_s16  ;;  %s1032_s27 = smul.u32 14, %s4553_s19  ;;  %v1317_v0 = vstv %s1026_s24  ;;  %v1295_v5 = vsel %vm1293_vm2, 1, %v4328_v21  ;;  %v1296_v6 = vsel %vm1294_vm3, 1, %v4328_v21  ;;  %v1198_v7 = vand.u32 65535, %v4627_v51 }
 0x27c   :  { %1102 = vadd.xlane.f32.xlu0 %v1100_v55  ;;  %1179 = vadd.xlane.f32.xlu1 %v1176_v57  ;;  %s1030_s28 = sshra.s32 %s1029_s25, 4  ;;  %s1034_s29 = smul.u32 14, %s4555_s15  ;;  %vm1318_vm4 = vcmp.lt.s32.totalorder %v4356_v19, %v1317_v0  ;;  %vm1319_vm5 = vcmp.lt.s32.totalorder %v4358_v20, %v1317_v0  ;;  %v1175_v9 = vcvt.s32.f32 %v1173_v2  ;;  %v1251_v10 = vcvt.s32.f32 %v1249_v3 }
 0x27d   :  { %s1031_s30 = sadd.s32 %s1030_s28, %s1028_s26  ;;  %s1033_s3 = sadd.s32 %s1032_s27, %s5350_s16  ;;  %v1274_v11 = vshrl.u32 %v1272_v4, 16  ;;  %v1297_v12 = vadd.s32 %v1296_v6, %v1295_v5  ;;  %v1320_v13 = vsel %vm1318_vm4, 1, %v4328_v21  ;;  %v1321_v14 = vsel %vm1319_vm5, 1, %v4328_v21 }
 0x27e   :  { %s1037_s4 = smul.u32 15, %s4553_s19  ;;  %s1035_s5 = sshra.s32 %s1034_s29, 4  ;;  %v1342_v8 = vstv %s1031_s30  ;;  %v1200_v15 = vcvt.s32.f32 %v1198_v7  ;;  %v1248_v18 = vand.u32 65535, %v1247_v59  ;;  %v1322_v23 = vadd.s32 %v1321_v14, %v1320_v13 }
 0x27f   :  { %s1039_s6 = smul.u32 15, %s4555_s15  ;;  %s1036_s7 = sadd.s32 %s1035_s5, %s1033_s3  ;;  %vm1343_vm6 = vcmp.lt.s32.totalorder %v4356_v19, %v1342_v8  ;;  %vm1344_vm7 = vcmp.lt.s32.totalorder %v4358_v20, %v1342_v8  ;;  %v1276_v17 = vcvt.s32.f32 %v1274_v11  ;;  %v1299_v22 = vshrl.u32 %v1297_v12, 16 }
 0x280   :  { %1152 = vadd.xlane.f32.xlu0 %v1150_v63  ;;  %1204 = vadd.xlane.f32.xlu1 %v1201_v1  ;;  %s1038_s8 = sadd.s32 %s1037_s4, %s5350_s16  ;;  %v1367_v16 = vstv %s1036_s7  ;;  %v1345_v24 = vsel %vm1343_vm6, 1, %v4328_v21  ;;  %v1346_v25 = vsel %vm1344_vm7, 1, %v4328_v21  ;;  %v1273_v26 = vand.u32 65535, %v1272_v4 }
 0x281   :  { %s1040_s9 = sshra.s32 %s1039_s6, 4  ;;  %vm1368_vm8 = vcmp.lt.s32.totalorder %v4356_v19, %v1367_v16  ;;  %vm1369_vm9 = vcmp.lt.s32.totalorder %v4358_v20, %v1367_v16  ;;  %v1250_v28 = vcvt.s32.f32 %v1248_v18  ;;  %v1301_v29 = vcvt.s32.f32 %v1299_v22 }
 0x282   :  { %s1041_s10 = sadd.s32 %s1040_s9, %s1038_s8  ;;  %v1324_v30 = vshrl.u32 %v1322_v23, 16  ;;  %v1347_v31 = vadd.s32 %v1346_v25, %v1345_v24  ;;  %v1370_v32 = vsel %vm1368_vm8, 1, %v4328_v21  ;;  %v1371_v33 = vsel %vm1369_vm9, 1, %v4328_v21 }
 0x283   :  { %v1392_v27 = vstv %s1041_s10  ;;  %v1275_v34 = vcvt.s32.f32 %v1273_v26  ;;  %v1298_v36 = vand.u32 65535, %v1297_v12  ;;  %v1372_v38 = vadd.s32 %v1371_v33, %v1370_v32 }
 0x284   :  { %1177 = vadd.xlane.f32.xlu0 %v1175_v9  ;;  %1254 = vadd.xlane.f32.xlu1 %v1251_v10  ;;  %vm1393_vm10 = vcmp.lt.s32.totalorder %v4356_v19, %v1392_v27  ;;  %vm1394_vm11 = vcmp.lt.s32.totalorder %v4358_v20, %v1392_v27  ;;  %v1326_v35 = vcvt.s32.f32 %v1324_v30  ;;  %v1349_v37 = vshrl.u32 %v1347_v31, 16 }
 0x285   :  { %v1395_v39 = vsel %vm1393_vm10, 1, %v4328_v21  ;;  %v1396_v40 = vsel %vm1394_vm11, 1, %v4328_v21  ;;  %v1323_v41 = vand.u32 65535, %v1322_v23  ;;  %v1300_v42 = vcvt.s32.f32 %v1298_v36 }
 0x286   :  { %v1351_v43 = vcvt.s32.f32 %v1349_v37  ;;  %v1374_v44 = vshrl.u32 %v1372_v38, 16  ;;  %v1397_v45 = vadd.s32 %v1396_v40, %v1395_v39  ;;  %v1348_v48 = vand.u32 65535, %v1347_v31 }
 0x287   :  { %v1325_v46 = vcvt.s32.f32 %v1323_v41  ;;  %v1373_v52 = vand.u32 65535, %v1372_v38 }
 0x288   :  { %1202 = vadd.xlane.f32.xlu0 %v1200_v15  ;;  %1279 = vadd.xlane.f32.xlu1 %v1276_v17  ;;  %v1376_v47 = vcvt.s32.f32 %v1374_v44  ;;  %v1399_v49 = vshrl.u32 %v1397_v45, 16  ;;  %v1350_v50 = vcvt.s32.f32 %v1348_v48  ;;  %v1398_v53 = vand.u32 65535, %v1397_v45 }
 0x289   :  { %v1375_v54 = vcvt.s32.f32 %v1373_v52 }
 0x28a   :  { %v1401_v51 = vcvt.s32.f32 %v1399_v49  ;;  %v1400_v55 = vcvt.s32.f32 %v1398_v53 }
 0x28c   :  { %1252 = vadd.xlane.f32.xlu0 %v1250_v28  ;;  %1304 = vadd.xlane.f32.xlu1 %v1301_v29 }
 0x290   :  { %1277 = vadd.xlane.f32.xlu0 %v1275_v34  ;;  %1329 = vadd.xlane.f32.xlu1 %v1326_v35 }
 0x294   :  { %1302 = vadd.xlane.f32.xlu0 %v1300_v42  ;;  %1354 = vadd.xlane.f32.xlu1 %v1351_v43 }
 0x298   :  { %1327 = vadd.xlane.f32.xlu0 %v1325_v46  ;;  %1379 = vadd.xlane.f32.xlu1 %v1376_v47 }
 0x29c   :  { %1352 = vadd.xlane.f32.xlu0 %v1350_v50  ;;  %1404 = vadd.xlane.f32.xlu1 %v1401_v51 }
 0x2a0   :  { %1377 = vadd.xlane.f32.xlu0 %v1375_v54  ;;  %1402 = vadd.xlane.f32.xlu1 %v1400_v55 }
 0x2f5   :  { %v1055_v56 = vpop.xlane.xlu0 %1054  ;;  %v1053_v57 = vpop.xlane.xlu1 %1052 }
 0x2f6   :  { %v1057_v58 = vcvt.f32.s32 %v1055_v56  ;;  %v1056_v60 = vcvt.f32.s32 %v1053_v57 }
 0x2f8   :  { %v1058_v59 = vshll.u32 %v1057_v58, 16 }
 0x2f9   :  { %v1078_v61 = vpop.xlane.xlu0 %1077  ;;  %v1080_v62 = vpop.xlane.xlu1 %1079 }
 0x2fa   :  { %v1059_v63 = vadd.s32 %v1058_v59, %v1056_v60  ;;  %v1082_v0 = vcvt.f32.s32 %v1080_v62  ;;  %v1081_v2 = vcvt.f32.s32 %v1078_v61 }
 0x2fc   :  { %v1060_v1 = vrot.slane %v1059_v63, 4  ;;  %v1083_v3 = vshll.u32 %v1082_v0, 16 }
 0x2fd   :  { %v1128_v4 = vpop.xlane.xlu0 %1127  ;;  %v1130_v5 = vpop.xlane.xlu1 %1129 }
 0x2fe   :  { %v1084_v6 = vadd.s32 %v1083_v3, %v1081_v2  ;;  %v1132_v7 = vcvt.f32.s32 %v1130_v5  ;;  %v1061_v8 = vadd.s32 %v1060_v1, %v1059_v63  ;;  %v1131_v10 = vcvt.f32.s32 %v1128_v4 }
 0x300   :  { %v1085_v9 = vrot.slane %v1084_v6, 4  ;;  %v1133_v11 = vshll.u32 %v1132_v7, 16  ;;  %v1062_v12 = vrot.slane %v1061_v8, 2 }
 0x301   :  { %v1228_v13 = vpop.xlane.xlu0 %1227  ;;  %v1230_v14 = vpop.xlane.xlu1 %1229 }
 0x302   :  { %v1134_v15 = vadd.s32 %v1133_v11, %v1131_v10  ;;  %v1063_v16 = vadd.s32 %v1062_v12, %v1061_v8  ;;  %v1086_v17 = vadd.s32 %v1085_v9, %v1084_v6  ;;  %v1232_v23 = vcvt.f32.s32 %v1230_v14 }
 0x303   :  { %v1231_v38 = vcvt.f32.s32 %v1228_v13 }
 0x304   :  { %v1064_v18 = vrot.slane %v1063_v16, 1  ;;  %v1135_v22 = vrot.slane %v1134_v15, 4  ;;  %v1087_v26 = vrot.slane %v1086_v17, 2  ;;  %v1233_v30 = vshll.u32 %v1232_v23, 16 }
 0x305   :  { %v1105_v24 = vpop.xlane.xlu0 %1104  ;;  %v1155_v25 = vpop.xlane.xlu1 %1154 }
 0x306   :  { %v1107_v27 = vcvt.f32.s32 %v1105_v24  ;;  %v1065_v28 = vadd.s32 %v1064_v18, %v1063_v16  ;;  %v1088_v29 = vadd.s32 %v1087_v26, %v1086_v17  ;;  %v1136_v34 = vadd.s32 %v1135_v22, %v1134_v15 }
 0x307   :  { %v1157_v36 = vcvt.f32.s32 %v1155_v25  ;;  %v1234_v41 = vadd.s32 %v1233_v30, %v1231_v38 }
 0x308   :  { %4145 = vpush %v1065_v28  ;;  %v1089_v33 = vrot.slane %v1088_v29, 1  ;;  %v1108_v35 = vshll.u32 %v1107_v27, 16  ;;  %v1137_v45 = vrot.slane %v1136_v34, 2 }
 0x309   :  { %v1103_v31 = vpop.xlane.xlu0 %1102  ;;  %v1180_v32 = vpop.xlane.xlu1 %1179  ;;  %v1158_v46 = vshll.u32 %v1157_v36, 16  ;;  %v1235_v51 = vrot.slane %v1234_v41, 4 }
 0x30a   :  { %v1106_v37 = vcvt.f32.s32 %v1103_v31  ;;  %v1090_v39 = vadd.s32 %v1089_v33, %v1088_v29  ;;  %v1182_v42 = vcvt.f32.s32 %v1180_v32  ;;  %v1138_v55 = vadd.s32 %v1137_v45, %v1136_v34 }
 0x30b   :  { %v1236_v3 = vadd.s32 %v1235_v51, %v1234_v41 }
 0x30c   :  { %v1109_v40 = vadd.s32 %v1108_v35, %v1106_v37  ;;  %4147 = vpush %v1090_v39  ;;  %v1183_v52 = vshll.u32 %v1182_v42, 16  ;;  %v1139_v2 = vrot.slane %v1138_v55, 1 }
 0x30d   :  { %v1153_v43 = vpop.xlane.xlu0 %1152  ;;  %v1205_v44 = vpop.xlane.xlu1 %1204  ;;  %v1237_v17 = vrot.slane %v1236_v3, 2 }
 0x30e   :  { %v1110_v47 = vrot.slane %v1109_v40, 4  ;;  %v1156_v48 = vcvt.f32.s32 %v1153_v43  ;;  %v1207_v57 = vcvt.f32.s32 %v1205_v44  ;;  %v1140_v15 = vadd.s32 %v1139_v2, %v1138_v55 }
 0x30f   :  { %v1238_v33 = vadd.s32 %v1237_v17, %v1236_v3 }
 0x310   :  { %v1159_v49 = vadd.s32 %v1158_v46, %v1156_v48  ;;  %v1111_v50 = vadd.s32 %v1110_v47, %v1109_v40  ;;  %v1208_v4 = vshll.u32 %v1207_v57, 16 }
 0x311   :  { %v1178_v53 = vpop.xlane.xlu0 %1177  ;;  %v1255_v54 = vpop.xlane.xlu1 %1254  ;;  %v1239_v46 = vrot.slane %v1238_v33, 1 }
 0x312   :  { %v1160_v56 = vrot.slane %v1159_v49, 4  ;;  %v1181_v58 = vcvt.f32.s32 %v1178_v53  ;;  %v1112_v59 = vrot.slane %v1111_v50, 2  ;;  %v1257_v63 = vcvt.f32.s32 %v1255_v54 }
 0x314   :  { %v1184_v60 = vadd.s32 %v1183_v52, %v1181_v58  ;;  %v1113_v61 = vadd.s32 %v1112_v59, %v1111_v50  ;;  %v1161_v62 = vadd.s32 %v1160_v56, %v1159_v49  ;;  %v1258_v12 = vshll.u32 %v1257_v63, 16 }
 0x315   :  { %v1203_v0 = vpop.xlane.xlu0 %1202  ;;  %v1280_v1 = vpop.xlane.xlu1 %1279  ;;  %v1240_v59 = vadd.s32 %v1239_v46, %v1238_v33 }
 0x316   :  { %v1185_v5 = vrot.slane %v1184_v60, 4  ;;  %v1206_v6 = vcvt.f32.s32 %v1203_v0  ;;  %v1114_v7 = vrot.slane %v1113_v61, 1  ;;  %v1162_v8 = vrot.slane %v1161_v62, 2 }
 0x317   :  { %v1282_v22 = vcvt.f32.s32 %v1280_v1 }
 0x318   :  { %v1209_v9 = vadd.s32 %v1208_v4, %v1206_v6  ;;  %v1115_v10 = vadd.s32 %v1114_v7, %v1113_v61  ;;  %v1186_v11 = vadd.s32 %v1185_v5, %v1184_v60  ;;  %v1163_v16 = vadd.s32 %v1162_v8, %v1161_v62 }
 0x319   :  { %v1253_v13 = vpop.xlane.xlu0 %1252  ;;  %v1305_v14 = vpop.xlane.xlu1 %1304  ;;  %v1283_v34 = vshll.u32 %v1282_v22, 16 }
 0x31a   :  { %v1210_v18 = vrot.slane %v1209_v9, 4  ;;  %v1256_v23 = vcvt.f32.s32 %v1253_v13  ;;  %4149 = vpush %v1115_v10  ;;  %v1187_v24 = vrot.slane %v1186_v11, 2  ;;  %v1164_v25 = vrot.slane %v1163_v16, 1 }
 0x31b   :  { %4151 = vpush %v1140_v15  ;;  %v1307_v29 = vcvt.f32.s32 %v1305_v14 }
 0x31c   :  { %v1259_v26 = vadd.s32 %v1258_v12, %v1256_v23  ;;  %v1188_v27 = vadd.s32 %v1187_v24, %v1186_v11  ;;  %v1211_v28 = vadd.s32 %v1210_v18, %v1209_v9  ;;  %v1165_v32 = vadd.s32 %v1164_v25, %v1163_v16 }
 0x31d   :  { %v1278_v30 = vpop.xlane.xlu0 %1277  ;;  %v1330_v31 = vpop.xlane.xlu1 %1329  ;;  %v1308_v42 = vshll.u32 %v1307_v29, 16 }
 0x31e   :  { %v1260_v35 = vrot.slane %v1259_v26, 4  ;;  %v1281_v36 = vcvt.f32.s32 %v1278_v30  ;;  %v1189_v37 = vrot.slane %v1188_v27, 1  ;;  %4153 = vpush %v1165_v32  ;;  %v1212_v38 = vrot.slane %v1211_v28, 2 }
 0x31f   :  { %v1332_v48 = vcvt.f32.s32 %v1330_v31 }
 0x320   :  { %v1284_v39 = vadd.s32 %v1283_v34, %v1281_v36  ;;  %v1190_v40 = vadd.s32 %v1189_v37, %v1188_v27  ;;  %v1261_v41 = vadd.s32 %v1260_v35, %v1259_v26  ;;  %v1213_v45 = vadd.s32 %v1212_v38, %v1211_v28 }
 0x321   :  { %v1303_v43 = vpop.xlane.xlu0 %1302  ;;  %v1355_v44 = vpop.xlane.xlu1 %1354  ;;  %v1333_v60 = vshll.u32 %v1332_v48, 16 }
 0x322   :  { %v1285_v47 = vrot.slane %v1284_v39, 4  ;;  %v1306_v49 = vcvt.f32.s32 %v1303_v43  ;;  %4155 = vpush %v1190_v40  ;;  %v1262_v50 = vrot.slane %v1261_v41, 2  ;;  %v1214_v51 = vrot.slane %v1213_v45, 1 }
 0x323   :  { %v1357_v55 = vcvt.f32.s32 %v1355_v44 }
 0x324   :  { %v1309_v52 = vadd.s32 %v1308_v42, %v1306_v49  ;;  %v1263_v53 = vadd.s32 %v1262_v50, %v1261_v41  ;;  %v1286_v54 = vadd.s32 %v1285_v47, %v1284_v39  ;;  %v1215_v58 = vadd.s32 %v1214_v51, %v1213_v45 }
 0x325   :  { %v1328_v56 = vpop.xlane.xlu0 %1327  ;;  %v1380_v57 = vpop.xlane.xlu1 %1379  ;;  %v1358_v4 = vshll.u32 %v1357_v55, 16 }
 0x326   :  { %v1310_v61 = vrot.slane %v1309_v52, 4  ;;  %v1331_v62 = vcvt.f32.s32 %v1328_v56  ;;  %v1264_v63 = vrot.slane %v1263_v53, 1  ;;  %4157 = vpush %v1215_v58  ;;  %v1287_v0 = vrot.slane %v1286_v54, 2 }
 0x327   :  { %4159 = vpush %v1240_v59  ;;  %v1382_v5 = vcvt.f32.s32 %v1380_v57 }
 0x328   :  { %v1334_v1 = vadd.s32 %v1333_v60, %v1331_v62  ;;  %v1265_v2 = vadd.s32 %v1264_v63, %v1263_v53  ;;  %v1311_v3 = vadd.s32 %v1310_v61, %v1309_v52  ;;  %v1288_v8 = vadd.s32 %v1287_v0, %v1286_v54 }
 0x329   :  { %v1353_v6 = vpop.xlane.xlu0 %1352  ;;  %v1405_v7 = vpop.xlane.xlu1 %1404  ;;  %v1383_v17 = vshll.u32 %v1382_v5, 16 }
 0x32a   :  { %v1335_v9 = vrot.slane %v1334_v1, 4  ;;  %v1356_v10 = vcvt.f32.s32 %v1353_v6  ;;  %v1407_v11 = vcvt.f32.s32 %v1405_v7  ;;  %4161 = vpush %v1265_v2  ;;  %v1312_v12 = vrot.slane %v1311_v3, 2 }
 0x32b   :  { %v1289_v13 = vrot.slane %v1288_v8, 1 }
 0x32c   :  { %v1359_v14 = vadd.s32 %v1358_v4, %v1356_v10  ;;  %v1313_v15 = vadd.s32 %v1312_v12, %v1311_v3  ;;  %v1336_v16 = vadd.s32 %v1335_v9, %v1334_v1  ;;  %v1408_v18 = vshll.u32 %v1407_v11, 16 }
 0x32d   :  { %v1378_v22 = vpop.xlane.xlu0 %1377  ;;  %v1403_v23 = vpop.xlane.xlu1 %1402  ;;  %v1290_v24 = vadd.s32 %v1289_v13, %v1288_v8 }
 0x32e   :  { %v1360_v25 = vrot.slane %v1359_v14, 4  ;;  %v1381_v26 = vcvt.f32.s32 %v1378_v22  ;;  %v1406_v27 = vcvt.f32.s32 %v1403_v23  ;;  %v1314_v28 = vrot.slane %v1313_v15, 1 }
 0x32f   :  { %4163 = vpush %v1290_v24  ;;  %v1337_v29 = vrot.slane %v1336_v16, 2 }
 0x330   :  { %v1384_v30 = vadd.s32 %v1383_v17, %v1381_v26  ;;  %v1409_v31 = vadd.s32 %v1408_v18, %v1406_v27  ;;  %v1315_v32 = vadd.s32 %v1314_v28, %v1313_v15  ;;  %v1361_v33 = vadd.s32 %v1360_v25, %v1359_v14 }
 0x331   :  { %v1338_v34 = vadd.s32 %v1337_v29, %v1336_v16 }
 0x332   :  { %v1385_v35 = vrot.slane %v1384_v30, 4  ;;  %v1410_v36 = vrot.slane %v1409_v31, 4  ;;  %4165 = vpush %v1315_v32  ;;  %v1362_v37 = vrot.slane %v1361_v33, 2 }
 0x333   :  { %v1339_v38 = vrot.slane %v1338_v34, 1 }
 0x334   :  { %v1363_v39 = vadd.s32 %v1362_v37, %v1361_v33  ;;  %v1386_v40 = vadd.s32 %v1385_v35, %v1384_v30  ;;  %v1411_v41 = vadd.s32 %v1410_v36, %v1409_v31 }
 0x335   :  { %v1340_v42 = vadd.s32 %v1339_v38, %v1338_v34 }
 0x336   :  { %v1364_v43 = vrot.slane %v1363_v39, 1  ;;  %v1387_v44 = vrot.slane %v1386_v40, 2  ;;  %v1412_v45 = vrot.slane %v1411_v41, 2 }
 0x337   :  { %4167 = vpush %v1340_v42 }
 0x338   :  { %v1365_v46 = vadd.s32 %v1364_v43, %v1363_v39  ;;  %v1388_v47 = vadd.s32 %v1387_v44, %v1386_v40  ;;  %v1413_v48 = vadd.s32 %v1412_v45, %v1411_v41 }
 0x339   :  { %s4146_s11 = spop %4145 }
 0x33a   :  { %4169 = vpush %v1365_v46  ;;  %v1389_v49 = vrot.slane %v1388_v47, 1  ;;  %v1414_v50 = vrot.slane %v1413_v48, 1  ;;  %p1417_p7 = scmp.lt.s32.totalorder %s4146_s11, 102 }
 0x33c   :  { %v1390_v51 = vadd.s32 %v1389_v49, %v1388_v47  ;;  %v1415_v52 = vadd.s32 %v1414_v50, %v1413_v48  ;;  %s1418_s1 = scalar_select %p1417_p7, 1, 0 }
 0x33d   :  { %s4148_s12 = spop %4147 }
 0x33e   :  { %4171 = vpush %v1390_v51  ;;  %p1419_p6 = scmp.lt.s32.totalorder %s4148_s12, 102 }
 0x33f   :  { %4173 = vpush %v1415_v52 }
 0x340   :  { %s1420_s18 = scalar_select %p1419_p6, 1, 0 }
 0x342   :  { %s1421_s21 = sadd.s32 %s1420_s18, %s1418_s1 }
 0x34b   :  { %s4150_s13 = spop %4149 }
 0x34c   :  { %p1422_p8 = scmp.lt.s32.totalorder %s4150_s13, 102  ;;  %s4152_s14 = spop %4151 }
 0x34d   :  { %p1425_p9 = scmp.lt.s32.totalorder %s4152_s14, 102 }
 0x34e   :  { %s1423_s20 = scalar_select %p1422_p8, 1, 0 }
 0x34f   :  { %s4154_s17 = spop %4153 }
 0x350   :  { %p1428_p10 = scmp.lt.s32.totalorder %s4154_s17, 102  ;;  %s1424_s26 = sadd.s32 %s1423_s20, %s1421_s21 }
 0x351   :  { %s1426_s24 = scalar_select %p1425_p9, 1, 0 }
 0x352   :  { %s1429_s27 = scalar_select %p1428_p10, 1, 0 }
 0x353   :  { %s4156_s22 = spop %4155  ;;  %s1427_s5 = sadd.s32 %s1426_s24, %s1424_s26 }
 0x354   :  { %p1431_p11 = scmp.lt.s32.totalorder %s4156_s22, 102  ;;  %s1430_s7 = sadd.s32 %s1429_s27, %s1427_s5 }
 0x356   :  { %s1432_s29 = scalar_select %p1431_p11, 1, 0 }
 0x357   :  { %s4158_s23 = spop %4157 }
 0x358   :  { %s4160_s25 = spop %4159  ;;  %p1434_p12 = scmp.lt.s32.totalorder %s4158_s23, 102 }
 0x359   :  { %p1437_p13 = scmp.lt.s32.totalorder %s4160_s25, 102  ;;  %s1433_s9 = sadd.s32 %s1432_s29, %s1430_s7 }
 0x35a   :  { %s1435_s30 = scalar_select %p1434_p12, 1, 0 }
 0x35b   :  { %s4162_s28 = spop %4161 }
 0x35c   :  { %p1440_p0 = scmp.lt.s32.totalorder %s4162_s28, 102  ;;  %s1436_s10 = sadd.s32 %s1435_s30, %s1433_s9 }
 0x35d   :  { %s1438_s4 = scalar_select %p1437_p13, 1, 0 }
 0x35e   :  { %s1441_s8 = scalar_select %p1440_p0, 1, 0 }
 0x35f   :  { %s1439_s14 = sadd.s32 %s1438_s4, %s1436_s10 }
 0x360   :  { %s4164_s3 = spop %4163  ;;  %s1442_s1 = sadd.s32 %s1441_s8, %s1439_s14 }
 0x361   :  { %p1443_p1 = scmp.lt.s32.totalorder %s4164_s3, 102 }
 0x363   :  { %s4166_s6 = spop %4165 }
 0x364   :  { %p1446_p2 = scmp.lt.s32.totalorder %s4166_s6, 102 }
 0x365   :  { %s1444_s12 = scalar_select %p1443_p1, 1, 0 }
 0x366   :  { %s1447_s13 = scalar_select %p1446_p2, 1, 0 }
 0x367   :  { %s1445_s21 = sadd.s32 %s1444_s12, %s1442_s1 }
 0x368   :  { %s4168_s11 = spop %4167  ;;  %s1448_s23 = sadd.s32 %s1447_s13, %s1445_s21 }
 0x369   :  { %p1449_p3 = scmp.lt.s32.totalorder %s4168_s11, 102 }
 0x36b   :  { %s4170_s18 = spop %4169 }
 0x36c   :  { %p1452_p4 = scmp.lt.s32.totalorder %s4170_s18, 102 }
 0x36d   :  { %s1450_s17 = scalar_select %p1449_p3, 1, 0 }
 0x36e   :  { %s1453_s20 = scalar_select %p1452_p4, 1, 0 }
 0x36f   :  { %s4172_s22 = spop %4171  ;;  %s1451_s24 = sadd.s32 %s1450_s17, %s1448_s23 }
 0x370   :  { %p1455_p5 = scmp.lt.s32.totalorder %s4172_s22, 102  ;;  %s4174_s25 = spop %4173 }
 0x371   :  { %s1454_s27 = sadd.s32 %s1453_s20, %s1451_s24  ;;  %p1458_p6 = scmp.lt.s32.totalorder %s4174_s25, 102 }
 0x372   :  { %s1456_s26 = scalar_select %p1455_p5, 1, 0 }
 0x373   :  { %s1459_s29 = scalar_select %p1458_p6, 1, 0 }
 0x374   :  { %s1457_s28 = sadd.s32 %s1456_s26, %s1454_s27 }
 0x375   :  { %s1460_s30 = sadd.s32 %s1459_s29, %s1457_s28 }
 0x376   :  { %s1461_s3 = sadd.s32 1, %s1460_s30  ;;  %s1467_s4 = smul.u32 %s1460_s30, %s4553_s19 }
 0x377   :  { %s1462_s5 = smul.u32 %s1461_s3, %s4553_s19  ;;  %p1472_p7 = scmp.gt.s32.totalorder %s1460_s30, 0 }
 0x378   :  { %s1464_s6 = smul.u32 %s1461_s3, %s4555_s15  ;;  %s1468_s7 = sadd.s32 %s1467_s4, %s5350_s16 }
 0x379   :  { %s1463_s8 = sadd.s32 %s1462_s5, %s5350_s16  ;;  %s1469_s9 = smul.u32 %s1460_s30, %s4555_s15 }
 0x37a   :  { %s1465_s10 = sshra.s32 %s1464_s6, 4 }
 0x37b   :  { %s1470_s11 = sshra.s32 %s1469_s9, 4  ;;  %s1466_s12 = sadd.s32 %s1465_s10, %s1463_s8 }
 0x37c   :  { %s1471_s13 = sadd.s32 %s1470_s11, %s1468_s7 }
 0x37d   :  { %s1473_s14 = scalar_select %p1472_p7, 1, 0 }
 0x37f   :  { %s1474_s18 = sadd.s32 %s1473_s14, %s1471_s13 }
 0x380   :  { %p1475_p8 = scmp.lt.s32.totalorder %s1474_s18, %s1466_s12 }
 0x382   :  { %s5352_s18 = smov (!%p1475_p8, %s1474_s18), %s1466_s12 }
 0x383   :  { %s1477_s1 = ssub.s32 %s1466_s12, %s5352_s18 }
 0x384   :  { %s4683_s17 = sshra.s32 %s1477_s1, 4  ;;  %s4685_s16 = sand.u32 15, %s1477_s1 }
 0x385   :  { %s1480_s19 = sadd.s32 %s4683_s17, %s5352_s18  ;;  %s1481_s15 = sshra.s32 %s4685_s16, 4 }
 0x386   :  { %s1482_s20 = sadd.s32 %s1481_s15, %s1480_s19  ;;  %s4055_s21 = sshll.u32 %s4683_s17, 1 }
 0x387   :  { %v1553_v53 = vstv %s1482_s20  ;;  %s1484_s22 = sadd.s32 %s4055_s21, %s5352_s18  ;;  %s4056_s23 = sshll.u32 %s4685_s16, 1 }
 0x388   :  { %vm1554_vm12 = vcmp.lt.s32.totalorder %v4356_v19, %v1553_v53  ;;  %vm1555_vm13 = vcmp.lt.s32.totalorder %v4358_v20, %v1553_v53  ;;  %s1486_s24 = sshra.s32 %s4056_s23, 4  ;;  %s4057_s25 = sshll.u32 %s4683_s17, 2 }
 0x389   :  { %v1556_v54 = vsel %vm1554_vm12, 1, %v4328_v21  ;;  %v1557_v55 = vsel %vm1555_vm13, 1, %v4328_v21  ;;  %s1487_s26 = sadd.s32 %s1486_s24, %s1484_s22  ;;  %s1494_s27 = sadd.s32 %s4057_s25, %s5352_s18 }
 0x38a   :  { %v1558_v56 = vadd.s32 %v1557_v55, %v1556_v54  ;;  %v1578_v57 = vstv %s1487_s26  ;;  %s4058_s28 = sshll.u32 %s4685_s16, 2  ;;  %s4059_s29 = sshll.u32 %s4683_s17, 3 }
 0x38b   :  { %vm1579_vm14 = vcmp.lt.s32.totalorder %v4356_v19, %v1578_v57  ;;  %vm1580_vm15 = vcmp.lt.s32.totalorder %v4358_v20, %v1578_v57  ;;  %s1496_s30 = sshra.s32 %s4058_s28, 4  ;;  %s1514_s3 = sadd.s32 %s4059_s29, %s5352_s18 }
 0x38c   :  { %v1560_v58 = vshrl.u32 %v1558_v56, 16  ;;  %v1559_v59 = vand.u32 65535, %v1558_v56  ;;  %v1581_v60 = vsel %vm1579_vm14, 1, %v4328_v21  ;;  %v1582_v61 = vsel %vm1580_vm15, 1, %v4328_v21  ;;  %s1497_s4 = sadd.s32 %s1496_s30, %s1494_s27  ;;  %s4060_s5 = sshll.u32 %s4685_s16, 3 }
 0x38d   :  { %v1583_v62 = vadd.s32 %v1582_v61, %v1581_v60  ;;  %v1628_v63 = vstv %s1497_s4  ;;  %s1516_s6 = sshra.s32 %s4060_s5, 4  ;;  %s1488_s7 = smul.u32 3, %s4683_s17 }
 0x38e   :  { %v1562_v0 = vcvt.s32.f32 %v1560_v58  ;;  %v1561_v1 = vcvt.s32.f32 %v1559_v59  ;;  %vm1629_vm0 = vcmp.lt.s32.totalorder %v4356_v19, %v1628_v63  ;;  %vm1630_vm1 = vcmp.lt.s32.totalorder %v4358_v20, %v1628_v63  ;;  %s1517_s8 = sadd.s32 %s1516_s6, %s1514_s3  ;;  %s1490_s9 = smul.u32 3, %s4685_s16 }
 0x38f   :  { %v1584_v2 = vand.u32 65535, %v1583_v62  ;;  %v1585_v3 = vshrl.u32 %v1583_v62, 16  ;;  %v1631_v4 = vsel %vm1629_vm0, 1, %v4328_v21  ;;  %v1632_v5 = vsel %vm1630_vm1, 1, %v4328_v21  ;;  %s1489_s10 = sadd.s32 %s1488_s7, %s5352_s18  ;;  %s1498_s11 = smul.u32 5, %s4683_s17 }
 0x390   :  { %1565 = vadd.xlane.f32.xlu0 %v1562_v0  ;;  %1563 = vadd.xlane.f32.xlu1 %v1561_v1  ;;  %v1633_v6 = vadd.s32 %v1632_v5, %v1631_v4  ;;  %v1728_v7 = vstv %s1517_s8  ;;  %s1491_s12 = sshra.s32 %s1490_s9, 4  ;;  %s1500_s13 = smul.u32 5, %s4685_s16 }
 0x391   :  { %v1586_v8 = vcvt.s32.f32 %v1584_v2  ;;  %v1587_v9 = vcvt.s32.f32 %v1585_v3  ;;  %vm1729_vm2 = vcmp.lt.s32.totalorder %v4356_v19, %v1728_v7  ;;  %vm1730_vm3 = vcmp.lt.s32.totalorder %v4358_v20, %v1728_v7  ;;  %s1492_s14 = sadd.s32 %s1491_s12, %s1489_s10  ;;  %s1499_s1 = sadd.s32 %s1498_s11, %s5352_s18 }
 0x392   :  { %v1634_v10 = vand.u32 65535, %v1633_v6  ;;  %v1635_v11 = vshrl.u32 %v1633_v6, 16  ;;  %v1731_v12 = vsel %vm1729_vm2, 1, %v4328_v21  ;;  %v1732_v13 = vsel %vm1730_vm3, 1, %v4328_v21  ;;  %s1501_s19 = sshra.s32 %s1500_s13, 4  ;;  %s1503_s15 = smul.u32 6, %s4683_s17 }
 0x393   :  { %v1733_v14 = vadd.s32 %v1732_v13, %v1731_v12  ;;  %v1603_v15 = vstv %s1492_s14  ;;  %s1502_s20 = sadd.s32 %s1501_s19, %s1499_s1  ;;  %s1505_s21 = smul.u32 6, %s4685_s16 }
 0x394   :  { %1588 = vadd.xlane.f32.xlu0 %v1586_v8  ;;  %1590 = vadd.xlane.f32.xlu1 %v1587_v9  ;;  %vm1604_vm4 = vcmp.lt.s32.totalorder %v4356_v19, %v1603_v15  ;;  %vm1605_vm5 = vcmp.lt.s32.totalorder %v4358_v20, %v1603_v15  ;;  %s1504_s22 = sadd.s32 %s1503_s15, %s5352_s18  ;;  %s1508_s23 = smul.u32 7, %s4683_s17  ;;  %v1636_v16 = vcvt.s32.f32 %v1634_v10  ;;  %v1637_v17 = vcvt.s32.f32 %v1635_v11 }
 0x395   :  { %v1606_v18 = vsel %vm1604_vm4, 1, %v4328_v21  ;;  %v1607_v22 = vsel %vm1605_vm5, 1, %v4328_v21  ;;  %s1506_s24 = sshra.s32 %s1505_s21, 4  ;;  %s1510_s25 = smul.u32 7, %s4685_s16  ;;  %v1734_v23 = vand.u32 65535, %v1733_v14  ;;  %v1735_v24 = vshrl.u32 %v1733_v14, 16 }
 0x396   :  { %v1608_v25 = vadd.s32 %v1607_v22, %v1606_v18  ;;  %v1653_v26 = vstv %s1502_s20  ;;  %s1507_s26 = sadd.s32 %s1506_s24, %s1504_s22  ;;  %s1509_s27 = sadd.s32 %s1508_s23, %s5352_s18 }
 0x397   :  { %vm1654_vm6 = vcmp.lt.s32.totalorder %v4356_v19, %v1653_v26  ;;  %vm1655_vm7 = vcmp.lt.s32.totalorder %v4358_v20, %v1653_v26  ;;  %s1511_s28 = sshra.s32 %s1510_s25, 4  ;;  %s1518_s29 = smul.u32 9, %s4683_s17  ;;  %v1678_v31 = vstv %s1507_s26  ;;  %v1736_v33 = vcvt.s32.f32 %v1734_v23 }
 0x398   :  { %1638 = vadd.xlane.f32.xlu0 %v1636_v16  ;;  %1640 = vadd.xlane.f32.xlu1 %v1637_v17  ;;  %v1656_v27 = vsel %vm1654_vm6, 1, %v4328_v21  ;;  %v1657_v28 = vsel %vm1655_vm7, 1, %v4328_v21  ;;  %s1512_s30 = sadd.s32 %s1511_s28, %s1509_s27  ;;  %s1520_s3 = smul.u32 9, %s4685_s16  ;;  %v1610_v29 = vshrl.u32 %v1608_v25, 16  ;;  %v1737_v34 = vcvt.s32.f32 %v1735_v24 }
 0x399   :  { %v4737_v30 = vadd.s32 %v1657_v28, %v1656_v27  ;;  %v1703_v32 = vstv %s1512_s30  ;;  %s1519_s4 = sadd.s32 %s1518_s29, %s5352_s18  ;;  %s1523_s5 = smul.u32 10, %s4683_s17  ;;  %vm1679_vm8 = vcmp.lt.s32.totalorder %v4356_v19, %v1678_v31  ;;  %vm1680_vm9 = vcmp.lt.s32.totalorder %v4358_v20, %v1678_v31 }
 0x39a   :  { %s1521_s6 = sshra.s32 %s1520_s3, 4  ;;  %s1525_s7 = smul.u32 10, %s4685_s16  ;;  %v1681_v36 = vsel %vm1679_vm8, 1, %v4328_v21  ;;  %v1682_v37 = vsel %vm1680_vm9, 1, %v4328_v21  ;;  %vm1704_vm10 = vcmp.lt.s32.totalorder %v4356_v19, %v1703_v32  ;;  %vm1705_vm11 = vcmp.lt.s32.totalorder %v4358_v20, %v1703_v32 }
 0x39b   :  { %v1660_v35 = vshrl.u32 %v4737_v30, 16  ;;  %s1522_s8 = sadd.s32 %s1521_s6, %s1519_s4  ;;  %s1524_s9 = sadd.s32 %s1523_s5, %s5352_s18  ;;  %v4748_v38 = vadd.s32 %v1682_v37, %v1681_v36  ;;  %v1612_v40 = vcvt.s32.f32 %v1610_v29  ;;  %v1609_v41 = vand.u32 65535, %v1608_v25 }
 0x39c   :  { %1738 = vadd.xlane.f32.xlu0 %v1736_v33  ;;  %1740 = vadd.xlane.f32.xlu1 %v1737_v34  ;;  %v1753_v39 = vstv %s1522_s8  ;;  %s1526_s10 = sshra.s32 %s1525_s7, 4  ;;  %s1528_s11 = smul.u32 11, %s4683_s17  ;;  %v1706_v42 = vsel %vm1704_vm10, 1, %v4328_v21  ;;  %v1707_v43 = vsel %vm1705_vm11, 1, %v4328_v21  ;;  %v1659_v51 = vand.u32 65535, %v4737_v30 }
 0x39d   :  { %s1527_s12 = sadd.s32 %s1526_s10, %s1524_s9  ;;  %s1530_s13 = smul.u32 11, %s4685_s16  ;;  %v1662_v44 = vcvt.s32.f32 %v1660_v35  ;;  %v1685_v45 = vshrl.u32 %v4748_v38, 16  ;;  %v4757_v46 = vadd.s32 %v1707_v43, %v1706_v42  ;;  %vm1754_vm12 = vcmp.lt.s32.totalorder %v4356_v19, %v1753_v39 }
 0x39e   :  { %s1529_s14 = sadd.s32 %s1528_s11, %s5352_s18  ;;  %s1533_s1 = smul.u32 12, %s4683_s17  ;;  %vm1755_vm13 = vcmp.lt.s32.totalorder %v4358_v20, %v1753_v39  ;;  %v1756_v47 = vsel %vm1754_vm12, 1, %v4328_v21  ;;  %v1778_v48 = vstv %s1527_s12  ;;  %v1611_v50 = vcvt.s32.f32 %v1609_v41 }
 0x39f   :  { %s1531_s19 = sshra.s32 %s1530_s13, 4  ;;  %s1535_s15 = smul.u32 12, %s4685_s16  ;;  %v1757_v49 = vsel %vm1755_vm13, 1, %v4328_v21  ;;  %vm1779_vm14 = vcmp.lt.s32.totalorder %v4356_v19, %v1778_v48  ;;  %vm1780_vm15 = vcmp.lt.s32.totalorder %v4358_v20, %v1778_v48  ;;  %v1687_v52 = vcvt.s32.f32 %v1685_v45 }
 0x3a0   :  { %1615 = vadd.xlane.f32.xlu0 %v1612_v40  ;;  %1665 = vadd.xlane.f32.xlu1 %v1662_v44  ;;  %s1532_s20 = sadd.s32 %s1531_s19, %s1529_s14  ;;  %s1534_s21 = sadd.s32 %s1533_s1, %s5352_s18  ;;  %v1710_v53 = vshrl.u32 %v4757_v46, 16  ;;  %v1758_v54 = vadd.s32 %v1757_v49, %v1756_v47  ;;  %v1781_v56 = vsel %vm1779_vm14, 1, %v4328_v21  ;;  %v1782_v57 = vsel %vm1780_vm15, 1, %v4328_v21 }
 0x3a1   :  { %s1536_s22 = sshra.s32 %s1535_s15, 4  ;;  %s1538_s23 = smul.u32 13, %s4683_s17  ;;  %v1803_v55 = vstv %s1532_s20  ;;  %v1661_v58 = vcvt.s32.f32 %v1659_v51  ;;  %v1684_v61 = vand.u32 65535, %v4748_v38  ;;  %v1783_v63 = vadd.s32 %v1782_v57, %v1781_v56 }
 0x3a2   :  { %s1537_s24 = sadd.s32 %s1536_s22, %s1534_s21  ;;  %s1540_s25 = smul.u32 13, %s4685_s16  ;;  %vm1804_vm0 = vcmp.lt.s32.totalorder %v4356_v19, %v1803_v55  ;;  %vm1805_vm1 = vcmp.lt.s32.totalorder %v4358_v20, %v1803_v55  ;;  %v1712_v60 = vcvt.s32.f32 %v1710_v53  ;;  %v1760_v62 = vshrl.u32 %v1758_v54, 16 }
 0x3a3   :  { %s1539_s26 = sadd.s32 %s1538_s23, %s5352_s18  ;;  %s1543_s27 = smul.u32 14, %s4683_s17  ;;  %v1828_v59 = vstv %s1537_s24  ;;  %v1806_v0 = vsel %vm1804_vm0, 1, %v4328_v21  ;;  %v1807_v1 = vsel %vm1805_vm1, 1, %v4328_v21  ;;  %v1709_v2 = vand.u32 65535, %v4757_v46 }
 0x3a4   :  { %1613 = vadd.xlane.f32.xlu0 %v1611_v50  ;;  %1690 = vadd.xlane.f32.xlu1 %v1687_v52  ;;  %s1541_s28 = sshra.s32 %s1540_s25, 4  ;;  %s1545_s29 = smul.u32 14, %s4685_s16  ;;  %vm1829_vm2 = vcmp.lt.s32.totalorder %v4356_v19, %v1828_v59  ;;  %vm1830_vm3 = vcmp.lt.s32.totalorder %v4358_v20, %v1828_v59  ;;  %v1686_v4 = vcvt.s32.f32 %v1684_v61  ;;  %v1762_v5 = vcvt.s32.f32 %v1760_v62 }
 0x3a5   :  { %s1542_s30 = sadd.s32 %s1541_s28, %s1539_s26  ;;  %s1544_s3 = sadd.s32 %s1543_s27, %s5352_s18  ;;  %v1785_v6 = vshrl.u32 %v1783_v63, 16  ;;  %v1808_v7 = vadd.s32 %v1807_v1, %v1806_v0  ;;  %v1831_v8 = vsel %vm1829_vm2, 1, %v4328_v21  ;;  %v1832_v9 = vsel %vm1830_vm3, 1, %v4328_v21 }
 0x3a6   :  { %s1548_s4 = smul.u32 15, %s4683_s17  ;;  %s1546_s5 = sshra.s32 %s1545_s29, 4  ;;  %v1853_v3 = vstv %s1542_s30  ;;  %v1711_v10 = vcvt.s32.f32 %v1709_v2  ;;  %v1759_v13 = vand.u32 65535, %v1758_v54  ;;  %v1833_v15 = vadd.s32 %v1832_v9, %v1831_v8 }
 0x3a7   :  { %s1550_s6 = smul.u32 15, %s4685_s16  ;;  %s1547_s7 = sadd.s32 %s1546_s5, %s1544_s3  ;;  %vm1854_vm4 = vcmp.lt.s32.totalorder %v4356_v19, %v1853_v3  ;;  %vm1855_vm5 = vcmp.lt.s32.totalorder %v4358_v20, %v1853_v3  ;;  %v1787_v12 = vcvt.s32.f32 %v1785_v6  ;;  %v1810_v14 = vshrl.u32 %v1808_v7, 16 }
 0x3a8   :  { %1663 = vadd.xlane.f32.xlu0 %v1661_v58  ;;  %1715 = vadd.xlane.f32.xlu1 %v1712_v60  ;;  %s1549_s8 = sadd.s32 %s1548_s4, %s5352_s18  ;;  %v1878_v11 = vstv %s1547_s7  ;;  %v1856_v16 = vsel %vm1854_vm4, 1, %v4328_v21  ;;  %v1857_v17 = vsel %vm1855_vm5, 1, %v4328_v21  ;;  %v1784_v18 = vand.u32 65535, %v1783_v63 }
 0x3a9   :  { %s1551_s9 = sshra.s32 %s1550_s6, 4  ;;  %vm1879_vm6 = vcmp.lt.s32.totalorder %v4356_v19, %v1878_v11  ;;  %vm1880_vm7 = vcmp.lt.s32.totalorder %v4358_v20, %v1878_v11  ;;  %v1761_v23 = vcvt.s32.f32 %v1759_v13  ;;  %v1812_v24 = vcvt.s32.f32 %v1810_v14 }
 0x3aa   :  { %s1552_s10 = sadd.s32 %s1551_s9, %s1549_s8  ;;  %v1835_v25 = vshrl.u32 %v1833_v15, 16  ;;  %v1858_v26 = vadd.s32 %v1857_v17, %v1856_v16  ;;  %v1881_v27 = vsel %vm1879_vm6, 1, %v4328_v21  ;;  %v1882_v28 = vsel %vm1880_vm7, 1, %v4328_v21 }
 0x3ab   :  { %v1903_v22 = vstv %s1552_s10  ;;  %v1786_v29 = vcvt.s32.f32 %v1784_v18  ;;  %v1809_v31 = vand.u32 65535, %v1808_v7  ;;  %v1883_v33 = vadd.s32 %v1882_v28, %v1881_v27 }
 0x3ac   :  { %1688 = vadd.xlane.f32.xlu0 %v1686_v4  ;;  %1765 = vadd.xlane.f32.xlu1 %v1762_v5  ;;  %vm1904_vm8 = vcmp.lt.s32.totalorder %v4356_v19, %v1903_v22  ;;  %vm1905_vm9 = vcmp.lt.s32.totalorder %v4358_v20, %v1903_v22  ;;  %v1837_v30 = vcvt.s32.f32 %v1835_v25  ;;  %v1860_v32 = vshrl.u32 %v1858_v26, 16 }
 0x3ad   :  { %v1906_v34 = vsel %vm1904_vm8, 1, %v4328_v21  ;;  %v1907_v35 = vsel %vm1905_vm9, 1, %v4328_v21  ;;  %v1834_v36 = vand.u32 65535, %v1833_v15  ;;  %v1811_v37 = vcvt.s32.f32 %v1809_v31 }
 0x3ae   :  { %v1862_v38 = vcvt.s32.f32 %v1860_v32  ;;  %v1885_v39 = vshrl.u32 %v1883_v33, 16  ;;  %v1908_v40 = vadd.s32 %v1907_v35, %v1906_v34  ;;  %v1859_v43 = vand.u32 65535, %v1858_v26 }
 0x3af   :  { %v1836_v41 = vcvt.s32.f32 %v1834_v36  ;;  %v1884_v47 = vand.u32 65535, %v1883_v33 }
 0x3b0   :  { %1713 = vadd.xlane.f32.xlu0 %v1711_v10  ;;  %1790 = vadd.xlane.f32.xlu1 %v1787_v12  ;;  %v1887_v42 = vcvt.s32.f32 %v1885_v39  ;;  %v1910_v44 = vshrl.u32 %v1908_v40, 16  ;;  %v1861_v45 = vcvt.s32.f32 %v1859_v43  ;;  %v1909_v48 = vand.u32 65535, %v1908_v40 }
 0x3b1   :  { %v1886_v49 = vcvt.s32.f32 %v1884_v47 }
 0x3b2   :  { %v1912_v46 = vcvt.s32.f32 %v1910_v44  ;;  %v1911_v50 = vcvt.s32.f32 %v1909_v48 }
 0x3b4   :  { %1763 = vadd.xlane.f32.xlu0 %v1761_v23  ;;  %1815 = vadd.xlane.f32.xlu1 %v1812_v24 }
 0x3b8   :  { %1788 = vadd.xlane.f32.xlu0 %v1786_v29  ;;  %1840 = vadd.xlane.f32.xlu1 %v1837_v30 }
 0x3bc   :  { %1813 = vadd.xlane.f32.xlu0 %v1811_v37  ;;  %1865 = vadd.xlane.f32.xlu1 %v1862_v38 }
 0x3c0   :  { %1838 = vadd.xlane.f32.xlu0 %v1836_v41  ;;  %1890 = vadd.xlane.f32.xlu1 %v1887_v42 }
 0x3c4   :  { %1863 = vadd.xlane.f32.xlu0 %v1861_v45  ;;  %1915 = vadd.xlane.f32.xlu1 %v1912_v46 }
 0x3c8   :  { %1888 = vadd.xlane.f32.xlu0 %v1886_v49  ;;  %1913 = vadd.xlane.f32.xlu1 %v1911_v50 }
 0x41d   :  { %v1566_v51 = vpop.xlane.xlu0 %1565  ;;  %v1564_v52 = vpop.xlane.xlu1 %1563 }
 0x41e   :  { %v1568_v53 = vcvt.f32.s32 %v1566_v51  ;;  %v1567_v55 = vcvt.f32.s32 %v1564_v52 }
 0x420   :  { %v1569_v54 = vshll.u32 %v1568_v53, 16 }
 0x421   :  { %v1589_v56 = vpop.xlane.xlu0 %1588  ;;  %v1591_v57 = vpop.xlane.xlu1 %1590 }
 0x422   :  { %v1570_v58 = vadd.s32 %v1569_v54, %v1567_v55  ;;  %v1593_v59 = vcvt.f32.s32 %v1591_v57  ;;  %v1592_v61 = vcvt.f32.s32 %v1589_v56 }
 0x424   :  { %v1571_v60 = vrot.slane %v1570_v58, 4  ;;  %v1594_v62 = vshll.u32 %v1593_v59, 16 }
 0x425   :  { %v1639_v63 = vpop.xlane.xlu0 %1638  ;;  %v1641_v0 = vpop.xlane.xlu1 %1640 }
 0x426   :  { %v1595_v1 = vadd.s32 %v1594_v62, %v1592_v61  ;;  %v1643_v2 = vcvt.f32.s32 %v1641_v0  ;;  %v1572_v3 = vadd.s32 %v1571_v60, %v1570_v58  ;;  %v1642_v5 = vcvt.f32.s32 %v1639_v63 }
 0x428   :  { %v1596_v4 = vrot.slane %v1595_v1, 4  ;;  %v1644_v6 = vshll.u32 %v1643_v2, 16  ;;  %v1573_v7 = vrot.slane %v1572_v3, 2 }
 0x429   :  { %v1739_v8 = vpop.xlane.xlu0 %1738  ;;  %v1741_v9 = vpop.xlane.xlu1 %1740 }
 0x42a   :  { %v1645_v10 = vadd.s32 %v1644_v6, %v1642_v5  ;;  %v1574_v11 = vadd.s32 %v1573_v7, %v1572_v3  ;;  %v1597_v12 = vadd.s32 %v1596_v4, %v1595_v1  ;;  %v1743_v15 = vcvt.f32.s32 %v1741_v9 }
 0x42b   :  { %v1742_v33 = vcvt.f32.s32 %v1739_v8 }
 0x42c   :  { %v1575_v13 = vrot.slane %v1574_v11, 1  ;;  %v1646_v14 = vrot.slane %v1645_v10, 4  ;;  %v1598_v18 = vrot.slane %v1597_v12, 2  ;;  %v1744_v25 = vshll.u32 %v1743_v15, 16 }
 0x42d   :  { %v1616_v16 = vpop.xlane.xlu0 %1615  ;;  %v1666_v17 = vpop.xlane.xlu1 %1665 }
 0x42e   :  { %v1618_v22 = vcvt.f32.s32 %v1616_v16  ;;  %v1576_v23 = vadd.s32 %v1575_v13, %v1574_v11  ;;  %v1599_v24 = vadd.s32 %v1598_v18, %v1597_v12  ;;  %v1647_v29 = vadd.s32 %v1646_v14, %v1645_v10 }
 0x42f   :  { %v1668_v31 = vcvt.f32.s32 %v1666_v17  ;;  %v1745_v36 = vadd.s32 %v1744_v25, %v1742_v33 }
 0x430   :  { %4175 = vpush %v1576_v23  ;;  %v1600_v28 = vrot.slane %v1599_v24, 1  ;;  %v1619_v30 = vshll.u32 %v1618_v22, 16  ;;  %v1648_v40 = vrot.slane %v1647_v29, 2 }
 0x431   :  { %v1614_v26 = vpop.xlane.xlu0 %1613  ;;  %v1691_v27 = vpop.xlane.xlu1 %1690  ;;  %v1669_v41 = vshll.u32 %v1668_v31, 16  ;;  %v1746_v46 = vrot.slane %v1745_v36, 4 }
 0x432   :  { %v1617_v32 = vcvt.f32.s32 %v1614_v26  ;;  %v1601_v34 = vadd.s32 %v1600_v28, %v1599_v24  ;;  %v1693_v37 = vcvt.f32.s32 %v1691_v27  ;;  %v1649_v50 = vadd.s32 %v1648_v40, %v1647_v29 }
 0x433   :  { %v1747_v62 = vadd.s32 %v1746_v46, %v1745_v36 }
 0x434   :  { %v1620_v35 = vadd.s32 %v1619_v30, %v1617_v32  ;;  %4177 = vpush %v1601_v34  ;;  %v1694_v47 = vshll.u32 %v1693_v37, 16  ;;  %v1650_v61 = vrot.slane %v1649_v50, 1 }
 0x435   :  { %v1664_v38 = vpop.xlane.xlu0 %1663  ;;  %v1716_v39 = vpop.xlane.xlu1 %1715  ;;  %v1748_v12 = vrot.slane %v1747_v62, 2 }
 0x436   :  { %v1621_v42 = vrot.slane %v1620_v35, 4  ;;  %v1667_v43 = vcvt.f32.s32 %v1664_v38  ;;  %v1718_v52 = vcvt.f32.s32 %v1716_v39  ;;  %v1651_v10 = vadd.s32 %v1650_v61, %v1649_v50 }
 0x437   :  { %v1749_v28 = vadd.s32 %v1748_v12, %v1747_v62 }
 0x438   :  { %v1670_v44 = vadd.s32 %v1669_v41, %v1667_v43  ;;  %v1622_v45 = vadd.s32 %v1621_v42, %v1620_v35  ;;  %v1719_v63 = vshll.u32 %v1718_v52, 16 }
 0x439   :  { %v1689_v48 = vpop.xlane.xlu0 %1688  ;;  %v1766_v49 = vpop.xlane.xlu1 %1765  ;;  %v1750_v41 = vrot.slane %v1749_v28, 1 }
 0x43a   :  { %v1671_v51 = vrot.slane %v1670_v44, 4  ;;  %v1692_v53 = vcvt.f32.s32 %v1689_v48  ;;  %v1623_v54 = vrot.slane %v1622_v45, 2  ;;  %v1768_v58 = vcvt.f32.s32 %v1766_v49 }
 0x43c   :  { %v1695_v55 = vadd.s32 %v1694_v47, %v1692_v53  ;;  %v1624_v56 = vadd.s32 %v1623_v54, %v1622_v45  ;;  %v1672_v57 = vadd.s32 %v1671_v51, %v1670_v44  ;;  %v1769_v7 = vshll.u32 %v1768_v58, 16 }
 0x43d   :  { %v1714_v59 = vpop.xlane.xlu0 %1713  ;;  %v1791_v60 = vpop.xlane.xlu1 %1790  ;;  %v1751_v54 = vadd.s32 %v1750_v41, %v1749_v28 }
 0x43e   :  { %v1696_v0 = vrot.slane %v1695_v55, 4  ;;  %v1717_v1 = vcvt.f32.s32 %v1714_v59  ;;  %v1625_v2 = vrot.slane %v1624_v56, 1  ;;  %v1673_v3 = vrot.slane %v1672_v57, 2 }
 0x43f   :  { %v1793_v14 = vcvt.f32.s32 %v1791_v60 }
 0x440   :  { %v1720_v4 = vadd.s32 %v1719_v63, %v1717_v1  ;;  %v1626_v5 = vadd.s32 %v1625_v2, %v1624_v56  ;;  %v1697_v6 = vadd.s32 %v1696_v0, %v1695_v55  ;;  %v1674_v11 = vadd.s32 %v1673_v3, %v1672_v57 }
 0x441   :  { %v1764_v8 = vpop.xlane.xlu0 %1763  ;;  %v1816_v9 = vpop.xlane.xlu1 %1815  ;;  %v1794_v29 = vshll.u32 %v1793_v14, 16 }
 0x442   :  { %v1721_v13 = vrot.slane %v1720_v4, 4  ;;  %v1767_v15 = vcvt.f32.s32 %v1764_v8  ;;  %4179 = vpush %v1626_v5  ;;  %v1698_v16 = vrot.slane %v1697_v6, 2  ;;  %v1675_v17 = vrot.slane %v1674_v11, 1 }
 0x443   :  { %4181 = vpush %v1651_v10  ;;  %v1818_v24 = vcvt.f32.s32 %v1816_v9 }
 0x444   :  { %v1770_v18 = vadd.s32 %v1769_v7, %v1767_v15  ;;  %v1699_v22 = vadd.s32 %v1698_v16, %v1697_v6  ;;  %v1722_v23 = vadd.s32 %v1721_v13, %v1720_v4  ;;  %v1676_v27 = vadd.s32 %v1675_v17, %v1674_v11 }
 0x445   :  { %v1789_v25 = vpop.xlane.xlu0 %1788  ;;  %v1841_v26 = vpop.xlane.xlu1 %1840  ;;  %v1819_v37 = vshll.u32 %v1818_v24, 16 }
 0x446   :  { %v1771_v30 = vrot.slane %v1770_v18, 4  ;;  %v1792_v31 = vcvt.f32.s32 %v1789_v25  ;;  %v1700_v32 = vrot.slane %v1699_v22, 1  ;;  %4183 = vpush %v1676_v27  ;;  %v1723_v33 = vrot.slane %v1722_v23, 2 }
 0x447   :  { %v1843_v43 = vcvt.f32.s32 %v1841_v26 }
 0x448   :  { %v1795_v34 = vadd.s32 %v1794_v29, %v1792_v31  ;;  %v1701_v35 = vadd.s32 %v1700_v32, %v1699_v22  ;;  %v1772_v36 = vadd.s32 %v1771_v30, %v1770_v18  ;;  %v1724_v40 = vadd.s32 %v1723_v33, %v1722_v23 }
 0x449   :  { %v1814_v38 = vpop.xlane.xlu0 %1813  ;;  %v1866_v39 = vpop.xlane.xlu1 %1865  ;;  %v1844_v55 = vshll.u32 %v1843_v43, 16 }
 0x44a   :  { %v1796_v42 = vrot.slane %v1795_v34, 4  ;;  %v1817_v44 = vcvt.f32.s32 %v1814_v38  ;;  %4185 = vpush %v1701_v35  ;;  %v1773_v45 = vrot.slane %v1772_v36, 2  ;;  %v1725_v46 = vrot.slane %v1724_v40, 1 }
 0x44b   :  { %v1868_v50 = vcvt.f32.s32 %v1866_v39 }
 0x44c   :  { %v1820_v47 = vadd.s32 %v1819_v37, %v1817_v44  ;;  %v1774_v48 = vadd.s32 %v1773_v45, %v1772_v36  ;;  %v1797_v49 = vadd.s32 %v1796_v42, %v1795_v34  ;;  %v1726_v53 = vadd.s32 %v1725_v46, %v1724_v40 }
 0x44d   :  { %v1839_v51 = vpop.xlane.xlu0 %1838  ;;  %v1891_v52 = vpop.xlane.xlu1 %1890  ;;  %v1869_v63 = vshll.u32 %v1868_v50, 16 }
 0x44e   :  { %v1821_v56 = vrot.slane %v1820_v47, 4  ;;  %v1842_v57 = vcvt.f32.s32 %v1839_v51  ;;  %v1775_v58 = vrot.slane %v1774_v48, 1  ;;  %4187 = vpush %v1726_v53  ;;  %v1798_v59 = vrot.slane %v1797_v49, 2 }
 0x44f   :  { %4189 = vpush %v1751_v54  ;;  %v1893_v0 = vcvt.f32.s32 %v1891_v52 }
 0x450   :  { %v1845_v60 = vadd.s32 %v1844_v55, %v1842_v57  ;;  %v1776_v61 = vadd.s32 %v1775_v58, %v1774_v48  ;;  %v1822_v62 = vadd.s32 %v1821_v56, %v1820_v47  ;;  %v1799_v3 = vadd.s32 %v1798_v59, %v1797_v49 }
 0x451   :  { %v1864_v1 = vpop.xlane.xlu0 %1863  ;;  %v1916_v2 = vpop.xlane.xlu1 %1915  ;;  %v1894_v12 = vshll.u32 %v1893_v0, 16 }
 0x452   :  { %v1846_v4 = vrot.slane %v1845_v60, 4  ;;  %v1867_v5 = vcvt.f32.s32 %v1864_v1  ;;  %v1918_v6 = vcvt.f32.s32 %v1916_v2  ;;  %4191 = vpush %v1776_v61  ;;  %v1823_v7 = vrot.slane %v1822_v62, 2 }
 0x453   :  { %v1800_v8 = vrot.slane %v1799_v3, 1 }
 0x454   :  { %v1870_v9 = vadd.s32 %v1869_v63, %v1867_v5  ;;  %v1824_v10 = vadd.s32 %v1823_v7, %v1822_v62  ;;  %v1847_v11 = vadd.s32 %v1846_v4, %v1845_v60  ;;  %v1919_v13 = vshll.u32 %v1918_v6, 16 }
 0x455   :  { %v1889_v14 = vpop.xlane.xlu0 %1888  ;;  %v1914_v15 = vpop.xlane.xlu1 %1913  ;;  %v1801_v16 = vadd.s32 %v1800_v8, %v1799_v3 }
 0x456   :  { %v1871_v17 = vrot.slane %v1870_v9, 4  ;;  %v1892_v18 = vcvt.f32.s32 %v1889_v14  ;;  %v1917_v22 = vcvt.f32.s32 %v1914_v15  ;;  %v1825_v23 = vrot.slane %v1824_v10, 1 }
 0x457   :  { %4193 = vpush %v1801_v16  ;;  %v1848_v24 = vrot.slane %v1847_v11, 2 }
 0x458   :  { %v1895_v25 = vadd.s32 %v1894_v12, %v1892_v18  ;;  %v1920_v26 = vadd.s32 %v1919_v13, %v1917_v22  ;;  %v1826_v27 = vadd.s32 %v1825_v23, %v1824_v10  ;;  %v1872_v28 = vadd.s32 %v1871_v17, %v1870_v9 }
 0x459   :  { %v1849_v29 = vadd.s32 %v1848_v24, %v1847_v11 }
 0x45a   :  { %v1896_v30 = vrot.slane %v1895_v25, 4  ;;  %v1921_v31 = vrot.slane %v1920_v26, 4  ;;  %4195 = vpush %v1826_v27  ;;  %v1873_v32 = vrot.slane %v1872_v28, 2 }
 0x45b   :  { %v1850_v33 = vrot.slane %v1849_v29, 1 }
 0x45c   :  { %v1874_v34 = vadd.s32 %v1873_v32, %v1872_v28  ;;  %v1897_v35 = vadd.s32 %v1896_v30, %v1895_v25  ;;  %v1922_v36 = vadd.s32 %v1921_v31, %v1920_v26 }
 0x45d   :  { %v1851_v37 = vadd.s32 %v1850_v33, %v1849_v29 }
 0x45e   :  { %v1875_v38 = vrot.slane %v1874_v34, 1  ;;  %v1898_v39 = vrot.slane %v1897_v35, 2  ;;  %v1923_v40 = vrot.slane %v1922_v36, 2 }
 0x45f   :  { %4197 = vpush %v1851_v37 }
 0x460   :  { %v1876_v41 = vadd.s32 %v1875_v38, %v1874_v34  ;;  %v1899_v42 = vadd.s32 %v1898_v39, %v1897_v35  ;;  %v1924_v43 = vadd.s32 %v1923_v40, %v1922_v36 }
 0x461   :  { %s4176_s11 = spop %4175 }
 0x462   :  { %4199 = vpush %v1876_v41  ;;  %v1900_v44 = vrot.slane %v1899_v42, 1  ;;  %v1925_v45 = vrot.slane %v1924_v43, 1  ;;  %p1928_p10 = scmp.lt.s32.totalorder %s4176_s11, 102 }
 0x464   :  { %v1901_v46 = vadd.s32 %v1900_v44, %v1899_v42  ;;  %v1926_v47 = vadd.s32 %v1925_v45, %v1924_v43  ;;  %s1929_s19 = scalar_select %p1928_p10, 1, 0 }
 0x465   :  { %s4178_s12 = spop %4177 }
 0x466   :  { %4201 = vpush %v1901_v46  ;;  %p1930_p9 = scmp.lt.s32.totalorder %s4178_s12, 102 }
 0x467   :  { %4203 = vpush %v1926_v47 }
 0x468   :  { %s1931_s1 = scalar_select %p1930_p9, 1, 0 }
 0x46a   :  { %s1932_s21 = sadd.s32 %s1931_s1, %s1929_s19 }
 0x473   :  { %s4180_s13 = spop %4179 }
 0x474   :  { %p1933_p11 = scmp.lt.s32.totalorder %s4180_s13, 102  ;;  %s4182_s14 = spop %4181 }
 0x475   :  { %p1936_p12 = scmp.lt.s32.totalorder %s4182_s14, 102 }
 0x476   :  { %s1934_s20 = scalar_select %p1933_p11, 1, 0 }
 0x477   :  { %s4184_s15 = spop %4183 }
 0x478   :  { %p1939_p13 = scmp.lt.s32.totalorder %s4184_s15, 102  ;;  %s1935_s26 = sadd.s32 %s1934_s20, %s1932_s21 }
 0x479   :  { %s1937_s24 = scalar_select %p1936_p12, 1, 0 }
 0x47a   :  { %s1940_s27 = scalar_select %p1939_p13, 1, 0 }
 0x47b   :  { %s4186_s22 = spop %4185  ;;  %s1938_s5 = sadd.s32 %s1937_s24, %s1935_s26 }
 0x47c   :  { %p1942_p0 = scmp.lt.s32.totalorder %s4186_s22, 102  ;;  %s1941_s7 = sadd.s32 %s1940_s27, %s1938_s5 }
 0x47e   :  { %s1943_s29 = scalar_select %p1942_p0, 1, 0 }
 0x47f   :  { %s4188_s23 = spop %4187 }
 0x480   :  { %s4190_s25 = spop %4189  ;;  %p1945_p1 = scmp.lt.s32.totalorder %s4188_s23, 102 }
 0x481   :  { %p1948_p2 = scmp.lt.s32.totalorder %s4190_s25, 102  ;;  %s1944_s9 = sadd.s32 %s1943_s29, %s1941_s7 }
 0x482   :  { %s1946_s30 = scalar_select %p1945_p1, 1, 0 }
 0x483   :  { %s4192_s28 = spop %4191 }
 0x484   :  { %p1951_p3 = scmp.lt.s32.totalorder %s4192_s28, 102  ;;  %s1947_s10 = sadd.s32 %s1946_s30, %s1944_s9 }
 0x485   :  { %s1949_s4 = scalar_select %p1948_p2, 1, 0 }
 0x486   :  { %s1952_s8 = scalar_select %p1951_p3, 1, 0 }
 0x487   :  { %s1950_s14 = sadd.s32 %s1949_s4, %s1947_s10 }
 0x488   :  { %s4194_s3 = spop %4193  ;;  %s1953_s19 = sadd.s32 %s1952_s8, %s1950_s14 }
 0x489   :  { %p1954_p4 = scmp.lt.s32.totalorder %s4194_s3, 102 }
 0x48b   :  { %s4196_s6 = spop %4195 }
 0x48c   :  { %p1957_p5 = scmp.lt.s32.totalorder %s4196_s6, 102 }
 0x48d   :  { %s1955_s12 = scalar_select %p1954_p4, 1, 0 }
 0x48e   :  { %s1958_s13 = scalar_select %p1957_p5, 1, 0 }
 0x48f   :  { %s1956_s21 = sadd.s32 %s1955_s12, %s1953_s19 }
 0x490   :  { %s4198_s11 = spop %4197  ;;  %s1959_s23 = sadd.s32 %s1958_s13, %s1956_s21 }
 0x491   :  { %p1960_p6 = scmp.lt.s32.totalorder %s4198_s11, 102 }
 0x493   :  { %s4200_s1 = spop %4199 }
 0x494   :  { %p1963_p7 = scmp.lt.s32.totalorder %s4200_s1, 102 }
 0x495   :  { %s1961_s15 = scalar_select %p1960_p6, 1, 0 }
 0x496   :  { %s1964_s20 = scalar_select %p1963_p7, 1, 0 }
 0x497   :  { %s4202_s22 = spop %4201  ;;  %s1962_s24 = sadd.s32 %s1961_s15, %s1959_s23 }
 0x498   :  { %p1966_p8 = scmp.lt.s32.totalorder %s4202_s22, 102  ;;  %s4204_s25 = spop %4203 }
 0x499   :  { %s1965_s27 = sadd.s32 %s1964_s20, %s1962_s24  ;;  %p1969_p9 = scmp.lt.s32.totalorder %s4204_s25, 102 }
 0x49a   :  { %s1967_s26 = scalar_select %p1966_p8, 1, 0 }
 0x49b   :  { %s1970_s29 = scalar_select %p1969_p9, 1, 0 }
 0x49c   :  { %s1968_s28 = sadd.s32 %s1967_s26, %s1965_s27 }
 0x49d   :  { %s1971_s30 = sadd.s32 %s1970_s29, %s1968_s28 }
 0x49e   :  { %s1972_s3 = sadd.s32 1, %s1971_s30  ;;  %s1978_s4 = smul.u32 %s1971_s30, %s4683_s17 }
 0x49f   :  { %s1973_s5 = smul.u32 %s1972_s3, %s4683_s17  ;;  %p1983_p10 = scmp.gt.s32.totalorder %s1971_s30, 0 }
 0x4a0   :  { %s1975_s6 = smul.u32 %s1972_s3, %s4685_s16  ;;  %s1979_s7 = sadd.s32 %s1978_s4, %s5352_s18 }
 0x4a1   :  { %s1974_s8 = sadd.s32 %s1973_s5, %s5352_s18  ;;  %s1980_s9 = smul.u32 %s1971_s30, %s4685_s16 }
 0x4a2   :  { %s1976_s10 = sshra.s32 %s1975_s6, 4 }
 0x4a3   :  { %s1981_s11 = sshra.s32 %s1980_s9, 4  ;;  %s1977_s12 = sadd.s32 %s1976_s10, %s1974_s8 }
 0x4a4   :  { %s1982_s13 = sadd.s32 %s1981_s11, %s1979_s7 }
 0x4a5   :  { %s1984_s14 = scalar_select %p1983_p10, 1, 0 }
 0x4a7   :  { %s1985_s1 = sadd.s32 %s1984_s14, %s1982_s13 }
 0x4a8   :  { %p1986_p11 = scmp.lt.s32.totalorder %s1985_s1, %s1977_s12 }
 0x4aa   :  { %s5354_s1 = smov (!%p1986_p11, %s1985_s1), %s1977_s12 }
 0x4ab   :  { %s1988_s19 = ssub.s32 %s1977_s12, %s5354_s1 }
 0x4ac   :  { %s4813_s15 = sshra.s32 %s1988_s19, 4  ;;  %s4815_s18 = sand.u32 15, %s1988_s19 }
 0x4ad   :  { %s1991_s17 = sadd.s32 %s4813_s15, %s5354_s1  ;;  %s1992_s16 = sshra.s32 %s4815_s18, 4 }
 0x4ae   :  { %s1993_s20 = sadd.s32 %s1992_s16, %s1991_s17  ;;  %s4061_s21 = sshll.u32 %s4813_s15, 1 }
 0x4af   :  { %v2064_v48 = vstv %s1993_s20  ;;  %s1995_s22 = sadd.s32 %s4061_s21, %s5354_s1  ;;  %s4062_s23 = sshll.u32 %s4815_s18, 1 }
 0x4b0   :  { %vm2065_vm10 = vcmp.lt.s32.totalorder %v4356_v19, %v2064_v48  ;;  %vm2066_vm11 = vcmp.lt.s32.totalorder %v4358_v20, %v2064_v48  ;;  %s1997_s24 = sshra.s32 %s4062_s23, 4  ;;  %s4063_s25 = sshll.u32 %s4813_s15, 2 }
 0x4b1   :  { %v2067_v49 = vsel %vm2065_vm10, 1, %v4328_v21  ;;  %v2068_v50 = vsel %vm2066_vm11, 1, %v4328_v21  ;;  %s1998_s26 = sadd.s32 %s1997_s24, %s1995_s22  ;;  %s2005_s27 = sadd.s32 %s4063_s25, %s5354_s1 }
 0x4b2   :  { %v2069_v51 = vadd.s32 %v2068_v50, %v2067_v49  ;;  %v2089_v52 = vstv %s1998_s26  ;;  %s4064_s28 = sshll.u32 %s4815_s18, 2  ;;  %s4065_s29 = sshll.u32 %s4813_s15, 3 }
 0x4b3   :  { %vm2090_vm12 = vcmp.lt.s32.totalorder %v4356_v19, %v2089_v52  ;;  %vm2091_vm13 = vcmp.lt.s32.totalorder %v4358_v20, %v2089_v52  ;;  %s2007_s30 = sshra.s32 %s4064_s28, 4  ;;  %s2025_s3 = sadd.s32 %s4065_s29, %s5354_s1 }
 0x4b4   :  { %v2071_v53 = vshrl.u32 %v2069_v51, 16  ;;  %v2070_v54 = vand.u32 65535, %v2069_v51  ;;  %v2092_v55 = vsel %vm2090_vm12, 1, %v4328_v21  ;;  %v2093_v56 = vsel %vm2091_vm13, 1, %v4328_v21  ;;  %s2008_s4 = sadd.s32 %s2007_s30, %s2005_s27  ;;  %s4066_s5 = sshll.u32 %s4815_s18, 3 }
 0x4b5   :  { %v2094_v57 = vadd.s32 %v2093_v56, %v2092_v55  ;;  %v2139_v58 = vstv %s2008_s4  ;;  %s2027_s6 = sshra.s32 %s4066_s5, 4  ;;  %s1999_s7 = smul.u32 3, %s4813_s15 }
 0x4b6   :  { %v2073_v59 = vcvt.s32.f32 %v2071_v53  ;;  %v2072_v60 = vcvt.s32.f32 %v2070_v54  ;;  %vm2140_vm14 = vcmp.lt.s32.totalorder %v4356_v19, %v2139_v58  ;;  %vm2141_vm15 = vcmp.lt.s32.totalorder %v4358_v20, %v2139_v58  ;;  %s2028_s8 = sadd.s32 %s2027_s6, %s2025_s3  ;;  %s2001_s9 = smul.u32 3, %s4815_s18 }
 0x4b7   :  { %v2095_v61 = vand.u32 65535, %v2094_v57  ;;  %v2096_v62 = vshrl.u32 %v2094_v57, 16  ;;  %v2142_v63 = vsel %vm2140_vm14, 1, %v4328_v21  ;;  %v2143_v0 = vsel %vm2141_vm15, 1, %v4328_v21  ;;  %s2000_s10 = sadd.s32 %s1999_s7, %s5354_s1  ;;  %s2009_s11 = smul.u32 5, %s4813_s15 }
 0x4b8   :  { %2076 = vadd.xlane.f32.xlu0 %v2073_v59  ;;  %2074 = vadd.xlane.f32.xlu1 %v2072_v60  ;;  %v2144_v1 = vadd.s32 %v2143_v0, %v2142_v63  ;;  %v2239_v2 = vstv %s2028_s8  ;;  %s2002_s12 = sshra.s32 %s2001_s9, 4  ;;  %s2011_s13 = smul.u32 5, %s4815_s18 }
 0x4b9   :  { %v2097_v3 = vcvt.s32.f32 %v2095_v61  ;;  %v2098_v4 = vcvt.s32.f32 %v2096_v62  ;;  %vm2240_vm0 = vcmp.lt.s32.totalorder %v4356_v19, %v2239_v2  ;;  %vm2241_vm1 = vcmp.lt.s32.totalorder %v4358_v20, %v2239_v2  ;;  %s2003_s14 = sadd.s32 %s2002_s12, %s2000_s10  ;;  %s2010_s19 = sadd.s32 %s2009_s11, %s5354_s1 }
 0x4ba   :  { %v2145_v5 = vand.u32 65535, %v2144_v1  ;;  %v2146_v6 = vshrl.u32 %v2144_v1, 16  ;;  %v2242_v7 = vsel %vm2240_vm0, 1, %v4328_v21  ;;  %v2243_v8 = vsel %vm2241_vm1, 1, %v4328_v21  ;;  %s2012_s17 = sshra.s32 %s2011_s13, 4  ;;  %s2014_s16 = smul.u32 6, %s4813_s15 }
 0x4bb   :  { %v2244_v9 = vadd.s32 %v2243_v8, %v2242_v7  ;;  %v2114_v10 = vstv %s2003_s14  ;;  %s2013_s20 = sadd.s32 %s2012_s17, %s2010_s19  ;;  %s2016_s21 = smul.u32 6, %s4815_s18 }
 0x4bc   :  { %2099 = vadd.xlane.f32.xlu0 %v2097_v3  ;;  %2101 = vadd.xlane.f32.xlu1 %v2098_v4  ;;  %vm2115_vm2 = vcmp.lt.s32.totalorder %v4356_v19, %v2114_v10  ;;  %vm2116_vm3 = vcmp.lt.s32.totalorder %v4358_v20, %v2114_v10  ;;  %s2015_s22 = sadd.s32 %s2014_s16, %s5354_s1  ;;  %s2019_s23 = smul.u32 7, %s4813_s15  ;;  %v2147_v11 = vcvt.s32.f32 %v2145_v5  ;;  %v2148_v12 = vcvt.s32.f32 %v2146_v6 }
 0x4bd   :  { %v2117_v13 = vsel %vm2115_vm2, 1, %v4328_v21  ;;  %v2118_v14 = vsel %vm2116_vm3, 1, %v4328_v21  ;;  %s2017_s24 = sshra.s32 %s2016_s21, 4  ;;  %s2021_s25 = smul.u32 7, %s4815_s18  ;;  %v2245_v15 = vand.u32 65535, %v2244_v9  ;;  %v2246_v16 = vshrl.u32 %v2244_v9, 16 }
 0x4be   :  { %v2119_v17 = vadd.s32 %v2118_v14, %v2117_v13  ;;  %v2164_v18 = vstv %s2013_s20  ;;  %s2018_s26 = sadd.s32 %s2017_s24, %s2015_s22  ;;  %s2020_s27 = sadd.s32 %s2019_s23, %s5354_s1 }
 0x4bf   :  { %vm2165_vm4 = vcmp.lt.s32.totalorder %v4356_v19, %v2164_v18  ;;  %vm2166_vm5 = vcmp.lt.s32.totalorder %v4358_v20, %v2164_v18  ;;  %s2022_s28 = sshra.s32 %s2021_s25, 4  ;;  %s2029_s29 = smul.u32 9, %s4813_s15  ;;  %v2189_v26 = vstv %s2018_s26  ;;  %v2247_v28 = vcvt.s32.f32 %v2245_v15 }
 0x4c0   :  { %2149 = vadd.xlane.f32.xlu0 %v2147_v11  ;;  %2151 = vadd.xlane.f32.xlu1 %v2148_v12  ;;  %v2167_v22 = vsel %vm2165_vm4, 1, %v4328_v21  ;;  %v2168_v23 = vsel %vm2166_vm5, 1, %v4328_v21  ;;  %s2023_s30 = sadd.s32 %s2022_s28, %s2020_s27  ;;  %s2031_s3 = smul.u32 9, %s4815_s18  ;;  %v2121_v24 = vshrl.u32 %v2119_v17, 16  ;;  %v2248_v29 = vcvt.s32.f32 %v2246_v16 }
 0x4c1   :  { %v4867_v25 = vadd.s32 %v2168_v23, %v2167_v22  ;;  %v2214_v27 = vstv %s2023_s30  ;;  %s2030_s4 = sadd.s32 %s2029_s29, %s5354_s1  ;;  %s2034_s5 = smul.u32 10, %s4813_s15  ;;  %vm2190_vm6 = vcmp.lt.s32.totalorder %v4356_v19, %v2189_v26  ;;  %vm2191_vm7 = vcmp.lt.s32.totalorder %v4358_v20, %v2189_v26 }
 0x4c2   :  { %s2032_s6 = sshra.s32 %s2031_s3, 4  ;;  %s2036_s7 = smul.u32 10, %s4815_s18  ;;  %v2192_v31 = vsel %vm2190_vm6, 1, %v4328_v21  ;;  %v2193_v32 = vsel %vm2191_vm7, 1, %v4328_v21  ;;  %vm2215_vm8 = vcmp.lt.s32.totalorder %v4356_v19, %v2214_v27  ;;  %vm2216_vm9 = vcmp.lt.s32.totalorder %v4358_v20, %v2214_v27 }
 0x4c3   :  { %v2171_v30 = vshrl.u32 %v4867_v25, 16  ;;  %s2033_s8 = sadd.s32 %s2032_s6, %s2030_s4  ;;  %s2035_s9 = sadd.s32 %s2034_s5, %s5354_s1  ;;  %v4878_v33 = vadd.s32 %v2193_v32, %v2192_v31  ;;  %v2123_v35 = vcvt.s32.f32 %v2121_v24  ;;  %v2120_v36 = vand.u32 65535, %v2119_v17 }
 0x4c4   :  { %2249 = vadd.xlane.f32.xlu0 %v2247_v28  ;;  %2251 = vadd.xlane.f32.xlu1 %v2248_v29  ;;  %v2264_v34 = vstv %s2033_s8  ;;  %s2037_s10 = sshra.s32 %s2036_s7, 4  ;;  %s2039_s11 = smul.u32 11, %s4813_s15  ;;  %v2217_v37 = vsel %vm2215_vm8, 1, %v4328_v21  ;;  %v2218_v38 = vsel %vm2216_vm9, 1, %v4328_v21  ;;  %v2170_v46 = vand.u32 65535, %v4867_v25 }
 0x4c5   :  { %s2038_s12 = sadd.s32 %s2037_s10, %s2035_s9  ;;  %s2041_s13 = smul.u32 11, %s4815_s18  ;;  %v2173_v39 = vcvt.s32.f32 %v2171_v30  ;;  %v2196_v40 = vshrl.u32 %v4878_v33, 16  ;;  %v4887_v41 = vadd.s32 %v2218_v38, %v2217_v37  ;;  %vm2265_vm10 = vcmp.lt.s32.totalorder %v4356_v19, %v2264_v34 }
 0x4c6   :  { %s2040_s14 = sadd.s32 %s2039_s11, %s5354_s1  ;;  %s2044_s19 = smul.u32 12, %s4813_s15  ;;  %vm2266_vm11 = vcmp.lt.s32.totalorder %v4358_v20, %v2264_v34  ;;  %v2267_v42 = vsel %vm2265_vm10, 1, %v4328_v21  ;;  %v2289_v43 = vstv %s2038_s12  ;;  %v2122_v45 = vcvt.s32.f32 %v2120_v36 }
 0x4c7   :  { %s2042_s17 = sshra.s32 %s2041_s13, 4  ;;  %s2046_s16 = smul.u32 12, %s4815_s18  ;;  %v2268_v44 = vsel %vm2266_vm11, 1, %v4328_v21  ;;  %vm2290_vm12 = vcmp.lt.s32.totalorder %v4356_v19, %v2289_v43  ;;  %vm2291_vm13 = vcmp.lt.s32.totalorder %v4358_v20, %v2289_v43  ;;  %v2198_v47 = vcvt.s32.f32 %v2196_v40 }
 0x4c8   :  { %2126 = vadd.xlane.f32.xlu0 %v2123_v35  ;;  %2176 = vadd.xlane.f32.xlu1 %v2173_v39  ;;  %s2043_s20 = sadd.s32 %s2042_s17, %s2040_s14  ;;  %s2045_s21 = sadd.s32 %s2044_s19, %s5354_s1  ;;  %v2221_v48 = vshrl.u32 %v4887_v41, 16  ;;  %v2269_v49 = vadd.s32 %v2268_v44, %v2267_v42  ;;  %v2292_v51 = vsel %vm2290_vm12, 1, %v4328_v21  ;;  %v2293_v52 = vsel %vm2291_vm13, 1, %v4328_v21 }
 0x4c9   :  { %s2047_s22 = sshra.s32 %s2046_s16, 4  ;;  %s2049_s23 = smul.u32 13, %s4813_s15  ;;  %v2314_v50 = vstv %s2043_s20  ;;  %v2172_v53 = vcvt.s32.f32 %v2170_v46  ;;  %v2195_v56 = vand.u32 65535, %v4878_v33  ;;  %v2294_v58 = vadd.s32 %v2293_v52, %v2292_v51 }
 0x4ca   :  { %s2048_s24 = sadd.s32 %s2047_s22, %s2045_s21  ;;  %s2051_s25 = smul.u32 13, %s4815_s18  ;;  %vm2315_vm14 = vcmp.lt.s32.totalorder %v4356_v19, %v2314_v50  ;;  %vm2316_vm15 = vcmp.lt.s32.totalorder %v4358_v20, %v2314_v50  ;;  %v2223_v55 = vcvt.s32.f32 %v2221_v48  ;;  %v2271_v57 = vshrl.u32 %v2269_v49, 16 }
 0x4cb   :  { %s2050_s26 = sadd.s32 %s2049_s23, %s5354_s1  ;;  %s2054_s27 = smul.u32 14, %s4813_s15  ;;  %v2339_v54 = vstv %s2048_s24  ;;  %v2317_v59 = vsel %vm2315_vm14, 1, %v4328_v21  ;;  %v2318_v60 = vsel %vm2316_vm15, 1, %v4328_v21  ;;  %v2220_v61 = vand.u32 65535, %v4887_v41 }
 0x4cc   :  { %2124 = vadd.xlane.f32.xlu0 %v2122_v45  ;;  %2201 = vadd.xlane.f32.xlu1 %v2198_v47  ;;  %s2052_s28 = sshra.s32 %s2051_s25, 4  ;;  %s2056_s29 = smul.u32 14, %s4815_s18  ;;  %vm2340_vm0 = vcmp.lt.s32.totalorder %v4356_v19, %v2339_v54  ;;  %vm2341_vm1 = vcmp.lt.s32.totalorder %v4358_v20, %v2339_v54  ;;  %v2197_v63 = vcvt.s32.f32 %v2195_v56  ;;  %v2273_v0 = vcvt.s32.f32 %v2271_v57 }
 0x4cd   :  { %s2053_s30 = sadd.s32 %s2052_s28, %s2050_s26  ;;  %s2055_s3 = sadd.s32 %s2054_s27, %s5354_s1  ;;  %v2296_v1 = vshrl.u32 %v2294_v58, 16  ;;  %v2319_v2 = vadd.s32 %v2318_v60, %v2317_v59  ;;  %v2342_v3 = vsel %vm2340_vm0, 1, %v4328_v21  ;;  %v2343_v4 = vsel %vm2341_vm1, 1, %v4328_v21 }
 0x4ce   :  { %s2059_s4 = smul.u32 15, %s4813_s15  ;;  %s2057_s5 = sshra.s32 %s2056_s29, 4  ;;  %v2364_v62 = vstv %s2053_s30  ;;  %v2222_v5 = vcvt.s32.f32 %v2220_v61  ;;  %v2270_v8 = vand.u32 65535, %v2269_v49  ;;  %v2344_v10 = vadd.s32 %v2343_v4, %v2342_v3 }
 0x4cf   :  { %s2061_s6 = smul.u32 15, %s4815_s18  ;;  %s2058_s7 = sadd.s32 %s2057_s5, %s2055_s3  ;;  %vm2365_vm2 = vcmp.lt.s32.totalorder %v4356_v19, %v2364_v62  ;;  %vm2366_vm3 = vcmp.lt.s32.totalorder %v4358_v20, %v2364_v62  ;;  %v2298_v7 = vcvt.s32.f32 %v2296_v1  ;;  %v2321_v9 = vshrl.u32 %v2319_v2, 16 }
 0x4d0   :  { %2174 = vadd.xlane.f32.xlu0 %v2172_v53  ;;  %2226 = vadd.xlane.f32.xlu1 %v2223_v55  ;;  %s2060_s8 = sadd.s32 %s2059_s4, %s5354_s1  ;;  %v2389_v6 = vstv %s2058_s7  ;;  %v2367_v11 = vsel %vm2365_vm2, 1, %v4328_v21  ;;  %v2368_v12 = vsel %vm2366_vm3, 1, %v4328_v21  ;;  %v2295_v13 = vand.u32 65535, %v2294_v58 }
 0x4d1   :  { %s2062_s9 = sshra.s32 %s2061_s6, 4  ;;  %vm2390_vm4 = vcmp.lt.s32.totalorder %v4356_v19, %v2389_v6  ;;  %vm2391_vm5 = vcmp.lt.s32.totalorder %v4358_v20, %v2389_v6  ;;  %v2272_v15 = vcvt.s32.f32 %v2270_v8  ;;  %v2323_v16 = vcvt.s32.f32 %v2321_v9 }
 0x4d2   :  { %s2063_s10 = sadd.s32 %s2062_s9, %s2060_s8  ;;  %v2346_v17 = vshrl.u32 %v2344_v10, 16  ;;  %v2369_v18 = vadd.s32 %v2368_v12, %v2367_v11  ;;  %v2392_v22 = vsel %vm2390_vm4, 1, %v4328_v21  ;;  %v2393_v23 = vsel %vm2391_vm5, 1, %v4328_v21 }
 0x4d3   :  { %v2414_v14 = vstv %s2063_s10  ;;  %v2297_v24 = vcvt.s32.f32 %v2295_v13  ;;  %v2320_v26 = vand.u32 65535, %v2319_v2  ;;  %v2394_v28 = vadd.s32 %v2393_v23, %v2392_v22 }
 0x4d4   :  { %2199 = vadd.xlane.f32.xlu0 %v2197_v63  ;;  %2276 = vadd.xlane.f32.xlu1 %v2273_v0  ;;  %vm2415_vm6 = vcmp.lt.s32.totalorder %v4356_v19, %v2414_v14  ;;  %vm2416_vm7 = vcmp.lt.s32.totalorder %v4358_v20, %v2414_v14  ;;  %v2348_v25 = vcvt.s32.f32 %v2346_v17  ;;  %v2371_v27 = vshrl.u32 %v2369_v18, 16 }
 0x4d5   :  { %v2417_v29 = vsel %vm2415_vm6, 1, %v4328_v21  ;;  %v2418_v30 = vsel %vm2416_vm7, 1, %v4328_v21  ;;  %v2345_v31 = vand.u32 65535, %v2344_v10  ;;  %v2322_v32 = vcvt.s32.f32 %v2320_v26 }
 0x4d6   :  { %v2373_v33 = vcvt.s32.f32 %v2371_v27  ;;  %v2396_v34 = vshrl.u32 %v2394_v28, 16  ;;  %v2419_v35 = vadd.s32 %v2418_v30, %v2417_v29  ;;  %v2370_v38 = vand.u32 65535, %v2369_v18 }
 0x4d7   :  { %v2347_v36 = vcvt.s32.f32 %v2345_v31  ;;  %v2395_v42 = vand.u32 65535, %v2394_v28 }
 0x4d8   :  { %2224 = vadd.xlane.f32.xlu0 %v2222_v5  ;;  %2301 = vadd.xlane.f32.xlu1 %v2298_v7  ;;  %v2398_v37 = vcvt.s32.f32 %v2396_v34  ;;  %v2421_v39 = vshrl.u32 %v2419_v35, 16  ;;  %v2372_v40 = vcvt.s32.f32 %v2370_v38  ;;  %v2420_v43 = vand.u32 65535, %v2419_v35 }
 0x4d9   :  { %v2397_v44 = vcvt.s32.f32 %v2395_v42 }
 0x4da   :  { %v2423_v41 = vcvt.s32.f32 %v2421_v39  ;;  %v2422_v45 = vcvt.s32.f32 %v2420_v43 }
 0x4dc   :  { %2274 = vadd.xlane.f32.xlu0 %v2272_v15  ;;  %2326 = vadd.xlane.f32.xlu1 %v2323_v16 }
 0x4e0   :  { %2299 = vadd.xlane.f32.xlu0 %v2297_v24  ;;  %2351 = vadd.xlane.f32.xlu1 %v2348_v25 }
 0x4e4   :  { %2324 = vadd.xlane.f32.xlu0 %v2322_v32  ;;  %2376 = vadd.xlane.f32.xlu1 %v2373_v33 }
 0x4e8   :  { %2349 = vadd.xlane.f32.xlu0 %v2347_v36  ;;  %2401 = vadd.xlane.f32.xlu1 %v2398_v37 }
 0x4ec   :  { %2374 = vadd.xlane.f32.xlu0 %v2372_v40  ;;  %2426 = vadd.xlane.f32.xlu1 %v2423_v41 }
 0x4f0   :  { %2399 = vadd.xlane.f32.xlu0 %v2397_v44  ;;  %2424 = vadd.xlane.f32.xlu1 %v2422_v45 }
 0x545   :  { %v2077_v46 = vpop.xlane.xlu0 %2076  ;;  %v2075_v47 = vpop.xlane.xlu1 %2074 }
 0x546   :  { %v2079_v48 = vcvt.f32.s32 %v2077_v46  ;;  %v2078_v50 = vcvt.f32.s32 %v2075_v47 }
 0x548   :  { %v2080_v49 = vshll.u32 %v2079_v48, 16 }
 0x549   :  { %v2100_v51 = vpop.xlane.xlu0 %2099  ;;  %v2102_v52 = vpop.xlane.xlu1 %2101 }
 0x54a   :  { %v2081_v53 = vadd.s32 %v2080_v49, %v2078_v50  ;;  %v2104_v54 = vcvt.f32.s32 %v2102_v52  ;;  %v2103_v56 = vcvt.f32.s32 %v2100_v51 }
 0x54c   :  { %v2082_v55 = vrot.slane %v2081_v53, 4  ;;  %v2105_v57 = vshll.u32 %v2104_v54, 16 }
 0x54d   :  { %v2150_v58 = vpop.xlane.xlu0 %2149  ;;  %v2152_v59 = vpop.xlane.xlu1 %2151 }
 0x54e   :  { %v2106_v60 = vadd.s32 %v2105_v57, %v2103_v56  ;;  %v2154_v61 = vcvt.f32.s32 %v2152_v59  ;;  %v2083_v62 = vadd.s32 %v2082_v55, %v2081_v53  ;;  %v2153_v0 = vcvt.f32.s32 %v2150_v58 }
 0x550   :  { %v2107_v63 = vrot.slane %v2106_v60, 4  ;;  %v2155_v1 = vshll.u32 %v2154_v61, 16  ;;  %v2084_v2 = vrot.slane %v2083_v62, 2 }
 0x551   :  { %v2250_v3 = vpop.xlane.xlu0 %2249  ;;  %v2252_v4 = vpop.xlane.xlu1 %2251 }
 0x552   :  { %v2156_v5 = vadd.s32 %v2155_v1, %v2153_v0  ;;  %v2085_v6 = vadd.s32 %v2084_v2, %v2083_v62  ;;  %v2108_v7 = vadd.s32 %v2107_v63, %v2106_v60  ;;  %v2254_v10 = vcvt.f32.s32 %v2252_v4 }
 0x553   :  { %v2253_v28 = vcvt.f32.s32 %v2250_v3 }
 0x554   :  { %v2086_v8 = vrot.slane %v2085_v6, 1  ;;  %v2157_v9 = vrot.slane %v2156_v5, 4  ;;  %v2109_v13 = vrot.slane %v2108_v7, 2  ;;  %v2255_v17 = vshll.u32 %v2254_v10, 16 }
 0x555   :  { %v2127_v11 = vpop.xlane.xlu0 %2126  ;;  %v2177_v12 = vpop.xlane.xlu1 %2176 }
 0x556   :  { %v2129_v14 = vcvt.f32.s32 %v2127_v11  ;;  %v2087_v15 = vadd.s32 %v2086_v8, %v2085_v6  ;;  %v2110_v16 = vadd.s32 %v2109_v13, %v2108_v7  ;;  %v2158_v24 = vadd.s32 %v2157_v9, %v2156_v5 }
 0x557   :  { %v2179_v26 = vcvt.f32.s32 %v2177_v12  ;;  %v2256_v31 = vadd.s32 %v2255_v17, %v2253_v28 }
 0x558   :  { %4205 = vpush %v2087_v15  ;;  %v2111_v23 = vrot.slane %v2110_v16, 1  ;;  %v2130_v25 = vshll.u32 %v2129_v14, 16  ;;  %v2159_v35 = vrot.slane %v2158_v24, 2 }
 0x559   :  { %v2125_v18 = vpop.xlane.xlu0 %2124  ;;  %v2202_v22 = vpop.xlane.xlu1 %2201  ;;  %v2180_v36 = vshll.u32 %v2179_v26, 16  ;;  %v2257_v41 = vrot.slane %v2256_v31, 4 }
 0x55a   :  { %v2128_v27 = vcvt.f32.s32 %v2125_v18  ;;  %v2112_v29 = vadd.s32 %v2111_v23, %v2110_v16  ;;  %v2204_v32 = vcvt.f32.s32 %v2202_v22  ;;  %v2160_v45 = vadd.s32 %v2159_v35, %v2158_v24 }
 0x55b   :  { %v2258_v57 = vadd.s32 %v2257_v41, %v2256_v31 }
 0x55c   :  { %v2131_v30 = vadd.s32 %v2130_v25, %v2128_v27  ;;  %4207 = vpush %v2112_v29  ;;  %v2205_v42 = vshll.u32 %v2204_v32, 16  ;;  %v2161_v56 = vrot.slane %v2160_v45, 1 }
 0x55d   :  { %v2175_v33 = vpop.xlane.xlu0 %2174  ;;  %v2227_v34 = vpop.xlane.xlu1 %2226  ;;  %v2259_v7 = vrot.slane %v2258_v57, 2 }
 0x55e   :  { %v2132_v37 = vrot.slane %v2131_v30, 4  ;;  %v2178_v38 = vcvt.f32.s32 %v2175_v33  ;;  %v2229_v47 = vcvt.f32.s32 %v2227_v34  ;;  %v2162_v5 = vadd.s32 %v2161_v56, %v2160_v45 }
 0x55f   :  { %v2260_v23 = vadd.s32 %v2259_v7, %v2258_v57 }
 0x560   :  { %v2181_v39 = vadd.s32 %v2180_v36, %v2178_v38  ;;  %v2133_v40 = vadd.s32 %v2132_v37, %v2131_v30  ;;  %v2230_v58 = vshll.u32 %v2229_v47, 16 }
 0x561   :  { %v2200_v43 = vpop.xlane.xlu0 %2199  ;;  %v2277_v44 = vpop.xlane.xlu1 %2276  ;;  %v2261_v36 = vrot.slane %v2260_v23, 1 }
 0x562   :  { %v2182_v46 = vrot.slane %v2181_v39, 4  ;;  %v2203_v48 = vcvt.f32.s32 %v2200_v43  ;;  %v2134_v49 = vrot.slane %v2133_v40, 2  ;;  %v2279_v53 = vcvt.f32.s32 %v2277_v44 }
 0x564   :  { %v2206_v50 = vadd.s32 %v2205_v42, %v2203_v48  ;;  %v2135_v51 = vadd.s32 %v2134_v49, %v2133_v40  ;;  %v2183_v52 = vadd.s32 %v2182_v46, %v2181_v39  ;;  %v2280_v2 = vshll.u32 %v2279_v53, 16 }
 0x565   :  { %v2225_v54 = vpop.xlane.xlu0 %2224  ;;  %v2302_v55 = vpop.xlane.xlu1 %2301  ;;  %v2262_v49 = vadd.s32 %v2261_v36, %v2260_v23 }
 0x566   :  { %v2207_v59 = vrot.slane %v2206_v50, 4  ;;  %v2228_v60 = vcvt.f32.s32 %v2225_v54  ;;  %v2136_v61 = vrot.slane %v2135_v51, 1  ;;  %v2184_v62 = vrot.slane %v2183_v52, 2 }
 0x567   :  { %v2304_v9 = vcvt.f32.s32 %v2302_v55 }
 0x568   :  { %v2231_v63 = vadd.s32 %v2230_v58, %v2228_v60  ;;  %v2137_v0 = vadd.s32 %v2136_v61, %v2135_v51  ;;  %v2208_v1 = vadd.s32 %v2207_v59, %v2206_v50  ;;  %v2185_v6 = vadd.s32 %v2184_v62, %v2183_v52 }
 0x569   :  { %v2275_v3 = vpop.xlane.xlu0 %2274  ;;  %v2327_v4 = vpop.xlane.xlu1 %2326  ;;  %v2305_v24 = vshll.u32 %v2304_v9, 16 }
 0x56a   :  { %v2232_v8 = vrot.slane %v2231_v63, 4  ;;  %v2278_v10 = vcvt.f32.s32 %v2275_v3  ;;  %4209 = vpush %v2137_v0  ;;  %v2209_v11 = vrot.slane %v2208_v1, 2  ;;  %v2186_v12 = vrot.slane %v2185_v6, 1 }
 0x56b   :  { %4211 = vpush %v2162_v5  ;;  %v2329_v16 = vcvt.f32.s32 %v2327_v4 }
 0x56c   :  { %v2281_v13 = vadd.s32 %v2280_v2, %v2278_v10  ;;  %v2210_v14 = vadd.s32 %v2209_v11, %v2208_v1  ;;  %v2233_v15 = vadd.s32 %v2232_v8, %v2231_v63  ;;  %v2187_v22 = vadd.s32 %v2186_v12, %v2185_v6 }
 0x56d   :  { %v2300_v17 = vpop.xlane.xlu0 %2299  ;;  %v2352_v18 = vpop.xlane.xlu1 %2351  ;;  %v2330_v32 = vshll.u32 %v2329_v16, 16 }
 0x56e   :  { %v2282_v25 = vrot.slane %v2281_v13, 4  ;;  %v2303_v26 = vcvt.f32.s32 %v2300_v17  ;;  %v2211_v27 = vrot.slane %v2210_v14, 1  ;;  %4213 = vpush %v2187_v22  ;;  %v2234_v28 = vrot.slane %v2233_v15, 2 }
 0x56f   :  { %v2354_v38 = vcvt.f32.s32 %v2352_v18 }
 0x570   :  { %v2306_v29 = vadd.s32 %v2305_v24, %v2303_v26  ;;  %v2212_v30 = vadd.s32 %v2211_v27, %v2210_v14  ;;  %v2283_v31 = vadd.s32 %v2282_v25, %v2281_v13  ;;  %v2235_v35 = vadd.s32 %v2234_v28, %v2233_v15 }
 0x571   :  { %v2325_v33 = vpop.xlane.xlu0 %2324  ;;  %v2377_v34 = vpop.xlane.xlu1 %2376  ;;  %v2355_v50 = vshll.u32 %v2354_v38, 16 }
 0x572   :  { %v2307_v37 = vrot.slane %v2306_v29, 4  ;;  %v2328_v39 = vcvt.f32.s32 %v2325_v33  ;;  %4215 = vpush %v2212_v30  ;;  %v2284_v40 = vrot.slane %v2283_v31, 2  ;;  %v2236_v41 = vrot.slane %v2235_v35, 1 }
 0x573   :  { %v2379_v45 = vcvt.f32.s32 %v2377_v34 }
 0x574   :  { %v2331_v42 = vadd.s32 %v2330_v32, %v2328_v39  ;;  %v2285_v43 = vadd.s32 %v2284_v40, %v2283_v31  ;;  %v2308_v44 = vadd.s32 %v2307_v37, %v2306_v29  ;;  %v2237_v48 = vadd.s32 %v2236_v41, %v2235_v35 }
 0x575   :  { %v2350_v46 = vpop.xlane.xlu0 %2349  ;;  %v2402_v47 = vpop.xlane.xlu1 %2401  ;;  %v2380_v58 = vshll.u32 %v2379_v45, 16 }
 0x576   :  { %v2332_v51 = vrot.slane %v2331_v42, 4  ;;  %v2353_v52 = vcvt.f32.s32 %v2350_v46  ;;  %v2286_v53 = vrot.slane %v2285_v43, 1  ;;  %4217 = vpush %v2237_v48  ;;  %v2309_v54 = vrot.slane %v2308_v44, 2 }
 0x577   :  { %4219 = vpush %v2262_v49  ;;  %v2404_v59 = vcvt.f32.s32 %v2402_v47 }
 0x578   :  { %v2333_v55 = vadd.s32 %v2332_v51, %v2331_v42  ;;  %v2356_v56 = vadd.s32 %v2355_v50, %v2353_v52  ;;  %v2287_v57 = vadd.s32 %v2286_v53, %v2285_v43  ;;  %v2310_v62 = vadd.s32 %v2309_v54, %v2308_v44 }
 0x579   :  { %v2375_v60 = vpop.xlane.xlu0 %2374  ;;  %v2427_v61 = vpop.xlane.xlu1 %2426  ;;  %v2405_v7 = vshll.u32 %v2404_v59, 16 }
 0x57a   :  { %v2357_v63 = vrot.slane %v2356_v56, 4  ;;  %v2378_v0 = vcvt.f32.s32 %v2375_v60  ;;  %v2429_v1 = vcvt.f32.s32 %v2427_v61  ;;  %4221 = vpush %v2287_v57  ;;  %v2334_v2 = vrot.slane %v2333_v55, 2 }
 0x57b   :  { %v2311_v3 = vrot.slane %v2310_v62, 1 }
 0x57c   :  { %v2358_v4 = vadd.s32 %v2357_v63, %v2356_v56  ;;  %v2381_v5 = vadd.s32 %v2380_v58, %v2378_v0  ;;  %v2335_v6 = vadd.s32 %v2334_v2, %v2333_v55  ;;  %v2430_v8 = vshll.u32 %v2429_v1, 16 }
 0x57d   :  { %v2400_v9 = vpop.xlane.xlu0 %2399  ;;  %v2425_v10 = vpop.xlane.xlu1 %2424  ;;  %v2312_v11 = vadd.s32 %v2311_v3, %v2310_v62 }
 0x57e   :  { %v2382_v12 = vrot.slane %v2381_v5, 4  ;;  %v2403_v13 = vcvt.f32.s32 %v2400_v9  ;;  %v2428_v14 = vcvt.f32.s32 %v2425_v10  ;;  %v2336_v15 = vrot.slane %v2335_v6, 1 }
 0x57f   :  { %4223 = vpush %v2312_v11  ;;  %v2359_v16 = vrot.slane %v2358_v4, 2 }
 0x580   :  { %v2383_v17 = vadd.s32 %v2382_v12, %v2381_v5  ;;  %v2406_v18 = vadd.s32 %v2405_v7, %v2403_v13  ;;  %v2431_v22 = vadd.s32 %v2430_v8, %v2428_v14  ;;  %v2337_v23 = vadd.s32 %v2336_v15, %v2335_v6 }
 0x581   :  { %v2360_v24 = vadd.s32 %v2359_v16, %v2358_v4 }
 0x582   :  { %v2407_v25 = vrot.slane %v2406_v18, 4  ;;  %v2432_v26 = vrot.slane %v2431_v22, 4  ;;  %4225 = vpush %v2337_v23  ;;  %v2384_v27 = vrot.slane %v2383_v17, 2 }
 0x583   :  { %v2361_v28 = vrot.slane %v2360_v24, 1 }
 0x584   :  { %v2408_v29 = vadd.s32 %v2407_v25, %v2406_v18  ;;  %v2433_v30 = vadd.s32 %v2432_v26, %v2431_v22  ;;  %v2385_v31 = vadd.s32 %v2384_v27, %v2383_v17 }
 0x585   :  { %v2362_v32 = vadd.s32 %v2361_v28, %v2360_v24 }
 0x586   :  { %v2386_v33 = vrot.slane %v2385_v31, 1  ;;  %v2409_v34 = vrot.slane %v2408_v29, 2  ;;  %v2434_v35 = vrot.slane %v2433_v30, 2 }
 0x587   :  { %4227 = vpush %v2362_v32 }
 0x588   :  { %v2387_v36 = vadd.s32 %v2386_v33, %v2385_v31  ;;  %v2410_v37 = vadd.s32 %v2409_v34, %v2408_v29  ;;  %v2435_v38 = vadd.s32 %v2434_v35, %v2433_v30 }
 0x589   :  { %s4206_s11 = spop %4205 }
 0x58a   :  { %4229 = vpush %v2387_v36  ;;  %v2411_v39 = vrot.slane %v2410_v37, 1  ;;  %v2436_v40 = vrot.slane %v2435_v38, 1  ;;  %p2439_p13 = scmp.lt.s32.totalorder %s4206_s11, 102 }
 0x58c   :  { %v2412_v41 = vadd.s32 %v2411_v39, %v2410_v37  ;;  %v2437_v42 = vadd.s32 %v2436_v40, %v2435_v38  ;;  %s2440_s17 = scalar_select %p2439_p13, 1, 0 }
 0x58d   :  { %s4208_s12 = spop %4207 }
 0x58e   :  { %4231 = vpush %v2412_v41  ;;  %p2441_p12 = scmp.lt.s32.totalorder %s4208_s12, 102 }
 0x58f   :  { %4233 = vpush %v2437_v42 }
 0x590   :  { %s2442_s19 = scalar_select %p2441_p12, 1, 0 }
 0x592   :  { %s2443_s21 = sadd.s32 %s2442_s19, %s2440_s17 }
 0x59b   :  { %s4210_s13 = spop %4209 }
 0x59c   :  { %p2444_p0 = scmp.lt.s32.totalorder %s4210_s13, 102  ;;  %s4212_s14 = spop %4211 }
 0x59d   :  { %p2447_p1 = scmp.lt.s32.totalorder %s4212_s14, 102 }
 0x59e   :  { %s2445_s20 = scalar_select %p2444_p0, 1, 0 }
 0x59f   :  { %s4214_s16 = spop %4213 }
 0x5a0   :  { %p2450_p2 = scmp.lt.s32.totalorder %s4214_s16, 102  ;;  %s2446_s26 = sadd.s32 %s2445_s20, %s2443_s21 }
 0x5a1   :  { %s2448_s24 = scalar_select %p2447_p1, 1, 0 }
 0x5a2   :  { %s2451_s27 = scalar_select %p2450_p2, 1, 0 }
 0x5a3   :  { %s4216_s22 = spop %4215  ;;  %s2449_s5 = sadd.s32 %s2448_s24, %s2446_s26 }
 0x5a4   :  { %p2453_p3 = scmp.lt.s32.totalorder %s4216_s22, 102  ;;  %s2452_s7 = sadd.s32 %s2451_s27, %s2449_s5 }
 0x5a6   :  { %s2454_s29 = scalar_select %p2453_p3, 1, 0 }
 0x5a7   :  { %s4218_s23 = spop %4217 }
 0x5a8   :  { %s4220_s25 = spop %4219  ;;  %p2456_p4 = scmp.lt.s32.totalorder %s4218_s23, 102 }
 0x5a9   :  { %p2459_p5 = scmp.lt.s32.totalorder %s4220_s25, 102  ;;  %s2455_s9 = sadd.s32 %s2454_s29, %s2452_s7 }
 0x5aa   :  { %s2457_s30 = scalar_select %p2456_p4, 1, 0 }
 0x5ab   :  { %s4222_s28 = spop %4221 }
 0x5ac   :  { %p2462_p6 = scmp.lt.s32.totalorder %s4222_s28, 102  ;;  %s2458_s10 = sadd.s32 %s2457_s30, %s2455_s9 }
 0x5ad   :  { %s2460_s4 = scalar_select %p2459_p5, 1, 0 }
 0x5ae   :  { %s2463_s8 = scalar_select %p2462_p6, 1, 0 }
 0x5af   :  { %s2461_s14 = sadd.s32 %s2460_s4, %s2458_s10 }
 0x5b0   :  { %s4224_s3 = spop %4223  ;;  %s2464_s17 = sadd.s32 %s2463_s8, %s2461_s14 }
 0x5b1   :  { %p2465_p7 = scmp.lt.s32.totalorder %s4224_s3, 102 }
 0x5b3   :  { %s4226_s6 = spop %4225 }
 0x5b4   :  { %p2468_p8 = scmp.lt.s32.totalorder %s4226_s6, 102 }
 0x5b5   :  { %s2466_s12 = scalar_select %p2465_p7, 1, 0 }
 0x5b6   :  { %s2469_s13 = scalar_select %p2468_p8, 1, 0 }
 0x5b7   :  { %s2467_s21 = sadd.s32 %s2466_s12, %s2464_s17 }
 0x5b8   :  { %s4228_s11 = spop %4227  ;;  %s2470_s23 = sadd.s32 %s2469_s13, %s2467_s21 }
 0x5b9   :  { %p2471_p9 = scmp.lt.s32.totalorder %s4228_s11, 102 }
 0x5bb   :  { %s4230_s19 = spop %4229 }
 0x5bc   :  { %p2474_p10 = scmp.lt.s32.totalorder %s4230_s19, 102 }
 0x5bd   :  { %s2472_s16 = scalar_select %p2471_p9, 1, 0 }
 0x5be   :  { %s2475_s20 = scalar_select %p2474_p10, 1, 0 }
 0x5bf   :  { %s4232_s22 = spop %4231  ;;  %s2473_s24 = sadd.s32 %s2472_s16, %s2470_s23 }
 0x5c0   :  { %p2477_p11 = scmp.lt.s32.totalorder %s4232_s22, 102  ;;  %s4234_s25 = spop %4233 }
 0x5c1   :  { %s2476_s27 = sadd.s32 %s2475_s20, %s2473_s24  ;;  %p2480_p12 = scmp.lt.s32.totalorder %s4234_s25, 102 }
 0x5c2   :  { %s2478_s26 = scalar_select %p2477_p11, 1, 0 }
 0x5c3   :  { %s2481_s29 = scalar_select %p2480_p12, 1, 0 }
 0x5c4   :  { %s2479_s28 = sadd.s32 %s2478_s26, %s2476_s27 }
 0x5c5   :  { %s2482_s30 = sadd.s32 %s2481_s29, %s2479_s28 }
 0x5c6   :  { %s2483_s3 = sadd.s32 1, %s2482_s30  ;;  %s2489_s4 = smul.u32 %s2482_s30, %s4813_s15 }
 0x5c7   :  { %s2484_s5 = smul.u32 %s2483_s3, %s4813_s15  ;;  %p2494_p13 = scmp.gt.s32.totalorder %s2482_s30, 0 }
 0x5c8   :  { %s2486_s6 = smul.u32 %s2483_s3, %s4815_s18  ;;  %s2490_s7 = sadd.s32 %s2489_s4, %s5354_s1 }
 0x5c9   :  { %s2485_s8 = sadd.s32 %s2484_s5, %s5354_s1  ;;  %s2491_s9 = smul.u32 %s2482_s30, %s4815_s18 }
 0x5ca   :  { %s2487_s10 = sshra.s32 %s2486_s6, 4 }
 0x5cb   :  { %s2492_s11 = sshra.s32 %s2491_s9, 4  ;;  %s2488_s12 = sadd.s32 %s2487_s10, %s2485_s8 }
 0x5cc   :  { %s2493_s13 = sadd.s32 %s2492_s11, %s2490_s7 }
 0x5cd   :  { %s2495_s14 = scalar_select %p2494_p13, 1, 0 }
 0x5cf   :  { %s2496_s19 = sadd.s32 %s2495_s14, %s2493_s13 }
 0x5d0   :  { %p2497_p0 = scmp.lt.s32.totalorder %s2496_s19, %s2488_s12 }
 0x5d2   :  { %s5356_s19 = smov (!%p2497_p0, %s2496_s19), %s2488_s12 }
 0x5d3   :  { %s2499_s17 = ssub.s32 %s2488_s12, %s5356_s19 }
 0x5d4   :  { %s4943_s16 = sshra.s32 %s2499_s17, 4  ;;  %s4945_s1 = sand.u32 15, %s2499_s17 }
 0x5d5   :  { %s2502_s15 = sadd.s32 %s4943_s16, %s5356_s19  ;;  %s2503_s18 = sshra.s32 %s4945_s1, 4 }
 0x5d6   :  { %s2504_s20 = sadd.s32 %s2503_s18, %s2502_s15  ;;  %s4067_s21 = sshll.u32 %s4943_s16, 1 }
 0x5d7   :  { %v2575_v43 = vstv %s2504_s20  ;;  %s2506_s22 = sadd.s32 %s4067_s21, %s5356_s19  ;;  %s4068_s23 = sshll.u32 %s4945_s1, 1 }
 0x5d8   :  { %vm2576_vm8 = vcmp.lt.s32.totalorder %v4356_v19, %v2575_v43  ;;  %vm2577_vm9 = vcmp.lt.s32.totalorder %v4358_v20, %v2575_v43  ;;  %s2508_s24 = sshra.s32 %s4068_s23, 4  ;;  %s4069_s25 = sshll.u32 %s4943_s16, 2 }
 0x5d9   :  { %v2578_v44 = vsel %vm2576_vm8, 1, %v4328_v21  ;;  %v2579_v45 = vsel %vm2577_vm9, 1, %v4328_v21  ;;  %s2509_s26 = sadd.s32 %s2508_s24, %s2506_s22  ;;  %s2516_s27 = sadd.s32 %s4069_s25, %s5356_s19 }
 0x5da   :  { %v2580_v46 = vadd.s32 %v2579_v45, %v2578_v44  ;;  %v2600_v47 = vstv %s2509_s26  ;;  %s4070_s28 = sshll.u32 %s4945_s1, 2  ;;  %s4071_s29 = sshll.u32 %s4943_s16, 3 }
 0x5db   :  { %vm2601_vm10 = vcmp.lt.s32.totalorder %v4356_v19, %v2600_v47  ;;  %vm2602_vm11 = vcmp.lt.s32.totalorder %v4358_v20, %v2600_v47  ;;  %s2518_s30 = sshra.s32 %s4070_s28, 4  ;;  %s2536_s3 = sadd.s32 %s4071_s29, %s5356_s19 }
 0x5dc   :  { %v2582_v48 = vshrl.u32 %v2580_v46, 16  ;;  %v2581_v49 = vand.u32 65535, %v2580_v46  ;;  %v2603_v50 = vsel %vm2601_vm10, 1, %v4328_v21  ;;  %v2604_v51 = vsel %vm2602_vm11, 1, %v4328_v21  ;;  %s2519_s4 = sadd.s32 %s2518_s30, %s2516_s27  ;;  %s4072_s5 = sshll.u32 %s4945_s1, 3 }
 0x5dd   :  { %v2605_v52 = vadd.s32 %v2604_v51, %v2603_v50  ;;  %v2650_v53 = vstv %s2519_s4  ;;  %s2538_s6 = sshra.s32 %s4072_s5, 4  ;;  %s2510_s7 = smul.u32 3, %s4943_s16 }
 0x5de   :  { %v2584_v54 = vcvt.s32.f32 %v2582_v48  ;;  %v2583_v55 = vcvt.s32.f32 %v2581_v49  ;;  %vm2651_vm12 = vcmp.lt.s32.totalorder %v4356_v19, %v2650_v53  ;;  %vm2652_vm13 = vcmp.lt.s32.totalorder %v4358_v20, %v2650_v53  ;;  %s2539_s8 = sadd.s32 %s2538_s6, %s2536_s3  ;;  %s2512_s9 = smul.u32 3, %s4945_s1 }
 0x5df   :  { %v2606_v56 = vand.u32 65535, %v2605_v52  ;;  %v2607_v57 = vshrl.u32 %v2605_v52, 16  ;;  %v2653_v58 = vsel %vm2651_vm12, 1, %v4328_v21  ;;  %v2654_v59 = vsel %vm2652_vm13, 1, %v4328_v21  ;;  %s2511_s10 = sadd.s32 %s2510_s7, %s5356_s19  ;;  %s2520_s11 = smul.u32 5, %s4943_s16 }
 0x5e0   :  { %2587 = vadd.xlane.f32.xlu0 %v2584_v54  ;;  %2585 = vadd.xlane.f32.xlu1 %v2583_v55  ;;  %v2655_v60 = vadd.s32 %v2654_v59, %v2653_v58  ;;  %v2750_v61 = vstv %s2539_s8  ;;  %s2513_s12 = sshra.s32 %s2512_s9, 4  ;;  %s2522_s13 = smul.u32 5, %s4945_s1 }
 0x5e1   :  { %v2608_v62 = vcvt.s32.f32 %v2606_v56  ;;  %v2609_v63 = vcvt.s32.f32 %v2607_v57  ;;  %vm2751_vm14 = vcmp.lt.s32.totalorder %v4356_v19, %v2750_v61  ;;  %vm2752_vm15 = vcmp.lt.s32.totalorder %v4358_v20, %v2750_v61  ;;  %s2514_s14 = sadd.s32 %s2513_s12, %s2511_s10  ;;  %s2521_s17 = sadd.s32 %s2520_s11, %s5356_s19 }
 0x5e2   :  { %v2656_v0 = vand.u32 65535, %v2655_v60  ;;  %v2657_v1 = vshrl.u32 %v2655_v60, 16  ;;  %v2753_v2 = vsel %vm2751_vm14, 1, %v4328_v21  ;;  %v2754_v3 = vsel %vm2752_vm15, 1, %v4328_v21  ;;  %s2523_s15 = sshra.s32 %s2522_s13, 4  ;;  %s2525_s18 = smul.u32 6, %s4943_s16 }
 0x5e3   :  { %v2755_v4 = vadd.s32 %v2754_v3, %v2753_v2  ;;  %v2625_v5 = vstv %s2514_s14  ;;  %s2524_s20 = sadd.s32 %s2523_s15, %s2521_s17  ;;  %s2527_s21 = smul.u32 6, %s4945_s1 }
 0x5e4   :  { %2610 = vadd.xlane.f32.xlu0 %v2608_v62  ;;  %2612 = vadd.xlane.f32.xlu1 %v2609_v63  ;;  %vm2626_vm0 = vcmp.lt.s32.totalorder %v4356_v19, %v2625_v5  ;;  %vm2627_vm1 = vcmp.lt.s32.totalorder %v4358_v20, %v2625_v5  ;;  %s2526_s22 = sadd.s32 %s2525_s18, %s5356_s19  ;;  %s2530_s23 = smul.u32 7, %s4943_s16  ;;  %v2658_v6 = vcvt.s32.f32 %v2656_v0  ;;  %v2659_v7 = vcvt.s32.f32 %v2657_v1 }
 0x5e5   :  { %v2628_v8 = vsel %vm2626_vm0, 1, %v4328_v21  ;;  %v2629_v9 = vsel %vm2627_vm1, 1, %v4328_v21  ;;  %s2528_s24 = sshra.s32 %s2527_s21, 4  ;;  %s2532_s25 = smul.u32 7, %s4945_s1  ;;  %v2756_v10 = vand.u32 65535, %v2755_v4  ;;  %v2757_v11 = vshrl.u32 %v2755_v4, 16 }
 0x5e6   :  { %v2630_v12 = vadd.s32 %v2629_v9, %v2628_v8  ;;  %v2675_v13 = vstv %s2524_s20  ;;  %s2529_s26 = sadd.s32 %s2528_s24, %s2526_s22  ;;  %s2531_s27 = sadd.s32 %s2530_s23, %s5356_s19 }
 0x5e7   :  { %vm2676_vm2 = vcmp.lt.s32.totalorder %v4356_v19, %v2675_v13  ;;  %vm2677_vm3 = vcmp.lt.s32.totalorder %v4358_v20, %v2675_v13  ;;  %s2533_s28 = sshra.s32 %s2532_s25, 4  ;;  %s2540_s29 = smul.u32 9, %s4943_s16  ;;  %v2700_v18 = vstv %s2529_s26  ;;  %v2758_v23 = vcvt.s32.f32 %v2756_v10 }
 0x5e8   :  { %2660 = vadd.xlane.f32.xlu0 %v2658_v6  ;;  %2662 = vadd.xlane.f32.xlu1 %v2659_v7  ;;  %v2678_v14 = vsel %vm2676_vm2, 1, %v4328_v21  ;;  %v2679_v15 = vsel %vm2677_vm3, 1, %v4328_v21  ;;  %s2534_s30 = sadd.s32 %s2533_s28, %s2531_s27  ;;  %s2542_s3 = smul.u32 9, %s4945_s1  ;;  %v2632_v16 = vshrl.u32 %v2630_v12, 16  ;;  %v2759_v24 = vcvt.s32.f32 %v2757_v11 }
 0x5e9   :  { %v4997_v17 = vadd.s32 %v2679_v15, %v2678_v14  ;;  %v2725_v22 = vstv %s2534_s30  ;;  %s2541_s4 = sadd.s32 %s2540_s29, %s5356_s19  ;;  %s2545_s5 = smul.u32 10, %s4943_s16  ;;  %vm2701_vm4 = vcmp.lt.s32.totalorder %v4356_v19, %v2700_v18  ;;  %vm2702_vm5 = vcmp.lt.s32.totalorder %v4358_v20, %v2700_v18 }
 0x5ea   :  { %s2543_s6 = sshra.s32 %s2542_s3, 4  ;;  %s2547_s7 = smul.u32 10, %s4945_s1  ;;  %v2703_v26 = vsel %vm2701_vm4, 1, %v4328_v21  ;;  %v2704_v27 = vsel %vm2702_vm5, 1, %v4328_v21  ;;  %vm2726_vm6 = vcmp.lt.s32.totalorder %v4356_v19, %v2725_v22  ;;  %vm2727_vm7 = vcmp.lt.s32.totalorder %v4358_v20, %v2725_v22 }
 0x5eb   :  { %v2682_v25 = vshrl.u32 %v4997_v17, 16  ;;  %s2544_s8 = sadd.s32 %s2543_s6, %s2541_s4  ;;  %s2546_s9 = sadd.s32 %s2545_s5, %s5356_s19  ;;  %v5008_v28 = vadd.s32 %v2704_v27, %v2703_v26  ;;  %v2634_v30 = vcvt.s32.f32 %v2632_v16  ;;  %v2631_v31 = vand.u32 65535, %v2630_v12 }
 0x5ec   :  { %2760 = vadd.xlane.f32.xlu0 %v2758_v23  ;;  %2762 = vadd.xlane.f32.xlu1 %v2759_v24  ;;  %v2775_v29 = vstv %s2544_s8  ;;  %s2548_s10 = sshra.s32 %s2547_s7, 4  ;;  %s2550_s11 = smul.u32 11, %s4943_s16  ;;  %v2728_v32 = vsel %vm2726_vm6, 1, %v4328_v21  ;;  %v2729_v33 = vsel %vm2727_vm7, 1, %v4328_v21  ;;  %v2681_v41 = vand.u32 65535, %v4997_v17 }
 0x5ed   :  { %s2549_s12 = sadd.s32 %s2548_s10, %s2546_s9  ;;  %s2552_s13 = smul.u32 11, %s4945_s1  ;;  %v2684_v34 = vcvt.s32.f32 %v2682_v25  ;;  %v2707_v35 = vshrl.u32 %v5008_v28, 16  ;;  %v5017_v36 = vadd.s32 %v2729_v33, %v2728_v32  ;;  %vm2776_vm8 = vcmp.lt.s32.totalorder %v4356_v19, %v2775_v29 }
 0x5ee   :  { %s2551_s14 = sadd.s32 %s2550_s11, %s5356_s19  ;;  %s2555_s17 = smul.u32 12, %s4943_s16  ;;  %vm2777_vm9 = vcmp.lt.s32.totalorder %v4358_v20, %v2775_v29  ;;  %v2778_v37 = vsel %vm2776_vm8, 1, %v4328_v21  ;;  %v2800_v38 = vstv %s2549_s12  ;;  %v2633_v40 = vcvt.s32.f32 %v2631_v31 }
 0x5ef   :  { %s2553_s15 = sshra.s32 %s2552_s13, 4  ;;  %s2557_s18 = smul.u32 12, %s4945_s1  ;;  %v2779_v39 = vsel %vm2777_vm9, 1, %v4328_v21  ;;  %vm2801_vm10 = vcmp.lt.s32.totalorder %v4356_v19, %v2800_v38  ;;  %vm2802_vm11 = vcmp.lt.s32.totalorder %v4358_v20, %v2800_v38  ;;  %v2709_v42 = vcvt.s32.f32 %v2707_v35 }
 0x5f0   :  { %2637 = vadd.xlane.f32.xlu0 %v2634_v30  ;;  %2687 = vadd.xlane.f32.xlu1 %v2684_v34  ;;  %s2554_s20 = sadd.s32 %s2553_s15, %s2551_s14  ;;  %s2556_s21 = sadd.s32 %s2555_s17, %s5356_s19  ;;  %v2732_v43 = vshrl.u32 %v5017_v36, 16  ;;  %v2780_v44 = vadd.s32 %v2779_v39, %v2778_v37  ;;  %v2803_v46 = vsel %vm2801_vm10, 1, %v4328_v21  ;;  %v2804_v47 = vsel %vm2802_vm11, 1, %v4328_v21 }
 0x5f1   :  { %s2558_s22 = sshra.s32 %s2557_s18, 4  ;;  %s2560_s23 = smul.u32 13, %s4943_s16  ;;  %v2825_v45 = vstv %s2554_s20  ;;  %v2683_v48 = vcvt.s32.f32 %v2681_v41  ;;  %v2706_v51 = vand.u32 65535, %v5008_v28  ;;  %v2805_v53 = vadd.s32 %v2804_v47, %v2803_v46 }
 0x5f2   :  { %s2559_s24 = sadd.s32 %s2558_s22, %s2556_s21  ;;  %s2562_s25 = smul.u32 13, %s4945_s1  ;;  %vm2826_vm12 = vcmp.lt.s32.totalorder %v4356_v19, %v2825_v45  ;;  %vm2827_vm13 = vcmp.lt.s32.totalorder %v4358_v20, %v2825_v45  ;;  %v2734_v50 = vcvt.s32.f32 %v2732_v43  ;;  %v2782_v52 = vshrl.u32 %v2780_v44, 16 }
 0x5f3   :  { %s2561_s26 = sadd.s32 %s2560_s23, %s5356_s19  ;;  %s2565_s27 = smul.u32 14, %s4943_s16  ;;  %v2850_v49 = vstv %s2559_s24  ;;  %v2828_v54 = vsel %vm2826_vm12, 1, %v4328_v21  ;;  %v2829_v55 = vsel %vm2827_vm13, 1, %v4328_v21  ;;  %v2731_v56 = vand.u32 65535, %v5017_v36 }
 0x5f4   :  { %2635 = vadd.xlane.f32.xlu0 %v2633_v40  ;;  %2712 = vadd.xlane.f32.xlu1 %v2709_v42  ;;  %s2563_s28 = sshra.s32 %s2562_s25, 4  ;;  %s2567_s29 = smul.u32 14, %s4945_s1  ;;  %vm2851_vm14 = vcmp.lt.s32.totalorder %v4356_v19, %v2850_v49  ;;  %vm2852_vm15 = vcmp.lt.s32.totalorder %v4358_v20, %v2850_v49  ;;  %v2708_v58 = vcvt.s32.f32 %v2706_v51  ;;  %v2784_v59 = vcvt.s32.f32 %v2782_v52 }
 0x5f5   :  { %s2564_s30 = sadd.s32 %s2563_s28, %s2561_s26  ;;  %s2566_s3 = sadd.s32 %s2565_s27, %s5356_s19  ;;  %v2807_v60 = vshrl.u32 %v2805_v53, 16  ;;  %v2830_v61 = vadd.s32 %v2829_v55, %v2828_v54  ;;  %v2853_v62 = vsel %vm2851_vm14, 1, %v4328_v21  ;;  %v2854_v63 = vsel %vm2852_vm15, 1, %v4328_v21 }
 0x5f6   :  { %s2570_s4 = smul.u32 15, %s4943_s16  ;;  %s2568_s5 = sshra.s32 %s2567_s29, 4  ;;  %v2875_v57 = vstv %s2564_s30  ;;  %v2733_v0 = vcvt.s32.f32 %v2731_v56  ;;  %v2781_v3 = vand.u32 65535, %v2780_v44  ;;  %v2855_v5 = vadd.s32 %v2854_v63, %v2853_v62 }
 0x5f7   :  { %s2572_s6 = smul.u32 15, %s4945_s1  ;;  %s2569_s7 = sadd.s32 %s2568_s5, %s2566_s3  ;;  %vm2876_vm0 = vcmp.lt.s32.totalorder %v4356_v19, %v2875_v57  ;;  %vm2877_vm1 = vcmp.lt.s32.totalorder %v4358_v20, %v2875_v57  ;;  %v2809_v2 = vcvt.s32.f32 %v2807_v60  ;;  %v2832_v4 = vshrl.u32 %v2830_v61, 16 }
 0x5f8   :  { %2685 = vadd.xlane.f32.xlu0 %v2683_v48  ;;  %2737 = vadd.xlane.f32.xlu1 %v2734_v50  ;;  %s2571_s8 = sadd.s32 %s2570_s4, %s5356_s19  ;;  %v2900_v1 = vstv %s2569_s7  ;;  %v2878_v6 = vsel %vm2876_vm0, 1, %v4328_v21  ;;  %v2879_v7 = vsel %vm2877_vm1, 1, %v4328_v21  ;;  %v2806_v8 = vand.u32 65535, %v2805_v53 }
 0x5f9   :  { %s2573_s9 = sshra.s32 %s2572_s6, 4  ;;  %vm2901_vm2 = vcmp.lt.s32.totalorder %v4356_v19, %v2900_v1  ;;  %vm2902_vm3 = vcmp.lt.s32.totalorder %v4358_v20, %v2900_v1  ;;  %v2783_v10 = vcvt.s32.f32 %v2781_v3  ;;  %v2834_v11 = vcvt.s32.f32 %v2832_v4 }
 0x5fa   :  { %s2574_s10 = sadd.s32 %s2573_s9, %s2571_s8  ;;  %v2857_v12 = vshrl.u32 %v2855_v5, 16  ;;  %v2880_v13 = vadd.s32 %v2879_v7, %v2878_v6  ;;  %v2903_v14 = vsel %vm2901_vm2, 1, %v4328_v21  ;;  %v2904_v15 = vsel %vm2902_vm3, 1, %v4328_v21 }
 0x5fb   :  { %v2925_v9 = vstv %s2574_s10  ;;  %v2808_v16 = vcvt.s32.f32 %v2806_v8  ;;  %v2831_v18 = vand.u32 65535, %v2830_v61  ;;  %v2905_v23 = vadd.s32 %v2904_v15, %v2903_v14 }
 0x5fc   :  { %2710 = vadd.xlane.f32.xlu0 %v2708_v58  ;;  %2787 = vadd.xlane.f32.xlu1 %v2784_v59  ;;  %vm2926_vm4 = vcmp.lt.s32.totalorder %v4356_v19, %v2925_v9  ;;  %vm2927_vm5 = vcmp.lt.s32.totalorder %v4358_v20, %v2925_v9  ;;  %v2859_v17 = vcvt.s32.f32 %v2857_v12  ;;  %v2882_v22 = vshrl.u32 %v2880_v13, 16 }
 0x5fd   :  { %v2928_v24 = vsel %vm2926_vm4, 1, %v4328_v21  ;;  %v2929_v25 = vsel %vm2927_vm5, 1, %v4328_v21  ;;  %v2856_v26 = vand.u32 65535, %v2855_v5  ;;  %v2833_v27 = vcvt.s32.f32 %v2831_v18 }
 0x5fe   :  { %v2884_v28 = vcvt.s32.f32 %v2882_v22  ;;  %v2907_v29 = vshrl.u32 %v2905_v23, 16  ;;  %v2930_v30 = vadd.s32 %v2929_v25, %v2928_v24  ;;  %v2881_v33 = vand.u32 65535, %v2880_v13 }
 0x5ff   :  { %v2858_v31 = vcvt.s32.f32 %v2856_v26  ;;  %v2906_v37 = vand.u32 65535, %v2905_v23 }
 0x600   :  { %2735 = vadd.xlane.f32.xlu0 %v2733_v0  ;;  %2812 = vadd.xlane.f32.xlu1 %v2809_v2  ;;  %v2909_v32 = vcvt.s32.f32 %v2907_v29  ;;  %v2932_v34 = vshrl.u32 %v2930_v30, 16  ;;  %v2883_v35 = vcvt.s32.f32 %v2881_v33  ;;  %v2931_v38 = vand.u32 65535, %v2930_v30 }
 0x601   :  { %v2908_v39 = vcvt.s32.f32 %v2906_v37 }
 0x602   :  { %v2934_v36 = vcvt.s32.f32 %v2932_v34  ;;  %v2933_v40 = vcvt.s32.f32 %v2931_v38 }
 0x604   :  { %2785 = vadd.xlane.f32.xlu0 %v2783_v10  ;;  %2837 = vadd.xlane.f32.xlu1 %v2834_v11 }
 0x608   :  { %2810 = vadd.xlane.f32.xlu0 %v2808_v16  ;;  %2862 = vadd.xlane.f32.xlu1 %v2859_v17 }
 0x60c   :  { %2835 = vadd.xlane.f32.xlu0 %v2833_v27  ;;  %2887 = vadd.xlane.f32.xlu1 %v2884_v28 }
 0x610   :  { %2860 = vadd.xlane.f32.xlu0 %v2858_v31  ;;  %2912 = vadd.xlane.f32.xlu1 %v2909_v32 }
 0x614   :  { %2885 = vadd.xlane.f32.xlu0 %v2883_v35  ;;  %2937 = vadd.xlane.f32.xlu1 %v2934_v36 }
 0x618   :  { %2910 = vadd.xlane.f32.xlu0 %v2908_v39  ;;  %2935 = vadd.xlane.f32.xlu1 %v2933_v40 }
 0x66d   :  { %v2588_v41 = vpop.xlane.xlu0 %2587  ;;  %v2586_v42 = vpop.xlane.xlu1 %2585 }
 0x66e   :  { %v2590_v43 = vcvt.f32.s32 %v2588_v41  ;;  %v2589_v45 = vcvt.f32.s32 %v2586_v42 }
 0x670   :  { %v2591_v44 = vshll.u32 %v2590_v43, 16 }
 0x671   :  { %v2611_v46 = vpop.xlane.xlu0 %2610  ;;  %v2613_v47 = vpop.xlane.xlu1 %2612 }
 0x672   :  { %v2592_v48 = vadd.s32 %v2591_v44, %v2589_v45  ;;  %v2615_v49 = vcvt.f32.s32 %v2613_v47  ;;  %v2614_v51 = vcvt.f32.s32 %v2611_v46 }
 0x674   :  { %v2593_v50 = vrot.slane %v2592_v48, 4  ;;  %v2616_v52 = vshll.u32 %v2615_v49, 16 }
 0x675   :  { %v2661_v53 = vpop.xlane.xlu0 %2660  ;;  %v2663_v54 = vpop.xlane.xlu1 %2662 }
 0x676   :  { %v2594_v55 = vadd.s32 %v2593_v50, %v2592_v48  ;;  %v2617_v56 = vadd.s32 %v2616_v52, %v2614_v51  ;;  %v2665_v57 = vcvt.f32.s32 %v2663_v54  ;;  %v2664_v59 = vcvt.f32.s32 %v2661_v53 }
 0x678   :  { %v2618_v58 = vrot.slane %v2617_v56, 4  ;;  %v2666_v60 = vshll.u32 %v2665_v57, 16  ;;  %v2595_v61 = vrot.slane %v2594_v55, 2 }
 0x679   :  { %v2761_v62 = vpop.xlane.xlu0 %2760  ;;  %v2763_v63 = vpop.xlane.xlu1 %2762 }
 0x67a   :  { %v2619_v0 = vadd.s32 %v2618_v58, %v2617_v56  ;;  %v2667_v1 = vadd.s32 %v2666_v60, %v2664_v59  ;;  %v2596_v2 = vadd.s32 %v2595_v61, %v2594_v55  ;;  %v2765_v5 = vcvt.f32.s32 %v2763_v63 }
 0x67b   :  { %v2764_v23 = vcvt.f32.s32 %v2761_v62 }
 0x67c   :  { %v2620_v3 = vrot.slane %v2619_v0, 2  ;;  %v2668_v4 = vrot.slane %v2667_v1, 4  ;;  %v2597_v8 = vrot.slane %v2596_v2, 1  ;;  %v2766_v13 = vshll.u32 %v2765_v5, 16 }
 0x67d   :  { %v2638_v6 = vpop.xlane.xlu0 %2637  ;;  %v2688_v7 = vpop.xlane.xlu1 %2687 }
 0x67e   :  { %v2640_v9 = vcvt.f32.s32 %v2638_v6  ;;  %v2598_v10 = vadd.s32 %v2597_v8, %v2596_v2  ;;  %v2621_v11 = vadd.s32 %v2620_v3, %v2619_v0  ;;  %v2669_v12 = vadd.s32 %v2668_v4, %v2667_v1 }
 0x67f   :  { %v2690_v18 = vcvt.f32.s32 %v2688_v7  ;;  %v2767_v26 = vadd.s32 %v2766_v13, %v2764_v23 }
 0x680   :  { %4235 = vpush %v2598_v10  ;;  %v2622_v16 = vrot.slane %v2621_v11, 1  ;;  %v2641_v17 = vshll.u32 %v2640_v9, 16  ;;  %v2670_v30 = vrot.slane %v2669_v12, 2 }
 0x681   :  { %v2636_v14 = vpop.xlane.xlu0 %2635  ;;  %v2713_v15 = vpop.xlane.xlu1 %2712  ;;  %v2691_v31 = vshll.u32 %v2690_v18, 16  ;;  %v2768_v36 = vrot.slane %v2767_v26, 4 }
 0x682   :  { %v2639_v22 = vcvt.f32.s32 %v2636_v14  ;;  %v2623_v24 = vadd.s32 %v2622_v16, %v2621_v11  ;;  %v2715_v27 = vcvt.f32.s32 %v2713_v15  ;;  %v2671_v40 = vadd.s32 %v2670_v30, %v2669_v12 }
 0x683   :  { %v2769_v48 = vadd.s32 %v2768_v36, %v2767_v26 }
 0x684   :  { %v2642_v25 = vadd.s32 %v2641_v17, %v2639_v22  ;;  %4237 = vpush %v2623_v24  ;;  %v2716_v37 = vshll.u32 %v2715_v27, 16  ;;  %v2672_v52 = vrot.slane %v2671_v40, 1 }
 0x685   :  { %v2686_v28 = vpop.xlane.xlu0 %2685  ;;  %v2738_v29 = vpop.xlane.xlu1 %2737  ;;  %v2770_v2 = vrot.slane %v2769_v48, 2 }
 0x686   :  { %v2643_v32 = vrot.slane %v2642_v25, 4  ;;  %v2689_v33 = vcvt.f32.s32 %v2686_v28  ;;  %v2740_v42 = vcvt.f32.s32 %v2738_v29  ;;  %v2673_v0 = vadd.s32 %v2672_v52, %v2671_v40 }
 0x687   :  { %v2771_v15 = vadd.s32 %v2770_v2, %v2769_v48 }
 0x688   :  { %v2644_v34 = vadd.s32 %v2643_v32, %v2642_v25  ;;  %v2692_v35 = vadd.s32 %v2691_v31, %v2689_v33  ;;  %v2741_v53 = vshll.u32 %v2740_v42, 16 }
 0x689   :  { %v2711_v38 = vpop.xlane.xlu0 %2710  ;;  %v2788_v39 = vpop.xlane.xlu1 %2787  ;;  %v2772_v31 = vrot.slane %v2771_v15, 1 }
 0x68a   :  { %v2693_v41 = vrot.slane %v2692_v35, 4  ;;  %v2714_v43 = vcvt.f32.s32 %v2711_v38  ;;  %v2645_v44 = vrot.slane %v2644_v34, 2  ;;  %v2790_v49 = vcvt.f32.s32 %v2788_v39 }
 0x68c   :  { %v2694_v45 = vadd.s32 %v2693_v41, %v2692_v35  ;;  %v2717_v46 = vadd.s32 %v2716_v37, %v2714_v43  ;;  %v2646_v47 = vadd.s32 %v2645_v44, %v2644_v34  ;;  %v2791_v61 = vshll.u32 %v2790_v49, 16 }
 0x68d   :  { %v2736_v50 = vpop.xlane.xlu0 %2735  ;;  %v2813_v51 = vpop.xlane.xlu1 %2812  ;;  %v2773_v44 = vadd.s32 %v2772_v31, %v2771_v15 }
 0x68e   :  { %v2718_v54 = vrot.slane %v2717_v46, 4  ;;  %v2739_v55 = vcvt.f32.s32 %v2736_v50  ;;  %v2647_v56 = vrot.slane %v2646_v47, 1  ;;  %v2695_v57 = vrot.slane %v2694_v45, 2 }
 0x68f   :  { %v2815_v4 = vcvt.f32.s32 %v2813_v51 }
 0x690   :  { %v2719_v58 = vadd.s32 %v2718_v54, %v2717_v46  ;;  %v2742_v59 = vadd.s32 %v2741_v53, %v2739_v55  ;;  %v2648_v60 = vadd.s32 %v2647_v56, %v2646_v47  ;;  %v2696_v1 = vadd.s32 %v2695_v57, %v2694_v45 }
 0x691   :  { %v2786_v62 = vpop.xlane.xlu0 %2785  ;;  %v2838_v63 = vpop.xlane.xlu1 %2837  ;;  %v2816_v16 = vshll.u32 %v2815_v4, 16 }
 0x692   :  { %v2743_v3 = vrot.slane %v2742_v59, 4  ;;  %v2789_v5 = vcvt.f32.s32 %v2786_v62  ;;  %4239 = vpush %v2648_v60  ;;  %v2720_v6 = vrot.slane %v2719_v58, 2  ;;  %v2697_v7 = vrot.slane %v2696_v1, 1 }
 0x693   :  { %4241 = vpush %v2673_v0  ;;  %v2840_v11 = vcvt.f32.s32 %v2838_v63 }
 0x694   :  { %v2744_v8 = vadd.s32 %v2743_v3, %v2742_v59  ;;  %v2792_v9 = vadd.s32 %v2791_v61, %v2789_v5  ;;  %v2721_v10 = vadd.s32 %v2720_v6, %v2719_v58  ;;  %v2698_v14 = vadd.s32 %v2697_v7, %v2696_v1 }
 0x695   :  { %v2811_v12 = vpop.xlane.xlu0 %2810  ;;  %v2863_v13 = vpop.xlane.xlu1 %2862  ;;  %v2841_v27 = vshll.u32 %v2840_v11, 16 }
 0x696   :  { %v2793_v17 = vrot.slane %v2792_v9, 4  ;;  %v2814_v18 = vcvt.f32.s32 %v2811_v12  ;;  %v2722_v22 = vrot.slane %v2721_v10, 1  ;;  %4243 = vpush %v2698_v14  ;;  %v2745_v23 = vrot.slane %v2744_v8, 2 }
 0x697   :  { %v2865_v33 = vcvt.f32.s32 %v2863_v13 }
 0x698   :  { %v2794_v24 = vadd.s32 %v2793_v17, %v2792_v9  ;;  %v2817_v25 = vadd.s32 %v2816_v16, %v2814_v18  ;;  %v2723_v26 = vadd.s32 %v2722_v22, %v2721_v10  ;;  %v2746_v30 = vadd.s32 %v2745_v23, %v2744_v8 }
 0x699   :  { %v2836_v28 = vpop.xlane.xlu0 %2835  ;;  %v2888_v29 = vpop.xlane.xlu1 %2887  ;;  %v2866_v45 = vshll.u32 %v2865_v33, 16 }
 0x69a   :  { %v2818_v32 = vrot.slane %v2817_v25, 4  ;;  %v2839_v34 = vcvt.f32.s32 %v2836_v28  ;;  %4245 = vpush %v2723_v26  ;;  %v2795_v35 = vrot.slane %v2794_v24, 2  ;;  %v2747_v36 = vrot.slane %v2746_v30, 1 }
 0x69b   :  { %v2890_v40 = vcvt.f32.s32 %v2888_v29 }
 0x69c   :  { %v2819_v37 = vadd.s32 %v2818_v32, %v2817_v25  ;;  %v2842_v38 = vadd.s32 %v2841_v27, %v2839_v34  ;;  %v2796_v39 = vadd.s32 %v2795_v35, %v2794_v24  ;;  %v2748_v43 = vadd.s32 %v2747_v36, %v2746_v30 }
 0x69d   :  { %v2861_v41 = vpop.xlane.xlu0 %2860  ;;  %v2913_v42 = vpop.xlane.xlu1 %2912  ;;  %v2891_v53 = vshll.u32 %v2890_v40, 16 }
 0x69e   :  { %v2843_v46 = vrot.slane %v2842_v38, 4  ;;  %v2864_v47 = vcvt.f32.s32 %v2861_v41  ;;  %v2797_v48 = vrot.slane %v2796_v39, 1  ;;  %4247 = vpush %v2748_v43  ;;  %v2820_v49 = vrot.slane %v2819_v37, 2 }
 0x69f   :  { %4249 = vpush %v2773_v44  ;;  %v2915_v54 = vcvt.f32.s32 %v2913_v42 }
 0x6a0   :  { %v2844_v50 = vadd.s32 %v2843_v46, %v2842_v38  ;;  %v2867_v51 = vadd.s32 %v2866_v45, %v2864_v47  ;;  %v2798_v52 = vadd.s32 %v2797_v48, %v2796_v39  ;;  %v2821_v57 = vadd.s32 %v2820_v49, %v2819_v37 }
 0x6a1   :  { %v2886_v55 = vpop.xlane.xlu0 %2885  ;;  %v2938_v56 = vpop.xlane.xlu1 %2937  ;;  %v2916_v2 = vshll.u32 %v2915_v54, 16 }
 0x6a2   :  { %v2868_v58 = vrot.slane %v2867_v51, 4  ;;  %v2889_v59 = vcvt.f32.s32 %v2886_v55  ;;  %v2940_v60 = vcvt.f32.s32 %v2938_v56  ;;  %4251 = vpush %v2798_v52  ;;  %v2845_v61 = vrot.slane %v2844_v50, 2 }
 0x6a3   :  { %v2822_v62 = vrot.slane %v2821_v57, 1 }
 0x6a4   :  { %v2869_v63 = vadd.s32 %v2868_v58, %v2867_v51  ;;  %v2892_v0 = vadd.s32 %v2891_v53, %v2889_v59  ;;  %v2846_v1 = vadd.s32 %v2845_v61, %v2844_v50  ;;  %v2941_v3 = vshll.u32 %v2940_v60, 16 }
 0x6a5   :  { %v2911_v4 = vpop.xlane.xlu0 %2910  ;;  %v2936_v5 = vpop.xlane.xlu1 %2935  ;;  %v2823_v6 = vadd.s32 %v2822_v62, %v2821_v57 }
 0x6a6   :  { %v2893_v7 = vrot.slane %v2892_v0, 4  ;;  %v2914_v8 = vcvt.f32.s32 %v2911_v4  ;;  %v2939_v9 = vcvt.f32.s32 %v2936_v5  ;;  %v2847_v10 = vrot.slane %v2846_v1, 1 }
 0x6a7   :  { %4253 = vpush %v2823_v6  ;;  %v2870_v11 = vrot.slane %v2869_v63, 2 }
 0x6a8   :  { %v2894_v12 = vadd.s32 %v2893_v7, %v2892_v0  ;;  %v2917_v13 = vadd.s32 %v2916_v2, %v2914_v8  ;;  %v2942_v14 = vadd.s32 %v2941_v3, %v2939_v9  ;;  %v2848_v15 = vadd.s32 %v2847_v10, %v2846_v1 }
 0x6a9   :  { %v2871_v16 = vadd.s32 %v2870_v11, %v2869_v63 }
 0x6aa   :  { %v2918_v17 = vrot.slane %v2917_v13, 4  ;;  %v2943_v18 = vrot.slane %v2942_v14, 4  ;;  %4255 = vpush %v2848_v15  ;;  %v2895_v22 = vrot.slane %v2894_v12, 2 }
 0x6ab   :  { %v2872_v23 = vrot.slane %v2871_v16, 1 }
 0x6ac   :  { %v2919_v24 = vadd.s32 %v2918_v17, %v2917_v13  ;;  %v2944_v25 = vadd.s32 %v2943_v18, %v2942_v14  ;;  %v2896_v26 = vadd.s32 %v2895_v22, %v2894_v12 }
 0x6ad   :  { %v2873_v27 = vadd.s32 %v2872_v23, %v2871_v16 }
 0x6ae   :  { %v2897_v28 = vrot.slane %v2896_v26, 1  ;;  %v2920_v29 = vrot.slane %v2919_v24, 2  ;;  %v2945_v30 = vrot.slane %v2944_v25, 2 }
 0x6af   :  { %4257 = vpush %v2873_v27 }
 0x6b0   :  { %v2898_v31 = vadd.s32 %v2897_v28, %v2896_v26  ;;  %v2921_v32 = vadd.s32 %v2920_v29, %v2919_v24  ;;  %v2946_v33 = vadd.s32 %v2945_v30, %v2944_v25 }
 0x6b1   :  { %s4236_s11 = spop %4235 }
 0x6b2   :  { %4259 = vpush %v2898_v31  ;;  %v2922_v34 = vrot.slane %v2921_v32, 1  ;;  %v2947_v35 = vrot.slane %v2946_v33, 1  ;;  %p2950_p2 = scmp.lt.s32.totalorder %s4236_s11, 102 }
 0x6b4   :  { %v2923_v36 = vadd.s32 %v2922_v34, %v2921_v32  ;;  %v2948_v37 = vadd.s32 %v2947_v35, %v2946_v33  ;;  %s2951_s15 = scalar_select %p2950_p2, 1, 0 }
 0x6b5   :  { %s4238_s12 = spop %4237 }
 0x6b6   :  { %4261 = vpush %v2923_v36  ;;  %p2952_p1 = scmp.lt.s32.totalorder %s4238_s12, 102 }
 0x6b7   :  { %4263 = vpush %v2948_v37 }
 0x6b8   :  { %s2953_s17 = scalar_select %p2952_p1, 1, 0 }
 0x6ba   :  { %s2954_s21 = sadd.s32 %s2953_s17, %s2951_s15 }
 0x6c3   :  { %s4240_s13 = spop %4239 }
 0x6c4   :  { %p2955_p3 = scmp.lt.s32.totalorder %s4240_s13, 102  ;;  %s4242_s14 = spop %4241 }
 0x6c5   :  { %p2958_p4 = scmp.lt.s32.totalorder %s4242_s14, 102 }
 0x6c6   :  { %s2956_s20 = scalar_select %p2955_p3, 1, 0 }
 0x6c7   :  { %s4244_s18 = spop %4243 }
 0x6c8   :  { %p2961_p5 = scmp.lt.s32.totalorder %s4244_s18, 102  ;;  %s2957_s26 = sadd.s32 %s2956_s20, %s2954_s21 }
 0x6c9   :  { %s2959_s24 = scalar_select %p2958_p4, 1, 0 }
 0x6ca   :  { %s2962_s27 = scalar_select %p2961_p5, 1, 0 }
 0x6cb   :  { %s4246_s22 = spop %4245  ;;  %s2960_s5 = sadd.s32 %s2959_s24, %s2957_s26 }
 0x6cc   :  { %p2964_p6 = scmp.lt.s32.totalorder %s4246_s22, 102  ;;  %s2963_s7 = sadd.s32 %s2962_s27, %s2960_s5 }
 0x6ce   :  { %s2965_s29 = scalar_select %p2964_p6, 1, 0 }
 0x6cf   :  { %s4248_s23 = spop %4247 }
 0x6d0   :  { %s4250_s25 = spop %4249  ;;  %p2967_p7 = scmp.lt.s32.totalorder %s4248_s23, 102 }
 0x6d1   :  { %p2970_p8 = scmp.lt.s32.totalorder %s4250_s25, 102  ;;  %s2966_s9 = sadd.s32 %s2965_s29, %s2963_s7 }
 0x6d2   :  { %s2968_s30 = scalar_select %p2967_p7, 1, 0 }
 0x6d3   :  { %s4252_s28 = spop %4251 }
 0x6d4   :  { %p2973_p9 = scmp.lt.s32.totalorder %s4252_s28, 102  ;;  %s2969_s10 = sadd.s32 %s2968_s30, %s2966_s9 }
 0x6d5   :  { %s2971_s4 = scalar_select %p2970_p8, 1, 0 }
 0x6d6   :  { %s2974_s8 = scalar_select %p2973_p9, 1, 0 }
 0x6d7   :  { %s2972_s14 = sadd.s32 %s2971_s4, %s2969_s10 }
 0x6d8   :  { %s4254_s3 = spop %4253  ;;  %s2975_s15 = sadd.s32 %s2974_s8, %s2972_s14 }
 0x6d9   :  { %p2976_p10 = scmp.lt.s32.totalorder %s4254_s3, 102 }
 0x6db   :  { %s4256_s6 = spop %4255 }
 0x6dc   :  { %p2979_p11 = scmp.lt.s32.totalorder %s4256_s6, 102 }
 0x6dd   :  { %s2977_s12 = scalar_select %p2976_p10, 1, 0 }
 0x6de   :  { %s2980_s13 = scalar_select %p2979_p11, 1, 0 }
 0x6df   :  { %s2978_s21 = sadd.s32 %s2977_s12, %s2975_s15 }
 0x6e0   :  { %s4258_s11 = spop %4257  ;;  %s2981_s23 = sadd.s32 %s2980_s13, %s2978_s21 }
 0x6e1   :  { %p2982_p12 = scmp.lt.s32.totalorder %s4258_s11, 102 }
 0x6e3   :  { %s4260_s17 = spop %4259 }
 0x6e4   :  { %p2985_p13 = scmp.lt.s32.totalorder %s4260_s17, 102 }
 0x6e5   :  { %s2983_s18 = scalar_select %p2982_p12, 1, 0 }
 0x6e6   :  { %s2986_s20 = scalar_select %p2985_p13, 1, 0 }
 0x6e7   :  { %s4262_s22 = spop %4261  ;;  %s2984_s24 = sadd.s32 %s2983_s18, %s2981_s23 }
 0x6e8   :  { %p2988_p0 = scmp.lt.s32.totalorder %s4262_s22, 102  ;;  %s4264_s25 = spop %4263 }
 0x6e9   :  { %s2987_s27 = sadd.s32 %s2986_s20, %s2984_s24  ;;  %p2991_p1 = scmp.lt.s32.totalorder %s4264_s25, 102 }
 0x6ea   :  { %s2989_s26 = scalar_select %p2988_p0, 1, 0 }
 0x6eb   :  { %s2992_s29 = scalar_select %p2991_p1, 1, 0 }
 0x6ec   :  { %s2990_s28 = sadd.s32 %s2989_s26, %s2987_s27 }
 0x6ed   :  { %s2993_s30 = sadd.s32 %s2992_s29, %s2990_s28 }
 0x6ee   :  { %s2994_s3 = sadd.s32 1, %s2993_s30  ;;  %s3000_s4 = smul.u32 %s2993_s30, %s4943_s16 }
 0x6ef   :  { %s2995_s5 = smul.u32 %s2994_s3, %s4943_s16  ;;  %p3005_p2 = scmp.gt.s32.totalorder %s2993_s30, 0 }
 0x6f0   :  { %s2997_s6 = smul.u32 %s2994_s3, %s4945_s1  ;;  %s3001_s7 = sadd.s32 %s3000_s4, %s5356_s19 }
 0x6f1   :  { %s2996_s8 = sadd.s32 %s2995_s5, %s5356_s19  ;;  %s3002_s9 = smul.u32 %s2993_s30, %s4945_s1 }
 0x6f2   :  { %s2998_s10 = sshra.s32 %s2997_s6, 4 }
 0x6f3   :  { %s3003_s11 = sshra.s32 %s3002_s9, 4  ;;  %s2999_s12 = sadd.s32 %s2998_s10, %s2996_s8 }
 0x6f4   :  { %s3004_s13 = sadd.s32 %s3003_s11, %s3001_s7 }
 0x6f5   :  { %s3006_s14 = scalar_select %p3005_p2, 1, 0 }
 0x6f7   :  { %s3007_s17 = sadd.s32 %s3006_s14, %s3004_s13 }
 0x6f8   :  { %p3008_p3 = scmp.lt.s32.totalorder %s3007_s17, %s2999_s12 }
 0x6fa   :  { %s5358_s17 = smov (!%p3008_p3, %s3007_s17), %s2999_s12 }
 0x6fb   :  { %s3010_s15 = ssub.s32 %s2999_s12, %s5358_s17 }
 0x6fc   :  { %s5073_s18 = sshra.s32 %s3010_s15, 4  ;;  %s5075_s19 = sand.u32 15, %s3010_s15 }
 0x6fd   :  { %s3013_s16 = sadd.s32 %s5073_s18, %s5358_s17  ;;  %s3014_s1 = sshra.s32 %s5075_s19, 4 }
 0x6fe   :  { %s3015_s20 = sadd.s32 %s3014_s1, %s3013_s16  ;;  %s4073_s21 = sshll.u32 %s5073_s18, 1 }
 0x6ff   :  { %v3086_v38 = vstv %s3015_s20  ;;  %s3017_s22 = sadd.s32 %s4073_s21, %s5358_s17  ;;  %s4074_s23 = sshll.u32 %s5075_s19, 1 }
 0x700   :  { %vm3087_vm6 = vcmp.lt.s32.totalorder %v4356_v19, %v3086_v38  ;;  %vm3088_vm7 = vcmp.lt.s32.totalorder %v4358_v20, %v3086_v38  ;;  %s3019_s24 = sshra.s32 %s4074_s23, 4  ;;  %s4075_s25 = sshll.u32 %s5073_s18, 2 }
 0x701   :  { %v3089_v39 = vsel %vm3087_vm6, 1, %v4328_v21  ;;  %v3090_v40 = vsel %vm3088_vm7, 1, %v4328_v21  ;;  %s3020_s26 = sadd.s32 %s3019_s24, %s3017_s22  ;;  %s3027_s27 = sadd.s32 %s4075_s25, %s5358_s17 }
 0x702   :  { %v3091_v41 = vadd.s32 %v3090_v40, %v3089_v39  ;;  %v3111_v42 = vstv %s3020_s26  ;;  %s4076_s28 = sshll.u32 %s5075_s19, 2  ;;  %s4077_s29 = sshll.u32 %s5073_s18, 3 }
 0x703   :  { %vm3112_vm8 = vcmp.lt.s32.totalorder %v4356_v19, %v3111_v42  ;;  %vm3113_vm9 = vcmp.lt.s32.totalorder %v4358_v20, %v3111_v42  ;;  %s3029_s30 = sshra.s32 %s4076_s28, 4  ;;  %s3047_s3 = sadd.s32 %s4077_s29, %s5358_s17 }
 0x704   :  { %v3093_v43 = vshrl.u32 %v3091_v41, 16  ;;  %v3092_v44 = vand.u32 65535, %v3091_v41  ;;  %v3114_v45 = vsel %vm3112_vm8, 1, %v4328_v21  ;;  %v3115_v46 = vsel %vm3113_vm9, 1, %v4328_v21  ;;  %s3030_s4 = sadd.s32 %s3029_s30, %s3027_s27  ;;  %s4078_s5 = sshll.u32 %s5075_s19, 3 }
 0x705   :  { %v3116_v47 = vadd.s32 %v3115_v46, %v3114_v45  ;;  %v3161_v48 = vstv %s3030_s4  ;;  %s3049_s6 = sshra.s32 %s4078_s5, 4  ;;  %s3021_s7 = smul.u32 3, %s5073_s18 }
 0x706   :  { %v3095_v49 = vcvt.s32.f32 %v3093_v43  ;;  %v3094_v50 = vcvt.s32.f32 %v3092_v44  ;;  %vm3162_vm10 = vcmp.lt.s32.totalorder %v4356_v19, %v3161_v48  ;;  %vm3163_vm11 = vcmp.lt.s32.totalorder %v4358_v20, %v3161_v48  ;;  %s3050_s8 = sadd.s32 %s3049_s6, %s3047_s3  ;;  %s3023_s9 = smul.u32 3, %s5075_s19 }
 0x707   :  { %v3117_v51 = vand.u32 65535, %v3116_v47  ;;  %v3118_v52 = vshrl.u32 %v3116_v47, 16  ;;  %v3164_v53 = vsel %vm3162_vm10, 1, %v4328_v21  ;;  %v3165_v54 = vsel %vm3163_vm11, 1, %v4328_v21  ;;  %s3022_s10 = sadd.s32 %s3021_s7, %s5358_s17  ;;  %s3031_s11 = smul.u32 5, %s5073_s18 }
 0x708   :  { %3098 = vadd.xlane.f32.xlu0 %v3095_v49  ;;  %3096 = vadd.xlane.f32.xlu1 %v3094_v50  ;;  %v3166_v55 = vadd.s32 %v3165_v54, %v3164_v53  ;;  %v3261_v56 = vstv %s3050_s8  ;;  %s3024_s12 = sshra.s32 %s3023_s9, 4  ;;  %s3033_s13 = smul.u32 5, %s5075_s19 }
 0x709   :  { %v3119_v57 = vcvt.s32.f32 %v3117_v51  ;;  %v3120_v58 = vcvt.s32.f32 %v3118_v52  ;;  %vm3262_vm12 = vcmp.lt.s32.totalorder %v4356_v19, %v3261_v56  ;;  %vm3263_vm13 = vcmp.lt.s32.totalorder %v4358_v20, %v3261_v56  ;;  %s3025_s14 = sadd.s32 %s3024_s12, %s3022_s10  ;;  %s3032_s15 = sadd.s32 %s3031_s11, %s5358_s17 }
 0x70a   :  { %v3167_v59 = vand.u32 65535, %v3166_v55  ;;  %v3168_v60 = vshrl.u32 %v3166_v55, 16  ;;  %v3264_v61 = vsel %vm3262_vm12, 1, %v4328_v21  ;;  %v3265_v62 = vsel %vm3263_vm13, 1, %v4328_v21  ;;  %s3034_s16 = sshra.s32 %s3033_s13, 4  ;;  %s3036_s1 = smul.u32 6, %s5073_s18 }
 0x70b   :  { %v3266_v63 = vadd.s32 %v3265_v62, %v3264_v61  ;;  %v3136_v0 = vstv %s3025_s14  ;;  %s3035_s20 = sadd.s32 %s3034_s16, %s3032_s15  ;;  %s3038_s21 = smul.u32 6, %s5075_s19 }
 0x70c   :  { %3121 = vadd.xlane.f32.xlu0 %v3119_v57  ;;  %3123 = vadd.xlane.f32.xlu1 %v3120_v58  ;;  %vm3137_vm14 = vcmp.lt.s32.totalorder %v4356_v19, %v3136_v0  ;;  %vm3138_vm15 = vcmp.lt.s32.totalorder %v4358_v20, %v3136_v0  ;;  %s3037_s22 = sadd.s32 %s3036_s1, %s5358_s17  ;;  %s3041_s23 = smul.u32 7, %s5073_s18  ;;  %v3169_v1 = vcvt.s32.f32 %v3167_v59  ;;  %v3170_v2 = vcvt.s32.f32 %v3168_v60 }
 0x70d   :  { %v3139_v3 = vsel %vm3137_vm14, 1, %v4328_v21  ;;  %v3140_v4 = vsel %vm3138_vm15, 1, %v4328_v21  ;;  %s3039_s24 = sshra.s32 %s3038_s21, 4  ;;  %s3043_s25 = smul.u32 7, %s5075_s19  ;;  %v3267_v5 = vand.u32 65535, %v3266_v63  ;;  %v3268_v6 = vshrl.u32 %v3266_v63, 16 }
 0x70e   :  { %v3141_v7 = vadd.s32 %v3140_v4, %v3139_v3  ;;  %v3186_v8 = vstv %s3035_s20  ;;  %s3040_s26 = sadd.s32 %s3039_s24, %s3037_s22  ;;  %s3042_s27 = sadd.s32 %s3041_s23, %s5358_s17 }
 0x70f   :  { %vm3187_vm0 = vcmp.lt.s32.totalorder %v4356_v19, %v3186_v8  ;;  %vm3188_vm1 = vcmp.lt.s32.totalorder %v4358_v20, %v3186_v8  ;;  %s3044_s28 = sshra.s32 %s3043_s25, 4  ;;  %s3051_s29 = smul.u32 9, %s5073_s18  ;;  %v3211_v13 = vstv %s3040_s26  ;;  %v3269_v15 = vcvt.s32.f32 %v3267_v5 }
 0x710   :  { %3171 = vadd.xlane.f32.xlu0 %v3169_v1  ;;  %3173 = vadd.xlane.f32.xlu1 %v3170_v2  ;;  %v3189_v9 = vsel %vm3187_vm0, 1, %v4328_v21  ;;  %v3190_v10 = vsel %vm3188_vm1, 1, %v4328_v21  ;;  %s3045_s30 = sadd.s32 %s3044_s28, %s3042_s27  ;;  %s3053_s3 = smul.u32 9, %s5075_s19  ;;  %v3143_v11 = vshrl.u32 %v3141_v7, 16  ;;  %v3270_v16 = vcvt.s32.f32 %v3268_v6 }
 0x711   :  { %v5127_v12 = vadd.s32 %v3190_v10, %v3189_v9  ;;  %v3236_v14 = vstv %s3045_s30  ;;  %s3052_s4 = sadd.s32 %s3051_s29, %s5358_s17  ;;  %s3056_s5 = smul.u32 10, %s5073_s18  ;;  %vm3212_vm2 = vcmp.lt.s32.totalorder %v4356_v19, %v3211_v13  ;;  %vm3213_vm3 = vcmp.lt.s32.totalorder %v4358_v20, %v3211_v13 }
 0x712   :  { %s3054_s6 = sshra.s32 %s3053_s3, 4  ;;  %s3058_s7 = smul.u32 10, %s5075_s19  ;;  %v3214_v18 = vsel %vm3212_vm2, 1, %v4328_v21  ;;  %v3215_v22 = vsel %vm3213_vm3, 1, %v4328_v21  ;;  %vm3237_vm4 = vcmp.lt.s32.totalorder %v4356_v19, %v3236_v14  ;;  %vm3238_vm5 = vcmp.lt.s32.totalorder %v4358_v20, %v3236_v14 }
 0x713   :  { %v3193_v17 = vshrl.u32 %v5127_v12, 16  ;;  %s3055_s8 = sadd.s32 %s3054_s6, %s3052_s4  ;;  %s3057_s9 = sadd.s32 %s3056_s5, %s5358_s17  ;;  %v5138_v23 = vadd.s32 %v3215_v22, %v3214_v18  ;;  %v3145_v25 = vcvt.s32.f32 %v3143_v11  ;;  %v3142_v26 = vand.u32 65535, %v3141_v7 }
 0x714   :  { %3271 = vadd.xlane.f32.xlu0 %v3269_v15  ;;  %3273 = vadd.xlane.f32.xlu1 %v3270_v16  ;;  %v3286_v24 = vstv %s3055_s8  ;;  %s3059_s10 = sshra.s32 %s3058_s7, 4  ;;  %s3061_s11 = smul.u32 11, %s5073_s18  ;;  %v3239_v27 = vsel %vm3237_vm4, 1, %v4328_v21  ;;  %v3240_v28 = vsel %vm3238_vm5, 1, %v4328_v21  ;;  %v3192_v36 = vand.u32 65535, %v5127_v12 }
 0x715   :  { %s3060_s12 = sadd.s32 %s3059_s10, %s3057_s9  ;;  %s3063_s13 = smul.u32 11, %s5075_s19  ;;  %v3195_v29 = vcvt.s32.f32 %v3193_v17  ;;  %v3218_v30 = vshrl.u32 %v5138_v23, 16  ;;  %v5147_v31 = vadd.s32 %v3240_v28, %v3239_v27  ;;  %vm3287_vm6 = vcmp.lt.s32.totalorder %v4356_v19, %v3286_v24 }
 0x716   :  { %s3062_s14 = sadd.s32 %s3061_s11, %s5358_s17  ;;  %s3066_s15 = smul.u32 12, %s5073_s18  ;;  %vm3288_vm7 = vcmp.lt.s32.totalorder %v4358_v20, %v3286_v24  ;;  %v3289_v32 = vsel %vm3287_vm6, 1, %v4328_v21  ;;  %v3311_v33 = vstv %s3060_s12  ;;  %v3144_v35 = vcvt.s32.f32 %v3142_v26 }
 0x717   :  { %s3064_s16 = sshra.s32 %s3063_s13, 4  ;;  %s3068_s1 = smul.u32 12, %s5075_s19  ;;  %v3290_v34 = vsel %vm3288_vm7, 1, %v4328_v21  ;;  %vm3312_vm8 = vcmp.lt.s32.totalorder %v4356_v19, %v3311_v33  ;;  %vm3313_vm9 = vcmp.lt.s32.totalorder %v4358_v20, %v3311_v33  ;;  %v3220_v37 = vcvt.s32.f32 %v3218_v30 }
 0x718   :  { %3148 = vadd.xlane.f32.xlu0 %v3145_v25  ;;  %3198 = vadd.xlane.f32.xlu1 %v3195_v29  ;;  %s3065_s20 = sadd.s32 %s3064_s16, %s3062_s14  ;;  %s3067_s21 = sadd.s32 %s3066_s15, %s5358_s17  ;;  %v3243_v38 = vshrl.u32 %v5147_v31, 16  ;;  %v3291_v39 = vadd.s32 %v3290_v34, %v3289_v32  ;;  %v3314_v41 = vsel %vm3312_vm8, 1, %v4328_v21  ;;  %v3315_v42 = vsel %vm3313_vm9, 1, %v4328_v21 }
 0x719   :  { %s3069_s22 = sshra.s32 %s3068_s1, 4  ;;  %s3071_s23 = smul.u32 13, %s5073_s18  ;;  %v3336_v40 = vstv %s3065_s20  ;;  %v3194_v43 = vcvt.s32.f32 %v3192_v36  ;;  %v3217_v46 = vand.u32 65535, %v5138_v23  ;;  %v3316_v48 = vadd.s32 %v3315_v42, %v3314_v41 }
 0x71a   :  { %s3070_s24 = sadd.s32 %s3069_s22, %s3067_s21  ;;  %s3073_s25 = smul.u32 13, %s5075_s19  ;;  %vm3337_vm10 = vcmp.lt.s32.totalorder %v4356_v19, %v3336_v40  ;;  %vm3338_vm11 = vcmp.lt.s32.totalorder %v4358_v20, %v3336_v40  ;;  %v3245_v45 = vcvt.s32.f32 %v3243_v38  ;;  %v3293_v47 = vshrl.u32 %v3291_v39, 16 }
 0x71b   :  { %s3072_s26 = sadd.s32 %s3071_s23, %s5358_s17  ;;  %s3076_s27 = smul.u32 14, %s5073_s18  ;;  %v3361_v44 = vstv %s3070_s24  ;;  %v3339_v49 = vsel %vm3337_vm10, 1, %v4328_v21  ;;  %v3340_v50 = vsel %vm3338_vm11, 1, %v4328_v21  ;;  %v3242_v51 = vand.u32 65535, %v5147_v31 }
 0x71c   :  { %3146 = vadd.xlane.f32.xlu0 %v3144_v35  ;;  %3223 = vadd.xlane.f32.xlu1 %v3220_v37  ;;  %s3074_s28 = sshra.s32 %s3073_s25, 4  ;;  %s3078_s29 = smul.u32 14, %s5075_s19  ;;  %vm3362_vm12 = vcmp.lt.s32.totalorder %v4356_v19, %v3361_v44  ;;  %vm3363_vm13 = vcmp.lt.s32.totalorder %v4358_v20, %v3361_v44  ;;  %v3219_v53 = vcvt.s32.f32 %v3217_v46  ;;  %v3295_v54 = vcvt.s32.f32 %v3293_v47 }
 0x71d   :  { %s3075_s30 = sadd.s32 %s3074_s28, %s3072_s26  ;;  %s3077_s3 = sadd.s32 %s3076_s27, %s5358_s17  ;;  %v3318_v55 = vshrl.u32 %v3316_v48, 16  ;;  %v3341_v56 = vadd.s32 %v3340_v50, %v3339_v49  ;;  %v3364_v57 = vsel %vm3362_vm12, 1, %v4328_v21  ;;  %v3365_v58 = vsel %vm3363_vm13, 1, %v4328_v21 }
 0x71e   :  { %s3081_s4 = smul.u32 15, %s5073_s18  ;;  %s3079_s5 = sshra.s32 %s3078_s29, 4  ;;  %v3386_v52 = vstv %s3075_s30  ;;  %v3244_v59 = vcvt.s32.f32 %v3242_v51  ;;  %v3292_v62 = vand.u32 65535, %v3291_v39  ;;  %v3366_v0 = vadd.s32 %v3365_v58, %v3364_v57 }
 0x71f   :  { %s3083_s6 = smul.u32 15, %s5075_s19  ;;  %s3080_s7 = sadd.s32 %s3079_s5, %s3077_s3  ;;  %vm3387_vm14 = vcmp.lt.s32.totalorder %v4356_v19, %v3386_v52  ;;  %vm3388_vm15 = vcmp.lt.s32.totalorder %v4358_v20, %v3386_v52  ;;  %v3320_v61 = vcvt.s32.f32 %v3318_v55  ;;  %v3343_v63 = vshrl.u32 %v3341_v56, 16 }
 0x720   :  { %3196 = vadd.xlane.f32.xlu0 %v3194_v43  ;;  %3248 = vadd.xlane.f32.xlu1 %v3245_v45  ;;  %s3082_s8 = sadd.s32 %s3081_s4, %s5358_s17  ;;  %v3411_v60 = vstv %s3080_s7  ;;  %v3389_v1 = vsel %vm3387_vm14, 1, %v4328_v21  ;;  %v3390_v2 = vsel %vm3388_vm15, 1, %v4328_v21  ;;  %v3317_v3 = vand.u32 65535, %v3316_v48 }
 0x721   :  { %s3084_s9 = sshra.s32 %s3083_s6, 4  ;;  %vm3412_vm0 = vcmp.lt.s32.totalorder %v4356_v19, %v3411_v60  ;;  %vm3413_vm1 = vcmp.lt.s32.totalorder %v4358_v20, %v3411_v60  ;;  %v3294_v5 = vcvt.s32.f32 %v3292_v62  ;;  %v3345_v6 = vcvt.s32.f32 %v3343_v63 }
 0x722   :  { %s3085_s10 = sadd.s32 %s3084_s9, %s3082_s8  ;;  %v3368_v7 = vshrl.u32 %v3366_v0, 16  ;;  %v3391_v8 = vadd.s32 %v3390_v2, %v3389_v1  ;;  %v3414_v9 = vsel %vm3412_vm0, 1, %v4328_v21  ;;  %v3415_v10 = vsel %vm3413_vm1, 1, %v4328_v21 }
 0x723   :  { %v3436_v4 = vstv %s3085_s10  ;;  %v3319_v11 = vcvt.s32.f32 %v3317_v3  ;;  %v3342_v13 = vand.u32 65535, %v3341_v56  ;;  %v3416_v15 = vadd.s32 %v3415_v10, %v3414_v9 }
 0x724   :  { %3221 = vadd.xlane.f32.xlu0 %v3219_v53  ;;  %3298 = vadd.xlane.f32.xlu1 %v3295_v54  ;;  %vm3437_vm2 = vcmp.lt.s32.totalorder %v4356_v19, %v3436_v4  ;;  %vm3438_vm3 = vcmp.lt.s32.totalorder %v4358_v20, %v3436_v4  ;;  %v3370_v12 = vcvt.s32.f32 %v3368_v7  ;;  %v3393_v14 = vshrl.u32 %v3391_v8, 16 }
 0x725   :  { %v3439_v16 = vsel %vm3437_vm2, 1, %v4328_v21  ;;  %v3440_v17 = vsel %vm3438_vm3, 1, %v4328_v21  ;;  %v3367_v18 = vand.u32 65535, %v3366_v0  ;;  %v3344_v22 = vcvt.s32.f32 %v3342_v13 }
 0x726   :  { %v3395_v23 = vcvt.s32.f32 %v3393_v14  ;;  %v3418_v24 = vshrl.u32 %v3416_v15, 16  ;;  %v3441_v25 = vadd.s32 %v3440_v17, %v3439_v16  ;;  %v3392_v28 = vand.u32 65535, %v3391_v8 }
 0x727   :  { %v3369_v26 = vcvt.s32.f32 %v3367_v18  ;;  %v3417_v32 = vand.u32 65535, %v3416_v15 }
 0x728   :  { %3246 = vadd.xlane.f32.xlu0 %v3244_v59  ;;  %3323 = vadd.xlane.f32.xlu1 %v3320_v61  ;;  %v3420_v27 = vcvt.s32.f32 %v3418_v24  ;;  %v3443_v29 = vshrl.u32 %v3441_v25, 16  ;;  %v3394_v30 = vcvt.s32.f32 %v3392_v28  ;;  %v3442_v33 = vand.u32 65535, %v3441_v25 }
 0x729   :  { %v3419_v34 = vcvt.s32.f32 %v3417_v32 }
 0x72a   :  { %v3445_v31 = vcvt.s32.f32 %v3443_v29  ;;  %v3444_v35 = vcvt.s32.f32 %v3442_v33 }
 0x72c   :  { %3296 = vadd.xlane.f32.xlu0 %v3294_v5  ;;  %3348 = vadd.xlane.f32.xlu1 %v3345_v6 }
 0x730   :  { %3321 = vadd.xlane.f32.xlu0 %v3319_v11  ;;  %3373 = vadd.xlane.f32.xlu1 %v3370_v12 }
 0x734   :  { %3346 = vadd.xlane.f32.xlu0 %v3344_v22  ;;  %3398 = vadd.xlane.f32.xlu1 %v3395_v23 }
 0x738   :  { %3371 = vadd.xlane.f32.xlu0 %v3369_v26  ;;  %3423 = vadd.xlane.f32.xlu1 %v3420_v27 }
 0x73c   :  { %3396 = vadd.xlane.f32.xlu0 %v3394_v30  ;;  %3448 = vadd.xlane.f32.xlu1 %v3445_v31 }
 0x740   :  { %3421 = vadd.xlane.f32.xlu0 %v3419_v34  ;;  %3446 = vadd.xlane.f32.xlu1 %v3444_v35 }
 0x795   :  { %v3099_v36 = vpop.xlane.xlu0 %3098  ;;  %v3097_v37 = vpop.xlane.xlu1 %3096 }
 0x796   :  { %v3101_v38 = vcvt.f32.s32 %v3099_v36  ;;  %v3100_v40 = vcvt.f32.s32 %v3097_v37 }
 0x798   :  { %v3102_v39 = vshll.u32 %v3101_v38, 16 }
 0x799   :  { %v3122_v41 = vpop.xlane.xlu0 %3121  ;;  %v3124_v42 = vpop.xlane.xlu1 %3123 }
 0x79a   :  { %v3103_v43 = vadd.s32 %v3102_v39, %v3100_v40  ;;  %v3126_v44 = vcvt.f32.s32 %v3124_v42  ;;  %v3125_v46 = vcvt.f32.s32 %v3122_v41 }
 0x79c   :  { %v3104_v45 = vrot.slane %v3103_v43, 4  ;;  %v3127_v47 = vshll.u32 %v3126_v44, 16 }
 0x79d   :  { %v3172_v48 = vpop.xlane.xlu0 %3171  ;;  %v3174_v49 = vpop.xlane.xlu1 %3173 }
 0x79e   :  { %v3105_v50 = vadd.s32 %v3104_v45, %v3103_v43  ;;  %v3128_v51 = vadd.s32 %v3127_v47, %v3125_v46  ;;  %v3176_v52 = vcvt.f32.s32 %v3174_v49  ;;  %v3175_v54 = vcvt.f32.s32 %v3172_v48 }
 0x7a0   :  { %v3129_v53 = vrot.slane %v3128_v51, 4  ;;  %v3177_v55 = vshll.u32 %v3176_v52, 16  ;;  %v3106_v56 = vrot.slane %v3105_v50, 2 }
 0x7a1   :  { %v3272_v57 = vpop.xlane.xlu0 %3271  ;;  %v3274_v58 = vpop.xlane.xlu1 %3273 }
 0x7a2   :  { %v3130_v59 = vadd.s32 %v3129_v53, %v3128_v51  ;;  %v3178_v60 = vadd.s32 %v3177_v55, %v3175_v54  ;;  %v3107_v61 = vadd.s32 %v3106_v56, %v3105_v50  ;;  %v3276_v0 = vcvt.f32.s32 %v3274_v58 }
 0x7a3   :  { %v3275_v15 = vcvt.f32.s32 %v3272_v57 }
 0x7a4   :  { %v3131_v62 = vrot.slane %v3130_v59, 2  ;;  %v3179_v63 = vrot.slane %v3178_v60, 4  ;;  %v3108_v3 = vrot.slane %v3107_v61, 1  ;;  %v3277_v8 = vshll.u32 %v3276_v0, 16 }
 0x7a5   :  { %v3149_v1 = vpop.xlane.xlu0 %3148  ;;  %v3199_v2 = vpop.xlane.xlu1 %3198 }
 0x7a6   :  { %v3151_v4 = vcvt.f32.s32 %v3149_v1  ;;  %v3109_v5 = vadd.s32 %v3108_v3, %v3107_v61  ;;  %v3132_v6 = vadd.s32 %v3131_v62, %v3130_v59  ;;  %v3180_v7 = vadd.s32 %v3179_v63, %v3178_v60 }
 0x7a7   :  { %v3201_v13 = vcvt.f32.s32 %v3199_v2  ;;  %v3278_v18 = vadd.s32 %v3277_v8, %v3275_v15 }
 0x7a8   :  { %4265 = vpush %v3109_v5  ;;  %v3133_v11 = vrot.slane %v3132_v6, 1  ;;  %v3152_v12 = vshll.u32 %v3151_v4, 16  ;;  %v3181_v25 = vrot.slane %v3180_v7, 2 }
 0x7a9   :  { %v3147_v9 = vpop.xlane.xlu0 %3146  ;;  %v3224_v10 = vpop.xlane.xlu1 %3223  ;;  %v3202_v26 = vshll.u32 %v3201_v13, 16  ;;  %v3279_v31 = vrot.slane %v3278_v18, 4 }
 0x7aa   :  { %v3150_v14 = vcvt.f32.s32 %v3147_v9  ;;  %v3134_v16 = vadd.s32 %v3133_v11, %v3132_v6  ;;  %v3226_v22 = vcvt.f32.s32 %v3224_v10  ;;  %v3182_v35 = vadd.s32 %v3181_v25, %v3180_v7 }
 0x7ab   :  { %v3280_v43 = vadd.s32 %v3279_v31, %v3278_v18 }
 0x7ac   :  { %v3153_v17 = vadd.s32 %v3152_v12, %v3150_v14  ;;  %4267 = vpush %v3134_v16  ;;  %v3227_v32 = vshll.u32 %v3226_v22, 16  ;;  %v3183_v47 = vrot.slane %v3182_v35, 1 }
 0x7ad   :  { %v3197_v23 = vpop.xlane.xlu0 %3196  ;;  %v3249_v24 = vpop.xlane.xlu1 %3248  ;;  %v3281_v61 = vrot.slane %v3280_v43, 2 }
 0x7ae   :  { %v3154_v27 = vrot.slane %v3153_v17, 4  ;;  %v3200_v28 = vcvt.f32.s32 %v3197_v23  ;;  %v3251_v37 = vcvt.f32.s32 %v3249_v24  ;;  %v3184_v59 = vadd.s32 %v3183_v47, %v3182_v35 }
 0x7af   :  { %v3282_v10 = vadd.s32 %v3281_v61, %v3280_v43 }
 0x7b0   :  { %v3155_v29 = vadd.s32 %v3154_v27, %v3153_v17  ;;  %v3203_v30 = vadd.s32 %v3202_v26, %v3200_v28  ;;  %v3252_v48 = vshll.u32 %v3251_v37, 16 }
 0x7b1   :  { %v3222_v33 = vpop.xlane.xlu0 %3221  ;;  %v3299_v34 = vpop.xlane.xlu1 %3298  ;;  %v3283_v26 = vrot.slane %v3282_v10, 1 }
 0x7b2   :  { %v3204_v36 = vrot.slane %v3203_v30, 4  ;;  %v3225_v38 = vcvt.f32.s32 %v3222_v33  ;;  %v3156_v39 = vrot.slane %v3155_v29, 2  ;;  %v3301_v44 = vcvt.f32.s32 %v3299_v34 }
 0x7b4   :  { %v3205_v40 = vadd.s32 %v3204_v36, %v3203_v30  ;;  %v3228_v41 = vadd.s32 %v3227_v32, %v3225_v38  ;;  %v3157_v42 = vadd.s32 %v3156_v39, %v3155_v29  ;;  %v3302_v56 = vshll.u32 %v3301_v44, 16 }
 0x7b5   :  { %v3247_v45 = vpop.xlane.xlu0 %3246  ;;  %v3324_v46 = vpop.xlane.xlu1 %3323  ;;  %v3284_v39 = vadd.s32 %v3283_v26, %v3282_v10 }
 0x7b6   :  { %v3229_v49 = vrot.slane %v3228_v41, 4  ;;  %v3250_v50 = vcvt.f32.s32 %v3247_v45  ;;  %v3158_v51 = vrot.slane %v3157_v42, 1  ;;  %v3206_v52 = vrot.slane %v3205_v40, 2 }
 0x7b7   :  { %v3326_v63 = vcvt.f32.s32 %v3324_v46 }
 0x7b8   :  { %v3230_v53 = vadd.s32 %v3229_v49, %v3228_v41  ;;  %v3253_v54 = vadd.s32 %v3252_v48, %v3250_v50  ;;  %v3159_v55 = vadd.s32 %v3158_v51, %v3157_v42  ;;  %v3207_v60 = vadd.s32 %v3206_v52, %v3205_v40 }
 0x7b9   :  { %v3297_v57 = vpop.xlane.xlu0 %3296  ;;  %v3349_v58 = vpop.xlane.xlu1 %3348  ;;  %v3327_v11 = vshll.u32 %v3326_v63, 16 }
 0x7ba   :  { %v3254_v62 = vrot.slane %v3253_v54, 4  ;;  %v3300_v0 = vcvt.f32.s32 %v3297_v57  ;;  %4269 = vpush %v3159_v55  ;;  %v3231_v1 = vrot.slane %v3230_v53, 2  ;;  %v3208_v2 = vrot.slane %v3207_v60, 1 }
 0x7bb   :  { %4271 = vpush %v3184_v59  ;;  %v3351_v6 = vcvt.f32.s32 %v3349_v58 }
 0x7bc   :  { %v3255_v3 = vadd.s32 %v3254_v62, %v3253_v54  ;;  %v3303_v4 = vadd.s32 %v3302_v56, %v3300_v0  ;;  %v3232_v5 = vadd.s32 %v3231_v1, %v3230_v53  ;;  %v3209_v9 = vadd.s32 %v3208_v2, %v3207_v60 }
 0x7bd   :  { %v3322_v7 = vpop.xlane.xlu0 %3321  ;;  %v3374_v8 = vpop.xlane.xlu1 %3373  ;;  %v3352_v22 = vshll.u32 %v3351_v6, 16 }
 0x7be   :  { %v3304_v12 = vrot.slane %v3303_v4, 4  ;;  %v3325_v13 = vcvt.f32.s32 %v3322_v7  ;;  %v3233_v14 = vrot.slane %v3232_v5, 1  ;;  %4273 = vpush %v3209_v9  ;;  %v3256_v15 = vrot.slane %v3255_v3, 2 }
 0x7bf   :  { %v3376_v28 = vcvt.f32.s32 %v3374_v8 }
 0x7c0   :  { %v3305_v16 = vadd.s32 %v3304_v12, %v3303_v4  ;;  %v3328_v17 = vadd.s32 %v3327_v11, %v3325_v13  ;;  %v3234_v18 = vadd.s32 %v3233_v14, %v3232_v5  ;;  %v3257_v25 = vadd.s32 %v3256_v15, %v3255_v3 }
 0x7c1   :  { %v3347_v23 = vpop.xlane.xlu0 %3346  ;;  %v3399_v24 = vpop.xlane.xlu1 %3398  ;;  %v3377_v40 = vshll.u32 %v3376_v28, 16 }
 0x7c2   :  { %v3329_v27 = vrot.slane %v3328_v17, 4  ;;  %v3350_v29 = vcvt.f32.s32 %v3347_v23  ;;  %4275 = vpush %v3234_v18  ;;  %v3306_v30 = vrot.slane %v3305_v16, 2  ;;  %v3258_v31 = vrot.slane %v3257_v25, 1 }
 0x7c3   :  { %v3401_v35 = vcvt.f32.s32 %v3399_v24 }
 0x7c4   :  { %v3330_v32 = vadd.s32 %v3329_v27, %v3328_v17  ;;  %v3353_v33 = vadd.s32 %v3352_v22, %v3350_v29  ;;  %v3307_v34 = vadd.s32 %v3306_v30, %v3305_v16  ;;  %v3259_v38 = vadd.s32 %v3258_v31, %v3257_v25 }
 0x7c5   :  { %v3372_v36 = vpop.xlane.xlu0 %3371  ;;  %v3424_v37 = vpop.xlane.xlu1 %3423  ;;  %v3402_v48 = vshll.u32 %v3401_v35, 16 }
 0x7c6   :  { %v3354_v41 = vrot.slane %v3353_v33, 4  ;;  %v3375_v42 = vcvt.f32.s32 %v3372_v36  ;;  %v3308_v43 = vrot.slane %v3307_v34, 1  ;;  %4277 = vpush %v3259_v38  ;;  %v3331_v44 = vrot.slane %v3330_v32, 2 }
 0x7c7   :  { %4279 = vpush %v3284_v39  ;;  %v3426_v49 = vcvt.f32.s32 %v3424_v37 }
 0x7c8   :  { %v3355_v45 = vadd.s32 %v3354_v41, %v3353_v33  ;;  %v3378_v46 = vadd.s32 %v3377_v40, %v3375_v42  ;;  %v3309_v47 = vadd.s32 %v3308_v43, %v3307_v34  ;;  %v3332_v52 = vadd.s32 %v3331_v44, %v3330_v32 }
 0x7c9   :  { %v3397_v50 = vpop.xlane.xlu0 %3396  ;;  %v3449_v51 = vpop.xlane.xlu1 %3448  ;;  %v3427_v61 = vshll.u32 %v3426_v49, 16 }
 0x7ca   :  { %v3379_v53 = vrot.slane %v3378_v46, 4  ;;  %v3400_v54 = vcvt.f32.s32 %v3397_v50  ;;  %v3451_v55 = vcvt.f32.s32 %v3449_v51  ;;  %4281 = vpush %v3309_v47  ;;  %v3356_v56 = vrot.slane %v3355_v45, 2 }
 0x7cb   :  { %v3333_v57 = vrot.slane %v3332_v52, 1 }
 0x7cc   :  { %v3380_v58 = vadd.s32 %v3379_v53, %v3378_v46  ;;  %v3403_v59 = vadd.s32 %v3402_v48, %v3400_v54  ;;  %v3357_v60 = vadd.s32 %v3356_v56, %v3355_v45  ;;  %v3452_v62 = vshll.u32 %v3451_v55, 16 }
 0x7cd   :  { %v3422_v63 = vpop.xlane.xlu0 %3421  ;;  %v3447_v0 = vpop.xlane.xlu1 %3446  ;;  %v3334_v1 = vadd.s32 %v3333_v57, %v3332_v52 }
 0x7ce   :  { %v3404_v2 = vrot.slane %v3403_v59, 4  ;;  %v3425_v3 = vcvt.f32.s32 %v3422_v63  ;;  %v3450_v4 = vcvt.f32.s32 %v3447_v0  ;;  %v3358_v5 = vrot.slane %v3357_v60, 1 }
 0x7cf   :  { %4283 = vpush %v3334_v1  ;;  %v3381_v6 = vrot.slane %v3380_v58, 2 }
 0x7d0   :  { %v3405_v7 = vadd.s32 %v3404_v2, %v3403_v59  ;;  %v3428_v8 = vadd.s32 %v3427_v61, %v3425_v3  ;;  %v3453_v9 = vadd.s32 %v3452_v62, %v3450_v4  ;;  %v3359_v10 = vadd.s32 %v3358_v5, %v3357_v60 }
 0x7d1   :  { %v3382_v11 = vadd.s32 %v3381_v6, %v3380_v58 }
 0x7d2   :  { %v3429_v12 = vrot.slane %v3428_v8, 4  ;;  %v3454_v13 = vrot.slane %v3453_v9, 4  ;;  %4285 = vpush %v3359_v10  ;;  %v3406_v14 = vrot.slane %v3405_v7, 2 }
 0x7d3   :  { %v3383_v15 = vrot.slane %v3382_v11, 1 }
 0x7d4   :  { %v3430_v16 = vadd.s32 %v3429_v12, %v3428_v8  ;;  %v3455_v17 = vadd.s32 %v3454_v13, %v3453_v9  ;;  %v3407_v18 = vadd.s32 %v3406_v14, %v3405_v7 }
 0x7d5   :  { %v3384_v22 = vadd.s32 %v3383_v15, %v3382_v11 }
 0x7d6   :  { %v3408_v23 = vrot.slane %v3407_v18, 1  ;;  %v3431_v24 = vrot.slane %v3430_v16, 2  ;;  %v3456_v25 = vrot.slane %v3455_v17, 2 }
 0x7d7   :  { %4287 = vpush %v3384_v22 }
 0x7d8   :  { %v3409_v26 = vadd.s32 %v3408_v23, %v3407_v18  ;;  %v3432_v27 = vadd.s32 %v3431_v24, %v3430_v16  ;;  %v3457_v28 = vadd.s32 %v3456_v25, %v3455_v17 }
 0x7d9   :  { %s4266_s11 = spop %4265 }
 0x7da   :  { %4289 = vpush %v3409_v26  ;;  %v3433_v29 = vrot.slane %v3432_v27, 1  ;;  %v3458_v30 = vrot.slane %v3457_v28, 1  ;;  %p3461_p5 = scmp.lt.s32.totalorder %s4266_s11, 102 }
 0x7dc   :  { %v3434_v31 = vadd.s32 %v3433_v29, %v3432_v27  ;;  %v3459_v32 = vadd.s32 %v3458_v30, %v3457_v28  ;;  %s3462_s16 = scalar_select %p3461_p5, 1, 0 }
 0x7dd   :  { %s4268_s12 = spop %4267 }
 0x7de   :  { %4291 = vpush %v3434_v31  ;;  %p3463_p4 = scmp.lt.s32.totalorder %s4268_s12, 102 }
 0x7df   :  { %4293 = vpush %v3459_v32 }
 0x7e0   :  { %s3464_s15 = scalar_select %p3463_p4, 1, 0 }
 0x7e2   :  { %s3465_s21 = sadd.s32 %s3464_s15, %s3462_s16 }
 0x7eb   :  { %s4270_s13 = spop %4269 }
 0x7ec   :  { %p3466_p6 = scmp.lt.s32.totalorder %s4270_s13, 102  ;;  %s4272_s14 = spop %4271 }
 0x7ed   :  { %p3469_p7 = scmp.lt.s32.totalorder %s4272_s14, 102 }
 0x7ee   :  { %s3467_s20 = scalar_select %p3466_p6, 1, 0 }
 0x7ef   :  { %s4274_s1 = spop %4273 }
 0x7f0   :  { %p3472_p8 = scmp.lt.s32.totalorder %s4274_s1, 102  ;;  %s3468_s26 = sadd.s32 %s3467_s20, %s3465_s21 }
 0x7f1   :  { %s3470_s24 = scalar_select %p3469_p7, 1, 0 }
 0x7f2   :  { %s3473_s27 = scalar_select %p3472_p8, 1, 0 }
 0x7f3   :  { %s4276_s22 = spop %4275  ;;  %s3471_s5 = sadd.s32 %s3470_s24, %s3468_s26 }
 0x7f4   :  { %p3475_p9 = scmp.lt.s32.totalorder %s4276_s22, 102  ;;  %s3474_s7 = sadd.s32 %s3473_s27, %s3471_s5 }
 0x7f6   :  { %s3476_s29 = scalar_select %p3475_p9, 1, 0 }
 0x7f7   :  { %s4278_s23 = spop %4277 }
 0x7f8   :  { %s4280_s25 = spop %4279  ;;  %p3478_p10 = scmp.lt.s32.totalorder %s4278_s23, 102 }
 0x7f9   :  { %p3481_p11 = scmp.lt.s32.totalorder %s4280_s25, 102  ;;  %s3477_s9 = sadd.s32 %s3476_s29, %s3474_s7 }
 0x7fa   :  { %s3479_s30 = scalar_select %p3478_p10, 1, 0 }
 0x7fb   :  { %s4282_s28 = spop %4281 }
 0x7fc   :  { %p3484_p12 = scmp.lt.s32.totalorder %s4282_s28, 102  ;;  %s3480_s10 = sadd.s32 %s3479_s30, %s3477_s9 }
 0x7fd   :  { %s3482_s4 = scalar_select %p3481_p11, 1, 0 }
 0x7fe   :  { %s3485_s8 = scalar_select %p3484_p12, 1, 0 }
 0x7ff   :  { %s3483_s14 = sadd.s32 %s3482_s4, %s3480_s10 }
 0x800   :  { %s4284_s3 = spop %4283  ;;  %s3486_s16 = sadd.s32 %s3485_s8, %s3483_s14 }
 0x801   :  { %p3487_p13 = scmp.lt.s32.totalorder %s4284_s3, 102 }
 0x803   :  { %s4286_s6 = spop %4285 }
 0x804   :  { %p3490_p0 = scmp.lt.s32.totalorder %s4286_s6, 102 }
 0x805   :  { %s3488_s12 = scalar_select %p3487_p13, 1, 0 }
 0x806   :  { %s3491_s13 = scalar_select %p3490_p0, 1, 0 }
 0x807   :  { %s3489_s21 = sadd.s32 %s3488_s12, %s3486_s16 }
 0x808   :  { %s4288_s11 = spop %4287  ;;  %s3492_s23 = sadd.s32 %s3491_s13, %s3489_s21 }
 0x809   :  { %p3493_p1 = scmp.lt.s32.totalorder %s4288_s11, 102 }
 0x80b   :  { %s4290_s15 = spop %4289 }
 0x80c   :  { %p3496_p2 = scmp.lt.s32.totalorder %s4290_s15, 102 }
 0x80d   :  { %s3494_s1 = scalar_select %p3493_p1, 1, 0 }
 0x80e   :  { %s3497_s20 = scalar_select %p3496_p2, 1, 0 }
 0x80f   :  { %s4292_s22 = spop %4291  ;;  %s3495_s24 = sadd.s32 %s3494_s1, %s3492_s23 }
 0x810   :  { %p3499_p3 = scmp.lt.s32.totalorder %s4292_s22, 102  ;;  %s4294_s25 = spop %4293 }
 0x811   :  { %s3498_s27 = sadd.s32 %s3497_s20, %s3495_s24  ;;  %p3502_p4 = scmp.lt.s32.totalorder %s4294_s25, 102 }
 0x812   :  { %s3500_s26 = scalar_select %p3499_p3, 1, 0 }
 0x813   :  { %s3503_s29 = scalar_select %p3502_p4, 1, 0 }
 0x814   :  { %s3501_s28 = sadd.s32 %s3500_s26, %s3498_s27 }
 0x815   :  { %s3504_s30 = sadd.s32 %s3503_s29, %s3501_s28 }
 0x816   :  { %s3505_s3 = sadd.s32 1, %s3504_s30  ;;  %s3511_s4 = smul.u32 %s3504_s30, %s5073_s18 }
 0x817   :  { %s3506_s5 = smul.u32 %s3505_s3, %s5073_s18  ;;  %p3516_p5 = scmp.gt.s32.totalorder %s3504_s30, 0 }
 0x818   :  { %s3508_s6 = smul.u32 %s3505_s3, %s5075_s19  ;;  %s3512_s7 = sadd.s32 %s3511_s4, %s5358_s17 }
 0x819   :  { %s3507_s8 = sadd.s32 %s3506_s5, %s5358_s17  ;;  %s3513_s9 = smul.u32 %s3504_s30, %s5075_s19 }
 0x81a   :  { %s3509_s10 = sshra.s32 %s3508_s6, 4 }
 0x81b   :  { %s3514_s11 = sshra.s32 %s3513_s9, 4  ;;  %s3510_s12 = sadd.s32 %s3509_s10, %s3507_s8 }
 0x81c   :  { %s3515_s13 = sadd.s32 %s3514_s11, %s3512_s7 }
 0x81d   :  { %s3517_s14 = scalar_select %p3516_p5, 1, 0 }
 0x81f   :  { %s3518_s15 = sadd.s32 %s3517_s14, %s3515_s13 }
 0x820   :  { %p3519_p6 = scmp.lt.s32.totalorder %s3518_s15, %s3510_s12 }
 0x822   :  { %s5360_s15 = smov (!%p3519_p6, %s3518_s15), %s3510_s12 }
 0x823   :  { %s3521_s16 = ssub.s32 %s3510_s12, %s5360_s15 }
 0x824   :  { %s5203_s1 = sshra.s32 %s3521_s16, 4  ;;  %s5205_s17 = sand.u32 15, %s3521_s16 }
 0x825   :  { %s3524_s18 = sadd.s32 %s5203_s1, %s5360_s15  ;;  %s3525_s19 = sshra.s32 %s5205_s17, 4 }
 0x826   :  { %s3526_s20 = sadd.s32 %s3525_s19, %s3524_s18  ;;  %s4079_s21 = sshll.u32 %s5203_s1, 1 }
 0x827   :  { %v3597_v33 = vstv %s3526_s20  ;;  %s3528_s22 = sadd.s32 %s4079_s21, %s5360_s15  ;;  %s4080_s23 = sshll.u32 %s5205_s17, 1 }
 0x828   :  { %vm3598_vm4 = vcmp.lt.s32.totalorder %v4356_v19, %v3597_v33  ;;  %vm3599_vm5 = vcmp.lt.s32.totalorder %v4358_v20, %v3597_v33  ;;  %s3530_s24 = sshra.s32 %s4080_s23, 4  ;;  %s4081_s25 = sshll.u32 %s5203_s1, 2 }
 0x829   :  { %v3600_v34 = vsel %vm3598_vm4, 1, %v4328_v21  ;;  %v3601_v35 = vsel %vm3599_vm5, 1, %v4328_v21  ;;  %s3531_s26 = sadd.s32 %s3530_s24, %s3528_s22  ;;  %s3538_s27 = sadd.s32 %s4081_s25, %s5360_s15 }
 0x82a   :  { %v3602_v36 = vadd.s32 %v3601_v35, %v3600_v34  ;;  %v3622_v37 = vstv %s3531_s26  ;;  %s4082_s28 = sshll.u32 %s5205_s17, 2  ;;  %s4083_s29 = sshll.u32 %s5203_s1, 3 }
 0x82b   :  { %vm3623_vm6 = vcmp.lt.s32.totalorder %v4356_v19, %v3622_v37  ;;  %vm3624_vm7 = vcmp.lt.s32.totalorder %v4358_v20, %v3622_v37  ;;  %s3540_s30 = sshra.s32 %s4082_s28, 4  ;;  %s3558_s3 = sadd.s32 %s4083_s29, %s5360_s15 }
 0x82c   :  { %v3604_v38 = vshrl.u32 %v3602_v36, 16  ;;  %v3603_v39 = vand.u32 65535, %v3602_v36  ;;  %v3625_v40 = vsel %vm3623_vm6, 1, %v4328_v21  ;;  %v3626_v41 = vsel %vm3624_vm7, 1, %v4328_v21  ;;  %s3541_s4 = sadd.s32 %s3540_s30, %s3538_s27  ;;  %s4084_s5 = sshll.u32 %s5205_s17, 3 }
 0x82d   :  { %v3627_v42 = vadd.s32 %v3626_v41, %v3625_v40  ;;  %v3672_v43 = vstv %s3541_s4  ;;  %s3560_s6 = sshra.s32 %s4084_s5, 4  ;;  %s3532_s7 = smul.u32 3, %s5203_s1 }
 0x82e   :  { %v3606_v44 = vcvt.s32.f32 %v3604_v38  ;;  %v3605_v45 = vcvt.s32.f32 %v3603_v39  ;;  %vm3673_vm8 = vcmp.lt.s32.totalorder %v4356_v19, %v3672_v43  ;;  %vm3674_vm9 = vcmp.lt.s32.totalorder %v4358_v20, %v3672_v43  ;;  %s3561_s8 = sadd.s32 %s3560_s6, %s3558_s3  ;;  %s3534_s9 = smul.u32 3, %s5205_s17 }
 0x82f   :  { %v3628_v46 = vand.u32 65535, %v3627_v42  ;;  %v3629_v47 = vshrl.u32 %v3627_v42, 16  ;;  %v3675_v48 = vsel %vm3673_vm8, 1, %v4328_v21  ;;  %v3676_v49 = vsel %vm3674_vm9, 1, %v4328_v21  ;;  %s3533_s10 = sadd.s32 %s3532_s7, %s5360_s15  ;;  %s3542_s11 = smul.u32 5, %s5203_s1 }
 0x830   :  { %3609 = vadd.xlane.f32.xlu0 %v3606_v44  ;;  %3607 = vadd.xlane.f32.xlu1 %v3605_v45  ;;  %v3677_v50 = vadd.s32 %v3676_v49, %v3675_v48  ;;  %v3772_v51 = vstv %s3561_s8  ;;  %s3535_s12 = sshra.s32 %s3534_s9, 4  ;;  %s3544_s13 = smul.u32 5, %s5205_s17 }
 0x831   :  { %v3630_v52 = vcvt.s32.f32 %v3628_v46  ;;  %v3631_v53 = vcvt.s32.f32 %v3629_v47  ;;  %vm3773_vm10 = vcmp.lt.s32.totalorder %v4356_v19, %v3772_v51  ;;  %vm3774_vm11 = vcmp.lt.s32.totalorder %v4358_v20, %v3772_v51  ;;  %s3536_s14 = sadd.s32 %s3535_s12, %s3533_s10  ;;  %s3543_s16 = sadd.s32 %s3542_s11, %s5360_s15 }
 0x832   :  { %v3678_v54 = vand.u32 65535, %v3677_v50  ;;  %v3679_v55 = vshrl.u32 %v3677_v50, 16  ;;  %v3775_v56 = vsel %vm3773_vm10, 1, %v4328_v21  ;;  %v3776_v57 = vsel %vm3774_vm11, 1, %v4328_v21  ;;  %s3545_s18 = sshra.s32 %s3544_s13, 4  ;;  %s3547_s19 = smul.u32 6, %s5203_s1 }
 0x833   :  { %v3777_v58 = vadd.s32 %v3776_v57, %v3775_v56  ;;  %v3647_v59 = vstv %s3536_s14  ;;  %s3546_s20 = sadd.s32 %s3545_s18, %s3543_s16  ;;  %s3549_s21 = smul.u32 6, %s5205_s17 }
 0x834   :  { %3632 = vadd.xlane.f32.xlu0 %v3630_v52  ;;  %3634 = vadd.xlane.f32.xlu1 %v3631_v53  ;;  %vm3648_vm12 = vcmp.lt.s32.totalorder %v4356_v19, %v3647_v59  ;;  %vm3649_vm13 = vcmp.lt.s32.totalorder %v4358_v20, %v3647_v59  ;;  %s3548_s22 = sadd.s32 %s3547_s19, %s5360_s15  ;;  %s3552_s23 = smul.u32 7, %s5203_s1  ;;  %v3680_v60 = vcvt.s32.f32 %v3678_v54  ;;  %v3681_v61 = vcvt.s32.f32 %v3679_v55 }
 0x835   :  { %v3650_v62 = vsel %vm3648_vm12, 1, %v4328_v21  ;;  %v3651_v63 = vsel %vm3649_vm13, 1, %v4328_v21  ;;  %s3550_s24 = sshra.s32 %s3549_s21, 4  ;;  %s3554_s25 = smul.u32 7, %s5205_s17  ;;  %v3778_v0 = vand.u32 65535, %v3777_v58  ;;  %v3779_v1 = vshrl.u32 %v3777_v58, 16 }
 0x836   :  { %v3652_v2 = vadd.s32 %v3651_v63, %v3650_v62  ;;  %v3697_v3 = vstv %s3546_s20  ;;  %s3551_s26 = sadd.s32 %s3550_s24, %s3548_s22  ;;  %s3553_s27 = sadd.s32 %s3552_s23, %s5360_s15 }
 0x837   :  { %vm3698_vm14 = vcmp.lt.s32.totalorder %v4356_v19, %v3697_v3  ;;  %vm3699_vm15 = vcmp.lt.s32.totalorder %v4358_v20, %v3697_v3  ;;  %s3555_s28 = sshra.s32 %s3554_s25, 4  ;;  %s3562_s29 = smul.u32 9, %s5203_s1  ;;  %v3722_v8 = vstv %s3551_s26  ;;  %v3780_v10 = vcvt.s32.f32 %v3778_v0 }
 0x838   :  { %3682 = vadd.xlane.f32.xlu0 %v3680_v60  ;;  %3684 = vadd.xlane.f32.xlu1 %v3681_v61  ;;  %v3700_v4 = vsel %vm3698_vm14, 1, %v4328_v21  ;;  %v3701_v5 = vsel %vm3699_vm15, 1, %v4328_v21  ;;  %s3556_s30 = sadd.s32 %s3555_s28, %s3553_s27  ;;  %s3564_s3 = smul.u32 9, %s5205_s17  ;;  %v3654_v6 = vshrl.u32 %v3652_v2, 16  ;;  %v3781_v11 = vcvt.s32.f32 %v3779_v1 }
 0x839   :  { %v5257_v7 = vadd.s32 %v3701_v5, %v3700_v4  ;;  %v3747_v9 = vstv %s3556_s30  ;;  %s3563_s4 = sadd.s32 %s3562_s29, %s5360_s15  ;;  %s3567_s5 = smul.u32 10, %s5203_s1  ;;  %vm3723_vm0 = vcmp.lt.s32.totalorder %v4356_v19, %v3722_v8  ;;  %vm3724_vm1 = vcmp.lt.s32.totalorder %v4358_v20, %v3722_v8 }
 0x83a   :  { %s3565_s6 = sshra.s32 %s3564_s3, 4  ;;  %s3569_s7 = smul.u32 10, %s5205_s17  ;;  %v3725_v13 = vsel %vm3723_vm0, 1, %v4328_v21  ;;  %v3726_v14 = vsel %vm3724_vm1, 1, %v4328_v21  ;;  %vm3748_vm2 = vcmp.lt.s32.totalorder %v4356_v19, %v3747_v9  ;;  %vm3749_vm3 = vcmp.lt.s32.totalorder %v4358_v20, %v3747_v9 }
 0x83b   :  { %v3704_v12 = vshrl.u32 %v5257_v7, 16  ;;  %s3566_s8 = sadd.s32 %s3565_s6, %s3563_s4  ;;  %s3568_s9 = sadd.s32 %s3567_s5, %s5360_s15  ;;  %v5268_v15 = vadd.s32 %v3726_v14, %v3725_v13  ;;  %v3656_v17 = vcvt.s32.f32 %v3654_v6  ;;  %v3653_v18 = vand.u32 65535, %v3652_v2 }
 0x83c   :  { %3782 = vadd.xlane.f32.xlu0 %v3780_v10  ;;  %3784 = vadd.xlane.f32.xlu1 %v3781_v11  ;;  %v3797_v16 = vstv %s3566_s8  ;;  %s3570_s10 = sshra.s32 %s3569_s7, 4  ;;  %s3572_s11 = smul.u32 11, %s5203_s1  ;;  %v3750_v22 = vsel %vm3748_vm2, 1, %v4328_v21  ;;  %v3751_v23 = vsel %vm3749_vm3, 1, %v4328_v21  ;;  %v3703_v31 = vand.u32 65535, %v5257_v7 }
 0x83d   :  { %s3571_s12 = sadd.s32 %s3570_s10, %s3568_s9  ;;  %s3574_s13 = smul.u32 11, %s5205_s17  ;;  %v3706_v24 = vcvt.s32.f32 %v3704_v12  ;;  %v3729_v25 = vshrl.u32 %v5268_v15, 16  ;;  %v5277_v26 = vadd.s32 %v3751_v23, %v3750_v22  ;;  %vm3798_vm4 = vcmp.lt.s32.totalorder %v4356_v19, %v3797_v16 }
 0x83e   :  { %s3573_s14 = sadd.s32 %s3572_s11, %s5360_s15  ;;  %s3577_s16 = smul.u32 12, %s5203_s1  ;;  %vm3799_vm5 = vcmp.lt.s32.totalorder %v4358_v20, %v3797_v16  ;;  %v3800_v27 = vsel %vm3798_vm4, 1, %v4328_v21  ;;  %v3822_v28 = vstv %s3571_s12  ;;  %v3655_v30 = vcvt.s32.f32 %v3653_v18 }
 0x83f   :  { %s3575_s18 = sshra.s32 %s3574_s13, 4  ;;  %s3579_s19 = smul.u32 12, %s5205_s17  ;;  %v3801_v29 = vsel %vm3799_vm5, 1, %v4328_v21  ;;  %vm3823_vm6 = vcmp.lt.s32.totalorder %v4356_v19, %v3822_v28  ;;  %vm3824_vm7 = vcmp.lt.s32.totalorder %v4358_v20, %v3822_v28  ;;  %v3731_v32 = vcvt.s32.f32 %v3729_v25 }
 0x840   :  { %3659 = vadd.xlane.f32.xlu0 %v3656_v17  ;;  %3709 = vadd.xlane.f32.xlu1 %v3706_v24  ;;  %s3576_s20 = sadd.s32 %s3575_s18, %s3573_s14  ;;  %s3578_s21 = sadd.s32 %s3577_s16, %s5360_s15  ;;  %v3754_v33 = vshrl.u32 %v5277_v26, 16  ;;  %v3802_v34 = vadd.s32 %v3801_v29, %v3800_v27  ;;  %v3825_v36 = vsel %vm3823_vm6, 1, %v4328_v21  ;;  %v3826_v37 = vsel %vm3824_vm7, 1, %v4328_v21 }
 0x841   :  { %s3580_s22 = sshra.s32 %s3579_s19, 4  ;;  %s3582_s23 = smul.u32 13, %s5203_s1  ;;  %v3847_v35 = vstv %s3576_s20  ;;  %v3705_v38 = vcvt.s32.f32 %v3703_v31  ;;  %v3728_v41 = vand.u32 65535, %v5268_v15  ;;  %v3827_v43 = vadd.s32 %v3826_v37, %v3825_v36 }
 0x842   :  { %s3581_s24 = sadd.s32 %s3580_s22, %s3578_s21  ;;  %s3584_s25 = smul.u32 13, %s5205_s17  ;;  %vm3848_vm8 = vcmp.lt.s32.totalorder %v4356_v19, %v3847_v35  ;;  %vm3849_vm9 = vcmp.lt.s32.totalorder %v4358_v20, %v3847_v35  ;;  %v3756_v40 = vcvt.s32.f32 %v3754_v33  ;;  %v3804_v42 = vshrl.u32 %v3802_v34, 16 }
 0x843   :  { %s3583_s26 = sadd.s32 %s3582_s23, %s5360_s15  ;;  %s3587_s27 = smul.u32 14, %s5203_s1  ;;  %v3872_v39 = vstv %s3581_s24  ;;  %v3850_v44 = vsel %vm3848_vm8, 1, %v4328_v21  ;;  %v3851_v45 = vsel %vm3849_vm9, 1, %v4328_v21  ;;  %v3753_v46 = vand.u32 65535, %v5277_v26 }
 0x844   :  { %3657 = vadd.xlane.f32.xlu0 %v3655_v30  ;;  %3734 = vadd.xlane.f32.xlu1 %v3731_v32  ;;  %s3585_s28 = sshra.s32 %s3584_s25, 4  ;;  %s3589_s29 = smul.u32 14, %s5205_s17  ;;  %vm3873_vm10 = vcmp.lt.s32.totalorder %v4356_v19, %v3872_v39  ;;  %vm3874_vm11 = vcmp.lt.s32.totalorder %v4358_v20, %v3872_v39  ;;  %v3730_v48 = vcvt.s32.f32 %v3728_v41  ;;  %v3806_v49 = vcvt.s32.f32 %v3804_v42 }
 0x845   :  { %s3586_s30 = sadd.s32 %s3585_s28, %s3583_s26  ;;  %s3588_s3 = sadd.s32 %s3587_s27, %s5360_s15  ;;  %v3829_v50 = vshrl.u32 %v3827_v43, 16  ;;  %v3852_v51 = vadd.s32 %v3851_v45, %v3850_v44  ;;  %v3875_v52 = vsel %vm3873_vm10, 1, %v4328_v21  ;;  %v3876_v53 = vsel %vm3874_vm11, 1, %v4328_v21 }
 0x846   :  { %s3592_s4 = smul.u32 15, %s5203_s1  ;;  %s3590_s5 = sshra.s32 %s3589_s29, 4  ;;  %v3897_v47 = vstv %s3586_s30  ;;  %v3755_v54 = vcvt.s32.f32 %v3753_v46  ;;  %v3803_v57 = vand.u32 65535, %v3802_v34  ;;  %v3877_v59 = vadd.s32 %v3876_v53, %v3875_v52 }
 0x847   :  { %s3594_s6 = smul.u32 15, %s5205_s17  ;;  %s3591_s7 = sadd.s32 %s3590_s5, %s3588_s3  ;;  %vm3898_vm12 = vcmp.lt.s32.totalorder %v4356_v19, %v3897_v47  ;;  %vm3899_vm13 = vcmp.lt.s32.totalorder %v4358_v20, %v3897_v47  ;;  %v3831_v56 = vcvt.s32.f32 %v3829_v50  ;;  %v3854_v58 = vshrl.u32 %v3852_v51, 16 }
 0x848   :  { %3707 = vadd.xlane.f32.xlu0 %v3705_v38  ;;  %3759 = vadd.xlane.f32.xlu1 %v3756_v40  ;;  %s3593_s8 = sadd.s32 %s3592_s4, %s5360_s15  ;;  %v3922_v55 = vstv %s3591_s7  ;;  %v3900_v60 = vsel %vm3898_vm12, 1, %v4328_v21  ;;  %v3901_v61 = vsel %vm3899_vm13, 1, %v4328_v21  ;;  %v3828_v62 = vand.u32 65535, %v3827_v43 }
 0x849   :  { %s3595_s9 = sshra.s32 %s3594_s6, 4  ;;  %vm3923_vm14 = vcmp.lt.s32.totalorder %v4356_v19, %v3922_v55  ;;  %vm3924_vm15 = vcmp.lt.s32.totalorder %v4358_v20, %v3922_v55  ;;  %v3805_v0 = vcvt.s32.f32 %v3803_v57  ;;  %v3856_v1 = vcvt.s32.f32 %v3854_v58 }
 0x84a   :  { %s3596_s10 = sadd.s32 %s3595_s9, %s3593_s8  ;;  %v3879_v2 = vshrl.u32 %v3877_v59, 16  ;;  %v3902_v3 = vadd.s32 %v3901_v61, %v3900_v60  ;;  %v3925_v4 = vsel %vm3923_vm14, 1, %v4328_v21  ;;  %v3926_v5 = vsel %vm3924_vm15, 1, %v4328_v21 }
 0x84b   :  { %v3947_v63 = vstv %s3596_s10  ;;  %v3830_v6 = vcvt.s32.f32 %v3828_v62  ;;  %v3853_v8 = vand.u32 65535, %v3852_v51  ;;  %v3927_v10 = vadd.s32 %v3926_v5, %v3925_v4 }
 0x84c   :  { %3732 = vadd.xlane.f32.xlu0 %v3730_v48  ;;  %3809 = vadd.xlane.f32.xlu1 %v3806_v49  ;;  %vm3948_vm0 = vcmp.lt.s32.totalorder %v4356_v19, %v3947_v63  ;;  %vm3949_vm1 = vcmp.lt.s32.totalorder %v4358_v20, %v3947_v63  ;;  %v3881_v7 = vcvt.s32.f32 %v3879_v2  ;;  %v3904_v9 = vshrl.u32 %v3902_v3, 16 }
 0x84d   :  { %v3950_v11 = vsel %vm3948_vm0, 1, %v4328_v21  ;;  %v3951_v12 = vsel %vm3949_vm1, 1, %v4328_v21  ;;  %v3878_v13 = vand.u32 65535, %v3877_v59  ;;  %v3855_v14 = vcvt.s32.f32 %v3853_v8 }
 0x84e   :  { %v3906_v15 = vcvt.s32.f32 %v3904_v9  ;;  %v3929_v16 = vshrl.u32 %v3927_v10, 16  ;;  %v3952_v17 = vadd.s32 %v3951_v12, %v3950_v11  ;;  %v3903_v23 = vand.u32 65535, %v3902_v3 }
 0x84f   :  { %v3880_v18 = vcvt.s32.f32 %v3878_v13  ;;  %v3928_v27 = vand.u32 65535, %v3927_v10 }
 0x850   :  { %3757 = vadd.xlane.f32.xlu0 %v3755_v54  ;;  %3834 = vadd.xlane.f32.xlu1 %v3831_v56  ;;  %v3931_v22 = vcvt.s32.f32 %v3929_v16  ;;  %v3954_v24 = vshrl.u32 %v3952_v17, 16  ;;  %v3905_v25 = vcvt.s32.f32 %v3903_v23  ;;  %v3953_v28 = vand.u32 65535, %v3952_v17 }
 0x851   :  { %v3930_v21 = vcvt.s32.f32 %v3928_v27 }
 0x852   :  { %v3956_v26 = vcvt.s32.f32 %v3954_v24  ;;  %v3955_v29 = vcvt.s32.f32 %v3953_v28 }
 0x854   :  { %3807 = vadd.xlane.f32.xlu0 %v3805_v0  ;;  %3859 = vadd.xlane.f32.xlu1 %v3856_v1 }
 0x858   :  { %3832 = vadd.xlane.f32.xlu0 %v3830_v6  ;;  %3884 = vadd.xlane.f32.xlu1 %v3881_v7 }
 0x85c   :  { %3857 = vadd.xlane.f32.xlu0 %v3855_v14  ;;  %3909 = vadd.xlane.f32.xlu1 %v3906_v15 }
 0x860   :  { %3882 = vadd.xlane.f32.xlu0 %v3880_v18  ;;  %3934 = vadd.xlane.f32.xlu1 %v3931_v22 }
 0x864   :  { %3907 = vadd.xlane.f32.xlu0 %v3905_v25  ;;  %3959 = vadd.xlane.f32.xlu1 %v3956_v26 }
 0x868   :  { %3932 = vadd.xlane.f32.xlu0 %v3930_v21  ;;  %3957 = vadd.xlane.f32.xlu1 %v3955_v29 }
 0x8bd   :  { %v3610_v30 = vpop.xlane.xlu0 %3609  ;;  %v3608_v31 = vpop.xlane.xlu1 %3607 }
 0x8be   :  { %v3612_v32 = vcvt.f32.s32 %v3610_v30  ;;  %v3611_v34 = vcvt.f32.s32 %v3608_v31 }
 0x8c0   :  { %v3613_v33 = vshll.u32 %v3612_v32, 16 }
 0x8c1   :  { %v3633_v35 = vpop.xlane.xlu0 %3632  ;;  %v3635_v36 = vpop.xlane.xlu1 %3634 }
 0x8c2   :  { %v3614_v37 = vadd.s32 %v3613_v33, %v3611_v34  ;;  %v3637_v38 = vcvt.f32.s32 %v3635_v36  ;;  %v3636_v40 = vcvt.f32.s32 %v3633_v35 }
 0x8c4   :  { %v3615_v39 = vrot.slane %v3614_v37, 4  ;;  %v3638_v41 = vshll.u32 %v3637_v38, 16 }
 0x8c5   :  { %v3683_v42 = vpop.xlane.xlu0 %3682  ;;  %v3685_v43 = vpop.xlane.xlu1 %3684 }
 0x8c6   :  { %v3616_v44 = vadd.s32 %v3615_v39, %v3614_v37  ;;  %v3639_v45 = vadd.s32 %v3638_v41, %v3636_v40  ;;  %v3687_v46 = vcvt.f32.s32 %v3685_v43  ;;  %v3686_v48 = vcvt.f32.s32 %v3683_v42 }
 0x8c8   :  { %v3640_v47 = vrot.slane %v3639_v45, 4  ;;  %v3688_v49 = vshll.u32 %v3687_v46, 16  ;;  %v3617_v50 = vrot.slane %v3616_v44, 2 }
 0x8c9   :  { %v3783_v51 = vpop.xlane.xlu0 %3782  ;;  %v3785_v52 = vpop.xlane.xlu1 %3784 }
 0x8ca   :  { %v3641_v53 = vadd.s32 %v3640_v47, %v3639_v45  ;;  %v3689_v54 = vadd.s32 %v3688_v49, %v3686_v48  ;;  %v3618_v55 = vadd.s32 %v3617_v50, %v3616_v44  ;;  %v3787_v58 = vcvt.f32.s32 %v3785_v52 }
 0x8cb   :  { %v3786_v9 = vcvt.f32.s32 %v3783_v51 }
 0x8cc   :  { %v3642_v56 = vrot.slane %v3641_v53, 2  ;;  %v3690_v57 = vrot.slane %v3689_v54, 4  ;;  %v3619_v61 = vrot.slane %v3618_v55, 1  ;;  %v3788_v2 = vshll.u32 %v3787_v58, 16 }
 0x8cd   :  { %v3660_v59 = vpop.xlane.xlu0 %3659  ;;  %v3710_v60 = vpop.xlane.xlu1 %3709 }
 0x8ce   :  { %v3662_v62 = vcvt.f32.s32 %v3660_v59  ;;  %v3620_v63 = vadd.s32 %v3619_v61, %v3618_v55  ;;  %v3643_v0 = vadd.s32 %v3642_v56, %v3641_v53  ;;  %v3691_v1 = vadd.s32 %v3690_v57, %v3689_v54 }
 0x8cf   :  { %v3712_v7 = vcvt.f32.s32 %v3710_v60  ;;  %v3789_v12 = vadd.s32 %v3788_v2, %v3786_v9 }
 0x8d0   :  { %4295 = vpush %v3620_v63  ;;  %v3644_v5 = vrot.slane %v3643_v0, 1  ;;  %v3663_v6 = vshll.u32 %v3662_v62, 16  ;;  %v3692_v16 = vrot.slane %v3691_v1, 2 }
 0x8d1   :  { %v3658_v3 = vpop.xlane.xlu0 %3657  ;;  %v3735_v4 = vpop.xlane.xlu1 %3734  ;;  %v3713_v17 = vshll.u32 %v3712_v7, 16  ;;  %v3790_v25 = vrot.slane %v3789_v12, 4 }
 0x8d2   :  { %v3661_v8 = vcvt.f32.s32 %v3658_v3  ;;  %v3645_v10 = vadd.s32 %v3644_v5, %v3643_v0  ;;  %v3737_v13 = vcvt.f32.s32 %v3735_v4  ;;  %v3693_v21 = vadd.s32 %v3692_v16, %v3691_v1 }
 0x8d3   :  { %v3791_v36 = vadd.s32 %v3790_v25, %v3789_v12 }
 0x8d4   :  { %v3664_v11 = vadd.s32 %v3663_v6, %v3661_v8  ;;  %4297 = vpush %v3645_v10  ;;  %v3738_v26 = vshll.u32 %v3737_v13, 16  ;;  %v3694_v40 = vrot.slane %v3693_v21, 1 }
 0x8d5   :  { %v3708_v14 = vpop.xlane.xlu0 %3707  ;;  %v3760_v15 = vpop.xlane.xlu1 %3759  ;;  %v3792_v54 = vrot.slane %v3791_v36, 2 }
 0x8d6   :  { %v3665_v18 = vrot.slane %v3664_v11, 4  ;;  %v3711_v22 = vcvt.f32.s32 %v3708_v14  ;;  %v3762_v30 = vcvt.f32.s32 %v3760_v15  ;;  %v3695_v52 = vadd.s32 %v3694_v40, %v3693_v21 }
 0x8d7   :  { %v3793_v3 = vadd.s32 %v3792_v54, %v3791_v36 }
 0x8d8   :  { %v3666_v23 = vadd.s32 %v3665_v18, %v3664_v11  ;;  %v3714_v24 = vadd.s32 %v3713_v17, %v3711_v22  ;;  %v3763_v41 = vshll.u32 %v3762_v30, 16 }
 0x8d9   :  { %v3733_v27 = vpop.xlane.xlu0 %3732  ;;  %v3810_v28 = vpop.xlane.xlu1 %3809  ;;  %v3794_v16 = vrot.slane %v3793_v3, 1 }
 0x8da   :  { %v3715_v29 = vrot.slane %v3714_v24, 4  ;;  %v3736_v31 = vcvt.f32.s32 %v3733_v27  ;;  %v3667_v32 = vrot.slane %v3666_v23, 2  ;;  %v3812_v37 = vcvt.f32.s32 %v3810_v28 }
 0x8dc   :  { %v3716_v33 = vadd.s32 %v3715_v29, %v3714_v24  ;;  %v3739_v34 = vadd.s32 %v3738_v26, %v3736_v31  ;;  %v3668_v35 = vadd.s32 %v3667_v32, %v3666_v23  ;;  %v3813_v49 = vshll.u32 %v3812_v37, 16 }
 0x8dd   :  { %v3758_v38 = vpop.xlane.xlu0 %3757  ;;  %v3835_v39 = vpop.xlane.xlu1 %3834  ;;  %v3795_v31 = vadd.s32 %v3794_v16, %v3793_v3 }
 0x8de   :  { %v3740_v42 = vrot.slane %v3739_v34, 4  ;;  %v3761_v43 = vcvt.f32.s32 %v3758_v38  ;;  %v3669_v44 = vrot.slane %v3668_v35, 1  ;;  %v3717_v45 = vrot.slane %v3716_v33, 2 }
 0x8df   :  { %v3837_v56 = vcvt.f32.s32 %v3835_v39 }
 0x8e0   :  { %v3741_v46 = vadd.s32 %v3740_v42, %v3739_v34  ;;  %v3764_v47 = vadd.s32 %v3763_v41, %v3761_v43  ;;  %v3670_v48 = vadd.s32 %v3669_v44, %v3668_v35  ;;  %v3718_v53 = vadd.s32 %v3717_v45, %v3716_v33 }
 0x8e1   :  { %v3808_v50 = vpop.xlane.xlu0 %3807  ;;  %v3860_v51 = vpop.xlane.xlu1 %3859  ;;  %v3838_v4 = vshll.u32 %v3837_v56, 16 }
 0x8e2   :  { %v3765_v55 = vrot.slane %v3764_v47, 4  ;;  %v3811_v57 = vcvt.f32.s32 %v3808_v50  ;;  %4299 = vpush %v3670_v48  ;;  %v3742_v58 = vrot.slane %v3741_v46, 2  ;;  %v3719_v59 = vrot.slane %v3718_v53, 1 }
 0x8e3   :  { %4301 = vpush %v3695_v52  ;;  %v3862_v63 = vcvt.f32.s32 %v3860_v51 }
 0x8e4   :  { %v3766_v60 = vadd.s32 %v3765_v55, %v3764_v47  ;;  %v3814_v61 = vadd.s32 %v3813_v49, %v3811_v57  ;;  %v3743_v62 = vadd.s32 %v3742_v58, %v3741_v46  ;;  %v3720_v2 = vadd.s32 %v3719_v59, %v3718_v53 }
 0x8e5   :  { %v3833_v0 = vpop.xlane.xlu0 %3832  ;;  %v3885_v1 = vpop.xlane.xlu1 %3884  ;;  %v3863_v12 = vshll.u32 %v3862_v63, 16 }
 0x8e6   :  { %v3815_v5 = vrot.slane %v3814_v61, 4  ;;  %v3836_v6 = vcvt.f32.s32 %v3833_v0  ;;  %v3744_v7 = vrot.slane %v3743_v62, 1  ;;  %4303 = vpush %v3720_v2  ;;  %v3767_v8 = vrot.slane %v3766_v60, 2 }
 0x8e7   :  { %v3887_v18 = vcvt.f32.s32 %v3885_v1 }
 0x8e8   :  { %v3816_v9 = vadd.s32 %v3815_v5, %v3814_v61  ;;  %v3839_v10 = vadd.s32 %v3838_v4, %v3836_v6  ;;  %v3745_v11 = vadd.s32 %v3744_v7, %v3743_v62  ;;  %v3768_v15 = vadd.s32 %v3767_v8, %v3766_v60 }
 0x8e9   :  { %v3858_v13 = vpop.xlane.xlu0 %3857  ;;  %v3910_v14 = vpop.xlane.xlu1 %3909  ;;  %v3888_v32 = vshll.u32 %v3887_v18, 16 }
 0x8ea   :  { %v3840_v17 = vrot.slane %v3839_v10, 4  ;;  %v3861_v22 = vcvt.f32.s32 %v3858_v13  ;;  %4305 = vpush %v3745_v11  ;;  %v3817_v23 = vrot.slane %v3816_v9, 2  ;;  %v3769_v24 = vrot.slane %v3768_v15, 1 }
 0x8eb   :  { %v3912_v28 = vcvt.f32.s32 %v3910_v14 }
 0x8ec   :  { %v3841_v25 = vadd.s32 %v3840_v17, %v3839_v10  ;;  %v3864_v26 = vadd.s32 %v3863_v12, %v3861_v22  ;;  %v3818_v27 = vadd.s32 %v3817_v23, %v3816_v9  ;;  %v3770_v30 = vadd.s32 %v3769_v24, %v3768_v15 }
 0x8ed   :  { %v3883_v21 = vpop.xlane.xlu0 %3882  ;;  %v3935_v29 = vpop.xlane.xlu1 %3934  ;;  %v3913_v40 = vshll.u32 %v3912_v28, 16  ;;  %v4327_v28 = vld [vmem:[%s5345_s0 + $0x8] sm:$0xff] }
 0x8ee   :  { %v3865_v33 = vrot.slane %v3864_v26, 4  ;;  %v3886_v34 = vcvt.f32.s32 %v3883_v21  ;;  %v3819_v35 = vrot.slane %v3818_v27, 1  ;;  %4307 = vpush %v3770_v30  ;;  %v3842_v36 = vrot.slane %v3841_v25, 2 }
 0x8ef   :  { %4309 = vpush %v3795_v31  ;;  %v3937_v41 = vcvt.f32.s32 %v3935_v29 }
 0x8f0   :  { %v3866_v37 = vadd.s32 %v3865_v33, %v3864_v26  ;;  %v3889_v38 = vadd.s32 %v3888_v32, %v3886_v34  ;;  %v3820_v39 = vadd.s32 %v3819_v35, %v3818_v27  ;;  %v3843_v44 = vadd.s32 %v3842_v36, %v3841_v25  ;;  %v4326_v26 = vld [vmem:[%s5345_s0] sm:$0xff] }
 0x8f1   :  { %v3908_v42 = vpop.xlane.xlu0 %3907  ;;  %v3960_v43 = vpop.xlane.xlu1 %3959  ;;  %v3938_v53 = vshll.u32 %v3937_v41, 16 }
 0x8f2   :  { %v3890_v45 = vrot.slane %v3889_v38, 4  ;;  %v3911_v46 = vcvt.f32.s32 %v3908_v42  ;;  %v3962_v47 = vcvt.f32.s32 %v3960_v43  ;;  %4311 = vpush %v3820_v39  ;;  %v3867_v48 = vrot.slane %v3866_v37, 2 }
 0x8f3   :  { %v3844_v49 = vrot.slane %v3843_v44, 1 }
 0x8f4   :  { %v3891_v50 = vadd.s32 %v3890_v45, %v3889_v38  ;;  %v3914_v51 = vadd.s32 %v3913_v40, %v3911_v46  ;;  %v3868_v52 = vadd.s32 %v3867_v48, %v3866_v37  ;;  %v3963_v54 = vshll.u32 %v3962_v47, 16 }
 0x8f5   :  { %v3933_v55 = vpop.xlane.xlu0 %3932  ;;  %v3958_v56 = vpop.xlane.xlu1 %3957  ;;  %v3845_v57 = vadd.s32 %v3844_v49, %v3843_v44 }
 0x8f6   :  { %v3915_v58 = vrot.slane %v3914_v51, 4  ;;  %v3936_v59 = vcvt.f32.s32 %v3933_v55  ;;  %v3961_v60 = vcvt.f32.s32 %v3958_v56  ;;  %v3869_v61 = vrot.slane %v3868_v52, 1 }
 0x8f7   :  { %4313 = vpush %v3845_v57  ;;  %v3892_v62 = vrot.slane %v3891_v50, 2 }
 0x8f8   :  { %v3916_v63 = vadd.s32 %v3915_v58, %v3914_v51  ;;  %v3939_v0 = vadd.s32 %v3938_v53, %v3936_v59  ;;  %v3964_v1 = vadd.s32 %v3963_v54, %v3961_v60  ;;  %v3870_v2 = vadd.s32 %v3869_v61, %v3868_v52 }
 0x8f9   :  { %v3893_v3 = vadd.s32 %v3892_v62, %v3891_v50 }
 0x8fa   :  { %v3940_v4 = vrot.slane %v3939_v0, 4  ;;  %v3965_v5 = vrot.slane %v3964_v1, 4  ;;  %4315 = vpush %v3870_v2  ;;  %v3917_v6 = vrot.slane %v3916_v63, 2 }
 0x8fb   :  { %v3894_v7 = vrot.slane %v3893_v3, 1 }
 0x8fc   :  { %v3941_v8 = vadd.s32 %v3940_v4, %v3939_v0  ;;  %v3966_v9 = vadd.s32 %v3965_v5, %v3964_v1  ;;  %v3918_v10 = vadd.s32 %v3917_v6, %v3916_v63 }
 0x8fd   :  { %v3895_v11 = vadd.s32 %v3894_v7, %v3893_v3 }
 0x8fe   :  { %v3919_v12 = vrot.slane %v3918_v10, 1  ;;  %v3942_v13 = vrot.slane %v3941_v8, 2  ;;  %v3967_v14 = vrot.slane %v3966_v9, 2 }
 0x8ff   :  { %4317 = vpush %v3895_v11 }
 0x900   :  { %v3920_v15 = vadd.s32 %v3919_v12, %v3918_v10  ;;  %v3943_v16 = vadd.s32 %v3942_v13, %v3941_v8  ;;  %v3968_v17 = vadd.s32 %v3967_v14, %v3966_v9 }
 0x901   :  { %s4296_s11 = spop %4295 }
 0x902   :  { %4319 = vpush %v3920_v15  ;;  %v3944_v18 = vrot.slane %v3943_v16, 1  ;;  %v3969_v22 = vrot.slane %v3968_v17, 1  ;;  %p3972_p8 = scmp.lt.s32.totalorder %s4296_s11, 102 }
 0x904   :  { %v3945_v23 = vadd.s32 %v3944_v18, %v3943_v16  ;;  %v3970_v24 = vadd.s32 %v3969_v22, %v3968_v17  ;;  %s3973_s18 = scalar_select %p3972_p8, 1, 0 }
 0x905   :  { %s4298_s12 = spop %4297 }
 0x906   :  { %4321 = vpush %v3945_v23  ;;  %p3974_p7 = scmp.lt.s32.totalorder %s4298_s12, 102 }
 0x907   :  { %4323 = vpush %v3970_v24 }
 0x908   :  { %s3975_s16 = scalar_select %p3974_p7, 1, 0 }
 0x90a   :  { %s3976_s21 = sadd.s32 %s3975_s16, %s3973_s18 }
 0x913   :  { %s4300_s13 = spop %4299 }
 0x914   :  { %p3977_p9 = scmp.lt.s32.totalorder %s4300_s13, 102  ;;  %s4302_s14 = spop %4301 }
 0x915   :  { %p3980_p10 = scmp.lt.s32.totalorder %s4302_s14, 102 }
 0x916   :  { %s3978_s20 = scalar_select %p3977_p9, 1, 0 }
 0x917   :  { %s4304_s19 = spop %4303 }
 0x918   :  { %p3983_p11 = scmp.lt.s32.totalorder %s4304_s19, 102  ;;  %s3979_s26 = sadd.s32 %s3978_s20, %s3976_s21 }
 0x919   :  { %s3981_s24 = scalar_select %p3980_p10, 1, 0 }
 0x91a   :  { %s3984_s27 = scalar_select %p3983_p11, 1, 0 }
 0x91b   :  { %s4306_s22 = spop %4305  ;;  %s3982_s5 = sadd.s32 %s3981_s24, %s3979_s26 }
 0x91c   :  { %p3986_p12 = scmp.lt.s32.totalorder %s4306_s22, 102  ;;  %s3985_s7 = sadd.s32 %s3984_s27, %s3982_s5 }
 0x91e   :  { %s3987_s29 = scalar_select %p3986_p12, 1, 0 }
 0x91f   :  { %s4308_s23 = spop %4307 }
 0x920   :  { %s4310_s25 = spop %4309  ;;  %p3989_p13 = scmp.lt.s32.totalorder %s4308_s23, 102 }
 0x921   :  { %p3992_p0 = scmp.lt.s32.totalorder %s4310_s25, 102  ;;  %s3988_s9 = sadd.s32 %s3987_s29, %s3985_s7 }
 0x922   :  { %s3990_s30 = scalar_select %p3989_p13, 1, 0 }
 0x923   :  { %s4312_s28 = spop %4311 }
 0x924   :  { %p3995_p1 = scmp.lt.s32.totalorder %s4312_s28, 102  ;;  %s3991_s10 = sadd.s32 %s3990_s30, %s3988_s9 }
 0x925   :  { %s3993_s4 = scalar_select %p3992_p0, 1, 0 }
 0x926   :  { %s3996_s8 = scalar_select %p3995_p1, 1, 0 }
 0x927   :  { %s3994_s14 = sadd.s32 %s3993_s4, %s3991_s10 }
 0x928   :  { %s4314_s3 = spop %4313  ;;  %s3997_s18 = sadd.s32 %s3996_s8, %s3994_s14 }
 0x929   :  { %p3998_p2 = scmp.lt.s32.totalorder %s4314_s3, 102 }
 0x92b   :  { %s4316_s6 = spop %4315 }
 0x92c   :  { %p4001_p3 = scmp.lt.s32.totalorder %s4316_s6, 102 }
 0x92d   :  { %s3999_s12 = scalar_select %p3998_p2, 1, 0 }
 0x92e   :  { %s4002_s13 = scalar_select %p4001_p3, 1, 0 }
 0x92f   :  { %s4000_s21 = sadd.s32 %s3999_s12, %s3997_s18 }
 0x930   :  { %s4318_s11 = spop %4317  ;;  %s4003_s23 = sadd.s32 %s4002_s13, %s4000_s21 }
 0x931   :  { %p4004_p4 = scmp.lt.s32.totalorder %s4318_s11, 102 }
 0x933   :  { %s4320_s16 = spop %4319 }
 0x934   :  { %p4007_p5 = scmp.lt.s32.totalorder %s4320_s16, 102 }
 0x935   :  { %s4005_s19 = scalar_select %p4004_p4, 1, 0 }
 0x936   :  { %s4008_s20 = scalar_select %p4007_p5, 1, 0 }
 0x937   :  { %s4322_s22 = spop %4321  ;;  %s4006_s24 = sadd.s32 %s4005_s19, %s4003_s23 }
 0x938   :  { %p4010_p6 = scmp.lt.s32.totalorder %s4322_s22, 102  ;;  %s4324_s25 = spop %4323 }
 0x939   :  { %s4009_s27 = sadd.s32 %s4008_s20, %s4006_s24  ;;  %p4013_p7 = scmp.lt.s32.totalorder %s4324_s25, 102 }
 0x93a   :  { %s4011_s26 = scalar_select %p4010_p6, 1, 0 }
 0x93b   :  { %s4014_s29 = scalar_select %p4013_p7, 1, 0 }
 0x93c   :  { %s4012_s28 = sadd.s32 %s4011_s26, %s4009_s27 }
 0x93d   :  { %s4015_s30 = sadd.s32 %s4014_s29, %s4012_s28 }
 0x93e   :  { %s4016_s3 = sadd.s32 1, %s4015_s30  ;;  %s4022_s4 = smul.u32 %s4015_s30, %s5203_s1 }
 0x93f   :  { %s4017_s5 = smul.u32 %s4016_s3, %s5203_s1  ;;  %p4027_p8 = scmp.gt.s32.totalorder %s4015_s30, 0 }
 0x940   :  { %s4019_s6 = smul.u32 %s4016_s3, %s5205_s17  ;;  %s4023_s7 = sadd.s32 %s4022_s4, %s5360_s15 }
 0x941   :  { %s4018_s8 = sadd.s32 %s4017_s5, %s5360_s15  ;;  %s4024_s9 = smul.u32 %s4015_s30, %s5205_s17 }
 0x942   :  { %s4020_s10 = sshra.s32 %s4019_s6, 4 }
 0x943   :  { %s4025_s11 = sshra.s32 %s4024_s9, 4  ;;  %s4021_s12 = sadd.s32 %s4020_s10, %s4018_s8 }
 0x944   :  { %s4026_s13 = sadd.s32 %s4025_s11, %s4023_s7 }
 0x945   :  { %s4028_s14 = scalar_select %p4027_p8, 1, 0 }
 0x947   :  { %s4029_s16 = sadd.s32 %s4028_s14, %s4026_s13 }
 0x948   :  { %p4030_p9 = scmp.lt.s32.totalorder %s4029_s16, %s4021_s12 }
 0x94a   :  { %s5362_s16 = smov (!%p4030_p9, %s4029_s16), %s4021_s12 }
 0x94b   :  { %v4032_v25 = vstv %s5362_s16 }
 0x94c   :  { %vm4033_vm2 = vcmp.lt.s32.totalorder %v4356_v19, %v4032_v25  ;;  %vm4034_vm3 = vcmp.lt.s32.totalorder %v4358_v20, %v4032_v25 }
 0x94d   :  { %v4035_v27 = vsel %vm4033_vm2, %v4326_v26, 0.0  ;;  %v4036_v21 = vsel %vm4034_vm3, %v4327_v28, 0.0 }
 0x94e   :  { %4037 = vst [vmem:[%s5346_s2] sm:$0xff] %v4035_v27  ;;  %4038 = vst [vmem:[%s5346_s2 + $0x8] sm:$0xff] %v4036_v21 }

</bundles_post_ra>
